<compile_context>
chip_gen: v5e
topology: v5e:2x2
jax: 0.10.0
libtpu: 0.0.40
codegen_flags: <defaults>
</compile_context>

<pallas_src>
import functools

import jax
import jax.numpy as jnp
from jax import lax
from jax.experimental import pallas as pl
from jax.experimental.pallas import tpu as pltpu

NUM_CHANNELS = 5
BATCH_TILE = 8          # images per grid step -> conv matmul M = 8 * H * W


def _round_up(x, m):
    return ((x + m - 1) // m) * m


# ------------------------------ fused kernel ------------------------------- #
def _fused_qnet_kernel(x_ref, w1_ref, b1_ref, w2_ref, b2_ref,
                       wf1_ref, bf1_ref, wf2_ref, bf2_ref,
                       out_ref, h1pad_ref, *, H, W):
    _, _, TB, CINP = x_ref.shape
    HW = H * W
    C1 = w1_ref.shape[2]          # conv1 out channels (zero-padded to 128)
    C2 = w2_ref.shape[2]          # conv2 out channels (zero-padded to 128)
    taps = [(dy, dx) for dy in range(3) for dx in range(3)]
    bf16, f32 = jnp.bfloat16, jnp.float32

    # ---- conv1 + ReLU: 9 shifted (HW*TB, CINP) @ (CINP, C1) MXU dots -------
    xv = x_ref[...]                                   # (H+2, W+2, TB, CINP) f32
    acc1 = jnp.zeros((HW * TB, C1), f32)
    for t, (dy, dx) in enumerate(taps):
        patch = xv[dy:dy + H, dx:dx + W].reshape(HW * TB, CINP).astype(bf16)
        acc1 = acc1 + jnp.dot(patch, w1_ref[t], preferred_element_type=f32)
    h1 = jnp.maximum(acc1 + b1_ref[...], 0.0)         # (HW*TB, C1) f32

    # ---- SAME-padding halo for conv2, staged in VMEM (no HBM round trip) ---
    h1pad_ref[...] = jnp.zeros_like(h1pad_ref)
    h1pad_ref[1:H + 1, 1:W + 1, :, :] = h1.reshape(H, W, TB, C1)
    h1p = h1pad_ref[...]                              # (H+2, W+2, TB, C1) f32

    # ---- conv2 + ReLU ------------------------------------------------------
    acc2 = jnp.zeros((HW * TB, C2), f32)
    for t, (dy, dx) in enumerate(taps):
        patch = h1p[dy:dy + H, dx:dx + W].reshape(HW * TB, C1).astype(bf16)
        acc2 = acc2 + jnp.dot(patch, w2_ref[t], preferred_element_type=f32)
    h2 = jnp.maximum(acc2 + b2_ref[...], 0.0)         # (HW*TB, C2) f32

    # ---- fc1 + ReLU: contraction over (position, channel) as a p-batched
    #      matmul (fc1 weights pre-permuted offline to (p, c, f)) ------------
    h2b = h2.reshape(HW, TB, C2).astype(bf16)         # rows are (p-major, b)
    z = jnp.einsum("pbc,pcf->pbf", h2b, wf1_ref[...],
                   preferred_element_type=f32)        # (HW, TB, F1)
    f1 = jnp.maximum(jnp.sum(z, axis=0) + bf1_ref[...], 0.0)   # (TB, F1)

    # ---- fc2 (+bias), lane-dense 128-wide output (sliced outside) ----------
    out = jnp.dot(f1.astype(bf16), wf2_ref[...],
                  preferred_element_type=f32) + bf2_ref[...]
    out_ref[...] = out.astype(out_ref.dtype)


# ---------------------- one-time weight re-layout (no jit) ------------------ #
def prepare_params(params, grid_size):
    f32, bf16 = jnp.float32, jnp.bfloat16
    c1, cin = params["conv1_w"].shape[:2]
    c2 = params["conv2_w"].shape[0]
    f1 = params["fc1_w"].shape[0]
    na = params["fc2_w"].shape[0]
    G = grid_size

    CINP = _round_up(cin, 8)       # sublane-align conv1 contraction depth
    C1P = _round_up(c1, 128)       # lane-dense conv1 output
    C2P = _round_up(c2, 128)       # lane-dense conv2 output
    F1P = _round_up(f1, 128)
    AP = _round_up(na, 128)        # lane-dense fc2 output (real actions sliced later)

    # conv weights: (O, I, 3, 3) -> (tap = dy*3+dx, I_pad, O_pad)
    w1 = jnp.transpose(params["conv1_w"], (2, 3, 1, 0)).reshape(9, cin, c1)
    w1 = jnp.pad(w1, ((0, 0), (0, CINP - cin), (0, C1P - c1))).astype(bf16)
    w2 = jnp.transpose(params["conv2_w"], (2, 3, 1, 0)).reshape(9, c1, c2)
    w2 = jnp.pad(w2, ((0, 0), (0, C1P - c1), (0, C2P - c2))).astype(bf16)
    b1 = jnp.pad(params["conv1_b"], (0, C1P - c1)).reshape(1, C1P).astype(f32)
    b2 = jnp.pad(params["conv2_b"], (0, C2P - c2)).reshape(1, C2P).astype(f32)

    # fc1: (F1, C*G*G) in PyTorch (C, H, W) flatten order -> (p=h*G+w, C_pad, F1)
    wf1 = params["fc1_w"].reshape(f1, c2, G, G)
    wf1 = jnp.transpose(wf1, (2, 3, 1, 0)).reshape(G * G, c2, f1)
    wf1 = jnp.pad(wf1, ((0, 0), (0, C2P - c2), (0, F1P - f1))).astype(bf16)
    bf1 = jnp.pad(params["fc1_b"], (0, F1P - f1)).reshape(1, F1P).astype(f32)

    # fc2: (A, F1) -> (F1_pad, A_pad)
    wf2 = jnp.pad(params["fc2_w"].T, ((0, F1P - f1), (0, AP - na))).astype(bf16)
    bf2 = jnp.pad(params["fc2_b"], (0, AP - na)).reshape(1, AP).astype(f32)

    return {"w1": w1, "b1": b1, "w2": w2, "b2": b2,
            "wf1": wf1, "bf1": bf1, "wf2": wf2, "bf2": bf2}


# ------------------------------- forward ----------------------------------- #
@functools.partial(jax.jit, static_argnames=("num_actions",))
def conv_qnetwork_forward(x_nchw, prep, *, num_actions):
    N, C, H, W = x_nchw.shape
    CINP = prep["w1"].shape[1]
    C1P = prep["w1"].shape[2]
    C2P = prep["w2"].shape[2]
    F1P = prep["wf1"].shape[2]
    AP = prep["wf2"].shape[1]
    HW = H * W

    TB = BATCH_TILE
    n_pad = _round_up(N, TB)

    # NCHW -> spatial-major (H+2, W+2, N_pad, C_pad): SAME halo + batch/channel
    # zero-padding folded into one cheap XLA pad of the (small) input only.
    x = jnp.transpose(x_nchw, (2, 3, 0, 1))
    x = jnp.pad(x, ((1, 1), (1, 1), (0, n_pad - N), (0, CINP - C)))

    flops = (2 * n_pad * HW * (9 * CINP * C1P + 9 * C1P * C2P + C2P * F1P)
             + 2 * n_pad * F1P * AP)
    bytes_accessed = int(x.size) * 4 + n_pad * AP * 4 + sum(
        int(prep[k].size) * prep[k].dtype.itemsize for k in prep)

    out = pl.pallas_call(
        functools.partial(_fused_qnet_kernel, H=H, W=W),
        out_shape=jax.ShapeDtypeStruct((n_pad, AP), jnp.float32),
        grid=(n_pad // TB,),
        in_specs=[
            pl.BlockSpec((H + 2, W + 2, TB, CINP), lambda i: (0, 0, i, 0)),
            pl.BlockSpec((9, CINP, C1P), lambda i: (0, 0, 0)),   # conv1 w
            pl.BlockSpec((1, C1P), lambda i: (0, 0)),            # conv1 b
            pl.BlockSpec((9, C1P, C2P), lambda i: (0, 0, 0)),    # conv2 w
            pl.BlockSpec((1, C2P), lambda i: (0, 0)),            # conv2 b
            pl.BlockSpec((HW, C2P, F1P), lambda i: (0, 0, 0)),   # fc1 w
            pl.BlockSpec((1, F1P), lambda i: (0, 0)),            # fc1 b
            pl.BlockSpec((F1P, AP), lambda i: (0, 0)),           # fc2 w
            pl.BlockSpec((1, AP), lambda i: (0, 0)),             # fc2 b
        ],
        out_specs=pl.BlockSpec((TB, AP), lambda i: (i, 0)),
        scratch_shapes=[pltpu.VMEM((H + 2, W + 2, TB, C1P), jnp.float32)],
        compiler_params=pltpu.CompilerParams(
            dimension_semantics=("parallel",),        # v7x: shard batch over 2 TCs
            vmem_limit_bytes=32 * 1024 * 1024),
        cost_estimate=pl.CostEstimate(flops=flops, transcendentals=0,
                                      bytes_accessed=bytes_accessed),
    )(x, prep["w1"], prep["b1"], prep["w2"], prep["b2"],
      prep["wf1"], prep["bf1"], prep["wf2"], prep["bf2"])

    return out[:N, :num_actions]


# --------------------------- pure-XLA reference ----------------------------- #
def reference_forward(x_nchw, params):
    """Same math, same bf16-operand / f32-accumulate numerics as the kernel."""
    bf16, f32 = jnp.bfloat16, jnp.float32
    dn = ("NCHW", "OIHW", "NCHW")
    h = lax.conv_general_dilated(x_nchw.astype(bf16), params["conv1_w"].astype(bf16),
                                 (1, 1), "SAME", dimension_numbers=dn,
                                 preferred_element_type=f32)
    h = jnp.maximum(h + params["conv1_b"][None, :, None, None], 0.0)
    h = lax.conv_general_dilated(h.astype(bf16), params["conv2_w"].astype(bf16),
                                 (1, 1), "SAME", dimension_numbers=dn,
                                 preferred_element_type=f32)
    h = jnp.maximum(h + params["conv2_b"][None, :, None, None], 0.0)
    flat = h.reshape(h.shape[0], -1)
    f1 = jnp.maximum(
        jnp.dot(flat.astype(bf16), params["fc1_w"].T.astype(bf16),
                preferred_element_type=f32) + params["fc1_b"], 0.0)
    return jnp.dot(f1.astype(bf16), params["fc2_w"].T.astype(bf16),
                   preferred_element_type=f32) + params["fc2_b"]


# --------------------------------- main ------------------------------------- #
def init_params(key, grid_size, num_actions):
    conv_out = 64 * grid_size * grid_size
    ks = jax.random.split(key, 8)
    s = 0.05
    return {
        "conv1_w": s * jax.random.normal(ks[0], (32, NUM_CHANNELS, 3, 3), jnp.float32),
        "conv1_b": s * jax.random.normal(ks[1], (32,), jnp.float32),
        "conv2_w": s * jax.random.normal(ks[2], (64, 32, 3, 3), jnp.float32),
        "conv2_b": s * jax.random.normal(ks[3], (64,), jnp.float32),
        "fc1_w":   s * jax.random.normal(ks[4], (128, conv_out), jnp.float32),
        "fc1_b":   s * jax.random.normal(ks[5], (128,), jnp.float32),
        "fc2_w":   s * jax.random.normal(ks[6], (num_actions, 128), jnp.float32),
        "fc2_b":   s * jax.random.normal(ks[7], (num_actions,), jnp.float32),
    }


if __name__ == "__main__":
    grid_size = 8
    num_actions = 4
    batch = 2

    key = jax.random.PRNGKey(0)
    k_x, k_p = jax.random.split(key)
    x = jax.random.normal(k_x, (batch, NUM_CHANNELS, grid_size, grid_size),
                          jnp.float32)
    params = init_params(k_p, grid_size, num_actions)
    prep = prepare_params(params, grid_size)        # one-time weight re-layout

    out = conv_qnetwork_forward(x, prep, num_actions=num_actions)
    out = jax.block_until_ready(out)

    ref = reference_forward(x, params)
    assert out.shape == (batch, num_actions)
    assert jnp.allclose(out, ref, atol=1e-3, rtol=1e-3), "mismatch vs reference"

    print("KERNEL_OK")
</pallas_src>

<mosaic_0001>
module attributes {stable_mosaic.version = 11 : i64} {
  func.func @_fused_qnet_kernel(%arg0: i32, %arg1: memref<10x10x8x8xf32, #tpu.memory_space<vmem>>, %arg2: memref<9x8x128xbf16, #tpu.memory_space<vmem>>, %arg3: memref<1x128xf32, #tpu.memory_space<vmem>>, %arg4: memref<9x128x128xbf16, #tpu.memory_space<vmem>>, %arg5: memref<1x128xf32, #tpu.memory_space<vmem>>, %arg6: memref<64x128x128xbf16, #tpu.memory_space<vmem>>, %arg7: memref<1x128xf32, #tpu.memory_space<vmem>>, %arg8: memref<128x128xbf16, #tpu.memory_space<vmem>>, %arg9: memref<1x128xf32, #tpu.memory_space<vmem>>, %arg10: memref<8x128xf32, #tpu.memory_space<vmem>>, %arg11: memref<10x10x8x128xf32, #tpu.memory_space<vmem>>) attributes {dimension_semantics = [#tpu.dimension_semantics<parallel>], iteration_bounds = array<i64: 1>, scalar_prefetch = 0 : i64, scratch_operands = 1 : i64, tpu.core_type = #tpu.core_type<tc>, window_params = [{transform_indices = @transform_0, window_bounds = array<i64: 10, 10, 8, 8>}, {pipeline_mode = #tpu.pipeline_mode<synchronous>, transform_indices = @transform_1, window_bounds = array<i64: 9, 8, 128>}, {pipeline_mode = #tpu.pipeline_mode<synchronous>, transform_indices = @transform_2, window_bounds = array<i64: 1, 128>}, {pipeline_mode = #tpu.pipeline_mode<synchronous>, transform_indices = @transform_3, window_bounds = array<i64: 9, 128, 128>}, {pipeline_mode = #tpu.pipeline_mode<synchronous>, transform_indices = @transform_4, window_bounds = array<i64: 1, 128>}, {pipeline_mode = #tpu.pipeline_mode<synchronous>, transform_indices = @transform_5, window_bounds = array<i64: 64, 128, 128>}, {pipeline_mode = #tpu.pipeline_mode<synchronous>, transform_indices = @transform_6, window_bounds = array<i64: 1, 128>}, {pipeline_mode = #tpu.pipeline_mode<synchronous>, transform_indices = @transform_7, window_bounds = array<i64: 128, 128>}, {pipeline_mode = #tpu.pipeline_mode<synchronous>, transform_indices = @transform_8, window_bounds = array<i64: 1, 128>}, {transform_indices = @transform_9, window_bounds = array<i64: 8, 128>}]} {
    %c0 = arith.constant 0 : index
    %c0_0 = arith.constant 0 : index
    %c0_1 = arith.constant 0 : index
    %c0_2 = arith.constant 0 : index
    %0 = vector.load %arg1[%c0, %c0_0, %c0_1, %c0_2] : memref<10x10x8x8xf32, #tpu.memory_space<vmem>>, vector<10x10x8x8xf32>
    %cst = arith.constant 0.000000e+00 : f32
    %1 = vector.broadcast %cst : f32 to vector<512x128xf32>
    %2 = vector.extract_strided_slice %0 {offsets = [0, 0, 0, 0], sizes = [8, 8, 8, 8], strides = [1, 1, 1, 1]} : vector<10x10x8x8xf32> to vector<8x8x8x8xf32>
    %3 = vector.shape_cast %2 : vector<8x8x8x8xf32> to vector<512x8xf32>
    %4 = arith.truncf %3 : vector<512x8xf32> to vector<512x8xbf16>
    %c0_3 = arith.constant 0 : index
    %c0_4 = arith.constant 0 : index
    %c0_5 = arith.constant 0 : index
    %5 = vector.load %arg2[%c0_3, %c0_4, %c0_5] : memref<9x8x128xbf16, #tpu.memory_space<vmem>>, vector<1x8x128xbf16>
    %6 = vector.shape_cast %5 : vector<1x8x128xbf16> to vector<8x128xbf16>
    %cst_6 = arith.constant dense<0.000000e+00> : vector<512x128xf32>
    %7 = tpu.matmul %4, %6, %cst_6 {dimension_numbers = #tpu.dot_dimension_numbers<[1], [0], [0], [1], [0, 0, 1, 1], [], []>} : vector<512x8xbf16>, vector<8x128xbf16>, vector<512x128xf32> -> vector<512x128xf32>
    %8 = arith.addf %1, %7 : vector<512x128xf32>
    %9 = vector.extract_strided_slice %0 {offsets = [0, 1, 0, 0], sizes = [8, 8, 8, 8], strides = [1, 1, 1, 1]} : vector<10x10x8x8xf32> to vector<8x8x8x8xf32>
    %10 = vector.shape_cast %9 : vector<8x8x8x8xf32> to vector<512x8xf32>
    %11 = arith.truncf %10 : vector<512x8xf32> to vector<512x8xbf16>
    %c1 = arith.constant 1 : index
    %c0_7 = arith.constant 0 : index
    %c0_8 = arith.constant 0 : index
    %12 = vector.load %arg2[%c1, %c0_7, %c0_8] : memref<9x8x128xbf16, #tpu.memory_space<vmem>>, vector<1x8x128xbf16>
    %13 = vector.shape_cast %12 : vector<1x8x128xbf16> to vector<8x128xbf16>
    %cst_9 = arith.constant dense<0.000000e+00> : vector<512x128xf32>
    %14 = tpu.matmul %11, %13, %cst_9 {dimension_numbers = #tpu.dot_dimension_numbers<[1], [0], [0], [1], [0, 0, 1, 1], [], []>} : vector<512x8xbf16>, vector<8x128xbf16>, vector<512x128xf32> -> vector<512x128xf32>
    %15 = arith.addf %8, %14 : vector<512x128xf32>
    %16 = vector.extract_strided_slice %0 {offsets = [0, 2, 0, 0], sizes = [8, 8, 8, 8], strides = [1, 1, 1, 1]} : vector<10x10x8x8xf32> to vector<8x8x8x8xf32>
    %17 = vector.shape_cast %16 : vector<8x8x8x8xf32> to vector<512x8xf32>
    %18 = arith.truncf %17 : vector<512x8xf32> to vector<512x8xbf16>
    %c2 = arith.constant 2 : index
    %c0_10 = arith.constant 0 : index
    %c0_11 = arith.constant 0 : index
    %19 = vector.load %arg2[%c2, %c0_10, %c0_11] : memref<9x8x128xbf16, #tpu.memory_space<vmem>>, vector<1x8x128xbf16>
    %20 = vector.shape_cast %19 : vector<1x8x128xbf16> to vector<8x128xbf16>
    %cst_12 = arith.constant dense<0.000000e+00> : vector<512x128xf32>
    %21 = tpu.matmul %18, %20, %cst_12 {dimension_numbers = #tpu.dot_dimension_numbers<[1], [0], [0], [1], [0, 0, 1, 1], [], []>} : vector<512x8xbf16>, vector<8x128xbf16>, vector<512x128xf32> -> vector<512x128xf32>
    %22 = arith.addf %15, %21 : vector<512x128xf32>
    %23 = vector.extract_strided_slice %0 {offsets = [1, 0, 0, 0], sizes = [8, 8, 8, 8], strides = [1, 1, 1, 1]} : vector<10x10x8x8xf32> to vector<8x8x8x8xf32>
    %24 = vector.shape_cast %23 : vector<8x8x8x8xf32> to vector<512x8xf32>
    %25 = arith.truncf %24 : vector<512x8xf32> to vector<512x8xbf16>
    %c3 = arith.constant 3 : index
    %c0_13 = arith.constant 0 : index
    %c0_14 = arith.constant 0 : index
    %26 = vector.load %arg2[%c3, %c0_13, %c0_14] : memref<9x8x128xbf16, #tpu.memory_space<vmem>>, vector<1x8x128xbf16>
    %27 = vector.shape_cast %26 : vector<1x8x128xbf16> to vector<8x128xbf16>
    %cst_15 = arith.constant dense<0.000000e+00> : vector<512x128xf32>
    %28 = tpu.matmul %25, %27, %cst_15 {dimension_numbers = #tpu.dot_dimension_numbers<[1], [0], [0], [1], [0, 0, 1, 1], [], []>} : vector<512x8xbf16>, vector<8x128xbf16>, vector<512x128xf32> -> vector<512x128xf32>
    %29 = arith.addf %22, %28 : vector<512x128xf32>
    %30 = vector.extract_strided_slice %0 {offsets = [1, 1, 0, 0], sizes = [8, 8, 8, 8], strides = [1, 1, 1, 1]} : vector<10x10x8x8xf32> to vector<8x8x8x8xf32>
    %31 = vector.shape_cast %30 : vector<8x8x8x8xf32> to vector<512x8xf32>
    %32 = arith.truncf %31 : vector<512x8xf32> to vector<512x8xbf16>
    %c4 = arith.constant 4 : index
    %c0_16 = arith.constant 0 : index
    %c0_17 = arith.constant 0 : index
    %33 = vector.load %arg2[%c4, %c0_16, %c0_17] : memref<9x8x128xbf16, #tpu.memory_space<vmem>>, vector<1x8x128xbf16>
    %34 = vector.shape_cast %33 : vector<1x8x128xbf16> to vector<8x128xbf16>
    %cst_18 = arith.constant dense<0.000000e+00> : vector<512x128xf32>
    %35 = tpu.matmul %32, %34, %cst_18 {dimension_numbers = #tpu.dot_dimension_numbers<[1], [0], [0], [1], [0, 0, 1, 1], [], []>} : vector<512x8xbf16>, vector<8x128xbf16>, vector<512x128xf32> -> vector<512x128xf32>
    %36 = arith.addf %29, %35 : vector<512x128xf32>
    %37 = vector.extract_strided_slice %0 {offsets = [1, 2, 0, 0], sizes = [8, 8, 8, 8], strides = [1, 1, 1, 1]} : vector<10x10x8x8xf32> to vector<8x8x8x8xf32>
    %38 = vector.shape_cast %37 : vector<8x8x8x8xf32> to vector<512x8xf32>
    %39 = arith.truncf %38 : vector<512x8xf32> to vector<512x8xbf16>
    %c5 = arith.constant 5 : index
    %c0_19 = arith.constant 0 : index
    %c0_20 = arith.constant 0 : index
    %40 = vector.load %arg2[%c5, %c0_19, %c0_20] : memref<9x8x128xbf16, #tpu.memory_space<vmem>>, vector<1x8x128xbf16>
    %41 = vector.shape_cast %40 : vector<1x8x128xbf16> to vector<8x128xbf16>
    %cst_21 = arith.constant dense<0.000000e+00> : vector<512x128xf32>
    %42 = tpu.matmul %39, %41, %cst_21 {dimension_numbers = #tpu.dot_dimension_numbers<[1], [0], [0], [1], [0, 0, 1, 1], [], []>} : vector<512x8xbf16>, vector<8x128xbf16>, vector<512x128xf32> -> vector<512x128xf32>
    %43 = arith.addf %36, %42 : vector<512x128xf32>
    %44 = vector.extract_strided_slice %0 {offsets = [2, 0, 0, 0], sizes = [8, 8, 8, 8], strides = [1, 1, 1, 1]} : vector<10x10x8x8xf32> to vector<8x8x8x8xf32>
    %45 = vector.shape_cast %44 : vector<8x8x8x8xf32> to vector<512x8xf32>
    %46 = arith.truncf %45 : vector<512x8xf32> to vector<512x8xbf16>
    %c6 = arith.constant 6 : index
    %c0_22 = arith.constant 0 : index
    %c0_23 = arith.constant 0 : index
    %47 = vector.load %arg2[%c6, %c0_22, %c0_23] : memref<9x8x128xbf16, #tpu.memory_space<vmem>>, vector<1x8x128xbf16>
    %48 = vector.shape_cast %47 : vector<1x8x128xbf16> to vector<8x128xbf16>
    %cst_24 = arith.constant dense<0.000000e+00> : vector<512x128xf32>
    %49 = tpu.matmul %46, %48, %cst_24 {dimension_numbers = #tpu.dot_dimension_numbers<[1], [0], [0], [1], [0, 0, 1, 1], [], []>} : vector<512x8xbf16>, vector<8x128xbf16>, vector<512x128xf32> -> vector<512x128xf32>
    %50 = arith.addf %43, %49 : vector<512x128xf32>
    %51 = vector.extract_strided_slice %0 {offsets = [2, 1, 0, 0], sizes = [8, 8, 8, 8], strides = [1, 1, 1, 1]} : vector<10x10x8x8xf32> to vector<8x8x8x8xf32>
    %52 = vector.shape_cast %51 : vector<8x8x8x8xf32> to vector<512x8xf32>
    %53 = arith.truncf %52 : vector<512x8xf32> to vector<512x8xbf16>
    %c7 = arith.constant 7 : index
    %c0_25 = arith.constant 0 : index
    %c0_26 = arith.constant 0 : index
    %54 = vector.load %arg2[%c7, %c0_25, %c0_26] : memref<9x8x128xbf16, #tpu.memory_space<vmem>>, vector<1x8x128xbf16>
    %55 = vector.shape_cast %54 : vector<1x8x128xbf16> to vector<8x128xbf16>
    %cst_27 = arith.constant dense<0.000000e+00> : vector<512x128xf32>
    %56 = tpu.matmul %53, %55, %cst_27 {dimension_numbers = #tpu.dot_dimension_numbers<[1], [0], [0], [1], [0, 0, 1, 1], [], []>} : vector<512x8xbf16>, vector<8x128xbf16>, vector<512x128xf32> -> vector<512x128xf32>
    %57 = arith.addf %50, %56 : vector<512x128xf32>
    %58 = vector.extract_strided_slice %0 {offsets = [2, 2, 0, 0], sizes = [8, 8, 8, 8], strides = [1, 1, 1, 1]} : vector<10x10x8x8xf32> to vector<8x8x8x8xf32>
    %59 = vector.shape_cast %58 : vector<8x8x8x8xf32> to vector<512x8xf32>
    %60 = arith.truncf %59 : vector<512x8xf32> to vector<512x8xbf16>
    %c8 = arith.constant 8 : index
    %c0_28 = arith.constant 0 : index
    %c0_29 = arith.constant 0 : index
    %61 = vector.load %arg2[%c8, %c0_28, %c0_29] : memref<9x8x128xbf16, #tpu.memory_space<vmem>>, vector<1x8x128xbf16>
    %62 = vector.shape_cast %61 : vector<1x8x128xbf16> to vector<8x128xbf16>
    %cst_30 = arith.constant dense<0.000000e+00> : vector<512x128xf32>
    %63 = tpu.matmul %60, %62, %cst_30 {dimension_numbers = #tpu.dot_dimension_numbers<[1], [0], [0], [1], [0, 0, 1, 1], [], []>} : vector<512x8xbf16>, vector<8x128xbf16>, vector<512x128xf32> -> vector<512x128xf32>
    %64 = arith.addf %57, %63 : vector<512x128xf32>
    %c0_31 = arith.constant 0 : index
    %c0_32 = arith.constant 0 : index
    %65 = vector.load %arg3[%c0_31, %c0_32] : memref<1x128xf32, #tpu.memory_space<vmem>>, vector<1x128xf32>
    %66 = vector.broadcast %65 : vector<1x128xf32> to vector<512x128xf32>
    %67 = arith.addf %64, %66 : vector<512x128xf32>
    %cst_33 = arith.constant 0.000000e+00 : f32
    %68 = vector.broadcast %cst_33 : f32 to vector<512x128xf32>
    %69 = arith.maximumf %67, %68 : vector<512x128xf32>
    %cst_34 = arith.constant 0.000000e+00 : f32
    %70 = vector.broadcast %cst_34 : f32 to vector<10x10x8x128xf32>
    %c0_35 = arith.constant 0 : index
    %c0_36 = arith.constant 0 : index
    %c0_37 = arith.constant 0 : index
    %c0_38 = arith.constant 0 : index
    %71 = vector.load %arg11[%c0_35, %c0_36, %c0_37, %c0_38] : memref<10x10x8x128xf32, #tpu.memory_space<vmem>>, vector<10x10x8x128xf32>
    tpu.vector_store %arg11[%c0_35, %c0_36, %c0_37, %c0_38], %70 {strides = array<i32>} : memref<10x10x8x128xf32, #tpu.memory_space<vmem>>, vector<10x10x8x128xf32>,
    %72 = vector.shape_cast %69 : vector<512x128xf32> to vector<8x8x8x128xf32>
    %c1_39 = arith.constant 1 : index
    %c1_40 = arith.constant 1 : index
    %c0_41 = arith.constant 0 : index
    %c0_42 = arith.constant 0 : index
    %73 = vector.load %arg11[%c1_39, %c1_40, %c0_41, %c0_42] : memref<10x10x8x128xf32, #tpu.memory_space<vmem>>, vector<8x8x8x128xf32>
    tpu.vector_store %arg11[%c1_39, %c1_40, %c0_41, %c0_42], %72 {strides = array<i32>} : memref<10x10x8x128xf32, #tpu.memory_space<vmem>>, vector<8x8x8x128xf32>,
    %c0_43 = arith.constant 0 : index
    %c0_44 = arith.constant 0 : index
    %c0_45 = arith.constant 0 : index
    %c0_46 = arith.constant 0 : index
    %74 = vector.load %arg11[%c0_43, %c0_44, %c0_45, %c0_46] : memref<10x10x8x128xf32, #tpu.memory_space<vmem>>, vector<10x10x8x128xf32>
    %cst_47 = arith.constant 0.000000e+00 : f32
    %75 = vector.broadcast %cst_47 : f32 to vector<512x128xf32>
    %76 = vector.extract_strided_slice %74 {offsets = [0, 0, 0, 0], sizes = [8, 8, 8, 128], strides = [1, 1, 1, 1]} : vector<10x10x8x128xf32> to vector<8x8x8x128xf32>
    %77 = vector.shape_cast %76 : vector<8x8x8x128xf32> to vector<512x128xf32>
    %78 = arith.truncf %77 : vector<512x128xf32> to vector<512x128xbf16>
    %c0_48 = arith.constant 0 : index
    %c0_49 = arith.constant 0 : index
    %c0_50 = arith.constant 0 : index
    %79 = vector.load %arg4[%c0_48, %c0_49, %c0_50] : memref<9x128x128xbf16, #tpu.memory_space<vmem>>, vector<1x128x128xbf16>
    %80 = vector.shape_cast %79 : vector<1x128x128xbf16> to vector<128x128xbf16>
    %cst_51 = arith.constant dense<0.000000e+00> : vector<512x128xf32>
    %81 = tpu.matmul %78, %80, %cst_51 {dimension_numbers = #tpu.dot_dimension_numbers<[1], [0], [0], [1], [0, 0, 1, 1], [], []>} : vector<512x128xbf16>, vector<128x128xbf16>, vector<512x128xf32> -> vector<512x128xf32>
    %82 = arith.addf %75, %81 : vector<512x128xf32>
    %83 = vector.extract_strided_slice %74 {offsets = [0, 1, 0, 0], sizes = [8, 8, 8, 128], strides = [1, 1, 1, 1]} : vector<10x10x8x128xf32> to vector<8x8x8x128xf32>
    %84 = vector.shape_cast %83 : vector<8x8x8x128xf32> to vector<512x128xf32>
    %85 = arith.truncf %84 : vector<512x128xf32> to vector<512x128xbf16>
    %c1_52 = arith.constant 1 : index
    %c0_53 = arith.constant 0 : index
    %c0_54 = arith.constant 0 : index
    %86 = vector.load %arg4[%c1_52, %c0_53, %c0_54] : memref<9x128x128xbf16, #tpu.memory_space<vmem>>, vector<1x128x128xbf16>
    %87 = vector.shape_cast %86 : vector<1x128x128xbf16> to vector<128x128xbf16>
    %cst_55 = arith.constant dense<0.000000e+00> : vector<512x128xf32>
    %88 = tpu.matmul %85, %87, %cst_55 {dimension_numbers = #tpu.dot_dimension_numbers<[1], [0], [0], [1], [0, 0, 1, 1], [], []>} : vector<512x128xbf16>, vector<128x128xbf16>, vector<512x128xf32> -> vector<512x128xf32>
    %89 = arith.addf %82, %88 : vector<512x128xf32>
    %90 = vector.extract_strided_slice %74 {offsets = [0, 2, 0, 0], sizes = [8, 8, 8, 128], strides = [1, 1, 1, 1]} : vector<10x10x8x128xf32> to vector<8x8x8x128xf32>
    %91 = vector.shape_cast %90 : vector<8x8x8x128xf32> to vector<512x128xf32>
    %92 = arith.truncf %91 : vector<512x128xf32> to vector<512x128xbf16>
    %c2_56 = arith.constant 2 : index
    %c0_57 = arith.constant 0 : index
    %c0_58 = arith.constant 0 : index
    %93 = vector.load %arg4[%c2_56, %c0_57, %c0_58] : memref<9x128x128xbf16, #tpu.memory_space<vmem>>, vector<1x128x128xbf16>
    %94 = vector.shape_cast %93 : vector<1x128x128xbf16> to vector<128x128xbf16>
    %cst_59 = arith.constant dense<0.000000e+00> : vector<512x128xf32>
    %95 = tpu.matmul %92, %94, %cst_59 {dimension_numbers = #tpu.dot_dimension_numbers<[1], [0], [0], [1], [0, 0, 1, 1], [], []>} : vector<512x128xbf16>, vector<128x128xbf16>, vector<512x128xf32> -> vector<512x128xf32>
    %96 = arith.addf %89, %95 : vector<512x128xf32>
    %97 = vector.extract_strided_slice %74 {offsets = [1, 0, 0, 0], sizes = [8, 8, 8, 128], strides = [1, 1, 1, 1]} : vector<10x10x8x128xf32> to vector<8x8x8x128xf32>
    %98 = vector.shape_cast %97 : vector<8x8x8x128xf32> to vector<512x128xf32>
    %99 = arith.truncf %98 : vector<512x128xf32> to vector<512x128xbf16>
    %c3_60 = arith.constant 3 : index
    %c0_61 = arith.constant 0 : index
    %c0_62 = arith.constant 0 : index
    %100 = vector.load %arg4[%c3_60, %c0_61, %c0_62] : memref<9x128x128xbf16, #tpu.memory_space<vmem>>, vector<1x128x128xbf16>
    %101 = vector.shape_cast %100 : vector<1x128x128xbf16> to vector<128x128xbf16>
    %cst_63 = arith.constant dense<0.000000e+00> : vector<512x128xf32>
    %102 = tpu.matmul %99, %101, %cst_63 {dimension_numbers = #tpu.dot_dimension_numbers<[1], [0], [0], [1], [0, 0, 1, 1], [], []>} : vector<512x128xbf16>, vector<128x128xbf16>, vector<512x128xf32> -> vector<512x128xf32>
    %103 = arith.addf %96, %102 : vector<512x128xf32>
    %104 = vector.extract_strided_slice %74 {offsets = [1, 1, 0, 0], sizes = [8, 8, 8, 128], strides = [1, 1, 1, 1]} : vector<10x10x8x128xf32> to vector<8x8x8x128xf32>
    %105 = vector.shape_cast %104 : vector<8x8x8x128xf32> to vector<512x128xf32>
    %106 = arith.truncf %105 : vector<512x128xf32> to vector<512x128xbf16>
    %c4_64 = arith.constant 4 : index
    %c0_65 = arith.constant 0 : index
    %c0_66 = arith.constant 0 : index
    %107 = vector.load %arg4[%c4_64, %c0_65, %c0_66] : memref<9x128x128xbf16, #tpu.memory_space<vmem>>, vector<1x128x128xbf16>
    %108 = vector.shape_cast %107 : vector<1x128x128xbf16> to vector<128x128xbf16>
    %cst_67 = arith.constant dense<0.000000e+00> : vector<512x128xf32>
    %109 = tpu.matmul %106, %108, %cst_67 {dimension_numbers = #tpu.dot_dimension_numbers<[1], [0], [0], [1], [0, 0, 1, 1], [], []>} : vector<512x128xbf16>, vector<128x128xbf16>, vector<512x128xf32> -> vector<512x128xf32>
    %110 = arith.addf %103, %109 : vector<512x128xf32>
    %111 = vector.extract_strided_slice %74 {offsets = [1, 2, 0, 0], sizes = [8, 8, 8, 128], strides = [1, 1, 1, 1]} : vector<10x10x8x128xf32> to vector<8x8x8x128xf32>
    %112 = vector.shape_cast %111 : vector<8x8x8x128xf32> to vector<512x128xf32>
    %113 = arith.truncf %112 : vector<512x128xf32> to vector<512x128xbf16>
    %c5_68 = arith.constant 5 : index
    %c0_69 = arith.constant 0 : index
    %c0_70 = arith.constant 0 : index
    %114 = vector.load %arg4[%c5_68, %c0_69, %c0_70] : memref<9x128x128xbf16, #tpu.memory_space<vmem>>, vector<1x128x128xbf16>
    %115 = vector.shape_cast %114 : vector<1x128x128xbf16> to vector<128x128xbf16>
    %cst_71 = arith.constant dense<0.000000e+00> : vector<512x128xf32>
    %116 = tpu.matmul %113, %115, %cst_71 {dimension_numbers = #tpu.dot_dimension_numbers<[1], [0], [0], [1], [0, 0, 1, 1], [], []>} : vector<512x128xbf16>, vector<128x128xbf16>, vector<512x128xf32> -> vector<512x128xf32>
    %117 = arith.addf %110, %116 : vector<512x128xf32>
    %118 = vector.extract_strided_slice %74 {offsets = [2, 0, 0, 0], sizes = [8, 8, 8, 128], strides = [1, 1, 1, 1]} : vector<10x10x8x128xf32> to vector<8x8x8x128xf32>
    %119 = vector.shape_cast %118 : vector<8x8x8x128xf32> to vector<512x128xf32>
    %120 = arith.truncf %119 : vector<512x128xf32> to vector<512x128xbf16>
    %c6_72 = arith.constant 6 : index
    %c0_73 = arith.constant 0 : index
    %c0_74 = arith.constant 0 : index
    %121 = vector.load %arg4[%c6_72, %c0_73, %c0_74] : memref<9x128x128xbf16, #tpu.memory_space<vmem>>, vector<1x128x128xbf16>
    %122 = vector.shape_cast %121 : vector<1x128x128xbf16> to vector<128x128xbf16>
    %cst_75 = arith.constant dense<0.000000e+00> : vector<512x128xf32>
    %123 = tpu.matmul %120, %122, %cst_75 {dimension_numbers = #tpu.dot_dimension_numbers<[1], [0], [0], [1], [0, 0, 1, 1], [], []>} : vector<512x128xbf16>, vector<128x128xbf16>, vector<512x128xf32> -> vector<512x128xf32>
    %124 = arith.addf %117, %123 : vector<512x128xf32>
    %125 = vector.extract_strided_slice %74 {offsets = [2, 1, 0, 0], sizes = [8, 8, 8, 128], strides = [1, 1, 1, 1]} : vector<10x10x8x128xf32> to vector<8x8x8x128xf32>
    %126 = vector.shape_cast %125 : vector<8x8x8x128xf32> to vector<512x128xf32>
    %127 = arith.truncf %126 : vector<512x128xf32> to vector<512x128xbf16>
    %c7_76 = arith.constant 7 : index
    %c0_77 = arith.constant 0 : index
    %c0_78 = arith.constant 0 : index
    %128 = vector.load %arg4[%c7_76, %c0_77, %c0_78] : memref<9x128x128xbf16, #tpu.memory_space<vmem>>, vector<1x128x128xbf16>
    %129 = vector.shape_cast %128 : vector<1x128x128xbf16> to vector<128x128xbf16>
    %cst_79 = arith.constant dense<0.000000e+00> : vector<512x128xf32>
    %130 = tpu.matmul %127, %129, %cst_79 {dimension_numbers = #tpu.dot_dimension_numbers<[1], [0], [0], [1], [0, 0, 1, 1], [], []>} : vector<512x128xbf16>, vector<128x128xbf16>, vector<512x128xf32> -> vector<512x128xf32>
    %131 = arith.addf %124, %130 : vector<512x128xf32>
    %132 = vector.extract_strided_slice %74 {offsets = [2, 2, 0, 0], sizes = [8, 8, 8, 128], strides = [1, 1, 1, 1]} : vector<10x10x8x128xf32> to vector<8x8x8x128xf32>
    %133 = vector.shape_cast %132 : vector<8x8x8x128xf32> to vector<512x128xf32>
    %134 = arith.truncf %133 : vector<512x128xf32> to vector<512x128xbf16>
    %c8_80 = arith.constant 8 : index
    %c0_81 = arith.constant 0 : index
    %c0_82 = arith.constant 0 : index
    %135 = vector.load %arg4[%c8_80, %c0_81, %c0_82] : memref<9x128x128xbf16, #tpu.memory_space<vmem>>, vector<1x128x128xbf16>
    %136 = vector.shape_cast %135 : vector<1x128x128xbf16> to vector<128x128xbf16>
    %cst_83 = arith.constant dense<0.000000e+00> : vector<512x128xf32>
    %137 = tpu.matmul %134, %136, %cst_83 {dimension_numbers = #tpu.dot_dimension_numbers<[1], [0], [0], [1], [0, 0, 1, 1], [], []>} : vector<512x128xbf16>, vector<128x128xbf16>, vector<512x128xf32> -> vector<512x128xf32>
    %138 = arith.addf %131, %137 : vector<512x128xf32>
    %c0_84 = arith.constant 0 : index
    %c0_85 = arith.constant 0 : index
    %139 = vector.load %arg5[%c0_84, %c0_85] : memref<1x128xf32, #tpu.memory_space<vmem>>, vector<1x128xf32>
    %140 = vector.broadcast %139 : vector<1x128xf32> to vector<512x128xf32>
    %141 = arith.addf %138, %140 : vector<512x128xf32>
    %cst_86 = arith.constant 0.000000e+00 : f32
    %142 = vector.broadcast %cst_86 : f32 to vector<512x128xf32>
    %143 = arith.maximumf %141, %142 : vector<512x128xf32>
    %144 = vector.shape_cast %143 : vector<512x128xf32> to vector<64x8x128xf32>
    %145 = arith.truncf %144 : vector<64x8x128xf32> to vector<64x8x128xbf16>
    %c0_87 = arith.constant 0 : index
    %c0_88 = arith.constant 0 : index
    %c0_89 = arith.constant 0 : index
    %146 = vector.load %arg6[%c0_87, %c0_88, %c0_89] : memref<64x128x128xbf16, #tpu.memory_space<vmem>>, vector<64x128x128xbf16>
    "tpu.trace_start"() <{level = 10 : i32, message = "pbc,pcf->pbf"}> : () -> ()
    %cst_90 = arith.constant dense<0.000000e+00> : vector<64x8x128xf32>
    %147 = tpu.matmul %145, %146, %cst_90 {dimension_numbers = #tpu.dot_dimension_numbers<[2], [1], [1], [2], [0, 0, 0, 1, 1, 2], [0], [0]>} : vector<64x8x128xbf16>, vector<64x128x128xbf16>, vector<64x8x128xf32> -> vector<64x8x128xf32>
    "tpu.trace_stop"() : () -> ()
    %cst_91 = arith.constant dense<0.000000e+00> : vector<8x128xf32>
    %148 = vector.multi_reduction <add>, %147, %cst_91 [0] : vector<64x8x128xf32> to vector<8x128xf32>
    %c0_92 = arith.constant 0 : index
    %c0_93 = arith.constant 0 : index
    %149 = vector.load %arg7[%c0_92, %c0_93] : memref<1x128xf32, #tpu.memory_space<vmem>>, vector<1x128xf32>
    %150 = vector.broadcast %149 : vector<1x128xf32> to vector<8x128xf32>
    %151 = arith.addf %148, %150 : vector<8x128xf32>
    %cst_94 = arith.constant 0.000000e+00 : f32
    %152 = vector.broadcast %cst_94 : f32 to vector<8x128xf32>
    %153 = arith.maximumf %151, %152 : vector<8x128xf32>
    %154 = arith.truncf %153 : vector<8x128xf32> to vector<8x128xbf16>
    %c0_95 = arith.constant 0 : index
    %c0_96 = arith.constant 0 : index
    %155 = vector.load %arg8[%c0_95, %c0_96] : memref<128x128xbf16, #tpu.memory_space<vmem>>, vector<128x128xbf16>
    %cst_97 = arith.constant dense<0.000000e+00> : vector<8x128xf32>
    %156 = tpu.matmul %154, %155, %cst_97 {dimension_numbers = #tpu.dot_dimension_numbers<[1], [0], [0], [1], [0, 0, 1, 1], [], []>} : vector<8x128xbf16>, vector<128x128xbf16>, vector<8x128xf32> -> vector<8x128xf32>
    %c0_98 = arith.constant 0 : index
    %c0_99 = arith.constant 0 : index
    %157 = vector.load %arg9[%c0_98, %c0_99] : memref<1x128xf32, #tpu.memory_space<vmem>>, vector<1x128xf32>
    %158 = vector.broadcast %157 : vector<1x128xf32> to vector<8x128xf32>
    %159 = arith.addf %156, %158 : vector<8x128xf32>
    %c0_100 = arith.constant 0 : index
    %c0_101 = arith.constant 0 : index
    %160 = vector.load %arg10[%c0_100, %c0_101] : memref<8x128xf32, #tpu.memory_space<vmem>>, vector<8x128xf32>
    tpu.vector_store %arg10[%c0_100, %c0_101], %159 {strides = array<i32>} : memref<8x128xf32, #tpu.memory_space<vmem>>, vector<8x128xf32>,
    return
  }
  func.func @transform_0(%arg0: i32) -> (i32, i32, i32, i32) {
    %c0_i32 = arith.constant 0 : i32
    %c0_i32_0 = arith.constant 0 : i32
    %c0_i32_1 = arith.constant 0 : i32
    %c0_i32_2 = arith.constant 0 : i32
    return %c0_i32, %c0_i32_0, %arg0, %c0_i32_1 : i32, i32, i32, i32
  }
  func.func @transform_1(%arg0: i32) -> (i32, i32, i32) {
    %c0_i32 = arith.constant 0 : i32
    %c0_i32_0 = arith.constant 0 : i32
    %c0_i32_1 = arith.constant 0 : i32
    %c0_i32_2 = arith.constant 0 : i32
    return %c0_i32, %c0_i32_0, %c0_i32_1 : i32, i32, i32
  }
  func.func @transform_2(%arg0: i32) -> (i32, i32) {
    %c0_i32 = arith.constant 0 : i32
    %c0_i32_0 = arith.constant 0 : i32
    %c0_i32_1 = arith.constant 0 : i32
    return %c0_i32, %c0_i32_0 : i32, i32
  }
  func.func @transform_3(%arg0: i32) -> (i32, i32, i32) {
    %c0_i32 = arith.constant 0 : i32
    %c0_i32_0 = arith.constant 0 : i32
    %c0_i32_1 = arith.constant 0 : i32
    %c0_i32_2 = arith.constant 0 : i32
    return %c0_i32, %c0_i32_0, %c0_i32_1 : i32, i32, i32
  }
  func.func @transform_4(%arg0: i32) -> (i32, i32) {
    %c0_i32 = arith.constant 0 : i32
    %c0_i32_0 = arith.constant 0 : i32
    %c0_i32_1 = arith.constant 0 : i32
    return %c0_i32, %c0_i32_0 : i32, i32
  }
  func.func @transform_5(%arg0: i32) -> (i32, i32, i32) {
    %c0_i32 = arith.constant 0 : i32
    %c0_i32_0 = arith.constant 0 : i32
    %c0_i32_1 = arith.constant 0 : i32
    %c0_i32_2 = arith.constant 0 : i32
    return %c0_i32, %c0_i32_0, %c0_i32_1 : i32, i32, i32
  }
  func.func @transform_6(%arg0: i32) -> (i32, i32) {
    %c0_i32 = arith.constant 0 : i32
    %c0_i32_0 = arith.constant 0 : i32
    %c0_i32_1 = arith.constant 0 : i32
    return %c0_i32, %c0_i32_0 : i32, i32
  }
  func.func @transform_7(%arg0: i32) -> (i32, i32) {
    %c0_i32 = arith.constant 0 : i32
    %c0_i32_0 = arith.constant 0 : i32
    %c0_i32_1 = arith.constant 0 : i32
    return %c0_i32, %c0_i32_0 : i32, i32
  }
  func.func @transform_8(%arg0: i32) -> (i32, i32) {
    %c0_i32 = arith.constant 0 : i32
    %c0_i32_0 = arith.constant 0 : i32
    %c0_i32_1 = arith.constant 0 : i32
    return %c0_i32, %c0_i32_0 : i32, i32
  }
  func.func @transform_9(%arg0: i32) -> (i32, i32) {
    %c0_i32 = arith.constant 0 : i32
    %c0_i32_0 = arith.constant 0 : i32
    return %arg0, %c0_i32 : i32, i32
  }
}

</mosaic_0001>

<bundles_post_ra>
// kernel: conv_qnetwork_forward.1
= control target key start
LH: loop header
LB: loop body
LE: loop exit
PB: predicated region body
PF: predicated region fallthrough
CT: control target
= control target key end

     0   :  { %14 = vsyncpa [#allocation4], 0  ;;  %s17827_s0 = inlined_call_operand.vmem [shape: f32[10,10,8,8], index: 0, kind: input, shape index: {}]   ;;  %s17828_s1 = inlined_call_operand.hbm [shape: bf16[9,8,128], index: 1, kind: input, shape index: {}]   ;;  %s17829_s2 = inlined_call_operand.hbm [shape: f32[1,128], index: 2, kind: input, shape index: {}]   ;;  %s17830_s3 = inlined_call_operand.hbm [shape: bf16[9,128,128], index: 3, kind: input, shape index: {}]   ;;  %s17831_s4 = inlined_call_operand.hbm [shape: f32[1,128], index: 4, kind: input, shape index: {}]   ;;  %s17832_s5 = inlined_call_operand.hbm [shape: bf16[64,128,128], index: 5, kind: input, shape index: {}]   ;;  %s17833_s6 = inlined_call_operand.hbm [shape: f32[1,128], index: 6, kind: input, shape index: {}]   ;;  %s17834_s7 = inlined_call_operand.hbm [shape: bf16[128,128], index: 7, kind: input, shape index: {}]   ;;  %s17835_s8 = inlined_call_operand.hbm [shape: f32[1,128], index: 8, kind: input, shape index: {}]   ;;  %s17836_s9 = inlined_call_operand.vmem [shape: f32[8,128], index: 9, kind: output, shape index: {}]  }
   0x1   :  { %15 = vsyncpa [#allocation6], 0 }
   0x2   :  { %16 = vsyncpa [#allocation9], 0 }
   0x3   :  { %17 = vsyncpa [#allocation12], 0  ;;  %s39_s11 = sshll.u32 %s17829_s2, 4  ;;  %s40_s11 = int_to_ptr.hbm [resolvable:$true] %s39_s11 }
   0x4   :  { %18 = vsyncpa [#allocation15], 0  ;;  %s14431_s12 = smov [#allocation5]   ;;  %s63_s16 = sshll.u32 %s17831_s4, 4  ;;  %s64_s16 = int_to_ptr.hbm [resolvable:$true] %s63_s16 }
   0x5   :  { %s41_s13 = sshll.u32 %s14431_s12, 4  ;;  %s14432_s17 = smov [#allocation8]   ;;  %s42_s13 = int_to_ptr.vmem [resolvable:$true] %s41_s13 }
   0x6   :  { %44 = dma.hbm_to_vmem [thread:$0]  %s40_s11, 16, %s42_s13, [#allocation6]  }
   0x7   :  { %s65_s18 = sshll.u32 %s14432_s17, 4  ;;  %s87_s21 = sshll.u32 %s17833_s6, 4  ;;  %s66_s18 = int_to_ptr.vmem [resolvable:$true] %s65_s18  ;;  %s88_s21 = int_to_ptr.hbm [resolvable:$true] %s87_s21 }
   0x8   :  { %68 = dma.hbm_to_vmem [thread:$0]  %s64_s16, 16, %s66_s18, [#allocation9]  }
   0x9   :  { %s25_s23 = sshll.u32 %s17828_s1, 4  ;;  %s14433_s24 = smov [#allocation11]   ;;  %s26_s23 = int_to_ptr.hbm [resolvable:$true] %s25_s23 }
   0xa   :  { %s89_s25 = sshll.u32 %s14433_s24, 4  ;;  %s14434_s4 = smov [#allocation3]   ;;  %s90_s25 = int_to_ptr.vmem [resolvable:$true] %s89_s25 }
   0xb   :  { %92 = dma.hbm_to_vmem [thread:$0]  %s88_s21, 16, %s90_s25, [#allocation12]  }
   0xc   :  { %s27_s26 = sshll.u32 %s14434_s4, 4  ;;  %s14435_s27 = smov 64   ;;  %s28_s26 = int_to_ptr.vmem [resolvable:$true] %s27_s26 }
   0xd   :  { %s14436_s28 = smov 4   ;;  %s49_s30 = sshll.u32 %s17830_s3, 4  ;;  %s50_s30 = int_to_ptr.hbm [resolvable:$true] %s49_s30 }
   0xe   :  { %33 = dma.hbm_to_vmem [thread:$0]  %s26_s23, 576, %s28_s26, [#allocation4], %s14435_s27, %s14435_s27, %s14436_s28  }
   0xf   :  { %s14437_s10 = smov [#allocation7]   ;;  %s73_s13 = sshll.u32 %s17832_s5, 4  ;;  %s74_s13 = int_to_ptr.hbm [resolvable:$true] %s73_s13 }
  0x10   :  { %s51_s11 = sshll.u32 %s14437_s10, 4  ;;  %s14438_s14 = smov [#allocation10]   ;;  %s52_s11 = int_to_ptr.vmem [resolvable:$true] %s51_s11 }
  0x11   :  { %57 = dma.hbm_to_vmem [thread:$0]  %s50_s30, 9216, %s52_s11, [#allocation6], %s14435_s27, %s14435_s27, %s14436_s28  }
  0x12   :  { %s75_s15 = sshll.u32 %s14438_s14, 4  ;;  %s97_s18 = sshll.u32 %s17834_s7, 4  ;;  %s76_s15 = int_to_ptr.vmem [resolvable:$true] %s75_s15  ;;  %s98_s18 = int_to_ptr.hbm [resolvable:$true] %s97_s18 }
  0x13   :  { %81 = dma.hbm_to_vmem [thread:$0]  %s74_s13, 65536, %s76_s15, [#allocation9], %s14435_s27, %s14435_s27, %s14436_s28  }
  0x14   :  { %s111_s20 = sshll.u32 %s17835_s8, 4  ;;  %s14439_s21 = smov [#allocation13]   ;;  %s112_s20 = int_to_ptr.hbm [resolvable:$true] %s111_s20 }
  0x15   :  { %s99_s2 = sshll.u32 %s14439_s21, 4  ;;  %s14440_s5 = smov [#allocation14]   ;;  %s100_s2 = int_to_ptr.vmem [resolvable:$true] %s99_s2 }
  0x16   :  { %105 = dma.hbm_to_vmem [thread:$0]  %s98_s18, 1024, %s100_s2, [#allocation12], %s14435_s27, %s14435_s27, %s14436_s28  }
  0x17   :  { %s113_s22 = sshll.u32 %s14440_s5, 4  ;;  %s114_s22 = int_to_ptr.vmem [resolvable:$true] %s113_s22 }
  0x18   :  { %116 = dma.hbm_to_vmem [thread:$0]  %s112_s20, 16, %s114_s22, [#allocation15]  }
  0x19   :  { %14421 = dma.done.wait [#allocation4], 576  }
  0x1a   :  { %14422 = vsyncadd [#allocation4], 4294966720 }
  0x1b   :  { %14423 = dma.done.wait [#allocation6], 9232  }
  0x1c   :  { %14424 = vsyncadd [#allocation6], 4294958064 }
  0x1d   :  { %14425 = dma.done.wait [#allocation9], 65552  }
  0x1e   :  { %14426 = vsyncadd [#allocation9], 4294901744 }
  0x1f   :  { %14427 = dma.done.wait [#allocation12], 1040  }
  0x20   :  { %14428 = vsyncadd [#allocation12], 4294966256 }
  0x21   :  { %14429 = dma.done.wait [#allocation15], 16  }
  0x22   :  { %14430 = vsyncadd [#allocation15], 4294967280  ;;  %vm414_vm0 = vcmask 1043456   ;;  %v316_v0 = vld [vmem:[#allocation3 + $0x4] sm:$0xf]  ;;  %v151_v1 = vld [vmem:[%s17827_s0 + $0x8] sm:$0xff] }
  0x23   :  { %v416_v2 = vsel %vm414_vm0, %v316_v0, 0  ;;  %v152_v3 = vld [vmem:[%s17827_s0 + $0x10] sm:$0xff]  ;;  %v227_v4 = vld [vmem:[%s17827_s0 + $0x268] sm:$0xff]  ;;  %vm317_vm1 = vcmask 64512   ;;  %v153_v11 = vld [vmem:[%s17827_s0 + $0x18] sm:$0xff] }
  0x24   :  { %425 = vmatpush.bf16.msra.mxu0 %v416_v2  ;;  %14198 = vmatpush.bf16.msra.mxu1 %v416_v2  ;;  %v283_v5 = vpack.c.bf16 %v152_v3, %v151_v1  ;;  %v228_v6 = vld [vmem:[%s17827_s0 + $0x270] sm:$0xff]  ;;  %v864_v7 = vld [vmem:[#allocation3 + $0x8] sm:$0xf]  ;;  %v1130_v10 = vld [vmem:[#allocation3 + $0xc] sm:$0xf]  ;;  %v251_v14 = vpack.c.bf16 %v153_v11, %v152_v3 }
  0x25   :  { %v14530_v8 = vpack.c.bf16 %v228_v6, %v227_v4  ;;  %v890_v9 = vsel %vm414_vm0, %v864_v7, 0  ;;  %v282_v12 = vld [vmem:[#allocation3] sm:$0xf]  ;;  %v1144_v13 = vsel %vm414_vm0, %v1130_v10, 0  ;;  %v160_v16 = vld [vmem:[%s17827_s0 + $0x50] sm:$0xff]  ;;  %v161_v17 = vld [vmem:[%s17827_s0 + $0x58] sm:$0xff] }
  0x26   :  { %899 = vmatpush.bf16.msra.mxu2 %v890_v9  ;;  %v684_v15 = vsel %vm414_vm0, %v282_v12, 0  ;;  %v254_v18 = vpack.c.bf16 %v161_v17, %v160_v16  ;;  %1153 = vmatpush.bf16.msra.mxu3 %v1144_v13  ;;  %v150_v19 = vld [vmem:[%s17827_s0] sm:$0xff]  ;;  %v155_v21 = vld [vmem:[%s17827_s0 + $0x28] sm:$0xff]  ;;  %v156_v28 = vld [vmem:[%s17827_s0 + $0x30] sm:$0xff] }
  0x27   :  { %18001 = vst [vmem:[#allocation21_spill] sm:$0xff] %v14530_v8  ;;  %10950 = vmatmul.msk.bf16.vlgmr.msra.gmra.mxu0 %vm317_vm1, %v283_v5  ;;  %10981 = vmatmul.msk.bf16.vlgmr.msra.gmra.mxu1 %vm317_vm1, %v14530_v8  ;;  %v154_v20 = vld [vmem:[%s17827_s0 + $0x20] sm:$0xff]  ;;  %v250_v22 = vpack.c.bf16 %v151_v1, %v150_v19  ;;  %v163_v25 = vld [vmem:[%s17827_s0 + $0x68] sm:$0xff]  ;;  %v157_v29 = vld [vmem:[%s17827_s0 + $0x38] sm:$0xff]  ;;  %v285_v30 = vpack.c.bf16 %v156_v28, %v155_v21 }
  0x28   :  { %693 = vmatpush.bf16.msrb.mxu1 %v684_v15  ;;  %v284_v23 = vpack.c.bf16 %v154_v20, %v153_v11  ;;  %v162_v24 = vld [vmem:[%s17827_s0 + $0x60] sm:$0xff]  ;;  %v252_v26 = vpack.c.bf16 %v155_v21, %v154_v20  ;;  %v164_v31 = vld [vmem:[%s17827_s0 + $0x70] sm:$0xff]  ;;  %v165_v32 = vld [vmem:[%s17827_s0 + $0x78] sm:$0xff]  ;;  %v253_v33 = vpack.c.bf16 %v157_v29, %v156_v28 }
  0x29   :  { %11014 = vmatmul.msk.bf16.vlgmr.msra.gmra.mxu2 %vm317_vm1, %v251_v14  ;;  %11046 = vmatmul.msk.bf16.vlgmr.msra.gmra.mxu3 %vm317_vm1, %v254_v18  ;;  %v14566_v27 = vpack.c.bf16 %v163_v25, %v162_v24  ;;  %v14585_v34 = vpack.c.bf16 %v165_v32, %v164_v31  ;;  %v158_v35 = vld [vmem:[%s17827_s0 + $0x40] sm:$0xff]  ;;  %v159_v36 = vld [vmem:[%s17827_s0 + $0x48] sm:$0xff]  ;;  %v14609_v42 = vpack.c.bf16 %v162_v24, %v161_v17  ;;  %v172_v47 = vld [vmem:[%s17827_s0 + $0xb0] sm:$0xff] }
  0x2a   :  { %v286_v37 = vpack.c.bf16 %v158_v35, %v157_v29  ;;  %v166_v38 = vld [vmem:[%s17827_s0 + $0x80] sm:$0xff]  ;;  %v167_v39 = vld [vmem:[%s17827_s0 + $0x88] sm:$0xff]  ;;  %v855_v40 = vpack.c.bf16 %v159_v36, %v158_v35  ;;  %v14626_v46 = vpack.c.bf16 %v164_v31, %v163_v25  ;;  %v173_v48 = vld [vmem:[%s17827_s0 + $0xb8] sm:$0xff] }
  0x2b   :  { %v14604_v41 = vpack.c.bf16 %v167_v39, %v166_v38  ;;  %v170_v43 = vld [vmem:[%s17827_s0 + $0xa0] sm:$0xff]  ;;  %v171_v44 = vld [vmem:[%s17827_s0 + $0xa8] sm:$0xff]  ;;  %v14637_v49 = vpack.c.bf16 %v173_v48, %v172_v47  ;;  %v14643_v50 = vpack.c.bf16 %v166_v38, %v165_v32  ;;  %v168_v54 = vld [vmem:[%s17827_s0 + $0x90] sm:$0xff] }
  0x2c   :  { %v14620_v45 = vpack.c.bf16 %v171_v44, %v170_v43  ;;  %v174_v51 = vld [vmem:[%s17827_s0 + $0xc0] sm:$0xff]  ;;  %v175_v52 = vld [vmem:[%s17827_s0 + $0xc8] sm:$0xff]  ;;  %v169_v55 = vld [vmem:[%s17827_s0 + $0x98] sm:$0xff]  ;;  %v14667_v56 = vpack.c.bf16 %v168_v54, %v167_v39  ;;  %v14691_v63 = vpack.c.bf16 %v172_v47, %v171_v44 }
  0x2d   :  { %v14655_v53 = vpack.c.bf16 %v175_v52, %v174_v51  ;;  %v176_v57 = vld [vmem:[%s17827_s0 + $0xd0] sm:$0xff]  ;;  %v14675_v58 = vld [vmem:[%s17827_s0 + $0xd8] sm:$0xff]  ;;  %v14677_v59 = vpack.c.bf16 %v169_v55, %v168_v54  ;;  %v14716_v10 = vpack.c.bf16 %v174_v51, %v173_v48  ;;  %v14721_v13 = vld [vmem:[%s17827_s0 + $0x100] sm:$0xff] }
  0x2e   :  { %v14684_v60 = vpack.c.bf16 %v14675_v58, %v176_v57  ;;  %v1384_v61 = vld [vmem:[#allocation3 + $0x10] sm:$0xf]  ;;  %v14701_v3 = vld [vmem:[%s17827_s0 + $0xf8] sm:$0xff]  ;;  %v14744_v29 = vpack.c.bf16 %v176_v57, %v175_v52  ;;  %v178_v54 = vld [vmem:[%s17827_s0 + $0xe0] sm:$0xff] }
  0x2f   :  { %v1398_v62 = vsel %vm414_vm0, %v1384_v61, 0  ;;  %v180_v2 = vld [vmem:[%s17827_s0 + $0xf0] sm:$0xff]  ;;  %v179_v57 = vld [vmem:[%s17827_s0 + $0xe8] sm:$0xff]  ;;  %v14779_v61 = vpack.c.bf16 %v178_v54, %v14675_v58 }
  0x30   :  { %1407 = vmatpush.bf16.msrb.mxu0 %v1398_v62  ;;  %v14708_v4 = vpack.c.bf16 %v14701_v3, %v180_v2  ;;  %v14749_v32 = vld [vmem:[%s17827_s0 + $0x110] sm:$0xff]  ;;  %v14784_v2 = vld [vmem:[%s17827_s0 + $0x120] sm:$0xff] }
  0x37   :  { %10951 = vmatmul.msk.bf16.gmra.mxu0 %vm317_vm1, %v284_v23  ;;  %10982 = vmatmul.msk.bf16.vlgmr.msrb.gmra.mxu1 %vm317_vm1, %v250_v22 }
  0x39   :  { %11015 = vmatmul.msk.bf16.gmra.mxu2 %vm317_vm1, %v252_v26  ;;  %11047 = vmatmul.msk.bf16.gmra.mxu3 %vm317_vm1, %v14566_v27 }
  0x47   :  { %10952 = vmatmul.msk.bf16.gmra.mxu0 %vm317_vm1, %v285_v30  ;;  %10983 = vmatmul.msk.bf16.gmra.mxu1 %vm317_vm1, %v251_v14  ;;  %v14726_v14 = vld [vmem:[%s17827_s0 + $0x108] sm:$0xff] }
  0x49   :  { %11016 = vmatmul.msk.bf16.gmra.mxu2 %vm317_vm1, %v253_v33  ;;  %11048 = vmatmul.msk.bf16.gmra.mxu3 %vm317_vm1, %v14585_v34 }
  0x57   :  { %10953 = vmatmul.msk.bf16.gmra.mxu0 %vm317_vm1, %v286_v37  ;;  %10984 = vmatmul.msk.bf16.gmra.mxu1 %vm317_vm1, %v252_v26 }
  0x59   :  { %11017 = vmatmul.msk.bf16.gmra.mxu2 %vm317_vm1, %v855_v40  ;;  %11049 = vmatmul.msk.bf16.gmra.mxu3 %vm317_vm1, %v14604_v41 }
  0x67   :  { %10954 = vmatmul.msk.bf16.gmra.mxu0 %vm317_vm1, %v14609_v42  ;;  %10985 = vmatmul.msk.bf16.gmra.mxu1 %vm317_vm1, %v253_v33  ;;  %v14754_v33 = vld [vmem:[%s17827_s0 + $0x118] sm:$0xff] }
  0x68   :  { %v14762_v39 = vpack.c.bf16 %v14754_v33, %v14749_v32 }
  0x69   :  { %11018 = vmatmul.msk.bf16.gmra.mxu2 %vm317_vm1, %v14566_v27  ;;  %11050 = vmatmul.msk.bf16.gmra.mxu3 %vm317_vm1, %v14620_v45 }
  0x77   :  { %10955 = vmatmul.msk.bf16.gmra.mxu0 %vm317_vm1, %v14626_v46  ;;  %10986 = vmatmul.msk.bf16.gmra.mxu1 %vm317_vm1, %v254_v18  ;;  %v14730_v18 = vpack.c.bf16 %v14726_v14, %v14721_v13 }
  0x79   :  { %11019 = vmatmul.msk.bf16.gmra.mxu2 %vm317_vm1, %v14585_v34  ;;  %11051 = vmatmul.msk.bf16.gmra.mxu3 %vm317_vm1, %v14637_v49 }
  0x87   :  { %10956 = vmatmul.msk.bf16.gmra.mxu0 %vm317_vm1, %v14643_v50  ;;  %10987 = vmatmul.msk.bf16.gmra.mxu1 %vm317_vm1, %v14566_v27 }
  0x89   :  { %11020 = vmatmul.msk.bf16.gmra.mxu2 %vm317_vm1, %v14604_v41  ;;  %11052 = vmatmul.msk.bf16.gmra.mxu3 %vm317_vm1, %v14655_v53 }
  0x97   :  { %10957 = vmatmul.msk.bf16.gmra.mxu0 %vm317_vm1, %v14667_v56  ;;  %10988 = vmatmul.msk.bf16.gmra.mxu1 %vm317_vm1, %v14585_v34 }
  0x99   :  { %11021 = vmatmul.msk.bf16.gmra.mxu2 %vm317_vm1, %v14677_v59  ;;  %11053 = vmatmul.msk.bf16.gmra.mxu3 %vm317_vm1, %v14684_v60 }
  0xa4   :  { %v427_v0 = vpop.f32.mrf.mxu0  ;;  %v14693_v1 = vpop.f32.mrf.mxu1 }
  0xa7   :  { %10958 = vmatmul.msk.bf16.gmra.mxu0 %vm317_vm1, %v14691_v63  ;;  %10989 = vmatmul.msk.bf16.gmra.mxu1 %vm317_vm1, %v14604_v41 }
  0xa9   :  { %11022 = vmatmul.msk.bf16.gmra.mxu2 %vm317_vm1, %v14637_v49  ;;  %11054 = vmatmul.msk.bf16.gmra.mxu3 %vm317_vm1, %v14708_v4 }
  0xac   :  { %v429_v5 = vpop.f32.mrf.mxu0  ;;  %v14714_v6 = vpop.f32.mrf.mxu1 }
  0xad   :  { %v901_v7 = vpop.f32.mrf.mxu2  ;;  %v1155_v9 = vpop.f32.mrf.mxu3 }
  0xb4   :  { %v432_v11 = vpop.f32.mrf.mxu0  ;;  %v695_v12 = vpop.f32.mrf.mxu1 }
  0xb5   :  { %v696_v15 = vadd.f32 %v695_v12, %v427_v0  ;;  %v903_v16 = vpop.f32.mrf.mxu2  ;;  %v1157_v17 = vpop.f32.mrf.mxu3  ;;  %v1635_v12 = vld [vmem:[#allocation3 + $0x14] sm:$0xf] }
  0xb6   :  { %v1640_v58 = vsel %vm414_vm0, %v1635_v12, 0 }
  0xb7   :  { %v1061_v19 = vadd.f32 %v901_v7, %v696_v15  ;;  %10959 = vmatmul.msk.bf16.gmra.mxu0 %vm317_vm1, %v14716_v10  ;;  %10990 = vmatmul.msk.bf16.gmra.mxu1 %vm317_vm1, %v14620_v45 }
  0xb8   :  { %1649 = vmatpush.bf16.msra.mxu1 %v1640_v58  ;;  %v14844_v58 = vld [vmem:[%s17827_s0 + $0x150] sm:$0xff] }
  0xb9   :  { %v14736_v20 = vadd.f32 %v1155_v9, %v1061_v19  ;;  %11023 = vmatmul.msk.bf16.gmra.mxu2 %vm317_vm1, %v14655_v53  ;;  %11055 = vmatmul.msk.bf16.gmra.mxu3 %vm317_vm1, %v14730_v18 }
  0xbc   :  { %v434_v21 = vpop.f32.mrf.mxu0  ;;  %v697_v22 = vpop.f32.mrf.mxu1 }
  0xbd   :  { %v698_v23 = vadd.f32 %v697_v22, %v429_v5  ;;  %v906_v24 = vpop.f32.mrf.mxu2  ;;  %v1160_v25 = vpop.f32.mrf.mxu3  ;;  %v14789_v5 = vld [vmem:[%s17827_s0 + $0x128] sm:$0xff] }
  0xbf   :  { %v1062_v26 = vadd.f32 %v903_v16, %v698_v23 }
  0xc1   :  { %v14742_v28 = vadd.f32 %v1157_v17, %v1062_v26  ;;  %v14800_v17 = vpack.c.bf16 %v14789_v5, %v14784_v2 }
  0xc4   :  { %v437_v30 = vpop.f32.mrf.mxu0  ;;  %v700_v31 = vpop.f32.mrf.mxu1 }
  0xc5   :  { %v701_v35 = vadd.f32 %v700_v31, %v432_v11  ;;  %v908_v36 = vpop.f32.mrf.mxu2  ;;  %v1162_v37 = vpop.f32.mrf.mxu3  ;;  %v14791_v11 = vpack.c.bf16 %v179_v57, %v178_v54  ;;  %v14812_v31 = vpack.c.bf16 %v14721_v13, %v14701_v3 }
  0xc7   :  { %v1063_v38 = vadd.f32 %v906_v24, %v701_v35  ;;  %10960 = vmatmul.msk.bf16.gmra.mxu0 %vm317_vm1, %v14744_v29  ;;  %10991 = vmatmul.msk.bf16.gmra.mxu1 %vm317_vm1, %v14637_v49 }
  0xc9   :  { %v14764_v40 = vadd.f32 %v1160_v25, %v1063_v38  ;;  %11024 = vmatmul.msk.bf16.gmra.mxu2 %vm317_vm1, %v14684_v60  ;;  %11056 = vmatmul.msk.bf16.gmra.mxu3 %vm317_vm1, %v14762_v39  ;;  %v14820_v38 = vld [vmem:[%s17827_s0 + $0x148] sm:$0xff] }
  0xcc   :  { %v439_v43 = vpop.f32.mrf.mxu0  ;;  %v702_v44 = vpop.f32.mrf.mxu1 }
  0xcd   :  { %v703_v47 = vadd.f32 %v702_v44, %v434_v21  ;;  %v911_v48 = vpop.f32.mrf.mxu2  ;;  %v1165_v51 = vpop.f32.mrf.mxu3 }
  0xcf   :  { %v1064_v52 = vadd.f32 %v908_v36, %v703_v47 }
  0xd1   :  { %v14773_v55 = vadd.f32 %v1162_v37, %v1064_v52  ;;  %v190_v37 = vld [vmem:[%s17827_s0 + $0x140] sm:$0xff] }
  0xd2   :  { %v14827_v3 = vpack.c.bf16 %v14820_v38, %v190_v37 }
  0xd4   :  { %v442_v62 = vpop.f32.mrf.mxu0  ;;  %v705_v0 = vpop.f32.mrf.mxu1 }
  0xd5   :  { %v706_v7 = vadd.f32 %v705_v0, %v437_v30  ;;  %v913_v9 = vpop.f32.mrf.mxu2  ;;  %v1167_v15 = vpop.f32.mrf.mxu3 }
  0xd7   :  { %v1065_v16 = vadd.f32 %v911_v48, %v706_v7  ;;  %10961 = vmatmul.msk.bf16.gmra.mxu0 %vm317_vm1, %v14779_v61  ;;  %10992 = vmatmul.msk.bf16.gmra.mxu1 %vm317_vm1, %v14655_v53 }
  0xd9   :  { %v14802_v19 = vadd.f32 %v1165_v51, %v1065_v16  ;;  %11025 = vmatmul.msk.bf16.gmra.mxu2 %vm317_vm1, %v14791_v11  ;;  %11057 = vmatmul.msk.bf16.gmra.mxu3 %vm317_vm1, %v14800_v17  ;;  %v14849_v16 = vld [vmem:[%s17827_s0 + $0x158] sm:$0xff] }
  0xdc   :  { %v444_v21 = vpop.f32.mrf.mxu0  ;;  %v707_v22 = vpop.f32.mrf.mxu1 }
  0xdd   :  { %v708_v23 = vadd.f32 %v707_v22, %v439_v43  ;;  %v916_v24 = vpop.f32.mrf.mxu2  ;;  %v1170_v25 = vpop.f32.mrf.mxu3 }
  0xdf   :  { %v1066_v26 = vadd.f32 %v913_v9, %v708_v23  ;;  %v14839_v9 = vpack.c.bf16 %v14749_v32, %v14726_v14  ;;  %v14857_v14 = vpack.c.bf16 %v14849_v16, %v14844_v58 }
  0xe1   :  { %v14808_v30 = vadd.f32 %v1167_v15, %v1066_v26  ;;  %18005 = vst [vmem:[#allocation25_spill] sm:$0xff] %v14857_v14 }
  0xe3   :  { %18002 = vst [vmem:[#allocation22_spill] sm:$0xff] %v14808_v30 }
  0xe4   :  { %v447_v35 = vpop.f32.mrf.mxu0  ;;  %v710_v36 = vpop.f32.mrf.mxu1 }
  0xe5   :  { %v711_v43 = vadd.f32 %v710_v36, %v442_v62  ;;  %v918_v44 = vpop.f32.mrf.mxu2  ;;  %v1172_v47 = vpop.f32.mrf.mxu3 }
  0xe7   :  { %v1067_v48 = vadd.f32 %v916_v24, %v711_v43  ;;  %10962 = vmatmul.msk.bf16.gmra.mxu0 %vm317_vm1, %v14812_v31  ;;  %10993 = vmatmul.msk.bf16.gmra.mxu1 %vm317_vm1, %v14684_v60 }
  0xe9   :  { %v14829_v13 = vadd.f32 %v1170_v25, %v1067_v48  ;;  %11026 = vmatmul.msk.bf16.gmra.mxu2 %vm317_vm1, %v14730_v18  ;;  %11058 = vmatmul.msk.bf16.gmra.mxu3 %vm317_vm1, %v14827_v3 }
  0xeb   :  { %18003 = vst [vmem:[#allocation23_spill] sm:$0xff] %v14829_v13 }
  0xec   :  { %v449_v51 = vpop.f32.mrf.mxu0  ;;  %v712_v52 = vpop.f32.mrf.mxu1 }
  0xed   :  { %v713_v54 = vadd.f32 %v712_v52, %v444_v21  ;;  %v921_v57 = vpop.f32.mrf.mxu2  ;;  %v1175_v62 = vpop.f32.mrf.mxu3 }
  0xef   :  { %v1068_v0 = vadd.f32 %v918_v44, %v713_v54  ;;  %v14874_v54 = vld [vmem:[%s17827_s0 + $0x160] sm:$0xff] }
  0xf1   :  { %v14835_v7 = vadd.f32 %v1172_v47, %v1068_v0  ;;  %v14869_v47 = vpack.c.bf16 %v14784_v2, %v14754_v33 }
  0xf3   :  { %18004 = vst [vmem:[#allocation24_spill] sm:$0xff] %v14835_v7  ;;  %v198_v7 = vld [vmem:[%s17827_s0 + $0x180] sm:$0xff] }
  0xf4   :  { %v452_v12 = vpop.f32.mrf.mxu0  ;;  %v715_v15 = vpop.f32.mrf.mxu1 }
  0xf5   :  { %v716_v21 = vadd.f32 %v715_v15, %v447_v35  ;;  %v923_v22 = vpop.f32.mrf.mxu2  ;;  %v1177_v23 = vpop.f32.mrf.mxu3 }
  0xf7   :  { %v1069_v24 = vadd.f32 %v921_v57, %v716_v21  ;;  %10963 = vmatmul.msk.bf16.gmra.mxu0 %vm317_vm1, %v14839_v9  ;;  %10994 = vmatmul.msk.bf16.gmra.mxu1 %vm317_vm1, %v14708_v4 }
  0xf9   :  { %v14859_v32 = vadd.f32 %v1175_v62, %v1069_v24  ;;  %11027 = vmatmul.msk.bf16.gmra.mxu2 %vm317_vm1, %v14762_v39  ;;  %11059 = vmatmul.msk.bf16.gmra.mxu3 %vm317_vm1, %v14857_v14 }
  0xfb   :  { %18006 = vst [vmem:[#allocation26_spill] sm:$0xff] %v14859_v32 }
  0xfc   :  { %v454_v25 = vpop.f32.mrf.mxu0  ;;  %v717_v26 = vpop.f32.mrf.mxu1 }
  0xfd   :  { %v718_v35 = vadd.f32 %v717_v26, %v449_v51  ;;  %v926_v36 = vpop.f32.mrf.mxu2  ;;  %v1180_v37 = vpop.f32.mrf.mxu3  ;;  %v14879_v51 = vld [vmem:[%s17827_s0 + $0x168] sm:$0xff] }
  0xfe   :  { %v14887_v33 = vpack.c.bf16 %v14879_v51, %v14874_v54 }
  0xff   :  { %v1070_v43 = vadd.f32 %v923_v22, %v718_v35  ;;  %v188_v35 = vld [vmem:[%s17827_s0 + $0x130] sm:$0xff] }
 0x100   :  { %18008 = vst [vmem:[#allocation28_spill] sm:$0xff] %v14887_v33 }
 0x101   :  { %v14865_v44 = vadd.f32 %v1177_v23, %v1070_v43  ;;  %v14904_v43 = vpack.c.bf16 %v188_v35, %v14789_v5 }
 0x103   :  { %18007 = vst [vmem:[#allocation27_spill] sm:$0xff] %v14865_v44 }
 0x104   :  { %v457_v48 = vpop.f32.mrf.mxu0  ;;  %v720_v52 = vpop.f32.mrf.mxu1 }
 0x105   :  { %v721_v57 = vadd.f32 %v720_v52, %v452_v12  ;;  %v928_v62 = vpop.f32.mrf.mxu2  ;;  %v1182_v0 = vpop.f32.mrf.mxu3 }
 0x107   :  { %v1071_v15 = vadd.f32 %v926_v36, %v721_v57  ;;  %10964 = vmatmul.msk.bf16.gmra.mxu0 %vm317_vm1, %v14869_v47  ;;  %10995 = vmatmul.msk.bf16.gmra.mxu1 %vm317_vm1, %v14730_v18 }
 0x109   :  { %v14889_v2 = vadd.f32 %v1180_v37, %v1071_v15  ;;  %11028 = vmatmul.msk.bf16.gmra.mxu2 %vm317_vm1, %v14800_v17  ;;  %11060 = vmatmul.msk.bf16.gmra.mxu3 %vm317_vm1, %v14887_v33  ;;  %v189_v37 = vld [vmem:[%s17827_s0 + $0x138] sm:$0xff] }
 0x10b   :  { %18009 = vst [vmem:[#allocation29_spill] sm:$0xff] %v14889_v2  ;;  %v14936_v2 = vpack.c.bf16 %v14844_v58, %v14820_v38 }
 0x10c   :  { %v459_v12 = vpop.f32.mrf.mxu0  ;;  %v722_v21 = vpop.f32.mrf.mxu1 }
 0x10d   :  { %v723_v22 = vadd.f32 %v722_v21, %v454_v25  ;;  %v931_v23 = vpop.f32.mrf.mxu2  ;;  %v1185_v24 = vpop.f32.mrf.mxu3  ;;  %v14909_v25 = vld [vmem:[%s17827_s0 + $0x170] sm:$0xff]  ;;  %v14916_v21 = vpack.c.bf16 %v189_v37, %v188_v35 }
 0x10e   :  { %v14993_v32 = vpack.c.bf16 %v14909_v25, %v14879_v51 }
 0x10f   :  { %v1072_v26 = vadd.f32 %v928_v62, %v723_v22  ;;  %v14914_v62 = vld [vmem:[%s17827_s0 + $0x178] sm:$0xff]  ;;  %18011 = vst [vmem:[#allocation31_spill] sm:$0xff] %v14916_v21 }
 0x110   :  { %v14924_v5 = vpack.c.bf16 %v14914_v62, %v14909_v25  ;;  %18022 = vst [vmem:[#allocation42_spill] sm:$0xff] %v14993_v32 }
 0x111   :  { %v14898_v36 = vadd.f32 %v1182_v0, %v1072_v26 }
 0x112   :  { %18012 = vst [vmem:[#allocation32_spill] sm:$0xff] %v14924_v5 }
 0x113   :  { %18010 = vst [vmem:[#allocation30_spill] sm:$0xff] %v14898_v36 }
 0x114   :  { %v462_v52 = vpop.f32.mrf.mxu0  ;;  %v725_v57 = vpop.f32.mrf.mxu1 }
 0x115   :  { %v726_v0 = vadd.f32 %v725_v57, %v457_v48  ;;  %v933_v15 = vpop.f32.mrf.mxu2  ;;  %v1187_v22 = vpop.f32.mrf.mxu3 }
 0x117   :  { %v1073_v26 = vadd.f32 %v931_v23, %v726_v0  ;;  %10965 = vmatmul.msk.bf16.gmra.mxu0 %vm317_vm1, %v14904_v43  ;;  %10996 = vmatmul.msk.bf16.gmra.mxu1 %vm317_vm1, %v14762_v39 }
 0x119   :  { %v14926_v8 = vadd.f32 %v1185_v24, %v1073_v26  ;;  %11029 = vmatmul.msk.bf16.gmra.mxu2 %vm317_vm1, %v14916_v21  ;;  %11061 = vmatmul.msk.bf16.gmra.mxu3 %vm317_vm1, %v14924_v5  ;;  %v14944_v21 = vld [vmem:[%s17827_s0 + $0x198] sm:$0xff] }
 0x11b   :  { %18013 = vst [vmem:[#allocation33_spill] sm:$0xff] %v14926_v8  ;;  %v200_v8 = vld [vmem:[%s17827_s0 + $0x190] sm:$0xff] }
 0x11c   :  { %v464_v48 = vpop.f32.mrf.mxu0  ;;  %v727_v23 = vpop.f32.mrf.mxu1  ;;  %v14951_v38 = vpack.c.bf16 %v14944_v21, %v200_v8  ;;  %v14963_v8 = vpack.c.bf16 %v14874_v54, %v14849_v16 }
 0x11d   :  { %v728_v35 = vadd.f32 %v727_v23, %v459_v12  ;;  %v936_v37 = vpop.f32.mrf.mxu2  ;;  %v1190_v57 = vpop.f32.mrf.mxu3 }
 0x11e   :  { %18015 = vst [vmem:[#allocation35_spill] sm:$0xff] %v14951_v38 }
 0x11f   :  { %v1074_v0 = vadd.f32 %v933_v15, %v728_v35  ;;  %18018 = vst [vmem:[#allocation38_spill] sm:$0xff] %v14963_v8 }
 0x121   :  { %v14932_v36 = vadd.f32 %v1187_v22, %v1074_v0 }
 0x123   :  { %18014 = vst [vmem:[#allocation34_spill] sm:$0xff] %v14932_v36 }
 0x124   :  { %v467_v24 = vpop.f32.mrf.mxu0  ;;  %v730_v26 = vpop.f32.mrf.mxu1 }
 0x125   :  { %v731_v12 = vadd.f32 %v730_v26, %v462_v52  ;;  %v938_v23 = vpop.f32.mrf.mxu2  ;;  %v1192_v15 = vpop.f32.mrf.mxu3 }
 0x127   :  { %v1075_v22 = vadd.f32 %v936_v37, %v731_v12  ;;  %10966 = vmatmul.msk.bf16.gmra.mxu0 %vm317_vm1, %v14936_v2  ;;  %10997 = vmatmul.msk.bf16.gmra.mxu1 %vm317_vm1, %v14800_v17 }
 0x129   :  { %v14953_v58 = vadd.f32 %v1190_v57, %v1075_v22  ;;  %11030 = vmatmul.msk.bf16.gmra.mxu2 %vm317_vm1, %v14857_v14  ;;  %11062 = vmatmul.msk.bf16.gmra.mxu3 %vm317_vm1, %v14951_v38 }
 0x12b   :  { %18016 = vst [vmem:[#allocation36_spill] sm:$0xff] %v14953_v58  ;;  %v14968_v58 = vld [vmem:[%s17827_s0 + $0x1a0] sm:$0xff] }
 0x12c   :  { %v469_v52 = vpop.f32.mrf.mxu0  ;;  %v732_v35 = vpop.f32.mrf.mxu1 }
 0x12d   :  { %v733_v37 = vadd.f32 %v732_v35, %v464_v48  ;;  %v941_v0 = vpop.f32.mrf.mxu2  ;;  %v1195_v26 = vpop.f32.mrf.mxu3  ;;  %v14973_v48 = vld [vmem:[%s17827_s0 + $0x1a8] sm:$0xff] }
 0x12e   :  { %v14981_v16 = vpack.c.bf16 %v14973_v48, %v14968_v58 }
 0x12f   :  { %v1076_v12 = vadd.f32 %v938_v23, %v733_v37 }
 0x130   :  { %18019 = vst [vmem:[#allocation39_spill] sm:$0xff] %v14981_v16 }
 0x131   :  { %v14959_v36 = vadd.f32 %v1192_v15, %v1076_v12 }
 0x133   :  { %18017 = vst [vmem:[#allocation37_spill] sm:$0xff] %v14959_v36 }
 0x134   :  { %v472_v57 = vpop.f32.mrf.mxu0  ;;  %v735_v22 = vpop.f32.mrf.mxu1 }
 0x135   :  { %v736_v35 = vadd.f32 %v735_v22, %v467_v24  ;;  %v943_v23 = vpop.f32.mrf.mxu2  ;;  %v1197_v15 = vpop.f32.mrf.mxu3 }
 0x137   :  { %v1077_v37 = vadd.f32 %v941_v0, %v736_v35  ;;  %10967 = vmatmul.msk.bf16.gmra.mxu0 %vm317_vm1, %v14963_v8  ;;  %10998 = vmatmul.msk.bf16.gmra.mxu1 %vm317_vm1, %v14827_v3  ;;  %v2134_v8 = vld [vmem:[#allocation3 + $0x1c] sm:$0xf] }
 0x139   :  { %v14983_v54 = vadd.f32 %v1195_v26, %v1077_v37  ;;  %11031 = vmatmul.msk.bf16.gmra.mxu2 %vm317_vm1, %v14887_v33  ;;  %11063 = vmatmul.msk.bf16.gmra.mxu3 %vm317_vm1, %v14981_v16 }
 0x13b   :  { %18020 = vst [vmem:[#allocation40_spill] sm:$0xff] %v14983_v54  ;;  %v14998_v54 = vld [vmem:[%s17827_s0 + $0x1b0] sm:$0xff] }
 0x13c   :  { %v474_v24 = vpop.f32.mrf.mxu0  ;;  %v737_v0 = vpop.f32.mrf.mxu1 }
 0x13d   :  { %v738_v12 = vadd.f32 %v737_v0, %v469_v52  ;;  %v946_v22 = vpop.f32.mrf.mxu2  ;;  %v1200_v35 = vpop.f32.mrf.mxu3  ;;  %v15003_v52 = vld [vmem:[%s17827_s0 + $0x1b8] sm:$0xff] }
 0x13e   :  { %v15011_v51 = vpack.c.bf16 %v15003_v52, %v14998_v54 }
 0x13f   :  { %v1078_v36 = vadd.f32 %v943_v23, %v738_v12 }
 0x140   :  { %18023 = vst [vmem:[#allocation43_spill] sm:$0xff] %v15011_v51 }
 0x141   :  { %v14989_v44 = vadd.f32 %v1197_v15, %v1078_v36 }
 0x143   :  { %18021 = vst [vmem:[#allocation41_spill] sm:$0xff] %v14989_v44 }
 0x144   :  { %v477_v26 = vpop.f32.mrf.mxu0  ;;  %v740_v37 = vpop.f32.mrf.mxu1 }
 0x145   :  { %v741_v0 = vadd.f32 %v740_v37, %v472_v57  ;;  %v948_v23 = vpop.f32.mrf.mxu2  ;;  %v1202_v36 = vpop.f32.mrf.mxu3 }
 0x147   :  { %v1079_v15 = vadd.f32 %v946_v22, %v741_v0  ;;  %10968 = vmatmul.msk.bf16.gmra.mxu0 %vm317_vm1, %v14993_v32  ;;  %10999 = vmatmul.msk.bf16.gmra.mxu1 %vm317_vm1, %v14857_v14 }
 0x149   :  { %v15013_v25 = vadd.f32 %v1200_v35, %v1079_v15  ;;  %11032 = vmatmul.msk.bf16.gmra.mxu2 %vm317_vm1, %v14924_v5  ;;  %11064 = vmatmul.msk.bf16.gmra.mxu3 %vm317_vm1, %v15011_v51  ;;  %v199_v35 = vld [vmem:[%s17827_s0 + $0x188] sm:$0xff]  ;;  %v15028_v15 = vpack.c.bf16 %v198_v7, %v14914_v62 }
 0x14b   :  { %18024 = vst [vmem:[#allocation44_spill] sm:$0xff] %v15013_v25 }
 0x14c   :  { %v479_v57 = vpop.f32.mrf.mxu0  ;;  %v742_v12 = vpop.f32.mrf.mxu1  ;;  %18026 = vst [vmem:[#allocation46_spill] sm:$0xff] %v15028_v15 }
 0x14d   :  { %v743_v22 = vadd.f32 %v742_v12, %v474_v24  ;;  %v951_v37 = vpop.f32.mrf.mxu2  ;;  %v1205_v0 = vpop.f32.mrf.mxu3  ;;  %v15033_v24 = vld [vmem:[%s17827_s0 + $0x1c0] sm:$0xff]  ;;  %v15040_v12 = vpack.c.bf16 %v199_v35, %v198_v7 }
 0x14f   :  { %v1080_v44 = vadd.f32 %v948_v23, %v743_v22  ;;  %v15038_v23 = vld [vmem:[%s17827_s0 + $0x1c8] sm:$0xff]  ;;  %18027 = vst [vmem:[#allocation47_spill] sm:$0xff] %v15040_v12 }
 0x150   :  { %v15048_v62 = vpack.c.bf16 %v15038_v23, %v15033_v24 }
 0x151   :  { %v15022_v32 = vadd.f32 %v1202_v36, %v1080_v44 }
 0x152   :  { %18028 = vst [vmem:[#allocation48_spill] sm:$0xff] %v15048_v62 }
 0x153   :  { %18025 = vst [vmem:[#allocation45_spill] sm:$0xff] %v15022_v32 }
 0x154   :  { %v482_v25 = vpop.f32.mrf.mxu0  ;;  %v745_v13 = vpop.f32.mrf.mxu1 }
 0x155   :  { %v746_v44 = vadd.f32 %v745_v13, %v477_v26  ;;  %v953_v36 = vpop.f32.mrf.mxu2  ;;  %v1207_v22 = vpop.f32.mrf.mxu3 }
 0x157   :  { %v1081_v32 = vadd.f32 %v951_v37, %v746_v44  ;;  %10969 = vmatmul.msk.bf16.gmra.mxu0 %vm317_vm1, %v15028_v15  ;;  %11000 = vmatmul.msk.bf16.gmra.mxu1 %vm317_vm1, %v14887_v33  ;;  %v15060_v33 = vpack.c.bf16 %v14968_v58, %v14944_v21 }
 0x159   :  { %v15050_v30 = vadd.f32 %v1205_v0, %v1081_v32  ;;  %11033 = vmatmul.msk.bf16.gmra.mxu2 %vm317_vm1, %v15040_v12  ;;  %11065 = vmatmul.msk.bf16.gmra.mxu3 %vm317_vm1, %v15048_v62  ;;  %18031 = vst [vmem:[#allocation51_spill] sm:$0xff] %v15060_v33  ;;  %v15068_v12 = vld [vmem:[%s17827_s0 + $0x1e8] sm:$0xff] }
 0x15b   :  { %18029 = vst [vmem:[#allocation49_spill] sm:$0xff] %v15050_v30  ;;  %v210_v30 = vld [vmem:[%s17827_s0 + $0x1e0] sm:$0xff] }
 0x15c   :  { %v484_v13 = vpop.f32.mrf.mxu0  ;;  %v747_v7 = vpop.f32.mrf.mxu1  ;;  %v15075_v21 = vpack.c.bf16 %v15068_v12, %v210_v30  ;;  %v15087_v30 = vpack.c.bf16 %v14998_v54, %v14973_v48 }
 0x15d   :  { %v748_v26 = vadd.f32 %v747_v7, %v479_v57  ;;  %v956_v37 = vpop.f32.mrf.mxu2  ;;  %v1210_v35 = vpop.f32.mrf.mxu3 }
 0x15e   :  { %18032 = vst [vmem:[#allocation52_spill] sm:$0xff] %v15075_v21 }
 0x15f   :  { %v1082_v44 = vadd.f32 %v953_v36, %v748_v26  ;;  %18035 = vst [vmem:[#allocation55_spill] sm:$0xff] %v15087_v30 }
 0x161   :  { %v15056_v15 = vadd.f32 %v1207_v22, %v1082_v44 }
 0x163   :  { %18030 = vst [vmem:[#allocation50_spill] sm:$0xff] %v15056_v15 }
 0x164   :  { %v487_v32 = vpop.f32.mrf.mxu0  ;;  %v750_v0 = vpop.f32.mrf.mxu1 }
 0x165   :  { %v751_v57 = vadd.f32 %v750_v0, %v482_v25  ;;  %v958_v7 = vpop.f32.mrf.mxu2  ;;  %v1212_v36 = vpop.f32.mrf.mxu3 }
 0x167   :  { %v1083_v22 = vadd.f32 %v956_v37, %v751_v57  ;;  %10970 = vmatmul.msk.bf16.gmra.mxu0 %vm317_vm1, %v15060_v33  ;;  %11001 = vmatmul.msk.bf16.gmra.mxu1 %vm317_vm1, %v14924_v5  ;;  %v15117_v33 = vpack.c.bf16 %v15033_v24, %v15003_v52 }
 0x169   :  { %v15077_v58 = vadd.f32 %v1210_v35, %v1083_v22  ;;  %11034 = vmatmul.msk.bf16.gmra.mxu2 %vm317_vm1, %v14981_v16  ;;  %11066 = vmatmul.msk.bf16.gmra.mxu3 %vm317_vm1, %v15075_v21  ;;  %18039 = vst [vmem:[#allocation59_spill] sm:$0xff] %v15117_v33 }
 0x16b   :  { %18033 = vst [vmem:[#allocation53_spill] sm:$0xff] %v15077_v58  ;;  %v15092_v58 = vld [vmem:[%s17827_s0 + $0x1f0] sm:$0xff] }
 0x16c   :  { %v489_v25 = vpop.f32.mrf.mxu0  ;;  %v752_v26 = vpop.f32.mrf.mxu1 }
 0x16d   :  { %v753_v37 = vadd.f32 %v752_v26, %v484_v13  ;;  %v961_v44 = vpop.f32.mrf.mxu2  ;;  %v1215_v0 = vpop.f32.mrf.mxu3  ;;  %v15097_v13 = vld [vmem:[%s17827_s0 + $0x1f8] sm:$0xff] }
 0x16e   :  { %v15105_v48 = vpack.c.bf16 %v15097_v13, %v15092_v58 }
 0x16f   :  { %v1084_v57 = vadd.f32 %v958_v7, %v753_v37 }
 0x170   :  { %18036 = vst [vmem:[#allocation56_spill] sm:$0xff] %v15105_v48 }
 0x171   :  { %v15083_v15 = vadd.f32 %v1212_v36, %v1084_v57 }
 0x173   :  { %18034 = vst [vmem:[#allocation54_spill] sm:$0xff] %v15083_v15 }
 0x174   :  { %v492_v35 = vpop.f32.mrf.mxu0  ;;  %v755_v22 = vpop.f32.mrf.mxu1 }
 0x175   :  { %v756_v26 = vadd.f32 %v755_v22, %v487_v32  ;;  %v963_v7 = vpop.f32.mrf.mxu2  ;;  %v1217_v36 = vpop.f32.mrf.mxu3 }
 0x177   :  { %v1085_v37 = vadd.f32 %v961_v44, %v756_v26  ;;  %10971 = vmatmul.msk.bf16.gmra.mxu0 %vm317_vm1, %v15087_v30  ;;  %11002 = vmatmul.msk.bf16.gmra.mxu1 %vm317_vm1, %v14951_v38 }
 0x179   :  { %v15107_v54 = vadd.f32 %v1215_v0, %v1085_v37  ;;  %11035 = vmatmul.msk.bf16.gmra.mxu2 %vm317_vm1, %v15011_v51  ;;  %11067 = vmatmul.msk.bf16.gmra.mxu3 %vm317_vm1, %v15105_v48 }
 0x17b   :  { %18037 = vst [vmem:[#allocation57_spill] sm:$0xff] %v15107_v54  ;;  %v15122_v54 = vld [vmem:[%s17827_s0 + $0x200] sm:$0xff] }
 0x17c   :  { %v494_v32 = vpop.f32.mrf.mxu0  ;;  %v757_v44 = vpop.f32.mrf.mxu1 }
 0x17d   :  { %v758_v57 = vadd.f32 %v757_v44, %v489_v25  ;;  %v966_v22 = vpop.f32.mrf.mxu2  ;;  %v1220_v26 = vpop.f32.mrf.mxu3  ;;  %v15127_v25 = vld [vmem:[%s17827_s0 + $0x208] sm:$0xff] }
 0x17e   :  { %v15135_v52 = vpack.c.bf16 %v15127_v25, %v15122_v54 }
 0x17f   :  { %v1086_v15 = vadd.f32 %v963_v7, %v758_v57 }
 0x180   :  { %18040 = vst [vmem:[#allocation60_spill] sm:$0xff] %v15135_v52 }
 0x181   :  { %v15113_v30 = vadd.f32 %v1217_v36, %v1086_v15 }
 0x183   :  { %18038 = vst [vmem:[#allocation58_spill] sm:$0xff] %v15113_v30 }
 0x184   :  { %v497_v0 = vpop.f32.mrf.mxu0  ;;  %v760_v37 = vpop.f32.mrf.mxu1 }
 0x185   :  { %v761_v44 = vadd.f32 %v760_v37, %v492_v35  ;;  %v968_v7 = vpop.f32.mrf.mxu2  ;;  %v1222_v15 = vpop.f32.mrf.mxu3 }
 0x187   :  { %v1087_v36 = vadd.f32 %v966_v22, %v761_v44  ;;  %10972 = vmatmul.msk.bf16.gmra.mxu0 %vm317_vm1, %v15117_v33  ;;  %11003 = vmatmul.msk.bf16.gmra.mxu1 %vm317_vm1, %v14981_v16  ;;  %v208_v33 = vld [vmem:[%s17827_s0 + $0x1d0] sm:$0xff] }
 0x189   :  { %v15137_v24 = vadd.f32 %v1220_v26, %v1087_v36  ;;  %11036 = vmatmul.msk.bf16.gmra.mxu2 %vm317_vm1, %v15048_v62  ;;  %11068 = vmatmul.msk.bf16.gmra.mxu3 %vm317_vm1, %v15135_v52  ;;  %v209_v26 = vld [vmem:[%s17827_s0 + $0x1d8] sm:$0xff]  ;;  %v15152_v36 = vpack.c.bf16 %v208_v33, %v15038_v23 }
 0x18b   :  { %18041 = vst [vmem:[#allocation61_spill] sm:$0xff] %v15137_v24 }
 0x18c   :  { %v499_v35 = vpop.f32.mrf.mxu0  ;;  %v762_v57 = vpop.f32.mrf.mxu1  ;;  %18043 = vst [vmem:[#allocation63_spill] sm:$0xff] %v15152_v36 }
 0x18d   :  { %v763_v22 = vadd.f32 %v762_v57, %v494_v32  ;;  %v971_v37 = vpop.f32.mrf.mxu2  ;;  %v1225_v44 = vpop.f32.mrf.mxu3  ;;  %v15157_v32 = vld [vmem:[%s17827_s0 + $0x210] sm:$0xff]  ;;  %v15164_v57 = vpack.c.bf16 %v209_v26, %v208_v33 }
 0x18f   :  { %v1088_v30 = vadd.f32 %v968_v7, %v763_v22  ;;  %v15162_v7 = vld [vmem:[%s17827_s0 + $0x218] sm:$0xff]  ;;  %18044 = vst [vmem:[#allocation64_spill] sm:$0xff] %v15164_v57 }
 0x190   :  { %v15172_v23 = vpack.c.bf16 %v15162_v7, %v15157_v32 }
 0x191   :  { %v15146_v16 = vadd.f32 %v1222_v15, %v1088_v30 }
 0x193   :  { %18042 = vst [vmem:[#allocation62_spill] sm:$0xff] %v15146_v16 }
 0x194   :  { %v502_v24 = vpop.f32.mrf.mxu0  ;;  %v765_v38 = vpop.f32.mrf.mxu1 }
 0x195   :  { %v766_v30 = vadd.f32 %v765_v38, %v497_v0  ;;  %v973_v15 = vpop.f32.mrf.mxu2  ;;  %v1227_v22 = vpop.f32.mrf.mxu3 }
 0x197   :  { %v1089_v16 = vadd.f32 %v971_v37, %v766_v30  ;;  %10973 = vmatmul.msk.bf16.gmra.mxu0 %vm317_vm1, %v15152_v36  ;;  %11004 = vmatmul.msk.bf16.gmra.mxu1 %vm317_vm1, %v15011_v51  ;;  %v15184_v51 = vpack.c.bf16 %v15092_v58, %v15068_v12 }
 0x199   :  { %v15174_v5 = vadd.f32 %v1225_v44, %v1089_v16  ;;  %11037 = vmatmul.msk.bf16.gmra.mxu2 %vm317_vm1, %v15164_v57  ;;  %11069 = vmatmul.msk.bf16.gmra.mxu3 %vm317_vm1, %v15172_v23  ;;  %18047 = vst [vmem:[#allocation67_spill] sm:$0xff] %v15184_v51  ;;  %v15192_v57 = vld [vmem:[%s17827_s0 + $0x238] sm:$0xff] }
 0x19b   :  { %18045 = vst [vmem:[#allocation65_spill] sm:$0xff] %v15174_v5  ;;  %v220_v5 = vld [vmem:[%s17827_s0 + $0x230] sm:$0xff] }
 0x19c   :  { %v504_v33 = vpop.f32.mrf.mxu0  ;;  %v767_v38 = vpop.f32.mrf.mxu1  ;;  %v15199_v12 = vpack.c.bf16 %v15192_v57, %v220_v5  ;;  %v15211_v5 = vpack.c.bf16 %v15122_v54, %v15097_v13 }
 0x19d   :  { %v768_v0 = vadd.f32 %v767_v38, %v499_v35  ;;  %v976_v37 = vpop.f32.mrf.mxu2  ;;  %v1230_v26 = vpop.f32.mrf.mxu3 }
 0x19e   :  { %18050 = vst [vmem:[#allocation70_spill] sm:$0xff] %v15211_v5 }
 0x19f   :  { %v1090_v30 = vadd.f32 %v973_v15, %v768_v0 }
 0x1a1   :  { %v15180_v36 = vadd.f32 %v1227_v22, %v1090_v30 }
 0x1a3   :  { %18046 = vst [vmem:[#allocation66_spill] sm:$0xff] %v15180_v36 }
 0x1a4   :  { %v507_v16 = vpop.f32.mrf.mxu0  ;;  %v770_v44 = vpop.f32.mrf.mxu1 }
 0x1a5   :  { %v771_v35 = vadd.f32 %v770_v44, %v502_v24  ;;  %v978_v38 = vpop.f32.mrf.mxu2  ;;  %v1232_v15 = vpop.f32.mrf.mxu3 }
 0x1a7   :  { %v1091_v22 = vadd.f32 %v976_v37, %v771_v35  ;;  %10974 = vmatmul.msk.bf16.gmra.mxu0 %vm317_vm1, %v15184_v51  ;;  %11005 = vmatmul.msk.bf16.gmra.mxu1 %vm317_vm1, %v15048_v62  ;;  %v15241_v51 = vpack.c.bf16 %v15157_v32, %v15127_v25 }
 0x1a9   :  { %v15201_v58 = vadd.f32 %v1230_v26, %v1091_v22  ;;  %11038 = vmatmul.msk.bf16.gmra.mxu2 %vm317_vm1, %v15105_v48  ;;  %11070 = vmatmul.msk.bf16.gmra.mxu3 %vm317_vm1, %v15199_v12  ;;  %18053 = vst [vmem:[#allocation73_spill] sm:$0xff] %v15241_v51 }
 0x1ab   :  { %18048 = vst [vmem:[#allocation68_spill] sm:$0xff] %v15201_v58  ;;  %v15216_v58 = vld [vmem:[%s17827_s0 + $0x240] sm:$0xff] }
 0x1ac   :  { %v509_v24 = vpop.f32.mrf.mxu0  ;;  %v772_v0 = vpop.f32.mrf.mxu1 }
 0x1ad   :  { %v773_v37 = vadd.f32 %v772_v0, %v504_v33  ;;  %v981_v30 = vpop.f32.mrf.mxu2  ;;  %v1235_v44 = vpop.f32.mrf.mxu3  ;;  %v15221_v33 = vld [vmem:[%s17827_s0 + $0x248] sm:$0xff] }
 0x1ae   :  { %v15229_v13 = vpack.c.bf16 %v15221_v33, %v15216_v58 }
 0x1af   :  { %v1092_v35 = vadd.f32 %v978_v38, %v773_v37 }
 0x1b1   :  { %v15207_v36 = vadd.f32 %v1232_v15, %v1092_v35 }
 0x1b3   :  { %18049 = vst [vmem:[#allocation69_spill] sm:$0xff] %v15207_v36 }
 0x1b4   :  { %v512_v26 = vpop.f32.mrf.mxu0  ;;  %v775_v22 = vpop.f32.mrf.mxu1 }
 0x1b5   :  { %v776_v0 = vadd.f32 %v775_v22, %v507_v16  ;;  %v983_v38 = vpop.f32.mrf.mxu2  ;;  %v1237_v15 = vpop.f32.mrf.mxu3 }
 0x1b7   :  { %v1093_v37 = vadd.f32 %v981_v30, %v776_v0  ;;  %10975 = vmatmul.msk.bf16.gmra.mxu0 %vm317_vm1, %v15211_v5  ;;  %11006 = vmatmul.msk.bf16.gmra.mxu1 %vm317_vm1, %v15075_v21 }
 0x1b9   :  { %v15231_v54 = vadd.f32 %v1235_v44, %v1093_v37  ;;  %11039 = vmatmul.msk.bf16.gmra.mxu2 %vm317_vm1, %v15135_v52  ;;  %11071 = vmatmul.msk.bf16.gmra.mxu3 %vm317_vm1, %v15229_v13 }
 0x1bb   :  { %18051 = vst [vmem:[#allocation71_spill] sm:$0xff] %v15231_v54  ;;  %v15246_v54 = vld [vmem:[%s17827_s0 + $0x250] sm:$0xff] }
 0x1bc   :  { %v514_v16 = vpop.f32.mrf.mxu0  ;;  %v777_v30 = vpop.f32.mrf.mxu1 }
 0x1bd   :  { %v778_v35 = vadd.f32 %v777_v30, %v509_v24  ;;  %v986_v22 = vpop.f32.mrf.mxu2  ;;  %v1240_v0 = vpop.f32.mrf.mxu3  ;;  %v15251_v24 = vld [vmem:[%s17827_s0 + $0x258] sm:$0xff] }
 0x1be   :  { %v15259_v25 = vpack.c.bf16 %v15251_v24, %v15246_v54 }
 0x1bf   :  { %v1094_v36 = vadd.f32 %v983_v38, %v778_v35 }
 0x1c0   :  { %18054 = vst [vmem:[#allocation74_spill] sm:$0xff] %v15259_v25 }
 0x1c1   :  { %v15237_v5 = vadd.f32 %v1237_v15, %v1094_v36 }
 0x1c3   :  { %18052 = vst [vmem:[#allocation72_spill] sm:$0xff] %v15237_v5 }
 0x1c4   :  { %v517_v44 = vpop.f32.mrf.mxu0  ;;  %v780_v37 = vpop.f32.mrf.mxu1 }
 0x1c5   :  { %v781_v30 = vadd.f32 %v780_v37, %v512_v26  ;;  %v988_v38 = vpop.f32.mrf.mxu2  ;;  %v1242_v36 = vpop.f32.mrf.mxu3 }
 0x1c7   :  { %v1095_v15 = vadd.f32 %v986_v22, %v781_v30  ;;  %10976 = vmatmul.msk.bf16.gmra.mxu0 %vm317_vm1, %v15241_v51  ;;  %11007 = vmatmul.msk.bf16.gmra.mxu1 %vm317_vm1, %v15105_v48  ;;  %v218_v51 = vld [vmem:[%s17827_s0 + $0x220] sm:$0xff] }
 0x1c9   :  { %v15261_v32 = vadd.f32 %v1240_v0, %v1095_v15  ;;  %11040 = vmatmul.msk.bf16.gmra.mxu2 %vm317_vm1, %v15172_v23  ;;  %11072 = vmatmul.msk.bf16.gmra.mxu3 %vm317_vm1, %v15259_v25  ;;  %v219_v0 = vld [vmem:[%s17827_s0 + $0x228] sm:$0xff]  ;;  %v15276_v15 = vpack.c.bf16 %v218_v51, %v15162_v7 }
 0x1ca   :  { %v15283_v21 = vpack.c.bf16 %v219_v0, %v218_v51 }
 0x1cb   :  { %18055 = vst [vmem:[#allocation75_spill] sm:$0xff] %v15261_v32 }
 0x1cc   :  { %v519_v26 = vpop.f32.mrf.mxu0  ;;  %v782_v35 = vpop.f32.mrf.mxu1  ;;  %18057 = vst [vmem:[#allocation77_spill] sm:$0xff] %v15276_v15 }
 0x1cd   :  { %v783_v22 = vadd.f32 %v782_v35, %v514_v16  ;;  %v991_v37 = vpop.f32.mrf.mxu2  ;;  %v1245_v30 = vpop.f32.mrf.mxu3  ;;  %v15281_v16 = vld [vmem:[%s17827_s0 + $0x260] sm:$0xff]  ;;  %18058 = vst [vmem:[#allocation78_spill] sm:$0xff] %v15283_v21 }
 0x1cf   :  { %v1096_v5 = vadd.f32 %v988_v38, %v783_v22 }
 0x1d1   :  { %v15270_v48 = vadd.f32 %v1242_v36, %v1096_v5  ;;  %v14215_v36 = vld [vmem:[%s17827_s0 + $0x268] sm:$0xff] }
 0x1d3   :  { %18056 = vst [vmem:[#allocation76_spill] sm:$0xff] %v15270_v48  ;;  %v15289_v48 = vpack.c.bf16 %v14215_v36, %v15281_v16 }
 0x1d4   :  { %v522_v35 = vpop.f32.mrf.mxu0  ;;  %v785_v38 = vpop.f32.mrf.mxu1 }
 0x1d5   :  { %v786_v22 = vadd.f32 %v785_v38, %v517_v44  ;;  %v993_v32 = vpop.f32.mrf.mxu2  ;;  %v1247_v5 = vpop.f32.mrf.mxu3 }
 0x1d7   :  { %v1097_v7 = vadd.f32 %v991_v37, %v786_v22  ;;  %10977 = vmatmul.msk.bf16.gmra.mxu0 %vm317_vm1, %v15276_v15  ;;  %11008 = vmatmul.msk.bf16.gmra.mxu1 %vm317_vm1, %v15135_v52  ;;  %v1880_v15 = vld [vmem:[#allocation3 + $0x18] sm:$0xf] }
 0x1d8   :  { %v1894_v52 = vsel %vm414_vm0, %v1880_v15, 0 }
 0x1d9   :  { %v15295_v62 = vadd.f32 %v1245_v30, %v1097_v7  ;;  %11041 = vmatmul.msk.bf16.gmra.mxu2 %vm317_vm1, %v15283_v21  ;;  %11073 = vmatmul.msk.bf16.gmra.mxu3 %vm317_vm1, %v15289_v48  ;;  %v2148_v30 = vsel %vm414_vm0, %v2134_v8, 0  ;;  %v15307_v7 = vpack.c.bf16 %v15216_v58, %v15192_v57 }
 0x1da   :  { %1903 = vmatpush.bf16.msrb.mxu2 %v1894_v52  ;;  %2157 = vmatpush.bf16.msrb.mxu3 %v2148_v30 }
 0x1db   :  { %18059 = vst [vmem:[#allocation79_spill] sm:$0xff] %v15295_v62 }
 0x1dc   :  { %v524_v51 = vpop.f32.mrf.mxu0  ;;  %v787_v44 = vpop.f32.mrf.mxu1 }
 0x1dd   :  { %v788_v0 = vadd.f32 %v787_v44, %v519_v26  ;;  %v996_v38 = vpop.f32.mrf.mxu2  ;;  %v1250_v36 = vpop.f32.mrf.mxu3  ;;  %v231_v26 = vld [vmem:[%s17827_s0 + $0x288] sm:$0xff] }
 0x1df   :  { %v1098_v37 = vadd.f32 %v993_v32, %v788_v0  ;;  %v230_v32 = vld [vmem:[%s17827_s0 + $0x280] sm:$0xff] }
 0x1e0   :  { %v15319_v52 = vpack.c.bf16 %v231_v26, %v230_v32  ;;  %v15331_v32 = vpack.c.bf16 %v15246_v54, %v15221_v33 }
 0x1e1   :  { %v15301_v22 = vadd.f32 %v1247_v5, %v1098_v37 }
 0x1e3   :  { %18060 = vst [vmem:[#allocation80_spill] sm:$0xff] %v15301_v22 }
 0x1e4   :  { %v527_v62 = vpop.f32.mrf.mxu0  ;;  %v790_v21 = vpop.f32.mrf.mxu1 }
 0x1e5   :  { %v791_v5 = vadd.f32 %v790_v21, %v522_v35  ;;  %v998_v15 = vpop.f32.mrf.mxu2  ;;  %v1252_v44 = vpop.f32.mrf.mxu3 }
 0x1e7   :  { %v1099_v8 = vadd.f32 %v996_v38, %v791_v5  ;;  %10978 = vmatmul.msk.bf16.gmra.mxu0 %vm317_vm1, %v15307_v7  ;;  %11009 = vmatmul.msk.bf16.gmra.mxu1 %vm317_vm1, %v15172_v23  ;;  %v232_v5 = vld [vmem:[%s17827_s0 + $0x290] sm:$0xff] }
 0x1e9   :  { %v15321_v57 = vadd.f32 %v1250_v36, %v1099_v8  ;;  %11042 = vmatmul.msk.bf16.gmra.mxu2 %vm317_vm1, %v15229_v13  ;;  %11074 = vmatmul.msk.bf16.gmra.mxu3 %vm317_vm1, %v15319_v52  ;;  %v233_v8 = vld [vmem:[%s17827_s0 + $0x298] sm:$0xff] }
 0x1ea   :  { %v15343_v33 = vpack.c.bf16 %v233_v8, %v232_v5  ;;  %v15355_v5 = vpack.c.bf16 %v15281_v16, %v15251_v24 }
 0x1eb   :  { %18061 = vst [vmem:[#allocation81_spill] sm:$0xff] %v15321_v57 }
 0x1ec   :  { %v529_v21 = vpop.f32.mrf.mxu0  ;;  %v792_v58 = vpop.f32.mrf.mxu1 }
 0x1ed   :  { %v793_v35 = vadd.f32 %v792_v58, %v524_v51  ;;  %v1001_v0 = vpop.f32.mrf.mxu2  ;;  %v1255_v38 = vpop.f32.mrf.mxu3 }
 0x1ef   :  { %v1100_v37 = vadd.f32 %v998_v15, %v793_v35 }
 0x1f1   :  { %v15327_v30 = vadd.f32 %v1252_v44, %v1100_v37 }
 0x1f3   :  { %18062 = vst [vmem:[#allocation82_spill] sm:$0xff] %v15327_v30 }
 0x1f4   :  { %v532_v36 = vpop.f32.mrf.mxu0  ;;  %v795_v26 = vpop.f32.mrf.mxu1 }
 0x1f5   :  { %v796_v51 = vadd.f32 %v795_v26, %v527_v62  ;;  %v1003_v58 = vpop.f32.mrf.mxu2  ;;  %v1257_v57 = vpop.f32.mrf.mxu3 }
 0x1f7   :  { %v1101_v15 = vadd.f32 %v1001_v0, %v796_v51  ;;  %10979 = vmatmul.msk.bf16.gmra.mxu0 %vm317_vm1, %v15331_v32  ;;  %11010 = vmatmul.msk.bf16.gmra.mxu1 %vm317_vm1, %v15199_v12 }
 0x1f9   :  { %v15345_v54 = vadd.f32 %v1255_v38, %v1101_v15  ;;  %11043 = vmatmul.msk.bf16.gmra.mxu2 %vm317_vm1, %v15259_v25  ;;  %11075 = vmatmul.msk.bf16.gmra.mxu3 %vm317_vm1, %v15343_v33  ;;  %v234_v15 = vld [vmem:[%s17827_s0 + $0x2a0] sm:$0xff] }
 0x1fb   :  { %18063 = vst [vmem:[#allocation83_spill] sm:$0xff] %v15345_v54  ;;  %v235_v54 = vld [vmem:[%s17827_s0 + $0x2a8] sm:$0xff] }
 0x1fc   :  { %v534_v62 = vpop.f32.mrf.mxu0  ;;  %v797_v44 = vpop.f32.mrf.mxu1  ;;  %v15367_v24 = vpack.c.bf16 %v235_v54, %v234_v15  ;;  %v229_v54 = vld [vmem:[%s17827_s0 + $0x278] sm:$0xff] }
 0x1fd   :  { %v798_v35 = vadd.f32 %v797_v44, %v529_v21  ;;  %v1006_v0 = vpop.f32.mrf.mxu2  ;;  %v1260_v37 = vpop.f32.mrf.mxu3 }
 0x1fe   :  { %18065 = vst [vmem:[#allocation85_spill] sm:$0xff] %v15367_v24 }
 0x1ff   :  { %v1102_v26 = vadd.f32 %v1003_v58, %v798_v35 }
 0x201   :  { %v15351_v51 = vadd.f32 %v1257_v57, %v1102_v26 }
 0x203   :  { %18064 = vst [vmem:[#allocation84_spill] sm:$0xff] %v15351_v51 }
 0x204   :  { %v537_v38 = vpop.f32.mrf.mxu0  ;;  %v800_v8 = vpop.f32.mrf.mxu1 }
 0x205   :  { %v801_v21 = vadd.f32 %v800_v8, %v532_v36  ;;  %v1008_v44 = vpop.f32.mrf.mxu2  ;;  %v1262_v30 = vpop.f32.mrf.mxu3 }
 0x207   :  { %v1103_v58 = vadd.f32 %v1006_v0, %v801_v21  ;;  %10980 = vmatmul.msk.bf16.gmra.mxu0 %vm317_vm1, %v15355_v5  ;;  %11011 = vmatmul.msk.bf16.gmra.mxu1 %vm317_vm1, %v15229_v13 }
 0x209   :  { %v15369_v16 = vadd.f32 %v1260_v37, %v1103_v58  ;;  %11044 = vmatmul.msk.bf16.gmra.mxu2 %vm317_vm1, %v15289_v48  ;;  %11076 = vmatmul.msk.bf16.gmra.mxu3 %vm317_vm1, %v15367_v24  ;;  %v236_v58 = vld [vmem:[%s17827_s0 + $0x2b0] sm:$0xff] }
 0x20b   :  { %18066 = vst [vmem:[#allocation86_spill] sm:$0xff] %v15369_v16  ;;  %v237_v16 = vld [vmem:[%s17827_s0 + $0x2b8] sm:$0xff] }
 0x20c   :  { %v539_v57 = vpop.f32.mrf.mxu0  ;;  %v802_v36 = vpop.f32.mrf.mxu1 }
 0x20d   :  { %v803_v35 = vadd.f32 %v802_v36, %v534_v62  ;;  %v1011_v0 = vpop.f32.mrf.mxu2  ;;  %v1265_v26 = vpop.f32.mrf.mxu3  ;;  %v14216_v62 = vld [vmem:[%s17827_s0 + $0x270] sm:$0xff] }
 0x20f   :  { %v1104_v8 = vadd.f32 %v1008_v44, %v803_v35 }
 0x211   :  { %v15375_v21 = vadd.f32 %v1262_v30, %v1104_v8  ;;  %v15389_v30 = vpack.c.bf16 %v229_v54, %v14216_v62 }
 0x213   :  { %18067 = vst [vmem:[#allocation87_spill] sm:$0xff] %v15375_v21  ;;  %v15395_v21 = vpack.c.bf16 %v237_v16, %v236_v58 }
 0x214   :  { %v542_v37 = vpop.f32.mrf.mxu0  ;;  %v805_v15 = vpop.f32.mrf.mxu1 }
 0x215   :  { %v806_v44 = vadd.f32 %v805_v15, %v537_v38  ;;  %v1013_v36 = vpop.f32.mrf.mxu2  ;;  %v1267_v35 = vpop.f32.mrf.mxu3 }
 0x217   :  { %v1105_v8 = vadd.f32 %v1011_v0, %v806_v44  ;;  %11012 = vmatmul.msk.bf16.gmra.mxu1 %vm317_vm1, %v15259_v25  ;;  %11078 = vmatmul.msk.bf16.vlgmr.msrb.gmra.mxu0 %vm317_vm1, %v14609_v42 }
 0x219   :  { %v15397_v51 = vadd.f32 %v1265_v26, %v1105_v8  ;;  %11045 = vmatmul.msk.bf16.gmra.mxu2 %vm317_vm1, %v15389_v30  ;;  %11077 = vmatmul.msk.bf16.gmra.mxu3 %vm317_vm1, %v15395_v21 }
 0x21b   :  { %18068 = vst [vmem:[#allocation88_spill] sm:$0xff] %v15397_v51 }
 0x21c   :  { %v544_v38 = vpop.f32.mrf.mxu0  ;;  %v807_v54 = vpop.f32.mrf.mxu1 }
 0x21d   :  { %v808_v15 = vadd.f32 %v807_v54, %v539_v57  ;;  %v1016_v0 = vpop.f32.mrf.mxu2  ;;  %v1270_v62 = vpop.f32.mrf.mxu3 }
 0x21f   :  { %v1106_v44 = vadd.f32 %v1013_v36, %v808_v15 }
 0x221   :  { %v15403_v24 = vadd.f32 %v1267_v35, %v1106_v44 }
 0x224   :  { %v547_v22 = vpop.f32.mrf.mxu0  ;;  %v810_v42 = vpop.f32.mrf.mxu1 }
 0x225   :  { %v811_v16 = vadd.f32 %v810_v42, %v542_v37  ;;  %v1018_v58 = vpop.f32.mrf.mxu2  ;;  %v1272_v26 = vpop.f32.mrf.mxu3 }
 0x227   :  { %v1107_v8 = vadd.f32 %v1016_v0, %v811_v16  ;;  %11013 = vmatmul.msk.bf16.gmra.mxu1 %vm317_vm1, %v15289_v48  ;;  %11079 = vmatmul.msk.bf16.gmra.mxu0 %vm317_vm1, %v14626_v46 }
 0x229   :  { %v15409_v51 = vadd.f32 %v1270_v62, %v1107_v8  ;;  %11142 = vmatmul.msk.bf16.vlgmr.msrb.gmra.mxu2 %vm317_vm1, %v14620_v45  ;;  %11174 = vmatmul.msk.bf16.vlgmr.msrb.gmra.mxu3 %vm317_vm1, %v14691_v63 }
 0x22c   :  { %v549_v57 = vpop.f32.mrf.mxu0  ;;  %v812_v36 = vpop.f32.mrf.mxu1 }
 0x22d   :  { %v813_v37 = vadd.f32 %v812_v36, %v544_v38  ;;  %v1021_v35 = vpop.f32.mrf.mxu2  ;;  %v1275_v54 = vpop.f32.mrf.mxu3 }
 0x22f   :  { %v1108_v15 = vadd.f32 %v1018_v58, %v813_v37 }
 0x231   :  { %v15415_v0 = vadd.f32 %v1272_v26, %v1108_v15 }
 0x234   :  { %v552_v44 = vpop.f32.mrf.mxu0  ;;  %v815_v42 = vpop.f32.mrf.mxu1 }
 0x235   :  { %v816_v16 = vadd.f32 %v815_v42, %v547_v22  ;;  %v1023_v46 = vpop.f32.mrf.mxu2  ;;  %v1277_v62 = vpop.f32.mrf.mxu3 }
 0x237   :  { %v1109_v8 = vadd.f32 %v1021_v35, %v816_v16  ;;  %11080 = vmatmul.msk.bf16.gmra.mxu0 %vm317_vm1, %v14643_v50  ;;  %11110 = vmatmul.msk.bf16.vlgmr.msra.gmra.mxu1 %vm317_vm1, %v14566_v27 }
 0x239   :  { %v15421_v45 = vadd.f32 %v1275_v54, %v1109_v8  ;;  %11143 = vmatmul.msk.bf16.gmra.mxu2 %vm317_vm1, %v14637_v49  ;;  %11175 = vmatmul.msk.bf16.gmra.mxu3 %vm317_vm1, %v14716_v10 }
 0x23c   :  { %v554_v38 = vpop.f32.mrf.mxu0  ;;  %v817_v58 = vpop.f32.mrf.mxu1 }
 0x23d   :  { %v818_v22 = vadd.f32 %v817_v58, %v549_v57  ;;  %v1026_v26 = vpop.f32.mrf.mxu2  ;;  %v1280_v36 = vpop.f32.mrf.mxu3 }
 0x23f   :  { %v1110_v37 = vadd.f32 %v1023_v46, %v818_v22 }
 0x241   :  { %v15427_v35 = vadd.f32 %v1277_v62, %v1110_v37 }
 0x244   :  { %v557_v50 = vpop.f32.mrf.mxu0  ;;  %v820_v15 = vpop.f32.mrf.mxu1 }
 0x245   :  { %v821_v42 = vadd.f32 %v820_v15, %v552_v44  ;;  %v1028_v27 = vpop.f32.mrf.mxu2  ;;  %v1282_v54 = vpop.f32.mrf.mxu3 }
 0x247   :  { %v1111_v16 = vadd.f32 %v1026_v26, %v821_v42  ;;  %11081 = vmatmul.msk.bf16.gmra.mxu0 %vm317_vm1, %v14667_v56  ;;  %11111 = vmatmul.msk.bf16.gmra.mxu1 %vm317_vm1, %v14585_v34 }
 0x249   :  { %v15433_v8 = vadd.f32 %v1280_v36, %v1111_v16  ;;  %11144 = vmatmul.msk.bf16.gmra.mxu2 %vm317_vm1, %v14655_v53  ;;  %11176 = vmatmul.msk.bf16.gmra.mxu3 %vm317_vm1, %v14744_v29 }
 0x24c   :  { %v559_v57 = vpop.f32.mrf.mxu0  ;;  %v822_v46 = vpop.f32.mrf.mxu1 }
 0x24d   :  { %v823_v44 = vadd.f32 %v822_v46, %v554_v38  ;;  %v1031_v62 = vpop.f32.mrf.mxu2  ;;  %v1285_v58 = vpop.f32.mrf.mxu3 }
 0x24f   :  { %v1112_v22 = vadd.f32 %v1028_v27, %v823_v44 }
 0x251   :  { %v15439_v26 = vadd.f32 %v1282_v54, %v1112_v22 }
 0x254   :  { %v562_v56 = vpop.f32.mrf.mxu0  ;;  %v825_v37 = vpop.f32.mrf.mxu1 }
 0x255   :  { %v826_v15 = vadd.f32 %v825_v37, %v557_v50  ;;  %v1033_v34 = vpop.f32.mrf.mxu2  ;;  %v1287_v36 = vpop.f32.mrf.mxu3 }
 0x257   :  { %v1113_v42 = vadd.f32 %v1031_v62, %v826_v15  ;;  %11082 = vmatmul.msk.bf16.gmra.mxu0 %vm317_vm1, %v14691_v63  ;;  %11112 = vmatmul.msk.bf16.gmra.mxu1 %vm317_vm1, %v14604_v41 }
 0x259   :  { %v15445_v16 = vadd.f32 %v1285_v58, %v1113_v42  ;;  %11145 = vmatmul.msk.bf16.gmra.mxu2 %vm317_vm1, %v14684_v60  ;;  %11177 = vmatmul.msk.bf16.gmra.mxu3 %vm317_vm1, %v14779_v61 }
 0x25c   :  { %v564_v38 = vpop.f32.mrf.mxu0  ;;  %v827_v27 = vpop.f32.mrf.mxu1 }
 0x25d   :  { %v828_v50 = vadd.f32 %v827_v27, %v559_v57  ;;  %v1036_v54 = vpop.f32.mrf.mxu2  ;;  %v1290_v46 = vpop.f32.mrf.mxu3 }
 0x25f   :  { %v1114_v44 = vadd.f32 %v1033_v34, %v828_v50 }
 0x261   :  { %v15451_v62 = vadd.f32 %v1287_v36, %v1114_v44 }
 0x264   :  { %v567_v63 = vpop.f32.mrf.mxu0  ;;  %v830_v22 = vpop.f32.mrf.mxu1 }
 0x265   :  { %v831_v37 = vadd.f32 %v830_v22, %v562_v56  ;;  %v1038_v41 = vpop.f32.mrf.mxu2  ;;  %v1292_v58 = vpop.f32.mrf.mxu3 }
 0x267   :  { %v1115_v15 = vadd.f32 %v1036_v54, %v831_v37  ;;  %11083 = vmatmul.msk.bf16.gmra.mxu0 %vm317_vm1, %v14716_v10  ;;  %11113 = vmatmul.msk.bf16.gmra.mxu1 %vm317_vm1, %v14677_v59 }
 0x269   :  { %v15457_v42 = vadd.f32 %v1290_v46, %v1115_v15  ;;  %11146 = vmatmul.msk.bf16.gmra.mxu2 %vm317_vm1, %v14708_v4  ;;  %11178 = vmatmul.msk.bf16.gmra.mxu3 %vm317_vm1, %v14812_v31 }
 0x26c   :  { %v569_v57 = vpop.f32.mrf.mxu0  ;;  %v832_v34 = vpop.f32.mrf.mxu1 }
 0x26d   :  { %v833_v56 = vadd.f32 %v832_v34, %v564_v38  ;;  %v1041_v36 = vpop.f32.mrf.mxu2  ;;  %v1295_v27 = vpop.f32.mrf.mxu3 }
 0x26f   :  { %v1116_v50 = vadd.f32 %v1038_v41, %v833_v56 }
 0x271   :  { %v15463_v54 = vadd.f32 %v1292_v58, %v1116_v50 }
 0x274   :  { %v572_v10 = vpop.f32.mrf.mxu0  ;;  %v835_v44 = vpop.f32.mrf.mxu1 }
 0x275   :  { %v836_v22 = vadd.f32 %v835_v44, %v567_v63  ;;  %v1043_v59 = vpop.f32.mrf.mxu2  ;;  %v1297_v46 = vpop.f32.mrf.mxu3 }
 0x277   :  { %v1117_v37 = vadd.f32 %v1041_v36, %v836_v22  ;;  %11084 = vmatmul.msk.bf16.gmra.mxu0 %vm317_vm1, %v14744_v29  ;;  %11114 = vmatmul.msk.bf16.gmra.mxu1 %vm317_vm1, %v14637_v49 }
 0x279   :  { %v15469_v4 = vadd.f32 %v1295_v27, %v1117_v37  ;;  %11147 = vmatmul.msk.bf16.gmra.mxu2 %vm317_vm1, %v14730_v18  ;;  %11179 = vmatmul.msk.bf16.gmra.mxu3 %vm317_vm1, %v14839_v9  ;;  %v2385_v37 = vld [vmem:[#allocation3 + $0x20] sm:$0xf] }
 0x27c   :  { %v574_v38 = vpop.f32.mrf.mxu0  ;;  %v837_v41 = vpop.f32.mrf.mxu1 }
 0x27d   :  { %v838_v63 = vadd.f32 %v837_v41, %v569_v57  ;;  %v1046_v58 = vpop.f32.mrf.mxu2  ;;  %v1300_v15 = vpop.f32.mrf.mxu3  ;;  %v2390_v57 = vsel %vm414_vm0, %v2385_v37, 0 }
 0x27e   :  { %2399 = vmatpush.bf16.msra.mxu0 %v2390_v57 }
 0x27f   :  { %v1118_v34 = vadd.f32 %v1043_v59, %v838_v63 }
 0x281   :  { %v15475_v56 = vadd.f32 %v1297_v46, %v1118_v34 }
 0x283   :  { %18069 = vst [vmem:[#allocation89_spill] sm:$0xff] %v15475_v56 }
 0x284   :  { %v577_v29 = vpop.f32.mrf.mxu0  ;;  %v840_v36 = vpop.f32.mrf.mxu1 }
 0x285   :  { %v841_v50 = vadd.f32 %v840_v36, %v572_v10  ;;  %v1048_v44 = vpop.f32.mrf.mxu2  ;;  %v1302_v27 = vpop.f32.mrf.mxu3 }
 0x287   :  { %v1119_v22 = vadd.f32 %v1046_v58, %v841_v50  ;;  %11085 = vmatmul.msk.bf16.gmra.mxu0 %vm317_vm1, %v14779_v61  ;;  %11115 = vmatmul.msk.bf16.gmra.mxu1 %vm317_vm1, %v14655_v53 }
 0x289   :  { %v15482_v41 = vadd.f32 %v1300_v15, %v1119_v22  ;;  %11148 = vmatmul.msk.bf16.gmra.mxu2 %vm317_vm1, %v14762_v39  ;;  %11180 = vmatmul.msk.bf16.gmra.mxu3 %vm317_vm1, %v14869_v47 }
 0x28b   :  { %18070 = vst [vmem:[#allocation90_spill] sm:$0xff] %v15482_v41 }
 0x28c   :  { %v579_v10 = vpop.f32.mrf.mxu0  ;;  %v842_v59 = vpop.f32.mrf.mxu1 }
 0x28d   :  { %v843_v46 = vadd.f32 %v842_v59, %v574_v38  ;;  %v1051_v63 = vpop.f32.mrf.mxu2  ;;  %v1305_v61 = vpop.f32.mrf.mxu3 }
 0x28f   :  { %v1120_v58 = vadd.f32 %v1048_v44, %v843_v46 }
 0x291   :  { %v15488_v34 = vadd.f32 %v1302_v27, %v1120_v58 }
 0x294   :  { %v845_v36 = vpop.f32.mrf.mxu1  ;;  %v1409_v50 = vpop.f32.mrf.mxu0 }
 0x295   :  { %v846_v37 = vadd.f32 %v845_v36, %v577_v29  ;;  %v1569_v15 = vadd.f32 %v1409_v50, %v14736_v20  ;;  %v1053_v22 = vpop.f32.mrf.mxu2  ;;  %v1307_v41 = vpop.f32.mrf.mxu3 }
 0x297   :  { %v1121_v56 = vadd.f32 %v1051_v63, %v846_v37  ;;  %11086 = vmatmul.msk.bf16.gmra.mxu0 %vm317_vm1, %v14812_v31  ;;  %11116 = vmatmul.msk.bf16.gmra.mxu1 %vm317_vm1, %v14684_v60 }
 0x299   :  { %v15495_v38 = vadd.f32 %v1305_v61, %v1121_v56  ;;  %11149 = vmatmul.msk.bf16.gmra.mxu2 %vm317_vm1, %v14800_v17  ;;  %11181 = vmatmul.msk.bf16.gmra.mxu3 %vm317_vm1, %v14904_v43 }
 0x29c   :  { %v847_v29 = vpop.f32.mrf.mxu1  ;;  %v1411_v44 = vpop.f32.mrf.mxu0 }
 0x29d   :  { %v848_v20 = vadd.f32 %v847_v29, %v579_v10  ;;  %v1570_v27 = vadd.f32 %v1411_v44, %v14742_v28  ;;  %v1056_v57 = vpop.f32.mrf.mxu2  ;;  %v1310_v59 = vpop.f32.mrf.mxu3 }
 0x29f   :  { %v1122_v46 = vadd.f32 %v1053_v22, %v848_v20 }
 0x2a1   :  { %v15502_v31 = vadd.f32 %v1307_v41, %v1122_v46 }
 0x2a4   :  { %v850_v63 = vpop.f32.mrf.mxu1  ;;  %v1414_v58 = vpop.f32.mrf.mxu0 }
 0x2a5   :  { %v851_v56 = vadd.f32 %v850_v63, %v14693_v1  ;;  %v1571_v61 = vadd.f32 %v1414_v58, %v14764_v40  ;;  %v1058_v36 = vpop.f32.mrf.mxu2  ;;  %v1312_v50 = vpop.f32.mrf.mxu3 }
 0x2a7   :  { %v1123_v37 = vadd.f32 %v1056_v57, %v851_v56  ;;  %11087 = vmatmul.msk.bf16.gmra.mxu0 %vm317_vm1, %v14839_v9  ;;  %11117 = vmatmul.msk.bf16.gmra.mxu1 %vm317_vm1, %v14791_v11 }
 0x2a9   :  { %v15510_v28 = vadd.f32 %v1310_v59, %v1123_v37  ;;  %11150 = vmatmul.msk.bf16.gmra.mxu2 %vm317_vm1, %v14827_v3  ;;  %11182 = vmatmul.msk.bf16.gmra.mxu3 %vm317_vm1, %v14936_v2 }
 0x2ab   :  { %18071 = vst [vmem:[#allocation91_spill] sm:$0xff] %v15510_v28  ;;  %v18090_v28 = vld [vmem:[#allocation31_spill] sm:$0xff] }
 0x2ac   :  { %v852_v1 = vpop.f32.mrf.mxu1  ;;  %v1416_v41 = vpop.f32.mrf.mxu0 }
 0x2ad   :  { %v853_v40 = vadd.f32 %v852_v1, %v14714_v6  ;;  %v1572_v10 = vadd.f32 %v1416_v41, %v14773_v55  ;;  %v1905_v22 = vpop.f32.mrf.mxu2  ;;  %v2159_v29 = vpop.f32.mrf.mxu3  ;;  %v18074_v55 = vld [vmem:[#allocation38_spill] sm:$0xff] }
 0x2af   :  { %v1124_v9 = vadd.f32 %v1058_v36, %v853_v40 }
 0x2b1   :  { %v15518_v44 = vadd.f32 %v1312_v50, %v1124_v9 }
 0x2b3   :  { %18072 = vst [vmem:[#allocation92_spill] sm:$0xff] %v15518_v44 }
 0x2b4   :  { %v1419_v20 = vpop.f32.mrf.mxu0  ;;  %v1651_v57 = vpop.f32.mrf.mxu1 }
 0x2b5   :  { %v1573_v59 = vadd.f32 %v1419_v20, %v14802_v19  ;;  %v1811_v46 = vadd.f32 %v1651_v57, %v1569_v15  ;;  %v1907_v3 = vpop.f32.mrf.mxu2  ;;  %v2161_v63 = vpop.f32.mrf.mxu3  ;;  %v18075_v15 = vld [vmem:[#allocation22_spill] sm:$0xff] }
 0x2b7   :  { %v2065_v58 = vadd.f32 %v1905_v22, %v1811_v46  ;;  %11088 = vmatmul.msk.bf16.gmra.mxu0 %vm317_vm1, %v14869_v47  ;;  %11118 = vmatmul.msk.bf16.gmra.mxu1 %vm317_vm1, %v14730_v18 }
 0x2b9   :  { %v15525_v6 = vadd.f32 %v2159_v29, %v2065_v58  ;;  %11151 = vmatmul.msk.bf16.gmra.mxu2 %vm317_vm1, %v14857_v14  ;;  %11183 = vmatmul.msk.bf16.gmra.mxu3 %vm317_vm1, %v18074_v55  ;;  %v18077_v29 = vld [vmem:[#allocation23_spill] sm:$0xff] }
 0x2bb   :  { %18073 = vst [vmem:[#allocation93_spill] sm:$0xff] %v15525_v6 }
 0x2bc   :  { %v1421_v56 = vpop.f32.mrf.mxu0  ;;  %v1653_v19 = vpop.f32.mrf.mxu1 }
 0x2bd   :  { %v1574_v36 = vadd.f32 %v1421_v56, %v18075_v15  ;;  %v1812_v50 = vadd.f32 %v1653_v19, %v1570_v27  ;;  %v1910_v37 = vpop.f32.mrf.mxu2  ;;  %v2164_v1 = vpop.f32.mrf.mxu3  ;;  %v18079_v56 = vld [vmem:[#allocation28_spill] sm:$0xff] }
 0x2bf   :  { %v2066_v41 = vadd.f32 %v1907_v3, %v1812_v50  ;;  %v18080_v3 = vld [vmem:[#allocation42_spill] sm:$0xff] }
 0x2c1   :  { %v15532_v47 = vadd.f32 %v2161_v63, %v2066_v41 }
 0x2c3   :  { %18076 = vst [vmem:[#allocation38_spill] sm:$0xff] %v15532_v47  ;;  %v13621_v47 = vld [vmem:[#allocation7 + $0x78] sm:$0xff] }
 0x2c4   :  { %v1424_v40 = vpop.f32.mrf.mxu0  ;;  %v1656_v22 = vpop.f32.mrf.mxu1  ;;  %3167 = vmatpush.bf16.msrb.mxu1 %v13621_v47 }
 0x2c5   :  { %v1575_v9 = vadd.f32 %v1424_v40, %v18077_v29  ;;  %v1813_v20 = vadd.f32 %v1656_v22, %v1571_v61  ;;  %v1912_v57 = vpop.f32.mrf.mxu2  ;;  %v2166_v46 = vpop.f32.mrf.mxu3  ;;  %v18081_v61 = vld [vmem:[#allocation24_spill] sm:$0xff] }
 0x2c7   :  { %v2067_v58 = vadd.f32 %v1910_v37, %v1813_v20  ;;  %11089 = vmatmul.msk.bf16.gmra.mxu0 %vm317_vm1, %v14904_v43  ;;  %11119 = vmatmul.msk.bf16.gmra.mxu1 %vm317_vm1, %v14762_v39 }
 0x2c9   :  { %v15539_v27 = vadd.f32 %v2164_v1, %v2067_v58  ;;  %11152 = vmatmul.msk.bf16.gmra.mxu2 %vm317_vm1, %v18079_v56  ;;  %11184 = vmatmul.msk.bf16.gmra.mxu3 %vm317_vm1, %v18080_v3  ;;  %v18083_v1 = vld [vmem:[#allocation26_spill] sm:$0xff] }
 0x2cb   :  { %18078 = vst [vmem:[#allocation22_spill] sm:$0xff] %v15539_v27 }
 0x2cc   :  { %v1426_v63 = vpop.f32.mrf.mxu0  ;;  %v1658_v19 = vpop.f32.mrf.mxu1 }
 0x2cd   :  { %v1576_v15 = vadd.f32 %v1426_v63, %v18081_v61  ;;  %v1814_v50 = vadd.f32 %v1658_v19, %v1572_v10  ;;  %v1915_v37 = vpop.f32.mrf.mxu2  ;;  %v2169_v41 = vpop.f32.mrf.mxu3  ;;  %v18087_v19 = vld [vmem:[#allocation27_spill] sm:$0xff] }
 0x2cf   :  { %v2068_v40 = vadd.f32 %v1912_v57, %v1814_v50  ;;  %v18085_v57 = vld [vmem:[#allocation32_spill] sm:$0xff] }
 0x2d1   :  { %v15546_v43 = vadd.f32 %v2166_v46, %v2068_v40  ;;  %v18086_v46 = vld [vmem:[#allocation46_spill] sm:$0xff] }
 0x2d3   :  { %18082 = vst [vmem:[#allocation23_spill] sm:$0xff] %v15546_v43 }
 0x2d4   :  { %v1429_v22 = vpop.f32.mrf.mxu0  ;;  %v1661_v29 = vpop.f32.mrf.mxu1 }
 0x2d5   :  { %v1577_v20 = vadd.f32 %v1429_v22, %v18083_v1  ;;  %v1815_v58 = vadd.f32 %v1661_v29, %v1573_v59  ;;  %v1917_v27 = vpop.f32.mrf.mxu2  ;;  %v2171_v6 = vpop.f32.mrf.mxu3 }
 0x2d7   :  { %v2069_v44 = vadd.f32 %v1915_v37, %v1815_v58  ;;  %11090 = vmatmul.msk.bf16.gmra.mxu0 %vm317_vm1, %v14936_v2  ;;  %11120 = vmatmul.msk.bf16.gmra.mxu1 %vm317_vm1, %v14800_v17 }
 0x2d9   :  { %v15553_v10 = vadd.f32 %v2169_v41, %v2069_v44  ;;  %11153 = vmatmul.msk.bf16.gmra.mxu2 %vm317_vm1, %v18085_v57  ;;  %11185 = vmatmul.msk.bf16.gmra.mxu3 %vm317_vm1, %v18086_v46  ;;  %v18089_v44 = vld [vmem:[#allocation29_spill] sm:$0xff] }
 0x2db   :  { %18084 = vst [vmem:[#allocation42_spill] sm:$0xff] %v15553_v10 }
 0x2dc   :  { %v1431_v59 = vpop.f32.mrf.mxu0  ;;  %v1663_v63 = vpop.f32.mrf.mxu1 }
 0x2dd   :  { %v1578_v61 = vadd.f32 %v1431_v59, %v18087_v19  ;;  %v1816_v50 = vadd.f32 %v1663_v63, %v1574_v36  ;;  %v1920_v37 = vpop.f32.mrf.mxu2  ;;  %v2174_v40 = vpop.f32.mrf.mxu3  ;;  %v18092_v59 = vld [vmem:[#allocation35_spill] sm:$0xff] }
 0x2df   :  { %v2070_v2 = vadd.f32 %v1917_v27, %v1816_v50 }
 0x2e1   :  { %v15560_v22 = vadd.f32 %v2171_v6, %v2070_v2  ;;  %v18093_v6 = vld [vmem:[#allocation51_spill] sm:$0xff] }
 0x2e3   :  { %18088 = vst [vmem:[#allocation24_spill] sm:$0xff] %v15560_v22 }
 0x2e4   :  { %v1434_v29 = vpop.f32.mrf.mxu0  ;;  %v1666_v47 = vpop.f32.mrf.mxu1 }
 0x2e5   :  { %v1579_v41 = vadd.f32 %v1434_v29, %v18089_v44  ;;  %v1817_v1 = vadd.f32 %v1666_v47, %v1575_v9  ;;  %v1922_v58 = vpop.f32.mrf.mxu2  ;;  %v2176_v10 = vpop.f32.mrf.mxu3  ;;  %v18094_v9 = vld [vmem:[#allocation30_spill] sm:$0xff] }
 0x2e7   :  { %v2071_v43 = vadd.f32 %v1920_v37, %v1817_v1  ;;  %11091 = vmatmul.msk.bf16.gmra.mxu0 %vm317_vm1, %v18074_v55  ;;  %11121 = vmatmul.msk.bf16.gmra.mxu1 %vm317_vm1, %v18090_v28 }
 0x2e9   :  { %v15567_v36 = vadd.f32 %v2174_v40, %v2071_v43  ;;  %11154 = vmatmul.msk.bf16.gmra.mxu2 %vm317_vm1, %v18092_v59  ;;  %11186 = vmatmul.msk.bf16.gmra.mxu3 %vm317_vm1, %v18093_v6  ;;  %v18096_v43 = vld [vmem:[#allocation33_spill] sm:$0xff] }
 0x2eb   :  { %18091 = vst [vmem:[#allocation26_spill] sm:$0xff] %v15567_v36 }
 0x2ec   :  { %v1436_v27 = vpop.f32.mrf.mxu0  ;;  %v1668_v63 = vpop.f32.mrf.mxu1 }
 0x2ed   :  { %v1580_v19 = vadd.f32 %v1436_v27, %v18094_v9  ;;  %v1818_v50 = vadd.f32 %v1668_v63, %v1576_v15  ;;  %v1925_v37 = vpop.f32.mrf.mxu2  ;;  %v2179_v2 = vpop.f32.mrf.mxu3  ;;  %v18098_v27 = vld [vmem:[#allocation39_spill] sm:$0xff] }
 0x2ef   :  { %v2072_v29 = vadd.f32 %v1922_v58, %v1818_v50 }
 0x2f1   :  { %v15574_v55 = vadd.f32 %v2176_v10, %v2072_v29  ;;  %v18099_v10 = vld [vmem:[#allocation55_spill] sm:$0xff] }
 0x2f3   :  { %18095 = vst [vmem:[#allocation46_spill] sm:$0xff] %v15574_v55 }
 0x2f4   :  { %v1439_v47 = vpop.f32.mrf.mxu0  ;;  %v1671_v44 = vpop.f32.mrf.mxu1 }
 0x2f5   :  { %v1581_v40 = vadd.f32 %v1439_v47, %v18096_v43  ;;  %v1819_v1 = vadd.f32 %v1671_v44, %v1577_v20  ;;  %v1927_v36 = vpop.f32.mrf.mxu2  ;;  %v2181_v59 = vpop.f32.mrf.mxu3  ;;  %v18100_v20 = vld [vmem:[#allocation34_spill] sm:$0xff] }
 0x2f7   :  { %v2073_v22 = vadd.f32 %v1925_v37, %v1819_v1  ;;  %11092 = vmatmul.msk.bf16.gmra.mxu0 %vm317_vm1, %v18080_v3  ;;  %11122 = vmatmul.msk.bf16.gmra.mxu1 %vm317_vm1, %v14857_v14 }
 0x2f9   :  { %v15581_v15 = vadd.f32 %v2179_v2, %v2073_v22  ;;  %11155 = vmatmul.msk.bf16.gmra.mxu2 %vm317_vm1, %v18098_v27  ;;  %11187 = vmatmul.msk.bf16.gmra.mxu3 %vm317_vm1, %v18099_v10  ;;  %v18102_v22 = vld [vmem:[#allocation36_spill] sm:$0xff] }
 0x2fb   :  { %18097 = vst [vmem:[#allocation27_spill] sm:$0xff] %v15581_v15 }
 0x2fc   :  { %v1441_v58 = vpop.f32.mrf.mxu0  ;;  %v1673_v63 = vpop.f32.mrf.mxu1 }
 0x2fd   :  { %v1582_v9 = vadd.f32 %v1441_v58, %v18100_v20  ;;  %v1820_v50 = vadd.f32 %v1673_v63, %v1578_v61  ;;  %v1930_v37 = vpop.f32.mrf.mxu2  ;;  %v2184_v29 = vpop.f32.mrf.mxu3  ;;  %v18104_v58 = vld [vmem:[#allocation43_spill] sm:$0xff] }
 0x2ff   :  { %v2074_v47 = vadd.f32 %v1927_v36, %v1820_v50  ;;  %v18105_v36 = vld [vmem:[#allocation59_spill] sm:$0xff] }
 0x301   :  { %v15588_v3 = vadd.f32 %v2181_v59, %v2074_v47 }
 0x303   :  { %18101 = vst [vmem:[#allocation29_spill] sm:$0xff] %v15588_v3  ;;  %v13620_v3 = vld [vmem:[#allocation7 + $0x70] sm:$0xff] }
 0x304   :  { %v1444_v44 = vpop.f32.mrf.mxu0  ;;  %v1676_v43 = vpop.f32.mrf.mxu1  ;;  %3168 = vmatpush.bf16.msrb.mxu1 %v13620_v3 }
 0x305   :  { %v1583_v2 = vadd.f32 %v1444_v44, %v18102_v22  ;;  %v1821_v1 = vadd.f32 %v1676_v43, %v1579_v41  ;;  %v1932_v15 = vpop.f32.mrf.mxu2  ;;  %v2186_v55 = vpop.f32.mrf.mxu3  ;;  %v18106_v41 = vld [vmem:[#allocation37_spill] sm:$0xff] }
 0x307   :  { %v2075_v14 = vadd.f32 %v1930_v37, %v1821_v1  ;;  %11093 = vmatmul.msk.bf16.gmra.mxu0 %vm317_vm1, %v18086_v46  ;;  %11123 = vmatmul.msk.bf16.gmra.mxu1 %vm317_vm1, %v18079_v56 }
 0x309   :  { %v15595_v61 = vadd.f32 %v2184_v29, %v2075_v14  ;;  %11156 = vmatmul.msk.bf16.gmra.mxu2 %vm317_vm1, %v18104_v58  ;;  %11188 = vmatmul.msk.bf16.gmra.mxu3 %vm317_vm1, %v18105_v36  ;;  %v18108_v14 = vld [vmem:[#allocation40_spill] sm:$0xff] }
 0x30b   :  { %18103 = vst [vmem:[#allocation35_spill] sm:$0xff] %v15595_v61 }
 0x30c   :  { %v1446_v59 = vpop.f32.mrf.mxu0  ;;  %v1678_v63 = vpop.f32.mrf.mxu1 }
 0x30d   :  { %v1584_v20 = vadd.f32 %v1446_v59, %v18106_v41  ;;  %v1822_v50 = vadd.f32 %v1678_v63, %v1580_v19  ;;  %v1935_v37 = vpop.f32.mrf.mxu2  ;;  %v2189_v47 = vpop.f32.mrf.mxu3  ;;  %v18112_v63 = vld [vmem:[#allocation41_spill] sm:$0xff] }
 0x30f   :  { %v2076_v44 = vadd.f32 %v1932_v15, %v1822_v50  ;;  %v18111_v15 = vld [vmem:[#allocation63_spill] sm:$0xff] }
 0x311   :  { %v15602_v46 = vadd.f32 %v2186_v55, %v2076_v44  ;;  %v18110_v55 = vld [vmem:[#allocation48_spill] sm:$0xff] }
 0x313   :  { %18107 = vst [vmem:[#allocation51_spill] sm:$0xff] %v15602_v46 }
 0x314   :  { %v1449_v43 = vpop.f32.mrf.mxu0  ;;  %v1681_v22 = vpop.f32.mrf.mxu1 }
 0x315   :  { %v1585_v29 = vadd.f32 %v1449_v43, %v18108_v14  ;;  %v1823_v1 = vadd.f32 %v1681_v22, %v1581_v40  ;;  %v1937_v61 = vpop.f32.mrf.mxu2  ;;  %v2191_v56 = vpop.f32.mrf.mxu3 }
 0x317   :  { %v2077_v28 = vadd.f32 %v1935_v37, %v1823_v1  ;;  %11094 = vmatmul.msk.bf16.gmra.mxu0 %vm317_vm1, %v18093_v6  ;;  %11124 = vmatmul.msk.bf16.gmra.mxu1 %vm317_vm1, %v18085_v57  ;;  %v18115_v57 = vld [vmem:[#allocation47_spill] sm:$0xff] }
 0x319   :  { %v15609_v19 = vadd.f32 %v2189_v47, %v2077_v28  ;;  %11157 = vmatmul.msk.bf16.gmra.mxu2 %vm317_vm1, %v18110_v55  ;;  %11189 = vmatmul.msk.bf16.gmra.mxu3 %vm317_vm1, %v18111_v15  ;;  %v18114_v28 = vld [vmem:[#allocation44_spill] sm:$0xff] }
 0x31b   :  { %18109 = vst [vmem:[#allocation30_spill] sm:$0xff] %v15609_v19 }
 0x31c   :  { %v1451_v40 = vpop.f32.mrf.mxu0  ;;  %v1683_v59 = vpop.f32.mrf.mxu1 }
 0x31d   :  { %v1586_v41 = vadd.f32 %v1451_v40, %v18112_v63  ;;  %v1824_v50 = vadd.f32 %v1683_v59, %v1582_v9  ;;  %v1940_v37 = vpop.f32.mrf.mxu2  ;;  %v2194_v44 = vpop.f32.mrf.mxu3  ;;  %v18117_v40 = vld [vmem:[#allocation52_spill] sm:$0xff] }
 0x31f   :  { %v2078_v6 = vadd.f32 %v1937_v61, %v1824_v50 }
 0x321   :  { %v15616_v43 = vadd.f32 %v2191_v56, %v2078_v6  ;;  %v18118_v56 = vld [vmem:[#allocation67_spill] sm:$0xff] }
 0x323   :  { %18113 = vst [vmem:[#allocation33_spill] sm:$0xff] %v15616_v43 }
 0x324   :  { %v1454_v22 = vpop.f32.mrf.mxu0  ;;  %v1686_v3 = vpop.f32.mrf.mxu1 }
 0x325   :  { %v1587_v47 = vadd.f32 %v1454_v22, %v18114_v28  ;;  %v1825_v14 = vadd.f32 %v1686_v3, %v1583_v2  ;;  %v1942_v1 = vpop.f32.mrf.mxu2  ;;  %v2196_v19 = vpop.f32.mrf.mxu3  ;;  %v18119_v2 = vld [vmem:[#allocation45_spill] sm:$0xff] }
 0x327   :  { %v2079_v46 = vadd.f32 %v1940_v37, %v1825_v14  ;;  %11095 = vmatmul.msk.bf16.gmra.mxu0 %vm317_vm1, %v18099_v10  ;;  %11125 = vmatmul.msk.bf16.gmra.mxu1 %vm317_vm1, %v18115_v57 }
 0x329   :  { %v15623_v9 = vadd.f32 %v2194_v44, %v2079_v46  ;;  %11158 = vmatmul.msk.bf16.gmra.mxu2 %vm317_vm1, %v18117_v40  ;;  %11190 = vmatmul.msk.bf16.gmra.mxu3 %vm317_vm1, %v18118_v56  ;;  %v18121_v46 = vld [vmem:[#allocation49_spill] sm:$0xff] }
 0x32b   :  { %18116 = vst [vmem:[#allocation55_spill] sm:$0xff] %v15623_v9 }
 0x32c   :  { %v1456_v61 = vpop.f32.mrf.mxu0  ;;  %v1688_v59 = vpop.f32.mrf.mxu1 }
 0x32d   :  { %v1588_v63 = vadd.f32 %v1456_v61, %v18119_v2  ;;  %v1826_v50 = vadd.f32 %v1688_v59, %v1584_v20  ;;  %v1945_v37 = vpop.f32.mrf.mxu2  ;;  %v2199_v6 = vpop.f32.mrf.mxu3  ;;  %v18123_v61 = vld [vmem:[#allocation56_spill] sm:$0xff] }
 0x32f   :  { %v2080_v22 = vadd.f32 %v1942_v1, %v1826_v50 }
 0x331   :  { %v15630_v10 = vadd.f32 %v2196_v19, %v2080_v22  ;;  %v18124_v19 = vld [vmem:[#allocation70_spill] sm:$0xff] }
 0x333   :  { %18120 = vst [vmem:[#allocation34_spill] sm:$0xff] %v15630_v10 }
 0x334   :  { %v1459_v3 = vpop.f32.mrf.mxu0  ;;  %v1691_v28 = vpop.f32.mrf.mxu1 }
 0x335   :  { %v1589_v44 = vadd.f32 %v1459_v3, %v18121_v46  ;;  %v1827_v14 = vadd.f32 %v1691_v28, %v1585_v29  ;;  %v1947_v9 = vpop.f32.mrf.mxu2  ;;  %v2201_v40 = vpop.f32.mrf.mxu3  ;;  %v18125_v29 = vld [vmem:[#allocation50_spill] sm:$0xff] }
 0x337   :  { %v2081_v43 = vadd.f32 %v1945_v37, %v1827_v14  ;;  %11096 = vmatmul.msk.bf16.gmra.mxu0 %vm317_vm1, %v18105_v36  ;;  %11126 = vmatmul.msk.bf16.gmra.mxu1 %vm317_vm1, %v18098_v27 }
 0x339   :  { %v15637_v20 = vadd.f32 %v2199_v6, %v2081_v43  ;;  %11159 = vmatmul.msk.bf16.gmra.mxu2 %vm317_vm1, %v18123_v61  ;;  %11191 = vmatmul.msk.bf16.gmra.mxu3 %vm317_vm1, %v18124_v19  ;;  %v18127_v43 = vld [vmem:[#allocation53_spill] sm:$0xff] }
 0x33b   :  { %18122 = vst [vmem:[#allocation36_spill] sm:$0xff] %v15637_v20 }
 0x33c   :  { %v1461_v1 = vpop.f32.mrf.mxu0  ;;  %v1693_v59 = vpop.f32.mrf.mxu1 }
 0x33d   :  { %v1590_v2 = vadd.f32 %v1461_v1, %v18125_v29  ;;  %v1828_v50 = vadd.f32 %v1693_v59, %v1586_v41  ;;  %v1950_v37 = vpop.f32.mrf.mxu2  ;;  %v2204_v22 = vpop.f32.mrf.mxu3  ;;  %v18129_v1 = vld [vmem:[#allocation60_spill] sm:$0xff] }
 0x33f   :  { %v2082_v3 = vadd.f32 %v1947_v9, %v1828_v50  ;;  %v18130_v9 = vld [vmem:[#allocation73_spill] sm:$0xff] }
 0x341   :  { %v15644_v36 = vadd.f32 %v2201_v40, %v2082_v3 }
 0x343   :  { %18126 = vst [vmem:[#allocation59_spill] sm:$0xff] %v15644_v36  ;;  %v13619_v36 = vld [vmem:[#allocation7 + $0x68] sm:$0xff] }
 0x344   :  { %v1464_v28 = vpop.f32.mrf.mxu0  ;;  %v1696_v46 = vpop.f32.mrf.mxu1  ;;  %3169 = vmatpush.bf16.msrb.mxu1 %v13619_v36 }
 0x345   :  { %v1591_v6 = vadd.f32 %v1464_v28, %v18127_v43  ;;  %v1829_v14 = vadd.f32 %v1696_v46, %v1587_v47  ;;  %v1952_v20 = vpop.f32.mrf.mxu2  ;;  %v2206_v10 = vpop.f32.mrf.mxu3  ;;  %v18131_v47 = vld [vmem:[#allocation54_spill] sm:$0xff] }
 0x347   :  { %v2083_v27 = vadd.f32 %v1950_v37, %v1829_v14  ;;  %11097 = vmatmul.msk.bf16.gmra.mxu0 %vm317_vm1, %v18111_v15  ;;  %11127 = vmatmul.msk.bf16.gmra.mxu1 %vm317_vm1, %v18104_v58 }
 0x349   :  { %v15651_v41 = vadd.f32 %v2204_v22, %v2083_v27  ;;  %11160 = vmatmul.msk.bf16.gmra.mxu2 %vm317_vm1, %v18129_v1  ;;  %11192 = vmatmul.msk.bf16.gmra.mxu3 %vm317_vm1, %v18130_v9  ;;  %v18133_v27 = vld [vmem:[#allocation57_spill] sm:$0xff] }
 0x34b   :  { %18128 = vst [vmem:[#allocation37_spill] sm:$0xff] %v15651_v41 }
 0x34c   :  { %v1466_v40 = vpop.f32.mrf.mxu0  ;;  %v1698_v59 = vpop.f32.mrf.mxu1 }
 0x34d   :  { %v1592_v29 = vadd.f32 %v1466_v40, %v18131_v47  ;;  %v1830_v50 = vadd.f32 %v1698_v59, %v1588_v63  ;;  %v1955_v37 = vpop.f32.mrf.mxu2  ;;  %v2209_v3 = vpop.f32.mrf.mxu3  ;;  %v18136_v40 = vld [vmem:[#allocation58_spill] sm:$0xff] }
 0x34f   :  { %v2084_v28 = vadd.f32 %v1952_v20, %v1830_v50 }
 0x351   :  { %v15658_v15 = vadd.f32 %v2206_v10, %v2084_v28  ;;  %v18135_v10 = vld [vmem:[#allocation77_spill] sm:$0xff] }
 0x353   :  { %18132 = vst [vmem:[#allocation40_spill] sm:$0xff] %v15658_v15  ;;  %v18138_v15 = vld [vmem:[#allocation64_spill] sm:$0xff] }
 0x354   :  { %v1469_v46 = vpop.f32.mrf.mxu0  ;;  %v1701_v43 = vpop.f32.mrf.mxu1 }
 0x355   :  { %v1593_v22 = vadd.f32 %v1469_v46, %v18133_v27  ;;  %v1831_v14 = vadd.f32 %v1701_v43, %v1589_v44  ;;  %v1957_v41 = vpop.f32.mrf.mxu2  ;;  %v2211_v58 = vpop.f32.mrf.mxu3 }
 0x357   :  { %v2085_v57 = vadd.f32 %v1955_v37, %v1831_v14  ;;  %11098 = vmatmul.msk.bf16.gmra.mxu0 %vm317_vm1, %v18118_v56  ;;  %11128 = vmatmul.msk.bf16.gmra.mxu1 %vm317_vm1, %v18110_v55 }
 0x359   :  { %v15665_v63 = vadd.f32 %v2209_v3, %v2085_v57  ;;  %11161 = vmatmul.msk.bf16.gmra.mxu2 %vm317_vm1, %v15172_v23  ;;  %11193 = vmatmul.msk.bf16.gmra.mxu3 %vm317_vm1, %v18135_v10  ;;  %v18137_v57 = vld [vmem:[#allocation61_spill] sm:$0xff] }
 0x35b   :  { %18134 = vst [vmem:[#allocation48_spill] sm:$0xff] %v15665_v63 }
 0x35c   :  { %v1471_v44 = vpop.f32.mrf.mxu0  ;;  %v1703_v20 = vpop.f32.mrf.mxu1 }
 0x35d   :  { %v1594_v59 = vadd.f32 %v1471_v44, %v18136_v40  ;;  %v1832_v47 = vadd.f32 %v1703_v20, %v1590_v2  ;;  %v1960_v50 = vpop.f32.mrf.mxu2  ;;  %v2214_v37 = vpop.f32.mrf.mxu3 }
 0x35f   :  { %v2086_v56 = vadd.f32 %v1957_v41, %v1832_v47 }
 0x361   :  { %v15672_v28 = vadd.f32 %v2211_v58, %v2086_v56 }
 0x364   :  { %v1474_v46 = vpop.f32.mrf.mxu0  ;;  %v1706_v36 = vpop.f32.mrf.mxu1 }
 0x365   :  { %v1595_v3 = vadd.f32 %v1474_v46, %v18137_v57  ;;  %v1833_v43 = vadd.f32 %v1706_v36, %v1591_v6  ;;  %v1962_v27 = vpop.f32.mrf.mxu2  ;;  %v2216_v14 = vpop.f32.mrf.mxu3  ;;  %v18139_v6 = vld [vmem:[#allocation62_spill] sm:$0xff] }
 0x367   :  { %v2087_v63 = vadd.f32 %v1960_v50, %v1833_v43  ;;  %11099 = vmatmul.msk.bf16.gmra.mxu0 %vm317_vm1, %v18124_v19  ;;  %11129 = vmatmul.msk.bf16.gmra.mxu1 %vm317_vm1, %v18138_v15 }
 0x369   :  { %v15679_v2 = vadd.f32 %v2214_v37, %v2087_v63  ;;  %11162 = vmatmul.msk.bf16.gmra.mxu2 %vm317_vm1, %v15199_v12  ;;  %11194 = vmatmul.msk.bf16.gmra.mxu3 %vm317_vm1, %v15307_v7  ;;  %v18140_v63 = vld [vmem:[#allocation65_spill] sm:$0xff] }
 0x36c   :  { %v1476_v58 = vpop.f32.mrf.mxu0  ;;  %v1708_v41 = vpop.f32.mrf.mxu1 }
 0x36d   :  { %v1596_v44 = vadd.f32 %v1476_v58, %v18139_v6  ;;  %v1834_v20 = vadd.f32 %v1708_v41, %v1592_v29  ;;  %v1965_v40 = vpop.f32.mrf.mxu2  ;;  %v2219_v47 = vpop.f32.mrf.mxu3 }
 0x36f   :  { %v2088_v50 = vadd.f32 %v1962_v27, %v1834_v20 }
 0x371   :  { %v15686_v19 = vadd.f32 %v2216_v14, %v2088_v50 }
 0x374   :  { %v1479_v56 = vpop.f32.mrf.mxu0  ;;  %v1711_v46 = vpop.f32.mrf.mxu1 }
 0x375   :  { %v1597_v37 = vadd.f32 %v1479_v56, %v18140_v63  ;;  %v1835_v36 = vadd.f32 %v1711_v46, %v1593_v22  ;;  %v1967_v57 = vpop.f32.mrf.mxu2  ;;  %v2221_v12 = vpop.f32.mrf.mxu3  ;;  %v18142_v22 = vld [vmem:[#allocation66_spill] sm:$0xff] }
 0x377   :  { %v2089_v43 = vadd.f32 %v1965_v40, %v1835_v36  ;;  %11100 = vmatmul.msk.bf16.gmra.mxu0 %vm317_vm1, %v18130_v9  ;;  %11130 = vmatmul.msk.bf16.gmra.mxu1 %vm317_vm1, %v18123_v61 }
 0x379   :  { %v15693_v29 = vadd.f32 %v2219_v47, %v2089_v43  ;;  %11163 = vmatmul.msk.bf16.gmra.mxu2 %vm317_vm1, %v15229_v13  ;;  %11195 = vmatmul.msk.bf16.gmra.mxu3 %vm317_vm1, %v15331_v32  ;;  %v18144_v47 = vld [vmem:[#allocation68_spill] sm:$0xff] }
 0x37b   :  { %18141 = vst [vmem:[#allocation63_spill] sm:$0xff] %v15693_v29 }
 0x37c   :  { %v1481_v27 = vpop.f32.mrf.mxu0  ;;  %v1713_v14 = vpop.f32.mrf.mxu1 }
 0x37d   :  { %v1598_v58 = vadd.f32 %v1481_v27, %v18142_v22  ;;  %v1836_v41 = vadd.f32 %v1713_v14, %v1594_v59  ;;  %v1970_v6 = vpop.f32.mrf.mxu2  ;;  %v2224_v20 = vpop.f32.mrf.mxu3 }
 0x37f   :  { %v2090_v40 = vadd.f32 %v1967_v57, %v1836_v41 }
 0x381   :  { %v15700_v9 = vadd.f32 %v2221_v12, %v2090_v40 }
 0x383   :  { %18143 = vst [vmem:[#allocation41_spill] sm:$0xff] %v15700_v9 }
 0x384   :  { %v1484_v50 = vpop.f32.mrf.mxu0  ;;  %v1716_v56 = vpop.f32.mrf.mxu1 }
 0x385   :  { %v1599_v46 = vadd.f32 %v1484_v50, %v18144_v47  ;;  %v1837_v63 = vadd.f32 %v1716_v56, %v1595_v3  ;;  %v1972_v36 = vpop.f32.mrf.mxu2  ;;  %v2226_v43 = vpop.f32.mrf.mxu3  ;;  %v18146_v3 = vld [vmem:[#allocation69_spill] sm:$0xff] }
 0x387   :  { %v2091_v29 = vadd.f32 %v1970_v6, %v1837_v63  ;;  %11101 = vmatmul.msk.bf16.gmra.mxu0 %vm317_vm1, %v18135_v10  ;;  %11131 = vmatmul.msk.bf16.gmra.mxu1 %vm317_vm1, %v18129_v1  ;;  %v13618_v63 = vld [vmem:[#allocation7 + $0x60] sm:$0xff] }
 0x388   :  { %3170 = vmatpush.bf16.msrb.mxu1 %v13618_v63 }
 0x389   :  { %v15707_v59 = vadd.f32 %v2224_v20, %v2091_v29  ;;  %11164 = vmatmul.msk.bf16.gmra.mxu2 %vm317_vm1, %v15259_v25  ;;  %11196 = vmatmul.msk.bf16.gmra.mxu3 %vm317_vm1, %v15355_v5  ;;  %v18148_v29 = vld [vmem:[#allocation71_spill] sm:$0xff] }
 0x38b   :  { %18145 = vst [vmem:[#allocation44_spill] sm:$0xff] %v15707_v59 }
 0x38c   :  { %v1486_v57 = vpop.f32.mrf.mxu0  ;;  %v1718_v12 = vpop.f32.mrf.mxu1 }
 0x38d   :  { %v1600_v27 = vadd.f32 %v1486_v57, %v18146_v3  ;;  %v1838_v14 = vadd.f32 %v1718_v12, %v1596_v44  ;;  %v1975_v22 = vpop.f32.mrf.mxu2  ;;  %v2229_v41 = vpop.f32.mrf.mxu3  ;;  %v18151_v57 = vld [vmem:[#allocation72_spill] sm:$0xff] }
 0x38f   :  { %v2092_v6 = vadd.f32 %v1972_v36, %v1838_v14  ;;  %v18150_v36 = vld [vmem:[#allocation21_spill] sm:$0xff] }
 0x391   :  { %v15714_v10 = vadd.f32 %v2226_v43, %v2092_v6 }
 0x393   :  { %18147 = vst [vmem:[#allocation52_spill] sm:$0xff] %v15714_v10  ;;  %v18154_v10 = vld [vmem:[#allocation78_spill] sm:$0xff] }
 0x394   :  { %v1489_v40 = vpop.f32.mrf.mxu0  ;;  %v1721_v50 = vpop.f32.mrf.mxu1 }
 0x395   :  { %v1601_v20 = vadd.f32 %v1489_v40, %v18148_v29  ;;  %v1839_v56 = vadd.f32 %v1721_v50, %v1597_v37  ;;  %v1977_v47 = vpop.f32.mrf.mxu2  ;;  %v2231_v59 = vpop.f32.mrf.mxu3 }
 0x397   :  { %v2093_v9 = vadd.f32 %v1975_v22, %v1839_v56  ;;  %11102 = vmatmul.msk.bf16.gmra.mxu0 %vm317_vm1, %v15307_v7  ;;  %11132 = vmatmul.msk.bf16.gmra.mxu1 %vm317_vm1, %v15172_v23 }
 0x399   :  { %v15721_v44 = vadd.f32 %v2229_v41, %v2093_v9  ;;  %11165 = vmatmul.msk.bf16.gmra.mxu2 %vm317_vm1, %v15289_v48  ;;  %11197 = vmatmul.msk.bf16.gmra.mxu3 %vm317_vm1, %v18150_v36  ;;  %v18153_v9 = vld [vmem:[#allocation75_spill] sm:$0xff] }
 0x39b   :  { %18149 = vst [vmem:[#allocation67_spill] sm:$0xff] %v15721_v44 }
 0x39c   :  { %v1491_v37 = vpop.f32.mrf.mxu0  ;;  %v1723_v43 = vpop.f32.mrf.mxu1 }
 0x39d   :  { %v1602_v12 = vadd.f32 %v1491_v37, %v18151_v57  ;;  %v1840_v3 = vadd.f32 %v1723_v43, %v1598_v58  ;;  %v1980_v14 = vpop.f32.mrf.mxu2  ;;  %v2234_v22 = vpop.f32.mrf.mxu3  ;;  %v14217_v58 = vld [vmem:[%s17827_s0 + $0x288] sm:$0xff] }
 0x39e   :  { %v18156_v43 = vld [vmem:[#allocation76_spill] sm:$0xff] }
 0x39f   :  { %v2094_v7 = vadd.f32 %v1977_v47, %v1840_v3 }
 0x3a1   :  { %v15728_v6 = vadd.f32 %v2231_v59, %v2094_v7  ;;  %v14218_v59 = vld [vmem:[%s17827_s0 + $0x290] sm:$0xff] }
 0x3a2   :  { %v15741_v47 = vpack.c.bf16 %v14218_v59, %v14217_v58 }
 0x3a3   :  { %18152 = vst [vmem:[#allocation45_spill] sm:$0xff] %v15728_v6  ;;  %v13617_v6 = vld [vmem:[#allocation7 + $0x58] sm:$0xff] }
 0x3a4   :  { %v1494_v40 = vpop.f32.mrf.mxu0  ;;  %v1726_v50 = vpop.f32.mrf.mxu1  ;;  %3171 = vmatpush.bf16.msrb.mxu1 %v13617_v6  ;;  %v13629_v6 = vld [vmem:[#allocation7 + $0xb8] sm:$0xff] }
 0x3a5   :  { %v1603_v41 = vadd.f32 %v1494_v40, %v18153_v9  ;;  %v1841_v29 = vadd.f32 %v1726_v50, %v1599_v46  ;;  %v1982_v56 = vpop.f32.mrf.mxu2  ;;  %v2236_v63 = vpop.f32.mrf.mxu3  ;;  %3626 = vmatpush.bf16.msra.mxu3 %v13629_v6 }
 0x3a7   :  { %v2095_v44 = vadd.f32 %v1980_v14, %v1841_v29  ;;  %11103 = vmatmul.msk.bf16.gmra.mxu0 %vm317_vm1, %v15331_v32  ;;  %11133 = vmatmul.msk.bf16.gmra.mxu1 %vm317_vm1, %v18154_v10 }
 0x3a9   :  { %v15743_v46 = vadd.f32 %v2234_v22, %v2095_v44  ;;  %11166 = vmatmul.msk.bf16.gmra.mxu2 %vm317_vm1, %v15319_v52  ;;  %11198 = vmatmul.msk.bf16.gmra.mxu3 %vm317_vm1, %v15741_v47  ;;  %v18158_v44 = vld [vmem:[#allocation79_spill] sm:$0xff] }
 0x3ab   :  { %18155 = vst [vmem:[#allocation49_spill] sm:$0xff] %v15743_v46 }
 0x3ac   :  { %v1496_v32 = vpop.f32.mrf.mxu0  ;;  %v1728_v37 = vpop.f32.mrf.mxu1 }
 0x3ad   :  { %v1604_v57 = vadd.f32 %v1496_v32, %v18156_v43  ;;  %v1842_v3 = vadd.f32 %v1728_v37, %v1600_v27  ;;  %v1985_v14 = vpop.f32.mrf.mxu2  ;;  %v2239_v7 = vpop.f32.mrf.mxu3  ;;  %v14219_v27 = vld [vmem:[%s17827_s0 + $0x298] sm:$0xff]  ;;  %v18160_v37 = vld [vmem:[#allocation80_spill] sm:$0xff] }
 0x3af   :  { %v2096_v40 = vadd.f32 %v1982_v56, %v1842_v3  ;;  %v14220_v56 = vld [vmem:[%s17827_s0 + $0x2a0] sm:$0xff] }
 0x3b1   :  { %v15750_v50 = vadd.f32 %v2236_v63, %v2096_v40  ;;  %v15763_v63 = vpack.c.bf16 %v14220_v56, %v14219_v27 }
 0x3b3   :  { %18157 = vst [vmem:[#allocation56_spill] sm:$0xff] %v15750_v50 }
 0x3b4   :  { %v1499_v9 = vpop.f32.mrf.mxu0  ;;  %v1731_v29 = vpop.f32.mrf.mxu1 }
 0x3b5   :  { %v1605_v22 = vadd.f32 %v1499_v9, %v18158_v44  ;;  %v1843_v58 = vadd.f32 %v1731_v29, %v1601_v20  ;;  %v1987_v59 = vpop.f32.mrf.mxu2  ;;  %v2241_v52 = vpop.f32.mrf.mxu3 }
 0x3b7   :  { %v2097_v46 = vadd.f32 %v1985_v14, %v1843_v58  ;;  %11104 = vmatmul.msk.bf16.gmra.mxu0 %vm317_vm1, %v15355_v5  ;;  %11134 = vmatmul.msk.bf16.gmra.mxu1 %vm317_vm1, %v15229_v13 }
 0x3b9   :  { %v15765_v20 = vadd.f32 %v2239_v7, %v2097_v46  ;;  %11167 = vmatmul.msk.bf16.gmra.mxu2 %vm317_vm1, %v15343_v33  ;;  %11199 = vmatmul.msk.bf16.gmra.mxu3 %vm317_vm1, %v15763_v63  ;;  %v18162_v46 = vld [vmem:[#allocation81_spill] sm:$0xff] }
 0x3bb   :  { %18159 = vst [vmem:[#allocation70_spill] sm:$0xff] %v15765_v20 }
 0x3bc   :  { %v1501_v5 = vpop.f32.mrf.mxu0  ;;  %v1733_v32 = vpop.f32.mrf.mxu1 }
 0x3bd   :  { %v1606_v43 = vadd.f32 %v1501_v5, %v18160_v37  ;;  %v1844_v3 = vadd.f32 %v1733_v32, %v1602_v12  ;;  %v1990_v14 = vpop.f32.mrf.mxu2  ;;  %v2244_v40 = vpop.f32.mrf.mxu3  ;;  %v14221_v12 = vld [vmem:[%s17827_s0 + $0x2a8] sm:$0xff]  ;;  %v18165_v37 = vld [vmem:[#allocation82_spill] sm:$0xff] }
 0x3be   :  { %v18164_v5 = vld [vmem:[#allocation85_spill] sm:$0xff] }
 0x3bf   :  { %v2098_v9 = vadd.f32 %v1987_v59, %v1844_v3  ;;  %v14222_v59 = vld [vmem:[%s17827_s0 + $0x2b0] sm:$0xff] }
 0x3c1   :  { %v15772_v29 = vadd.f32 %v2241_v52, %v2098_v9  ;;  %v15785_v52 = vpack.c.bf16 %v14222_v59, %v14221_v12 }
 0x3c3   :  { %18161 = vst [vmem:[#allocation50_spill] sm:$0xff] %v15772_v29 }
 0x3c4   :  { %v1504_v44 = vpop.f32.mrf.mxu0  ;;  %v1736_v58 = vpop.f32.mrf.mxu1 }
 0x3c5   :  { %v1607_v7 = vadd.f32 %v1504_v44, %v18162_v46  ;;  %v1845_v27 = vadd.f32 %v1736_v58, %v1603_v41  ;;  %v1992_v56 = vpop.f32.mrf.mxu2  ;;  %v2246_v20 = vpop.f32.mrf.mxu3 }
 0x3c7   :  { %v2099_v50 = vadd.f32 %v1990_v14, %v1845_v27  ;;  %11105 = vmatmul.msk.bf16.gmra.mxu0 %vm317_vm1, %v18150_v36  ;;  %11135 = vmatmul.msk.bf16.gmra.mxu1 %vm317_vm1, %v15259_v25 }
 0x3c9   :  { %v15787_v41 = vadd.f32 %v2244_v40, %v2099_v50  ;;  %11168 = vmatmul.msk.bf16.gmra.mxu2 %vm317_vm1, %v18164_v5  ;;  %11200 = vmatmul.msk.bf16.gmra.mxu3 %vm317_vm1, %v15785_v52  ;;  %v15799_v50 = vld [vmem:[%s17827_s0 + $0x2c0] sm:$0xff] }
 0x3ca   :  { %v18166_v40 = vld [vmem:[#allocation83_spill] sm:$0xff] }
 0x3cb   :  { %18163 = vst [vmem:[#allocation53_spill] sm:$0xff] %v15787_v41 }
 0x3cc   :  { %v1506_v36 = vpop.f32.mrf.mxu0  ;;  %v1738_v32 = vpop.f32.mrf.mxu1 }
 0x3cd   :  { %v1608_v3 = vadd.f32 %v1506_v36, %v18165_v37  ;;  %v1846_v14 = vadd.f32 %v1738_v32, %v1604_v57  ;;  %v1995_v9 = vpop.f32.mrf.mxu2  ;;  %v2249_v44 = vpop.f32.mrf.mxu3  ;;  %v14223_v57 = vld [vmem:[%s17827_s0 + $0x2b8] sm:$0xff] }
 0x3cf   :  { %v2100_v58 = vadd.f32 %v1992_v56, %v1846_v14 }
 0x3d1   :  { %v15794_v46 = vadd.f32 %v2246_v20, %v2100_v58  ;;  %v15810_v20 = vpack.c.bf16 %v15799_v50, %v14223_v57 }
 0x3d4   :  { %v1509_v27 = vpop.f32.mrf.mxu0  ;;  %v1741_v12 = vpop.f32.mrf.mxu1 }
 0x3d5   :  { %v1609_v59 = vadd.f32 %v1509_v27, %v18166_v40  ;;  %v1847_v41 = vadd.f32 %v1741_v12, %v1605_v22  ;;  %v1997_v29 = vpop.f32.mrf.mxu2  ;;  %v2251_v25 = vpop.f32.mrf.mxu3  ;;  %v13613_v12 = vld [vmem:[#allocation7 + $0x38] sm:$0xff] }
 0x3d6   :  { %v241_v40 = vld [vmem:[%s17827_s0 + $0x2d8] sm:$0xff]  ;;  %3384 = vmatpush.bf16.msra.mxu2 %v13613_v12 }
 0x3d7   :  { %v2101_v36 = vadd.f32 %v1995_v9, %v1847_v41  ;;  %11106 = vmatmul.msk.bf16.gmra.mxu0 %vm317_vm1, %v15741_v47  ;;  %11136 = vmatmul.msk.bf16.gmra.mxu1 %vm317_vm1, %v15289_v48  ;;  %v18168_v41 = vld [vmem:[#allocation84_spill] sm:$0xff] }
 0x3d9   :  { %v15812_v56 = vadd.f32 %v2249_v44, %v2101_v36  ;;  %11169 = vmatmul.msk.bf16.gmra.mxu2 %vm317_vm1, %v15395_v21  ;;  %11201 = vmatmul.msk.bf16.gmra.mxu3 %vm317_vm1, %v15810_v20  ;;  %v240_v44 = vld [vmem:[%s17827_s0 + $0x2d0] sm:$0xff] }
 0x3db   :  { %18167 = vst [vmem:[#allocation60_spill] sm:$0xff] %v15812_v56 }
 0x3dc   :  { %v1511_v47 = vpop.f32.mrf.mxu0  ;;  %v1743_v22 = vpop.f32.mrf.mxu1 }
 0x3dd   :  { %v1610_v32 = vadd.f32 %v1511_v47, %v18168_v41  ;;  %v1848_v37 = vadd.f32 %v1743_v22, %v1606_v43  ;;  %v2000_v14 = vpop.f32.mrf.mxu2  ;;  %v2254_v9 = vpop.f32.mrf.mxu3  ;;  %v242_v43 = vld [vmem:[%s17827_s0 + $0x2e0] sm:$0xff]  ;;  %v1875_v41 = vpack.c.bf16 %v241_v40, %v240_v44 }
 0x3de   :  { %v2129_v12 = vpack.c.bf16 %v242_v43, %v241_v40 }
 0x3df   :  { %v2102_v58 = vadd.f32 %v1997_v29, %v1848_v37 }
 0x3e1   :  { %v15819_v27 = vadd.f32 %v2251_v25, %v2102_v58  ;;  %v18170_v25 = vld [vmem:[#allocation86_spill] sm:$0xff] }
 0x3e3   :  { %18169 = vst [vmem:[#allocation73_spill] sm:$0xff] %v15819_v27 }
 0x3e4   :  { %v1514_v36 = vpop.f32.mrf.mxu0  ;;  %v1746_v57 = vpop.f32.mrf.mxu1 }
 0x3e5   :  { %v1611_v29 = vadd.f32 %v1514_v36, %v18170_v25  ;;  %v1849_v47 = vadd.f32 %v1746_v57, %v1607_v7  ;;  %v2002_v22 = vpop.f32.mrf.mxu2  ;;  %v2256_v37 = vpop.f32.mrf.mxu3  ;;  %v18172_v7 = vld [vmem:[#allocation87_spill] sm:$0xff] }
 0x3e7   :  { %v2103_v58 = vadd.f32 %v2000_v14, %v1849_v47  ;;  %11107 = vmatmul.msk.bf16.gmra.mxu0 %vm317_vm1, %v15763_v63  ;;  %11137 = vmatmul.msk.bf16.gmra.mxu1 %vm317_vm1, %v15389_v30  ;;  %v243_v63 = vld [vmem:[%s17827_s0 + $0x2e8] sm:$0xff] }
 0x3e9   :  { %v15835_v6 = vadd.f32 %v2254_v9, %v2103_v58  ;;  %11170 = vmatmul.msk.bf16.gmra.mxu2 %vm317_vm1, %v1875_v41  ;;  %11202 = vmatmul.msk.bf16.gmra.mxu3 %vm317_vm1, %v2129_v12  ;;  %v244_v41 = vld [vmem:[%s17827_s0 + $0x2f0] sm:$0xff]  ;;  %v18173_v58 = vld [vmem:[#allocation88_spill] sm:$0xff] }
 0x3eb   :  { %18171 = vst [vmem:[#allocation54_spill] sm:$0xff] %v15835_v6 }
 0x3ec   :  { %v1516_v27 = vpop.f32.mrf.mxu0  ;;  %v1748_v36 = vpop.f32.mrf.mxu1 }
 0x3ed   :  { %v1612_v57 = vadd.f32 %v1516_v27, %v18172_v7  ;;  %v1850_v44 = vadd.f32 %v1748_v36, %v1608_v3  ;;  %v2005_v25 = vpop.f32.mrf.mxu2  ;;  %v2259_v14 = vpop.f32.mrf.mxu3  ;;  %v15849_v3 = vpack.c.bf16 %v243_v63, %v242_v43 }
 0x3ef   :  { %v2104_v47 = vadd.f32 %v2002_v22, %v1850_v44 }
 0x3f1   :  { %v15840_v56 = vadd.f32 %v2256_v37, %v2104_v47  ;;  %v2130_v37 = vpack.c.bf16 %v244_v41, %v243_v63 }
 0x3f4   :  { %v1519_v9 = vpop.f32.mrf.mxu0  ;;  %v1751_v40 = vpop.f32.mrf.mxu1 }
 0x3f5   :  { %v1613_v12 = vadd.f32 %v1519_v9, %v18173_v58  ;;  %v1851_v6 = vadd.f32 %v1751_v40, %v1609_v59  ;;  %v2007_v27 = vpop.f32.mrf.mxu2  ;;  %v2261_v36 = vpop.f32.mrf.mxu3  ;;  %v246_v58 = vld [vmem:[%s17827_s0 + $0x300] sm:$0xff] }
 0x3f7   :  { %v2105_v22 = vadd.f32 %v2005_v25, %v1851_v6  ;;  %11108 = vmatmul.msk.bf16.gmra.mxu0 %vm317_vm1, %v15785_v52  ;;  %11138 = vmatmul.msk.bf16.gmra.mxu1 %vm317_vm1, %v15343_v33 }
 0x3f9   :  { %v15855_v7 = vadd.f32 %v2259_v14, %v2105_v22  ;;  %11171 = vmatmul.msk.bf16.gmra.mxu2 %vm317_vm1, %v15849_v3  ;;  %11203 = vmatmul.msk.bf16.gmra.mxu3 %vm317_vm1, %v2130_v37  ;;  %v245_v14 = vld [vmem:[%s17827_s0 + $0x2f8] sm:$0xff] }
 0x3fc   :  { %v1521_v59 = vpop.f32.mrf.mxu0  ;;  %v1753_v44 = vpop.f32.mrf.mxu1 }
 0x3fd   :  { %v1614_v43 = vadd.f32 %v1521_v59, %v15403_v24  ;;  %v1852_v47 = vadd.f32 %v1753_v44, %v1610_v32  ;;  %v2010_v6 = vpop.f32.mrf.mxu2  ;;  %v2264_v25 = vpop.f32.mrf.mxu3  ;;  %v15870_v32 = vpack.c.bf16 %v245_v14, %v244_v41 }
 0x3ff   :  { %v2106_v9 = vadd.f32 %v2007_v27, %v1852_v47 }
 0x401   :  { %v15861_v52 = vadd.f32 %v2261_v36, %v2106_v9  ;;  %v2131_v36 = vpack.c.bf16 %v246_v58, %v245_v14 }
 0x404   :  { %v1524_v63 = vpop.f32.mrf.mxu0  ;;  %v1756_v40 = vpop.f32.mrf.mxu1 }
 0x405   :  { %v1615_v22 = vadd.f32 %v1524_v63, %v15409_v51  ;;  %v1853_v37 = vadd.f32 %v1756_v40, %v1611_v29  ;;  %v2012_v24 = vpop.f32.mrf.mxu2  ;;  %v2266_v59 = vpop.f32.mrf.mxu3 }
 0x407   :  { %v2107_v27 = vadd.f32 %v2010_v6, %v1853_v37  ;;  %11109 = vmatmul.msk.bf16.gmra.mxu0 %vm317_vm1, %v15810_v20  ;;  %11139 = vmatmul.msk.bf16.gmra.mxu1 %vm317_vm1, %v18164_v5  ;;  %v248_v37 = vld [vmem:[%s17827_s0 + $0x310] sm:$0xff] }
 0x409   :  { %v15876_v44 = vadd.f32 %v2264_v25, %v2107_v27  ;;  %11172 = vmatmul.msk.bf16.gmra.mxu2 %vm317_vm1, %v15870_v32  ;;  %11204 = vmatmul.msk.bf16.gmra.mxu3 %vm317_vm1, %v2131_v36  ;;  %v247_v25 = vld [vmem:[%s17827_s0 + $0x308] sm:$0xff] }
 0x40a   :  { %v15895_v36 = vpack.c.bf16 %v247_v25, %v246_v58 }
 0x40c   :  { %v1526_v51 = vpop.f32.mrf.mxu0  ;;  %v1758_v29 = vpop.f32.mrf.mxu1 }
 0x40d   :  { %v15882_v41 = vadd.f32 %v1526_v51, %v15415_v0  ;;  %v1854_v47 = vadd.f32 %v1758_v29, %v1612_v57  ;;  %v2015_v6 = vpop.f32.mrf.mxu2  ;;  %v2269_v9 = vpop.f32.mrf.mxu3  ;;  %v2132_v29 = vpack.c.bf16 %v248_v37, %v247_v25  ;;  %v13611_v25 = vld [vmem:[#allocation7 + $0x28] sm:$0xff] }
 0x40e   :  { %v239_v37 = vld [vmem:[%s17827_s0 + $0x2c8] sm:$0xff] }
 0x40f   :  { %v2108_v20 = vadd.f32 %v2012_v24, %v1854_v47  ;;  %v13616_v24 = vld [vmem:[#allocation7 + $0x50] sm:$0xff] }
 0x410   :  { %3172 = vmatpush.bf16.msrb.mxu1 %v13616_v24 }
 0x411   :  { %v15884_v63 = vadd.f32 %v2266_v59, %v2108_v20 }
 0x414   :  { %v1529_v14 = vpop.f32.mrf.mxu0  ;;  %v1761_v40 = vpop.f32.mrf.mxu1 }
 0x415   :  { %v15893_v27 = vadd.f32 %v1529_v14, %v15421_v45  ;;  %v1855_v0 = vadd.f32 %v1761_v40, %v1613_v12  ;;  %v2017_v57 = vpop.f32.mrf.mxu2  ;;  %v2271_v59 = vpop.f32.mrf.mxu3  ;;  %v13612_v45 = vld [vmem:[#allocation7 + $0x30] sm:$0xff] }
 0x416   :  { %3385 = vmatpush.bf16.msra.mxu2 %v13612_v45  ;;  %v13626_v45 = vld [vmem:[#allocation7 + $0xa0] sm:$0xff] }
 0x417   :  { %v2109_v51 = vadd.f32 %v2015_v6, %v1855_v0  ;;  %11140 = vmatmul.msk.bf16.gmra.mxu1 %vm317_vm1, %v15395_v21  ;;  %11206 = vmatmul.msk.bf16.vlgmr.msra.gmra.mxu0 %vm317_vm1, %v14637_v49  ;;  %v13628_v6 = vld [vmem:[#allocation7 + $0xb0] sm:$0xff]  ;;  %v13627_v0 = vld [vmem:[#allocation7 + $0xa8] sm:$0xff] }
 0x418   :  { %3627 = vmatpush.bf16.msra.mxu3 %v13628_v6 }
 0x419   :  { %v15901_v47 = vadd.f32 %v2269_v9, %v2109_v51  ;;  %11173 = vmatmul.msk.bf16.gmra.mxu2 %vm317_vm1, %v15895_v36  ;;  %11205 = vmatmul.msk.bf16.gmra.mxu3 %vm317_vm1, %v2132_v29  ;;  %v13610_v51 = vld [vmem:[#allocation7 + $0x20] sm:$0xff]  ;;  %v15915_v29 = vpack.c.bf16 %v239_v37, %v15799_v50  ;;  %v13625_v50 = vld [vmem:[#allocation7 + $0x98] sm:$0xff] }
 0x41a   :  { %3386 = vmatpush.bf16.msra.mxu2 %v13611_v25 }
 0x41c   :  { %v1531_v12 = vpop.f32.mrf.mxu0  ;;  %v1763_v58 = vpop.f32.mrf.mxu1  ;;  %3628 = vmatpush.bf16.msra.mxu3 %v13627_v0 }
 0x41d   :  { %v15907_v20 = vadd.f32 %v1531_v12, %v15427_v35  ;;  %v1856_v14 = vadd.f32 %v1763_v58, %v1614_v43  ;;  %v2020_v40 = vpop.f32.mrf.mxu2  ;;  %v2274_v49 = vpop.f32.mrf.mxu3 }
 0x41e   :  { %3387 = vmatpush.bf16.msra.mxu2 %v13610_v51 }
 0x41f   :  { %v2110_v9 = vadd.f32 %v2017_v57, %v1856_v14  ;;  %v13609_v14 = vld [vmem:[#allocation7 + $0x18] sm:$0xff] }
 0x420   :  { %3629 = vmatpush.bf16.msra.mxu3 %v13626_v45  ;;  %v13623_v45 = vld [vmem:[#allocation7 + $0x88] sm:$0xff] }
 0x421   :  { %v15912_v24 = vadd.f32 %v2271_v59, %v2110_v9  ;;  %v13608_v9 = vld [vmem:[#allocation7 + $0x10] sm:$0xff] }
 0x422   :  { %3388 = vmatpush.bf16.msra.mxu2 %v13609_v14 }
 0x424   :  { %v1534_v35 = vpop.f32.mrf.mxu0  ;;  %v1766_v43 = vpop.f32.mrf.mxu1  ;;  %3630 = vmatpush.bf16.msra.mxu3 %v13625_v50  ;;  %v13615_v50 = vld [vmem:[#allocation7 + $0x48] sm:$0xff] }
 0x425   :  { %v1619_v12 = vadd.f32 %v1534_v35, %v15433_v8  ;;  %v1857_v57 = vadd.f32 %v1766_v43, %v1615_v22  ;;  %v2022_v58 = vpop.f32.mrf.mxu2  ;;  %v2276_v6 = vpop.f32.mrf.mxu3  ;;  %v13624_v22 = vld [vmem:[#allocation7 + $0x90] sm:$0xff]  ;;  %v13607_v43 = vld [vmem:[#allocation7 + $0x8] sm:$0xff]  ;;  %3173 = vmatpush.bf16.msrb.mxu1 %v13615_v50 }
 0x426   :  { %3389 = vmatpush.bf16.msra.mxu2 %v13608_v9  ;;  %v13622_v9 = vld [vmem:[#allocation7 + $0x80] sm:$0xff] }
 0x427   :  { %v2111_v25 = vadd.f32 %v2020_v40, %v1857_v57  ;;  %11141 = vmatmul.msk.bf16.gmra.mxu1 %vm317_vm1, %v15915_v29  ;;  %11207 = vmatmul.msk.bf16.gmra.mxu0 %vm317_vm1, %v14655_v53  ;;  %v13606_v57 = vld [vmem:[#allocation7] sm:$0xff] }
 0x428   :  { %3631 = vmatpush.bf16.msra.mxu3 %v13624_v22  ;;  %v13614_v22 = vld [vmem:[#allocation7 + $0x40] sm:$0xff] }
 0x429   :  { %v15922_v59 = vadd.f32 %v2274_v49, %v2111_v25  ;;  %3174 = vmatpush.bf16.msrb.mxu1 %v13614_v22 }
 0x42a   :  { %3390 = vmatpush.bf16.msra.mxu2 %v13607_v43 }
 0x42c   :  { %v1536_v37 = vpop.f32.mrf.mxu0  ;;  %v1768_v8 = vpop.f32.mrf.mxu1  ;;  %3632 = vmatpush.bf16.msra.mxu3 %v13623_v45 }
 0x42d   :  { %v15925_v0 = vadd.f32 %v1536_v37, %v15439_v26  ;;  %v1858_v40 = vadd.f32 %v1768_v8, %v15882_v41  ;;  %v2025_v51 = vpop.f32.mrf.mxu2  ;;  %v2279_v35 = vpop.f32.mrf.mxu3 }
 0x42e   :  { %3391 = vmatpush.bf16.msra.mxu2 %v13606_v57 }
 0x42f   :  { %v2112_v53 = vadd.f32 %v2022_v58, %v1858_v40 }
 0x430   :  { %3633 = vmatpush.bf16.msra.mxu3 %v13622_v9 }
 0x431   :  { %v15928_v49 = vadd.f32 %v2276_v6, %v2112_v53  ;;  %v17893_v6 = vmov 0.0|0.0  }
 0x432   :  { %3392 = vmatmul.bf16.vlgmr.msra.gmra.mxu2 %v17893_v6 }
 0x433   :  { %3634 = vmatmul.bf16.vlgmr.msra.gmra.mxu3 %v17893_v6 }
 0x434   :  { %v1539_v14 = vpop.f32.mrf.mxu0  ;;  %v1771_v25 = vpop.f32.mrf.mxu1 }
 0x435   :  { %v1621_v26 = vadd.f32 %v1539_v14, %v15445_v16  ;;  %v1859_v41 = vadd.f32 %v1771_v25, %v15893_v27  ;;  %v15932_v37 = vpop.f32.mrf.mxu2  ;;  %v15934_v8 = vpop.f32.mrf.mxu3 }
 0x437   :  { %v2113_v58 = vadd.f32 %v2025_v51, %v1859_v41  ;;  %11208 = vmatmul.msk.bf16.gmra.mxu0 %vm317_vm1, %v14684_v60  ;;  %3175 = vmatmul.bf16.vlgmr.msrb.gmra.mxu1 %v17893_v6 }
 0x439   :  { %v15939_v40 = vadd.f32 %v2279_v35, %v2113_v58 }
 0x43c   :  { %v1541_v16 = vpop.f32.mrf.mxu0  ;;  %v15942_v27 = vpop.f32.mrf.mxu1 }
 0x43d   :  { %v15945_v43 = vadd.f32 %v1541_v16, %v15451_v62  ;;  %v2030_v53 = vpop.f32.mrf.mxu2  ;;  %v2284_v51 = vpop.f32.mrf.mxu3 }
 0x442   :  { %3397 = vmatmul.bf16.gmra.mxu2 %v17893_v6 }
 0x443   :  { %3639 = vmatmul.bf16.gmra.mxu3 %v17893_v6 }
 0x444   :  { %v1544_v60 = vpop.f32.mrf.mxu0  ;;  %v1776_v45 = vpop.f32.mrf.mxu1 }
 0x445   :  { %v1623_v57 = vadd.f32 %v1544_v60, %v15457_v42  ;;  %v1861_v14 = vadd.f32 %v1776_v45, %v1619_v12  ;;  %v15949_v35 = vpop.f32.mrf.mxu2  ;;  %v15951_v25 = vpop.f32.mrf.mxu3 }
 0x447   :  { %v2115_v50 = vadd.f32 %v2030_v53, %v1861_v14  ;;  %11209 = vmatmul.msk.bf16.gmra.mxu0 %vm317_vm1, %v14791_v11  ;;  %3180 = vmatmul.bf16.gmra.mxu1 %v17893_v6 }
 0x449   :  { %v15956_v62 = vadd.f32 %v2284_v51, %v2115_v50 }
 0x44c   :  { %v1546_v9 = vpop.f32.mrf.mxu0  ;;  %v15959_v41 = vpop.f32.mrf.mxu1 }
 0x44d   :  { %v15962_v42 = vadd.f32 %v1546_v9, %v15463_v54  ;;  %v2035_v12 = vpop.f32.mrf.mxu2  ;;  %v2289_v58 = vpop.f32.mrf.mxu3  ;;  %v18177_v9 = vld [vmem:[#allocation89_spill] sm:$0xff] }
 0x44f   :  { %18174 = vst [vmem:[#allocation57_spill] sm:$0xff] %v15962_v42 }
 0x452   :  { %3402 = vmatmul.bf16.gmra.mxu2 %v17893_v6 }
 0x453   :  { %3644 = vmatmul.bf16.gmra.mxu3 %v17893_v6 }
 0x454   :  { %v1549_v22 = vpop.f32.mrf.mxu0  ;;  %v1781_v16 = vpop.f32.mrf.mxu1 }
 0x455   :  { %v1625_v11 = vadd.f32 %v1549_v22, %v15469_v4  ;;  %v1863_v53 = vadd.f32 %v1781_v16, %v1621_v26  ;;  %v15966_v60 = vpop.f32.mrf.mxu2  ;;  %v15968_v51 = vpop.f32.mrf.mxu3 }
 0x456   :  { %18175 = vst [vmem:[#allocation77_spill] sm:$0xff] %v15966_v60 }
 0x457   :  { %18176 = vst [vmem:[#allocation58_spill] sm:$0xff] %v15968_v51  ;;  %v2117_v45 = vadd.f32 %v2035_v12, %v1863_v53  ;;  %11210 = vmatmul.msk.bf16.gmra.mxu0 %vm317_vm1, %v14730_v18  ;;  %3185 = vmatmul.bf16.gmra.mxu1 %v17893_v6  ;;  %v18179_v53 = vld [vmem:[#allocation90_spill] sm:$0xff] }
 0x459   :  { %v15973_v54 = vadd.f32 %v2289_v58, %v2117_v45 }
 0x45c   :  { %v1551_v14 = vpop.f32.mrf.mxu0  ;;  %v15976_v50 = vpop.f32.mrf.mxu1 }
 0x45d   :  { %v15979_v4 = vadd.f32 %v1551_v14, %v18177_v9  ;;  %v2040_v26 = vpop.f32.mrf.mxu2  ;;  %v2294_v22 = vpop.f32.mrf.mxu3 }
 0x45f   :  { %18178 = vst [vmem:[#allocation61_spill] sm:$0xff] %v15979_v4 }
 0x462   :  { %3407 = vmatmul.bf16.gmra.mxu2 %v17893_v6 }
 0x463   :  { %3649 = vmatmul.bf16.gmra.mxu3 %v17893_v6 }
 0x464   :  { %v1554_v12 = vpop.f32.mrf.mxu0  ;;  %v1786_v16 = vpop.f32.mrf.mxu1 }
 0x465   :  { %v1627_v18 = vadd.f32 %v1554_v12, %v18179_v53  ;;  %v1865_v42 = vadd.f32 %v1786_v16, %v1623_v57  ;;  %v15983_v51 = vpop.f32.mrf.mxu2  ;;  %v15985_v58 = vpop.f32.mrf.mxu3 }
 0x466   :  { %18180 = vst [vmem:[#allocation64_spill] sm:$0xff] %v15983_v51 }
 0x467   :  { %18181 = vst [vmem:[#allocation62_spill] sm:$0xff] %v15985_v58  ;;  %v2119_v45 = vadd.f32 %v2040_v26, %v1865_v42  ;;  %11211 = vmatmul.msk.bf16.gmra.mxu0 %vm317_vm1, %v14762_v39  ;;  %3190 = vmatmul.bf16.gmra.mxu1 %v17893_v6 }
 0x469   :  { %v15990_v14 = vadd.f32 %v2294_v22, %v2119_v45 }
 0x46b   :  { %18182 = vst [vmem:[#allocation65_spill] sm:$0xff] %v15990_v14 }
 0x46c   :  { %v1556_v9 = vpop.f32.mrf.mxu0  ;;  %v15993_v4 = vpop.f32.mrf.mxu1 }
 0x46d   :  { %18183 = vst [vmem:[#allocation66_spill] sm:$0xff] %v15993_v4  ;;  %v15996_v12 = vadd.f32 %v1556_v9, %v15488_v34  ;;  %v2045_v57 = vpop.f32.mrf.mxu2  ;;  %v2299_v16 = vpop.f32.mrf.mxu3 }
 0x46f   :  { %18184 = vst [vmem:[#allocation68_spill] sm:$0xff] %v15996_v12 }
 0x474   :  { %v1559_v42 = vpop.f32.mrf.mxu0  ;;  %v1791_v26 = vpop.f32.mrf.mxu1 }
 0x475   :  { %v1629_v39 = vadd.f32 %v1559_v42, %v15495_v38  ;;  %v1867_v53 = vadd.f32 %v1791_v26, %v1625_v11  ;;  %v16000_v58 = vpop.f32.mrf.mxu2  ;;  %v16002_v22 = vpop.f32.mrf.mxu3  ;;  %v18190_v42 = vld [vmem:[#allocation91_spill] sm:$0xff] }
 0x476   :  { %18185 = vst [vmem:[#allocation69_spill] sm:$0xff] %v16000_v58 }
 0x477   :  { %18186 = vst [vmem:[#allocation71_spill] sm:$0xff] %v16002_v22  ;;  %v2121_v45 = vadd.f32 %v2045_v57, %v1867_v53  ;;  %11212 = vmatmul.msk.bf16.gmra.mxu0 %vm317_vm1, %v14800_v17  ;;  %v18192_v53 = vld [vmem:[#allocation31_spill] sm:$0xff] }
 0x479   :  { %v16006_v51 = vadd.f32 %v2299_v16, %v2121_v45 }
 0x47b   :  { %18187 = vst [vmem:[#allocation21_spill] sm:$0xff] %v16006_v51 }
 0x47c   :  { %v1561_v34 = vpop.f32.mrf.mxu0  ;;  %v16008_v9 = vpop.f32.mrf.mxu1 }
 0x47d   :  { %18188 = vst [vmem:[#allocation72_spill] sm:$0xff] %v16008_v9  ;;  %v16011_v6 = vadd.f32 %v1561_v34, %v15502_v31  ;;  %v2050_v12 = vpop.f32.mrf.mxu2  ;;  %v2304_v14 = vpop.f32.mrf.mxu3  ;;  %v18196_v34 = vld [vmem:[#allocation92_spill] sm:$0xff] }
 0x47f   :  { %18189 = vst [vmem:[#allocation75_spill] sm:$0xff] %v16011_v6 }
 0x484   :  { %v1564_v38 = vpop.f32.mrf.mxu0  ;;  %v1796_v11 = vpop.f32.mrf.mxu1 }
 0x485   :  { %v1631_v26 = vadd.f32 %v1564_v38, %v18190_v42  ;;  %v1869_v58 = vadd.f32 %v1796_v11, %v1627_v18  ;;  %v16014_v22 = vpop.f32.mrf.mxu2  ;;  %v16018_v17 = vpop.f32.mrf.mxu3  ;;  %v16027_v38 = vld [vmem:[#allocation5] ss:$0 sm:$0xff] }
 0x486   :  { %18191 = vst [vmem:[#allocation78_spill] sm:$0xff] %v16014_v22 }
 0x487   :  { %v2123_v57 = vadd.f32 %v2050_v12, %v1869_v58  ;;  %11213 = vmatmul.msk.bf16.gmra.mxu0 %vm317_vm1, %v18192_v53  ;;  %18193 = vst [vmem:[#allocation76_spill] sm:$0xff] %v16018_v17  ;;  %v18198_v12 = vld [vmem:[#allocation93_spill] sm:$0xff] }
 0x489   :  { %v16020_v16 = vadd.f32 %v2304_v14, %v2123_v57  ;;  %v18199_v14 = vld [vmem:[#allocation25_spill] sm:$0xff] }
 0x48b   :  { %18194 = vst [vmem:[#allocation79_spill] sm:$0xff] %v16020_v16 }
 0x48c   :  { %v1566_v45 = vpop.f32.mrf.mxu0  ;;  %v16022_v31 = vpop.f32.mrf.mxu1 }
 0x48d   :  { %18195 = vst [vmem:[#allocation80_spill] sm:$0xff] %v16022_v31  ;;  %v16025_v6 = vadd.f32 %v1566_v45, %v18196_v34  ;;  %v2055_v51 = vpop.f32.mrf.mxu2  ;;  %v2309_v9 = vpop.f32.mrf.mxu3  ;;  %v17895_v34 = vmov 0.0   ;;  %v18209_v31 = vld [vmem:[#allocation23_spill] sm:$0xff] }
 0x48f   :  { %18197 = vst [vmem:[#allocation81_spill] sm:$0xff] %v16025_v6 }
 0x494   :  { %v1801_v18 = vpop.f32.mrf.mxu1  ;;  %v2401_v11 = vpop.f32.mrf.mxu0 }
 0x495   :  { %v1871_v58 = vadd.f32 %v1801_v18, %v1629_v39  ;;  %v2561_v42 = vadd.f32 %v2401_v11, %v18198_v12  ;;  %v16035_v45 = vpop.f32.mrf.mxu2  ;;  %v16040_v16 = vpop.f32.mrf.mxu3  ;;  %v18204_v11 = vld [vmem:[#allocation38_spill] sm:$0xff] }
 0x496   :  { %18201 = vst [vmem:[#allocation82_spill] sm:$0xff] %v16035_v45 }
 0x497   :  { %v2629_v53 = vadd.f32 %v16027_v38, %v2561_v42  ;;  %v2125_v17 = vadd.f32 %v2055_v51, %v1871_v58  ;;  %11214 = vmatmul.msk.bf16.gmra.mxu0 %vm317_vm1, %v18199_v14  ;;  %18202 = vst [vmem:[#allocation83_spill] sm:$0xff] %v16040_v16 }
 0x499   :  { %v2693_v57 = vmax.f32 %v2629_v53, 0.0  ;;  %v16033_v22 = vadd.f32 %v2309_v9, %v2125_v17 }
 0x49b   :  { %18200 = vst [vmem:[#allocation85_spill] sm:$0xff] %v16033_v22  ;;  %v16038_v6 = vpack.c.bf16 %v2693_v57, %v17895_v34  ;;  %v18206_v34 = vld [vmem:[#allocation22_spill] sm:$0xff] }
 0x49c   :  { %v16042_v39 = vpop.f32.mrf.mxu1  ;;  %v2403_v18 = vpop.f32.mrf.mxu0 }
 0x49d   :  { %18203 = vst [vmem:[#allocation84_spill] sm:$0xff] %v16042_v39  ;;  %v2562_v12 = vadd.f32 %v2403_v18, %v18204_v11  ;;  %3412 = vmatmul.bf16.gmra.mxu2 %v16038_v6  ;;  %v2060_v17 = vpop.f32.mrf.mxu2  ;;  %v2314_v16 = vpop.f32.mrf.mxu3  ;;  %v18207_v18 = vld [vmem:[#allocation28_spill] sm:$0xff] }
 0x49f   :  { %v2630_v51 = vadd.f32 %v16027_v38, %v2562_v12 }
 0x4a1   :  { %v2694_v58 = vmax.f32 %v2630_v51, 0.0 }
 0x4a3   :  { %v16047_v9 = vpack.c.bf16 %v2694_v58, %v2693_v57 }
 0x4a4   :  { %v1806_v42 = vpop.f32.mrf.mxu1  ;;  %v2406_v53 = vpop.f32.mrf.mxu0 }
 0x4a5   :  { %18205 = vst [vmem:[#allocation86_spill] sm:$0xff] %v16047_v9  ;;  %v1873_v14 = vadd.f32 %v1806_v42, %v1631_v26  ;;  %v2563_v45 = vadd.f32 %v2406_v53, %v18206_v34  ;;  %3195 = vmatmul.bf16.gmra.mxu1 %v16047_v9  ;;  %v18215_v53 = vld [vmem:[#allocation32_spill] sm:$0xff] }
 0x4a7   :  { %v2631_v22 = vadd.f32 %v16027_v38, %v2563_v45  ;;  %v2127_v39 = vadd.f32 %v2060_v17, %v1873_v14  ;;  %11215 = vmatmul.msk.bf16.gmra.mxu0 %vm317_vm1, %v18207_v18  ;;  %v16064_v17 = vpop.f32.mrf.mxu2 }
 0x4a8   :  { %18211 = vst [vmem:[#allocation89_spill] sm:$0xff] %v16064_v17 }
 0x4a9   :  { %v2695_v11 = vmax.f32 %v2631_v22, 0.0  ;;  %v16054_v12 = vadd.f32 %v2314_v16, %v2127_v39  ;;  %v16068_v22 = vpop.f32.mrf.mxu3  ;;  %v18214_v39 = vld [vmem:[#allocation42_spill] sm:$0xff] }
 0x4aa   :  { %18213 = vst [vmem:[#allocation91_spill] sm:$0xff] %v16068_v22 }
 0x4ab   :  { %18208 = vst [vmem:[#allocation87_spill] sm:$0xff] %v16054_v12  ;;  %v16056_v57 = vpack.c.bf16 %v2695_v11, %v2694_v58  ;;  %v18217_v12 = vld [vmem:[#allocation24_spill] sm:$0xff] }
 0x4ac   :  { %v2408_v51 = vpop.f32.mrf.mxu0  ;;  %v16062_v45 = vpop.f32.mrf.mxu1 }
 0x4ad   :  { %v2564_v4 = vadd.f32 %v2408_v51, %v18209_v31  ;;  %3417 = vmatmul.bf16.gmra.mxu2 %v16056_v57  ;;  %3654 = vmatmul.bf16.gmra.mxu3 %v16056_v57  ;;  %18210 = vst [vmem:[#allocation88_spill] sm:$0xff] %v16062_v45  ;;  %v18223_v45 = vld [vmem:[#allocation26_spill] sm:$0xff] }
 0x4af   :  { %v2632_v26 = vadd.f32 %v16027_v38, %v2564_v4 }
 0x4b1   :  { %v2696_v34 = vmax.f32 %v2632_v26, 0.0 }
 0x4b3   :  { %v16066_v42 = vpack.c.bf16 %v2696_v34, %v2695_v11 }
 0x4b4   :  { %v2411_v16 = vpop.f32.mrf.mxu0  ;;  %v3176_v14 = vpop.f32.mrf.mxu1 }
 0x4b5   :  { %18212 = vst [vmem:[#allocation90_spill] sm:$0xff] %v16066_v42  ;;  %v2565_v58 = vadd.f32 %v2411_v16, %v18214_v39  ;;  %3200 = vmatmul.bf16.gmra.mxu1 %v16066_v42  ;;  %v3393_v18 = vpop.f32.mrf.mxu2  ;;  %v18224_v42 = vld [vmem:[#allocation47_spill] sm:$0xff] }
 0x4b6   :  { %v3394_v26 = vadd.f32 %v3393_v18, %v3176_v14  ;;  %v3635_v17 = vpop.f32.mrf.mxu3 }
 0x4b7   :  { %v2633_v31 = vadd.f32 %v16027_v38, %v2565_v58  ;;  %11216 = vmatmul.msk.bf16.gmra.mxu0 %vm317_vm1, %v18215_v53 }
 0x4b8   :  { %v16081_v58 = vadd.f32 %v3635_v17, %v3394_v26 }
 0x4b9   :  { %v2697_v4 = vmax.f32 %v2633_v31, 0.0 }
 0x4ba   :  { %18218 = vst [vmem:[#allocation92_spill] sm:$0xff] %v16081_v58  ;;  %v18226_v58 = vld [vmem:[#allocation46_spill] sm:$0xff] }
 0x4bb   :  { %v16075_v51 = vpack.c.bf16 %v2697_v4, %v2696_v34 }
 0x4bc   :  { %v2413_v11 = vpop.f32.mrf.mxu0  ;;  %v16083_v53 = vpop.f32.mrf.mxu1 }
 0x4bd   :  { %18216 = vst [vmem:[#allocation31_spill] sm:$0xff] %v16075_v51  ;;  %v2566_v22 = vadd.f32 %v2413_v11, %v18217_v12  ;;  %3422 = vmatmul.bf16.gmra.mxu2 %v16075_v51  ;;  %3659 = vmatmul.bf16.gmra.mxu3 %v16075_v51  ;;  %v16085_v31 = vpop.f32.mrf.mxu2 }
 0x4be   :  { %18219 = vst [vmem:[#allocation93_spill] sm:$0xff] %v16083_v53  ;;  %v16089_v18 = vpop.f32.mrf.mxu3 }
 0x4bf   :  { %v2634_v16 = vadd.f32 %v16027_v38, %v2566_v22  ;;  %18220 = vst [vmem:[#allocation25_spill] sm:$0xff] %v16085_v31 }
 0x4c0   :  { %18222 = vst [vmem:[#allocation22_spill] sm:$0xff] %v16089_v18 }
 0x4c1   :  { %v2698_v39 = vmax.f32 %v2634_v16, 0.0 }
 0x4c3   :  { %v16087_v34 = vpack.c.bf16 %v2698_v39, %v2697_v4 }
 0x4c4   :  { %v2416_v14 = vpop.f32.mrf.mxu0  ;;  %v3181_v22 = vpop.f32.mrf.mxu1 }
 0x4c5   :  { %18221 = vst [vmem:[#allocation38_spill] sm:$0xff] %v16087_v34  ;;  %v2567_v12 = vadd.f32 %v2416_v14, %v18223_v45  ;;  %3205 = vmatmul.bf16.gmra.mxu1 %v16087_v34  ;;  %v3398_v26 = vpop.f32.mrf.mxu2 }
 0x4c6   :  { %v3399_v31 = vadd.f32 %v3398_v26, %v3181_v22  ;;  %v3640_v53 = vpop.f32.mrf.mxu3 }
 0x4c7   :  { %v2635_v11 = vadd.f32 %v16027_v38, %v2567_v12  ;;  %11217 = vmatmul.msk.bf16.gmra.mxu0 %vm317_vm1, %v18224_v42  ;;  %v13637_v42 = vld [vmem:[#allocation7 + $0xf8] sm:$0xff] }
 0x4c8   :  { %v16102_v12 = vadd.f32 %v3640_v53, %v3399_v31  ;;  %3928 = vmatpush.bf16.msrb.mxu0 %v13637_v42  ;;  %v13645_v42 = vld [vmem:[#allocation7 + $0x138] sm:$0xff] }
 0x4c9   :  { %v2699_v17 = vmax.f32 %v2635_v11, 0.0  ;;  %4230 = vmatpush.bf16.msra.mxu1 %v13645_v42 }
 0x4ca   :  { %18227 = vst [vmem:[#allocation23_spill] sm:$0xff] %v16102_v12  ;;  %v18234_v12 = vmov 0.0  }
 0x4cb   :  { %v16096_v16 = vpack.c.bf16 %v2699_v17, %v2698_v39 }
 0x4cc   :  { %v2418_v4 = vpop.f32.mrf.mxu0  ;;  %v16104_v11 = vpop.f32.mrf.mxu1 }
 0x4cd   :  { %18225 = vst [vmem:[#allocation28_spill] sm:$0xff] %v16096_v16  ;;  %v2568_v9 = vadd.f32 %v2418_v4, %v18226_v58  ;;  %3427 = vmatmul.bf16.gmra.mxu2 %v16096_v16  ;;  %3664 = vmatmul.bf16.gmra.mxu3 %v16096_v16  ;;  %v16106_v18 = vpop.f32.mrf.mxu2  ;;  %v18232_v58 = vld [vmem:[#allocation27_spill] sm:$0xff] }
 0x4ce   :  { %18228 = vst [vmem:[#allocation42_spill] sm:$0xff] %v16104_v11  ;;  %v16110_v26 = vpop.f32.mrf.mxu3 }
 0x4cf   :  { %v2636_v45 = vadd.f32 %v16027_v38, %v2568_v9  ;;  %18229 = vst [vmem:[#allocation32_spill] sm:$0xff] %v16106_v18 }
 0x4d0   :  { %18231 = vst [vmem:[#allocation26_spill] sm:$0xff] %v16110_v26 }
 0x4d1   :  { %v2700_v14 = vmax.f32 %v2636_v45, 0.0  ;;  %v18233_v45 = vld [vmem:[#allocation39_spill] sm:$0xff] }
 0x4d3   :  { %v16108_v39 = vpack.c.bf16 %v2700_v14, %v2699_v17  ;;  %v16120_v17 = vpack.c.bf16 0.0, %v2700_v14 }
 0x4d4   :  { %v2421_v22 = vpop.f32.mrf.mxu0  ;;  %v3186_v31 = vpop.f32.mrf.mxu1 }
 0x4d5   :  { %18230 = vst [vmem:[#allocation24_spill] sm:$0xff] %v16108_v39  ;;  %v2569_v4 = vadd.f32 %v2421_v22, %v18232_v58  ;;  %3210 = vmatmul.bf16.gmra.mxu1 %v16108_v39  ;;  %v3403_v11 = vpop.f32.mrf.mxu2  ;;  %v18236_v22 = vld [vmem:[#allocation29_spill] sm:$0xff] }
 0x4d6   :  { %18235 = vst [vmem:[#allocation47_spill] sm:$0xff] %v16120_v17  ;;  %v3404_v34 = vadd.f32 %v3403_v11, %v3186_v31  ;;  %v3645_v16 = vpop.f32.mrf.mxu3  ;;  %v18241_v31 = vld [vmem:[#allocation35_spill] sm:$0xff] }
 0x4d7   :  { %v2637_v9 = vadd.f32 %v16027_v38, %v2569_v4  ;;  %11218 = vmatmul.msk.bf16.gmra.mxu0 %vm317_vm1, %v18233_v45 }
 0x4d8   :  { %v16126_v45 = vadd.f32 %v3645_v16, %v3404_v34 }
 0x4d9   :  { %v2701_v53 = vmax.f32 %v2637_v9, 0.0 }
 0x4da   :  { %18237 = vst [vmem:[#allocation46_spill] sm:$0xff] %v16126_v45 }
 0x4db   :  { %v16118_v18 = vpack.c.bf16 %v2701_v53, %v18234_v12 }
 0x4dc   :  { %v2423_v26 = vpop.f32.mrf.mxu0  ;;  %v16128_v39 = vpop.f32.mrf.mxu1 }
 0x4dd   :  { %v2570_v58 = vadd.f32 %v2423_v26, %v18236_v22  ;;  %3432 = vmatmul.bf16.gmra.mxu2 %v16118_v18  ;;  %3669 = vmatmul.bf16.gmra.mxu3 %v16120_v17  ;;  %18238 = vst [vmem:[#allocation27_spill] sm:$0xff] %v16128_v39  ;;  %v16130_v14 = vpop.f32.mrf.mxu2  ;;  %v18243_v22 = vld [vmem:[#allocation43_spill] sm:$0xff] }
 0x4de   :  { %18239 = vst [vmem:[#allocation39_spill] sm:$0xff] %v16130_v14  ;;  %v16136_v26 = vpop.f32.mrf.mxu3  ;;  %v18245_v39 = vld [vmem:[#allocation51_spill] sm:$0xff] }
 0x4df   :  { %v2638_v4 = vadd.f32 %v16027_v38, %v2570_v58  ;;  %18242 = vst [vmem:[#allocation35_spill] sm:$0xff] %v16136_v26 }
 0x4e1   :  { %v2702_v9 = vmax.f32 %v2638_v4, 0.0 }
 0x4e3   :  { %v16132_v51 = vpack.c.bf16 %v2702_v9, %v2701_v53 }
 0x4e4   :  { %v2426_v11 = vpop.f32.mrf.mxu0  ;;  %v3191_v16 = vpop.f32.mrf.mxu1 }
 0x4e5   :  { %18240 = vst [vmem:[#allocation29_spill] sm:$0xff] %v16132_v51  ;;  %v2571_v60 = vadd.f32 %v2426_v11, %v18241_v31  ;;  %3215 = vmatmul.bf16.gmra.mxu1 %v16132_v51  ;;  %v3408_v58 = vpop.f32.mrf.mxu2  ;;  %v18248_v51 = vld [vmem:[#allocation30_spill] sm:$0xff] }
 0x4e6   :  { %v3409_v14 = vadd.f32 %v3408_v58, %v3191_v16  ;;  %v3650_v31 = vpop.f32.mrf.mxu3 }
 0x4e7   :  { %v2639_v42 = vadd.f32 %v16027_v38, %v2571_v60  ;;  %11219 = vmatmul.msk.bf16.gmra.mxu0 %vm317_vm1, %v18243_v22 }
 0x4e8   :  { %v16147_v26 = vadd.f32 %v3650_v31, %v3409_v14 }
 0x4e9   :  { %v2703_v34 = vmax.f32 %v2639_v42, 0.0 }
 0x4ea   :  { %18246 = vst [vmem:[#allocation51_spill] sm:$0xff] %v16147_v26 }
 0x4eb   :  { %v16141_v4 = vpack.c.bf16 %v2703_v34, %v2702_v9 }
 0x4ec   :  { %v2428_v53 = vpop.f32.mrf.mxu0 }
 0x4ed   :  { %18244 = vst [vmem:[#allocation43_spill] sm:$0xff] %v16141_v4  ;;  %v2572_v45 = vadd.f32 %v2428_v53, %v18245_v39  ;;  %3437 = vmatmul.bf16.gmra.mxu2 %v16141_v4  ;;  %3674 = vmatmul.bf16.gmra.mxu3 %v16141_v4  ;;  %v18250_v53 = vld [vmem:[#allocation33_spill] sm:$0xff] }
 0x4ef   :  { %v2640_v11 = vadd.f32 %v16027_v38, %v2572_v45 }
 0x4f1   :  { %v2704_v60 = vmax.f32 %v2640_v11, 0.0 }
 0x4f3   :  { %v16149_v22 = vpack.c.bf16 %v2704_v60, %v2703_v34 }
 0x4f4   :  { %v2431_v42 = vpop.f32.mrf.mxu0 }
 0x4f5   :  { %18247 = vst [vmem:[#allocation94_spill] sm:$0xff] %v16149_v22  ;;  %v2573_v9 = vadd.f32 %v2431_v42, %v18248_v51  ;;  %3220 = vmatmul.bf16.gmra.mxu1 %v16149_v22  ;;  %v18252_v42 = vld [vmem:[#allocation55_spill] sm:$0xff] }
 0x4f7   :  { %v2641_v16 = vadd.f32 %v16027_v38, %v2573_v9  ;;  %11220 = vmatmul.msk.bf16.gmra.mxu0 %vm317_vm1, %v18110_v55 }
 0x4f9   :  { %v2705_v39 = vmax.f32 %v2641_v16, 0.0 }
 0x4fb   :  { %v16156_v58 = vpack.c.bf16 %v2705_v39, %v2704_v60 }
 0x4fc   :  { %v2433_v45 = vpop.f32.mrf.mxu0 }
 0x4fd   :  { %18249 = vst [vmem:[#allocation30_spill] sm:$0xff] %v16156_v58  ;;  %v2574_v11 = vadd.f32 %v2433_v45, %v18250_v53  ;;  %3442 = vmatmul.bf16.gmra.mxu2 %v16156_v58  ;;  %3679 = vmatmul.bf16.gmra.mxu3 %v16156_v58  ;;  %v18254_v53 = vld [vmem:[#allocation34_spill] sm:$0xff] }
 0x4ff   :  { %v2642_v14 = vadd.f32 %v16027_v38, %v2574_v11 }
 0x501   :  { %v2706_v51 = vmax.f32 %v2642_v14, 0.0 }
 0x503   :  { %v16162_v34 = vpack.c.bf16 %v2706_v51, %v2705_v39 }
 0x504   :  { %v2436_v31 = vpop.f32.mrf.mxu0 }
 0x505   :  { %18251 = vst [vmem:[#allocation33_spill] sm:$0xff] %v16162_v34  ;;  %v2575_v9 = vadd.f32 %v2436_v31, %v18252_v42  ;;  %3225 = vmatmul.bf16.gmra.mxu1 %v16162_v34  ;;  %v13636_v31 = vld [vmem:[#allocation7 + $0xf0] sm:$0xff] }
 0x506   :  { %3929 = vmatpush.bf16.msrb.mxu0 %v13636_v31 }
 0x507   :  { %v2643_v55 = vadd.f32 %v16027_v38, %v2575_v9  ;;  %11221 = vmatmul.msk.bf16.gmra.mxu0 %vm317_vm1, %v18138_v15  ;;  %v18256_v9 = vld [vmem:[#allocation36_spill] sm:$0xff] }
 0x509   :  { %v2707_v60 = vmax.f32 %v2643_v55, 0.0 }
 0x50b   :  { %v16169_v16 = vpack.c.bf16 %v2707_v60, %v2706_v51  ;;  %v16182_v51 = vpop.f32.mrf.mxu2 }
 0x50c   :  { %v2438_v45 = vpop.f32.mrf.mxu0  ;;  %18257 = vst [vmem:[#allocation36_spill] sm:$0xff] %v16182_v51 }
 0x50d   :  { %18253 = vst [vmem:[#allocation55_spill] sm:$0xff] %v16169_v16  ;;  %v2576_v26 = vadd.f32 %v2438_v45, %v18254_v53  ;;  %3447 = vmatmul.bf16.gmra.mxu2 %v16169_v16  ;;  %3684 = vmatmul.bf16.gmra.mxu3 %v16169_v16  ;;  %v16184_v45 = vpop.f32.mrf.mxu1  ;;  %v13644_v53 = vld [vmem:[#allocation7 + $0x130] sm:$0xff] }
 0x50e   :  { %18258 = vst [vmem:[#allocation95_spill] sm:$0xff] %v16184_v45  ;;  %4231 = vmatpush.bf16.msra.mxu1 %v13644_v53 }
 0x50f   :  { %v2644_v39 = vadd.f32 %v16027_v38, %v2576_v26 }
 0x511   :  { %v2708_v11 = vmax.f32 %v2644_v39, 0.0 }
 0x513   :  { %v16175_v14 = vpack.c.bf16 %v2708_v11, %v2707_v60  ;;  %v16189_v60 = vpack.c.bf16 0.0, %v2708_v11  ;;  %v18263_v11 = vld [vmem:[#allocation37_spill] sm:$0xff] }
 0x514   :  { %v2441_v42 = vpop.f32.mrf.mxu0 }
 0x515   :  { %18255 = vst [vmem:[#allocation34_spill] sm:$0xff] %v16175_v14  ;;  %v2577_v34 = vadd.f32 %v2441_v42, %v18256_v9  ;;  %3230 = vmatmul.bf16.gmra.mxu1 %v16175_v14  ;;  %v18261_v42 = vld [vmem:[#allocation59_spill] sm:$0xff] }
 0x516   :  { %18260 = vst [vmem:[#allocation97_spill] sm:$0xff] %v16189_v60 }
 0x517   :  { %v2645_v15 = vadd.f32 %v16027_v38, %v2577_v34  ;;  %11222 = vmatmul.msk.bf16.gmra.mxu0 %vm317_vm1, %v18123_v61 }
 0x519   :  { %v2709_v55 = vmax.f32 %v2645_v15, 0.0 }
 0x51b   :  { %v16187_v26 = vpack.c.bf16 %v2709_v55, %v18234_v12 }
 0x51c   :  { %v2443_v39 = vpop.f32.mrf.mxu0 }
 0x51d   :  { %18259 = vst [vmem:[#allocation96_spill] sm:$0xff] %v16187_v26  ;;  %v2578_v9 = vadd.f32 %v2443_v39, %v18261_v42  ;;  %3452 = vmatmul.bf16.gmra.mxu2 %v16187_v26  ;;  %3689 = vmatmul.bf16.gmra.mxu3 %v16189_v60  ;;  %v16202_v42 = vpop.f32.mrf.mxu3 }
 0x51e   :  { %18264 = vst [vmem:[#allocation37_spill] sm:$0xff] %v16202_v42 }
 0x51f   :  { %v2646_v61 = vadd.f32 %v16027_v38, %v2578_v9 }
 0x520   :  { %v3413_v34 = vpop.f32.mrf.mxu2 }
 0x521   :  { %v2710_v31 = vmax.f32 %v2646_v61, 0.0 }
 0x522   :  { %v3196_v15 = vpop.f32.mrf.mxu1 }
 0x523   :  { %v3414_v51 = vadd.f32 %v3413_v34, %v3196_v15  ;;  %v16195_v45 = vpack.c.bf16 %v2710_v31, %v2709_v55  ;;  %v18266_v15 = vld [vmem:[#allocation40_spill] sm:$0xff] }
 0x524   :  { %v2446_v14 = vpop.f32.mrf.mxu0 }
 0x525   :  { %18262 = vst [vmem:[#allocation59_spill] sm:$0xff] %v16195_v45  ;;  %v2579_v22 = vadd.f32 %v2446_v14, %v18263_v11  ;;  %3235 = vmatmul.bf16.gmra.mxu1 %v16195_v45 }
 0x527   :  { %v2647_v39 = vadd.f32 %v16027_v38, %v2579_v22  ;;  %11223 = vmatmul.msk.bf16.gmra.mxu0 %vm317_vm1, %v18129_v1 }
 0x528   :  { %v3415_v53 = vpop.f32.mrf.mxu2 }
 0x529   :  { %v2711_v9 = vmax.f32 %v2647_v39, 0.0 }
 0x52a   :  { %v3198_v60 = vpop.f32.mrf.mxu1 }
 0x52b   :  { %v16204_v61 = vpack.c.bf16 %v2711_v9, %v2710_v31  ;;  %v3416_v34 = vadd.f32 %v3415_v53, %v3198_v60  ;;  %v18268_v60 = vld [vmem:[#allocation48_spill] sm:$0xff] }
 0x52c   :  { %v2448_v55 = vpop.f32.mrf.mxu0 }
 0x52d   :  { %18265 = vst [vmem:[#allocation98_spill] sm:$0xff] %v16204_v61  ;;  %v2580_v26 = vadd.f32 %v2448_v55, %v18266_v15  ;;  %3457 = vmatmul.bf16.gmra.mxu2 %v16204_v61  ;;  %3694 = vmatmul.bf16.gmra.mxu3 %v16204_v61 }
 0x52f   :  { %v2648_v22 = vadd.f32 %v16027_v38, %v2580_v26 }
 0x530   :  { %v3418_v14 = vpop.f32.mrf.mxu2  ;;  %v3655_v11 = vpop.f32.mrf.mxu3 }
 0x531   :  { %v2712_v1 = vmax.f32 %v2648_v22, 0.0  ;;  %v16210_v45 = vadd.f32 %v3655_v11, %v3414_v51 }
 0x532   :  { %v3201_v42 = vpop.f32.mrf.mxu1 }
 0x533   :  { %v3419_v39 = vadd.f32 %v3418_v14, %v3201_v42  ;;  %v16212_v17 = vpack.c.bf16 %v2712_v1, %v2711_v9 }
 0x534   :  { %v2451_v31 = vpop.f32.mrf.mxu0 }
 0x535   :  { %18267 = vst [vmem:[#allocation40_spill] sm:$0xff] %v16212_v17  ;;  %v2581_v53 = vadd.f32 %v2451_v31, %v18268_v60  ;;  %3240 = vmatmul.bf16.gmra.mxu1 %v16212_v17 }
 0x537   :  { %v2649_v55 = vadd.f32 %v16027_v38, %v2581_v53  ;;  %11224 = vmatmul.msk.bf16.gmra.mxu0 %vm317_vm1, %v15172_v23 }
 0x538   :  { %v3420_v26 = vpop.f32.mrf.mxu2  ;;  %v3657_v15 = vpop.f32.mrf.mxu3 }
 0x539   :  { %v2713_v61 = vmax.f32 %v2649_v55, 0.0  ;;  %v16219_v22 = vadd.f32 %v3657_v15, %v3416_v34 }
 0x53a   :  { %v3203_v51 = vpop.f32.mrf.mxu1 }
 0x53b   :  { %v16221_v11 = vpack.c.bf16 %v2713_v61, %v2712_v1  ;;  %v3421_v42 = vadd.f32 %v3420_v26, %v3203_v51 }
 0x53c   :  { %v2453_v9 = vpop.f32.mrf.mxu0 }
 0x53d   :  { %18269 = vst [vmem:[#allocation48_spill] sm:$0xff] %v16221_v11  ;;  %v2582_v14 = vadd.f32 %v2453_v9, %v15672_v28  ;;  %3462 = vmatmul.bf16.gmra.mxu2 %v16221_v11  ;;  %3699 = vmatmul.bf16.gmra.mxu3 %v16221_v11 }
 0x53f   :  { %v2650_v31 = vadd.f32 %v16027_v38, %v2582_v14 }
 0x540   :  { %v3423_v60 = vpop.f32.mrf.mxu2  ;;  %v3660_v23 = vpop.f32.mrf.mxu3 }
 0x541   :  { %v2714_v53 = vmax.f32 %v2650_v31, 0.0  ;;  %v16227_v17 = vadd.f32 %v3660_v23, %v3419_v39 }
 0x542   :  { %v3206_v34 = vpop.f32.mrf.mxu1 }
 0x543   :  { %18270 = vst [vmem:[#allocation99_spill] sm:$0xff] %v16227_v17  ;;  %v3424_v55 = vadd.f32 %v3423_v60, %v3206_v34  ;;  %v16229_v15 = vpack.c.bf16 %v2714_v53, %v2713_v61 }
 0x544   :  { %v2456_v1 = vpop.f32.mrf.mxu0 }
 0x545   :  { %18271 = vst [vmem:[#allocation100_spill] sm:$0xff] %v16229_v15  ;;  %v2583_v26 = vadd.f32 %v2456_v1, %v15679_v2  ;;  %3245 = vmatmul.bf16.gmra.mxu1 %v16229_v15 }
 0x547   :  { %v2651_v28 = vadd.f32 %v16027_v38, %v2583_v26  ;;  %11225 = vmatmul.msk.bf16.gmra.mxu0 %vm317_vm1, %v18154_v10 }
 0x548   :  { %v3425_v51 = vpop.f32.mrf.mxu2  ;;  %v3662_v9 = vpop.f32.mrf.mxu3 }
 0x549   :  { %v2715_v14 = vmax.f32 %v2651_v28, 0.0  ;;  %v16236_v31 = vadd.f32 %v3662_v9, %v3421_v42 }
 0x54a   :  { %v3208_v39 = vpop.f32.mrf.mxu1 }
 0x54b   :  { %18272 = vst [vmem:[#allocation101_spill] sm:$0xff] %v16236_v31  ;;  %v16238_v23 = vpack.c.bf16 %v2715_v14, %v2714_v53  ;;  %v3426_v61 = vadd.f32 %v3425_v51, %v3208_v39  ;;  %v13635_v53 = vld [vmem:[#allocation7 + $0xe8] sm:$0xff]  ;;  %v18276_v39 = vld [vmem:[#allocation63_spill] sm:$0xff] }
 0x54c   :  { %v2458_v60 = vpop.f32.mrf.mxu0  ;;  %3930 = vmatpush.bf16.msrb.mxu0 %v13635_v53  ;;  %v18279_v53 = vld [vmem:[#allocation41_spill] sm:$0xff] }
 0x54d   :  { %18273 = vst [vmem:[#allocation102_spill] sm:$0xff] %v16238_v23  ;;  %v2584_v34 = vadd.f32 %v2458_v60, %v15686_v19  ;;  %3467 = vmatmul.bf16.gmra.mxu2 %v16238_v23  ;;  %3704 = vmatmul.bf16.gmra.mxu3 %v16238_v23 }
 0x54f   :  { %v2652_v2 = vadd.f32 %v16027_v38, %v2584_v34 }
 0x550   :  { %v3428_v1 = vpop.f32.mrf.mxu2  ;;  %v3665_v10 = vpop.f32.mrf.mxu3 }
 0x551   :  { %v2716_v26 = vmax.f32 %v2652_v2, 0.0  ;;  %v16244_v15 = vadd.f32 %v3665_v10, %v3424_v55 }
 0x552   :  { %v3211_v42 = vpop.f32.mrf.mxu1 }
 0x553   :  { %18274 = vst [vmem:[#allocation103_spill] sm:$0xff] %v16244_v15  ;;  %v3429_v28 = vadd.f32 %v3428_v1, %v3211_v42  ;;  %v16246_v9 = vpack.c.bf16 %v2716_v26, %v2715_v14  ;;  %v16258_v42 = vpack.c.bf16 0.0, %v2716_v26  ;;  %v18282_v15 = vld [vmem:[#allocation44_spill] sm:$0xff] }
 0x554   :  { %v2461_v51 = vpop.f32.mrf.mxu0 }
 0x555   :  { %18275 = vst [vmem:[#allocation104_spill] sm:$0xff] %v16246_v9  ;;  %v2585_v31 = vadd.f32 %v2461_v51, %v18276_v39  ;;  %3250 = vmatmul.bf16.gmra.mxu1 %v16246_v9  ;;  %v13643_v51 = vld [vmem:[#allocation7 + $0x128] sm:$0xff] }
 0x556   :  { %18278 = vst [vmem:[#allocation105_spill] sm:$0xff] %v16258_v42  ;;  %4232 = vmatpush.bf16.msra.mxu1 %v13643_v51 }
 0x557   :  { %v2653_v19 = vadd.f32 %v16027_v38, %v2585_v31  ;;  %11226 = vmatmul.msk.bf16.gmra.mxu0 %vm317_vm1, %v15229_v13 }
 0x558   :  { %v3430_v60 = vpop.f32.mrf.mxu2  ;;  %v3667_v34 = vpop.f32.mrf.mxu3 }
 0x559   :  { %v2717_v55 = vmax.f32 %v2653_v19, 0.0  ;;  %v16253_v2 = vadd.f32 %v3667_v34, %v3426_v61 }
 0x55a   :  { %v3213_v1 = vpop.f32.mrf.mxu1 }
 0x55b   :  { %18277 = vst [vmem:[#allocation63_spill] sm:$0xff] %v16253_v2  ;;  %v3431_v14 = vadd.f32 %v3430_v60, %v3213_v1  ;;  %v16256_v10 = vpack.c.bf16 %v2717_v55, %v18234_v12 }
 0x55c   :  { %v2463_v39 = vpop.f32.mrf.mxu0 }
 0x55d   :  { %v2586_v9 = vadd.f32 %v2463_v39, %v18279_v53  ;;  %3472 = vmatmul.bf16.gmra.mxu2 %v16256_v10  ;;  %3709 = vmatmul.bf16.gmra.mxu3 %v16258_v42  ;;  %v18283_v53 = vld [vmem:[#allocation74_spill] sm:$0xff] }
 0x55f   :  { %v2654_v13 = vadd.f32 %v16027_v38, %v2586_v9 }
 0x560   :  { %v3433_v31 = vpop.f32.mrf.mxu2  ;;  %v3670_v61 = vpop.f32.mrf.mxu3 }
 0x561   :  { %v2718_v19 = vmax.f32 %v2654_v13, 0.0  ;;  %v16264_v60 = vadd.f32 %v3670_v61, %v3429_v28 }
 0x562   :  { %v3216_v34 = vpop.f32.mrf.mxu1 }
 0x563   :  { %18280 = vst [vmem:[#allocation41_spill] sm:$0xff] %v16264_v60  ;;  %v3434_v1 = vadd.f32 %v3433_v31, %v3216_v34  ;;  %v16266_v26 = vpack.c.bf16 %v2718_v19, %v2717_v55  ;;  %v18286_v34 = vld [vmem:[#allocation52_spill] sm:$0xff] }
 0x564   :  { %v2466_v2 = vpop.f32.mrf.mxu0 }
 0x565   :  { %18281 = vst [vmem:[#allocation106_spill] sm:$0xff] %v16266_v26  ;;  %v2587_v17 = vadd.f32 %v2466_v2, %v18282_v15  ;;  %3255 = vmatmul.bf16.gmra.mxu1 %v16266_v26 }
 0x567   :  { %v2655_v39 = vadd.f32 %v16027_v38, %v2587_v17  ;;  %11227 = vmatmul.msk.bf16.gmra.mxu0 %vm317_vm1, %v18283_v53 }
 0x568   :  { %v3435_v9 = vpop.f32.mrf.mxu2  ;;  %v3672_v51 = vpop.f32.mrf.mxu3 }
 0x569   :  { %v2719_v42 = vmax.f32 %v2655_v39, 0.0  ;;  %v16273_v13 = vadd.f32 %v3672_v51, %v3431_v14 }
 0x56a   :  { %v3218_v28 = vpop.f32.mrf.mxu1 }
 0x56b   :  { %18284 = vst [vmem:[#allocation44_spill] sm:$0xff] %v16273_v13  ;;  %v16275_v61 = vpack.c.bf16 %v2719_v42, %v2718_v19  ;;  %v3436_v55 = vadd.f32 %v3435_v9, %v3218_v28  ;;  %v18289_v9 = vld [vmem:[#allocation67_spill] sm:$0xff] }
 0x56c   :  { %v2468_v31 = vpop.f32.mrf.mxu0 }
 0x56d   :  { %18285 = vst [vmem:[#allocation74_spill] sm:$0xff] %v16275_v61  ;;  %v2588_v60 = vadd.f32 %v2468_v31, %v18286_v34  ;;  %3477 = vmatmul.bf16.gmra.mxu2 %v16275_v61  ;;  %3714 = vmatmul.bf16.gmra.mxu3 %v16275_v61 }
 0x56f   :  { %v2656_v17 = vadd.f32 %v16027_v38, %v2588_v60 }
 0x570   :  { %v3438_v15 = vpop.f32.mrf.mxu2  ;;  %v3675_v2 = vpop.f32.mrf.mxu3 }
 0x571   :  { %v2720_v53 = vmax.f32 %v2656_v17, 0.0  ;;  %v16281_v26 = vadd.f32 %v3675_v2, %v3434_v1 }
 0x572   :  { %v3221_v14 = vpop.f32.mrf.mxu1 }
 0x573   :  { %18287 = vst [vmem:[#allocation52_spill] sm:$0xff] %v16281_v26  ;;  %v3439_v39 = vadd.f32 %v3438_v15, %v3221_v14  ;;  %v16283_v51 = vpack.c.bf16 %v2720_v53, %v2719_v42  ;;  %v18292_v14 = vld [vmem:[#allocation45_spill] sm:$0xff] }
 0x574   :  { %v2471_v19 = vpop.f32.mrf.mxu0 }
 0x575   :  { %18288 = vst [vmem:[#allocation107_spill] sm:$0xff] %v16283_v51  ;;  %v2589_v28 = vadd.f32 %v2471_v19, %v18289_v9  ;;  %3260 = vmatmul.bf16.gmra.mxu1 %v16283_v51 }
 0x577   :  { %v2657_v31 = vadd.f32 %v16027_v38, %v2589_v28  ;;  %11228 = vmatmul.msk.bf16.gmra.mxu0 %vm317_vm1, %v15289_v48 }
 0x578   :  { %v3440_v60 = vpop.f32.mrf.mxu2  ;;  %v3677_v34 = vpop.f32.mrf.mxu3 }
 0x579   :  { %v2721_v13 = vmax.f32 %v2657_v31, 0.0  ;;  %v16290_v17 = vadd.f32 %v3677_v34, %v3436_v55 }
 0x57a   :  { %v3223_v1 = vpop.f32.mrf.mxu1 }
 0x57b   :  { %18290 = vst [vmem:[#allocation67_spill] sm:$0xff] %v16290_v17  ;;  %v16292_v2 = vpack.c.bf16 %v2721_v13, %v2720_v53  ;;  %v3441_v42 = vadd.f32 %v3440_v60, %v3223_v1  ;;  %v18295_v60 = vld [vmem:[#allocation49_spill] sm:$0xff] }
 0x57c   :  { %v2473_v15 = vpop.f32.mrf.mxu0 }
 0x57d   :  { %18291 = vst [vmem:[#allocation108_spill] sm:$0xff] %v16292_v2  ;;  %v2590_v26 = vadd.f32 %v2473_v15, %v18292_v14  ;;  %3482 = vmatmul.bf16.gmra.mxu2 %v16292_v2  ;;  %3719 = vmatmul.bf16.gmra.mxu3 %v16292_v2 }
 0x57f   :  { %v2658_v19 = vadd.f32 %v16027_v38, %v2590_v26 }
 0x580   :  { %v3443_v9 = vpop.f32.mrf.mxu2  ;;  %v3680_v48 = vpop.f32.mrf.mxu3 }
 0x581   :  { %v2722_v28 = vmax.f32 %v2658_v19, 0.0  ;;  %v16298_v51 = vadd.f32 %v3680_v48, %v3439_v39 }
 0x582   :  { %v3226_v55 = vpop.f32.mrf.mxu1 }
 0x583   :  { %18293 = vst [vmem:[#allocation45_spill] sm:$0xff] %v16298_v51  ;;  %v3444_v31 = vadd.f32 %v3443_v9, %v3226_v55  ;;  %v16300_v34 = vpack.c.bf16 %v2722_v28, %v2721_v13  ;;  %v18298_v55 = vld [vmem:[#allocation56_spill] sm:$0xff] }
 0x584   :  { %v2476_v53 = vpop.f32.mrf.mxu0 }
 0x585   :  { %18294 = vst [vmem:[#allocation109_spill] sm:$0xff] %v16300_v34  ;;  %v2591_v1 = vadd.f32 %v2476_v53, %v18295_v60  ;;  %3265 = vmatmul.bf16.gmra.mxu1 %v16300_v34 }
 0x587   :  { %v2659_v15 = vadd.f32 %v16027_v38, %v2591_v1  ;;  %11229 = vmatmul.msk.bf16.gmra.mxu0 %vm317_vm1, %v15389_v30 }
 0x588   :  { %v3445_v26 = vpop.f32.mrf.mxu2  ;;  %v3682_v14 = vpop.f32.mrf.mxu3 }
 0x589   :  { %v2723_v17 = vmax.f32 %v2659_v15, 0.0  ;;  %v16307_v19 = vadd.f32 %v3682_v14, %v3441_v42 }
 0x58a   :  { %v3228_v39 = vpop.f32.mrf.mxu1 }
 0x58b   :  { %18296 = vst [vmem:[#allocation49_spill] sm:$0xff] %v16307_v19  ;;  %v16309_v48 = vpack.c.bf16 %v2723_v17, %v2722_v28  ;;  %v3446_v13 = vadd.f32 %v3445_v26, %v3228_v39  ;;  %v13634_v28 = vld [vmem:[#allocation7 + $0xe0] sm:$0xff]  ;;  %v18301_v39 = vld [vmem:[#allocation70_spill] sm:$0xff] }
 0x58c   :  { %v2478_v9 = vpop.f32.mrf.mxu0  ;;  %3931 = vmatpush.bf16.msrb.mxu0 %v13634_v28  ;;  %v18304_v28 = vld [vmem:[#allocation50_spill] sm:$0xff] }
 0x58d   :  { %18297 = vst [vmem:[#allocation110_spill] sm:$0xff] %v16309_v48  ;;  %v2592_v51 = vadd.f32 %v2478_v9, %v18298_v55  ;;  %3487 = vmatmul.bf16.gmra.mxu2 %v16309_v48  ;;  %3724 = vmatmul.bf16.gmra.mxu3 %v16309_v48 }
 0x58f   :  { %v2660_v53 = vadd.f32 %v16027_v38, %v2592_v51 }
 0x590   :  { %v3448_v60 = vpop.f32.mrf.mxu2  ;;  %v3685_v30 = vpop.f32.mrf.mxu3 }
 0x591   :  { %v2724_v1 = vmax.f32 %v2660_v53, 0.0  ;;  %v16315_v34 = vadd.f32 %v3685_v30, %v3444_v31 }
 0x592   :  { %v3231_v42 = vpop.f32.mrf.mxu1 }
 0x593   :  { %18299 = vst [vmem:[#allocation56_spill] sm:$0xff] %v16315_v34  ;;  %v3449_v15 = vadd.f32 %v3448_v60, %v3231_v42  ;;  %v16317_v14 = vpack.c.bf16 %v2724_v1, %v2723_v17  ;;  %v16329_v42 = vpack.c.bf16 0.0, %v2724_v1  ;;  %v18306_v34 = vld [vmem:[#allocation53_spill] sm:$0xff] }
 0x594   :  { %v2481_v26 = vpop.f32.mrf.mxu0 }
 0x595   :  { %18300 = vst [vmem:[#allocation111_spill] sm:$0xff] %v16317_v14  ;;  %v2593_v19 = vadd.f32 %v2481_v26, %v18301_v39  ;;  %3270 = vmatmul.bf16.gmra.mxu1 %v16317_v14  ;;  %v13642_v26 = vld [vmem:[#allocation7 + $0x120] sm:$0xff] }
 0x596   :  { %18303 = vst [vmem:[#allocation112_spill] sm:$0xff] %v16329_v42  ;;  %4233 = vmatpush.bf16.msra.mxu1 %v13642_v26 }
 0x597   :  { %v2661_v9 = vadd.f32 %v16027_v38, %v2593_v19  ;;  %11230 = vmatmul.msk.bf16.gmra.mxu0 %vm317_vm1, %v15343_v33 }
 0x598   :  { %v3450_v51 = vpop.f32.mrf.mxu2  ;;  %v3687_v55 = vpop.f32.mrf.mxu3 }
 0x599   :  { %v2725_v31 = vmax.f32 %v2661_v9, 0.0  ;;  %v16324_v53 = vadd.f32 %v3687_v55, %v3446_v13 }
 0x59a   :  { %v3233_v60 = vpop.f32.mrf.mxu1 }
 0x59b   :  { %18302 = vst [vmem:[#allocation70_spill] sm:$0xff] %v16324_v53  ;;  %v3451_v17 = vadd.f32 %v3450_v51, %v3233_v60  ;;  %v16327_v30 = vpack.c.bf16 %v2725_v31, %v18234_v12 }
 0x59c   :  { %v2483_v39 = vpop.f32.mrf.mxu0 }
 0x59d   :  { %v2594_v14 = vadd.f32 %v2483_v39, %v18304_v28  ;;  %3492 = vmatmul.bf16.gmra.mxu2 %v16327_v30  ;;  %3729 = vmatmul.bf16.gmra.mxu3 %v16329_v42 }
 0x59f   :  { %v2662_v33 = vadd.f32 %v16027_v38, %v2594_v14 }
 0x5a0   :  { %v3453_v19 = vpop.f32.mrf.mxu2  ;;  %v3690_v13 = vpop.f32.mrf.mxu3 }
 0x5a1   :  { %v2726_v9 = vmax.f32 %v2662_v33, 0.0  ;;  %v16335_v51 = vadd.f32 %v3690_v13, %v3449_v15 }
 0x5a2   :  { %v3236_v55 = vpop.f32.mrf.mxu1 }
 0x5a3   :  { %v3454_v60 = vadd.f32 %v3453_v19, %v3236_v55  ;;  %v16337_v1 = vpack.c.bf16 %v2726_v9, %v2725_v31 }
 0x5a4   :  { %v2486_v53 = vpop.f32.mrf.mxu0 }
 0x5a5   :  { %18305 = vst [vmem:[#allocation50_spill] sm:$0xff] %v16337_v1  ;;  %v2595_v48 = vadd.f32 %v2486_v53, %v18306_v34  ;;  %3275 = vmatmul.bf16.gmra.mxu1 %v16337_v1 }
 0x5a7   :  { %v2663_v39 = vadd.f32 %v16027_v38, %v2595_v48  ;;  %11231 = vmatmul.msk.bf16.gmra.mxu0 %vm317_vm1, %v18164_v5 }
 0x5a8   :  { %v3455_v14 = vpop.f32.mrf.mxu2  ;;  %v3692_v26 = vpop.f32.mrf.mxu3 }
 0x5a9   :  { %v2727_v28 = vmax.f32 %v2663_v39, 0.0  ;;  %v16344_v33 = vadd.f32 %v3692_v26, %v3451_v17 }
 0x5aa   :  { %v3238_v15 = vpop.f32.mrf.mxu1 }
 0x5ab   :  { %v16346_v13 = vpack.c.bf16 %v2727_v28, %v2726_v9  ;;  %v3456_v31 = vadd.f32 %v3455_v14, %v3238_v15  ;;  %v18310_v14 = vld [vmem:[#allocation60_spill] sm:$0xff] }
 0x5ac   :  { %v2488_v19 = vpop.f32.mrf.mxu0 }
 0x5ad   :  { %18307 = vst [vmem:[#allocation53_spill] sm:$0xff] %v16346_v13  ;;  %v2596_v55 = vadd.f32 %v2488_v19, %v15794_v46  ;;  %3497 = vmatmul.bf16.gmra.mxu2 %v16346_v13  ;;  %3734 = vmatmul.bf16.gmra.mxu3 %v16346_v13 }
 0x5af   :  { %v2664_v34 = vadd.f32 %v16027_v38, %v2596_v55 }
 0x5b0   :  { %v3458_v48 = vpop.f32.mrf.mxu2  ;;  %v3695_v5 = vpop.f32.mrf.mxu3 }
 0x5b1   :  { %v2728_v53 = vmax.f32 %v2664_v34, 0.0  ;;  %v16352_v1 = vadd.f32 %v3695_v5, %v3454_v60 }
 0x5b2   :  { %v3241_v17 = vpop.f32.mrf.mxu1 }
 0x5b3   :  { %18308 = vst [vmem:[#allocation113_spill] sm:$0xff] %v16352_v1  ;;  %v3459_v39 = vadd.f32 %v3458_v48, %v3241_v17  ;;  %v16354_v26 = vpack.c.bf16 %v2728_v53, %v2727_v28  ;;  %v18313_v17 = vld [vmem:[#allocation73_spill] sm:$0xff] }
 0x5b4   :  { %v2491_v9 = vpop.f32.mrf.mxu0 }
 0x5b5   :  { %18309 = vst [vmem:[#allocation114_spill] sm:$0xff] %v16354_v26  ;;  %v2597_v15 = vadd.f32 %v2491_v9, %v18310_v14  ;;  %3280 = vmatmul.bf16.gmra.mxu1 %v16354_v26 }
 0x5b7   :  { %v2665_v46 = vadd.f32 %v16027_v38, %v2597_v15  ;;  %11232 = vmatmul.msk.bf16.gmra.mxu0 %vm317_vm1, %v15395_v21 }
 0x5b8   :  { %v3460_v19 = vpop.f32.mrf.mxu2  ;;  %v3697_v55 = vpop.f32.mrf.mxu3 }
 0x5b9   :  { %v2729_v42 = vmax.f32 %v2665_v46, 0.0  ;;  %v16361_v34 = vadd.f32 %v3697_v55, %v3456_v31 }
 0x5ba   :  { %v3243_v60 = vpop.f32.mrf.mxu1 }
 0x5bb   :  { %18311 = vst [vmem:[#allocation60_spill] sm:$0xff] %v16361_v34  ;;  %v16363_v5 = vpack.c.bf16 %v2729_v42, %v2728_v53  ;;  %v3461_v28 = vadd.f32 %v3460_v19, %v3243_v60  ;;  %v18315_v19 = vld [vmem:[#allocation54_spill] sm:$0xff] }
 0x5bc   :  { %v2493_v48 = vpop.f32.mrf.mxu0 }
 0x5bd   :  { %18312 = vst [vmem:[#allocation115_spill] sm:$0xff] %v16363_v5  ;;  %v2598_v1 = vadd.f32 %v2493_v48, %v18313_v17  ;;  %3502 = vmatmul.bf16.gmra.mxu2 %v16363_v5  ;;  %3739 = vmatmul.bf16.gmra.mxu3 %v16363_v5 }
 0x5bf   :  { %v2666_v9 = vadd.f32 %v16027_v38, %v2598_v1 }
 0x5c0   :  { %v3463_v14 = vpop.f32.mrf.mxu2  ;;  %v3700_v21 = vpop.f32.mrf.mxu3 }
 0x5c1   :  { %v2730_v15 = vmax.f32 %v2666_v9, 0.0  ;;  %v16369_v26 = vadd.f32 %v3700_v21, %v3459_v39 }
 0x5c2   :  { %v3246_v31 = vpop.f32.mrf.mxu1 }
 0x5c3   :  { %v3464_v46 = vadd.f32 %v3463_v14, %v3246_v31  ;;  %v16371_v55 = vpack.c.bf16 %v2730_v15, %v2729_v42 }
 0x5c4   :  { %v2496_v53 = vpop.f32.mrf.mxu0 }
 0x5c5   :  { %18314 = vst [vmem:[#allocation73_spill] sm:$0xff] %v16371_v55  ;;  %v2599_v60 = vadd.f32 %v2496_v53, %v18315_v19  ;;  %3285 = vmatmul.bf16.gmra.mxu1 %v16371_v55 }
 0x5c7   :  { %v2667_v48 = vadd.f32 %v16027_v38, %v2599_v60  ;;  %11233 = vmatmul.msk.bf16.gmra.mxu0 %vm317_vm1, %v15915_v29 }
 0x5c8   :  { %v3465_v1 = vpop.f32.mrf.mxu2  ;;  %v3702_v17 = vpop.f32.mrf.mxu3 }
 0x5c9   :  { %v2731_v34 = vmax.f32 %v2667_v48, 0.0  ;;  %v16378_v9 = vadd.f32 %v3702_v17, %v3461_v28 }
 0x5ca   :  { %v3248_v39 = vpop.f32.mrf.mxu1 }
 0x5cb   :  { %v16380_v21 = vpack.c.bf16 %v2731_v34, %v2730_v15  ;;  %v3466_v42 = vadd.f32 %v3465_v1, %v3248_v39  ;;  %v13633_v15 = vld [vmem:[#allocation7 + $0xd8] sm:$0xff] }
 0x5cc   :  { %v2498_v14 = vpop.f32.mrf.mxu0  ;;  %3932 = vmatpush.bf16.msrb.mxu0 %v13633_v15 }
 0x5cd   :  { %18316 = vst [vmem:[#allocation54_spill] sm:$0xff] %v16380_v21  ;;  %v2600_v31 = vadd.f32 %v2498_v14, %v15840_v56  ;;  %3507 = vmatmul.bf16.gmra.mxu2 %v16380_v21  ;;  %3744 = vmatmul.bf16.gmra.mxu3 %v16380_v21 }
 0x5cf   :  { %v2668_v53 = vadd.f32 %v16027_v38, %v2600_v31 }
 0x5d0   :  { %v3468_v19 = vpop.f32.mrf.mxu2  ;;  %v3705_v29 = vpop.f32.mrf.mxu3 }
 0x5d1   :  { %v2732_v60 = vmax.f32 %v2668_v53, 0.0  ;;  %v16386_v55 = vadd.f32 %v3705_v29, %v3464_v46 }
 0x5d2   :  { %v3251_v28 = vpop.f32.mrf.mxu1 }
 0x5d3   :  { %v3469_v48 = vadd.f32 %v3468_v19, %v3251_v28  ;;  %v16388_v17 = vpack.c.bf16 %v2732_v60, %v2731_v34  ;;  %v16400_v28 = vpack.c.bf16 0.0, %v2732_v60 }
 0x5d4   :  { %v2501_v1 = vpop.f32.mrf.mxu0 }
 0x5d5   :  { %18317 = vst [vmem:[#allocation116_spill] sm:$0xff] %v16388_v17  ;;  %v2601_v39 = vadd.f32 %v2501_v1, %v15855_v7  ;;  %3290 = vmatmul.bf16.gmra.mxu1 %v16388_v17  ;;  %v13641_v7 = vld [vmem:[#allocation7 + $0x118] sm:$0xff] }
 0x5d6   :  { %18319 = vst [vmem:[#allocation118_spill] sm:$0xff] %v16400_v28  ;;  %4234 = vmatpush.bf16.msra.mxu1 %v13641_v7 }
 0x5d7   :  { %v2669_v56 = vadd.f32 %v16027_v38, %v2601_v39  ;;  %11234 = vmatmul.msk.bf16.gmra.mxu0 %vm317_vm1, %v15849_v3 }
 0x5d8   :  { %v3470_v14 = vpop.f32.mrf.mxu2  ;;  %v3707_v31 = vpop.f32.mrf.mxu3 }
 0x5d9   :  { %v2733_v46 = vmax.f32 %v2669_v56, 0.0  ;;  %v16395_v53 = vadd.f32 %v3707_v31, %v3466_v42  ;;  %v13653_v31 = vld [vmem:[#allocation7 + $0x178] sm:$0xff] }
 0x5da   :  { %v3253_v19 = vpop.f32.mrf.mxu1  ;;  %4529 = vmatpush.bf16.msrb.mxu2 %v13653_v31 }
 0x5db   :  { %18318 = vst [vmem:[#allocation117_spill] sm:$0xff] %v16395_v53  ;;  %v3471_v34 = vadd.f32 %v3470_v14, %v3253_v19  ;;  %v16398_v29 = vpack.c.bf16 %v2733_v46, %v18234_v12  ;;  %v13661_v53 = vld [vmem:[#allocation7 + $0x1b8] sm:$0xff] }
 0x5dc   :  { %v2503_v1 = vpop.f32.mrf.mxu0  ;;  %4831 = vmatpush.bf16.msrb.mxu3 %v13661_v53  ;;  %v13631_v53 = vld [vmem:[#allocation7 + $0xc8] sm:$0xff] }
 0x5dd   :  { %v2602_v15 = vadd.f32 %v2503_v1, %v15861_v52  ;;  %3512 = vmatmul.bf16.gmra.mxu2 %v16398_v29  ;;  %3749 = vmatmul.bf16.gmra.mxu3 %v16400_v28 }
 0x5df   :  { %v2670_v3 = vadd.f32 %v16027_v38, %v2602_v15 }
 0x5e0   :  { %v3473_v42 = vpop.f32.mrf.mxu2  ;;  %v3710_v39 = vpop.f32.mrf.mxu3 }
 0x5e1   :  { %v2734_v56 = vmax.f32 %v2670_v3, 0.0  ;;  %v16406_v14 = vadd.f32 %v3710_v39, %v3469_v48 }
 0x5e2   :  { %v3256_v19 = vpop.f32.mrf.mxu1 }
 0x5e3   :  { %v3474_v60 = vadd.f32 %v3473_v42, %v3256_v19  ;;  %v16408_v17 = vpack.c.bf16 %v2734_v56, %v2733_v46  ;;  %v13632_v42 = vld [vmem:[#allocation7 + $0xd0] sm:$0xff] }
 0x5e4   :  { %v2506_v52 = vpop.f32.mrf.mxu0  ;;  %3933 = vmatpush.bf16.msrb.mxu0 %v13632_v42 }
 0x5e5   :  { %18320 = vst [vmem:[#allocation119_spill] sm:$0xff] %v16408_v17  ;;  %v2603_v1 = vadd.f32 %v2506_v52, %v15876_v44  ;;  %3295 = vmatmul.bf16.gmra.mxu1 %v16408_v17 }
 0x5e7   :  { %v2671_v7 = vadd.f32 %v16027_v38, %v2603_v1  ;;  %11235 = vmatmul.msk.bf16.gmra.mxu0 %vm317_vm1, %v15870_v32 }
 0x5e8   :  { %v3475_v48 = vpop.f32.mrf.mxu2  ;;  %v3712_v15 = vpop.f32.mrf.mxu3  ;;  %3934 = vmatpush.bf16.msrb.mxu0 %v13631_v53 }
 0x5e9   :  { %v2735_v3 = vmax.f32 %v2671_v7, 0.0  ;;  %v16415_v39 = vadd.f32 %v3712_v15, %v3471_v34  ;;  %v13630_v15 = vld [vmem:[#allocation7 + $0xc0] sm:$0xff] }
 0x5ea   :  { %v3258_v46 = vpop.f32.mrf.mxu1 }
 0x5eb   :  { %v16417_v31 = vpack.c.bf16 %v2735_v3, %v2734_v56  ;;  %v3476_v19 = vadd.f32 %v3475_v48, %v3258_v46 }
 0x5ec   :  { %v2508_v28 = vpop.f32.mrf.mxu0  ;;  %3935 = vmatpush.bf16.msrb.mxu0 %v13630_v15 }
 0x5ed   :  { %18321 = vst [vmem:[#allocation120_spill] sm:$0xff] %v16417_v31  ;;  %v2604_v44 = vadd.f32 %v2508_v28, %v15884_v63  ;;  %3517 = vmatmul.bf16.gmra.mxu2 %v16417_v31  ;;  %3754 = vmatmul.bf16.gmra.mxu3 %v16417_v31  ;;  %v16429_v28 = vld [vmem:[#allocation5] ss:$0 sm:$0xff] }
 0x5ef   :  { %v2672_v32 = vadd.f32 %v16027_v38, %v2604_v44 }
 0x5f0   :  { %v3478_v52 = vpop.f32.mrf.mxu2  ;;  %v3715_v1 = vpop.f32.mrf.mxu3 }
 0x5f1   :  { %v2736_v34 = vmax.f32 %v2672_v32, 0.0  ;;  %v16423_v7 = vadd.f32 %v3715_v1, %v3474_v60 }
 0x5f2   :  { %v3261_v56 = vpop.f32.mrf.mxu1 }
 0x5f3   :  { %v3479_v48 = vadd.f32 %v3478_v52, %v3261_v56  ;;  %v16425_v46 = vpack.c.bf16 %v2736_v34, %v2735_v3 }
 0x5f4   :  { %v2511_v42 = vpop.f32.mrf.mxu0 }
 0x5f5   :  { %18322 = vst [vmem:[#allocation121_spill] sm:$0xff] %v16425_v46  ;;  %v2605_v63 = vadd.f32 %v2511_v42, %v15901_v47  ;;  %3300 = vmatmul.bf16.gmra.mxu1 %v16425_v46 }
 0x5f7   :  { %v2673_v38 = vadd.f32 %v16429_v28, %v2605_v63  ;;  %11236 = vmatmul.msk.bf16.gmra.mxu0 %vm317_vm1, %v15895_v36 }
 0x5f8   :  { %v3480_v60 = vpop.f32.mrf.mxu2  ;;  %v3717_v44 = vpop.f32.mrf.mxu3 }
 0x5f9   :  { %v2737_v53 = vmax.f32 %v2673_v38, 0.0  ;;  %v16434_v32 = vadd.f32 %v3717_v44, %v3476_v19  ;;  %v249_v19 = vld [vmem:[%s17827_s0 + $0x318] sm:$0xff] }
 0x5fa   :  { %v3263_v3 = vpop.f32.mrf.mxu1 }
 0x5fb   :  { %v16436_v52 = vpack.c.bf16 %v2737_v53, %v2736_v34  ;;  %v3481_v1 = vadd.f32 %v3480_v60, %v3263_v3 }
 0x5fc   :  { %v2513_v56 = vpop.f32.mrf.mxu0 }
 0x5fd   :  { %18323 = vst [vmem:[#allocation122_spill] sm:$0xff] %v16436_v52  ;;  %v2606_v47 = vadd.f32 %v2513_v56, %v15912_v24  ;;  %3522 = vmatmul.bf16.gmra.mxu2 %v16436_v52  ;;  %3759 = vmatmul.bf16.gmra.mxu3 %v16436_v52  ;;  %v14225_v24 = vld [vmem:[%s17827_s0 + $0x310] sm:$0xff] }
 0x5fe   :  { %v2383_v3 = vpack.c.bf16 %v249_v19, %v14225_v24 }
 0x5ff   :  { %v2674_v15 = vadd.f32 %v16429_v28, %v2606_v47 }
 0x600   :  { %v3483_v42 = vpop.f32.mrf.mxu2  ;;  %v3720_v36 = vpop.f32.mrf.mxu3 }
 0x601   :  { %v2738_v63 = vmax.f32 %v2674_v15, 0.0  ;;  %v16445_v38 = vadd.f32 %v3720_v36, %v3479_v48 }
 0x602   :  { %v3266_v34 = vpop.f32.mrf.mxu1 }
 0x603   :  { %18324 = vst [vmem:[#allocation123_spill] sm:$0xff] %v16445_v38  ;;  %v3484_v60 = vadd.f32 %v3483_v42, %v3266_v34  ;;  %v16447_v44 = vpack.c.bf16 %v2738_v63, %v2737_v53 }
 0x604   :  { %v2516_v56 = vpop.f32.mrf.mxu0 }
 0x605   :  { %v2607_v47 = vadd.f32 %v2516_v56, %v15922_v59  ;;  %3305 = vmatmul.bf16.gmra.mxu1 %v16447_v44 }
 0x607   :  { %v2675_v46 = vadd.f32 %v16429_v28, %v2607_v47  ;;  %11237 = vmatmul.msk.bf16.gmra.mxu0 %vm317_vm1, %v2383_v3 }
 0x608   :  { %v3485_v48 = vpop.f32.mrf.mxu2  ;;  %v3722_v15 = vpop.f32.mrf.mxu3 }
 0x609   :  { %v2739_v36 = vmax.f32 %v2675_v46, 0.0  ;;  %v16456_v42 = vadd.f32 %v3722_v15, %v3481_v1  ;;  %v1860_v1 = vadd.f32 %v15942_v27, %v15907_v20 }
 0x60a   :  { %v3268_v53 = vpop.f32.mrf.mxu1 }
 0x60b   :  { %v16458_v34 = vpack.c.bf16 %v2739_v36, %v2738_v63  ;;  %v3486_v17 = vadd.f32 %v3485_v48, %v3268_v53 }
 0x60c   :  { %v2518_v38 = vpop.f32.mrf.mxu0 }
 0x60d   :  { %18325 = vst [vmem:[#allocation124_spill] sm:$0xff] %v16458_v34  ;;  %v2608_v19 = vadd.f32 %v2518_v38, %v15928_v49  ;;  %3527 = vmatmul.bf16.gmra.mxu2 %v16458_v34  ;;  %3764 = vmatmul.bf16.gmra.mxu3 %v16458_v34  ;;  %v2114_v38 = vadd.f32 %v15932_v37, %v1860_v1 }
 0x60f   :  { %v2676_v59 = vadd.f32 %v16429_v28, %v2608_v19  ;;  %v2368_v27 = vadd.f32 %v15934_v8, %v2114_v38 }
 0x610   :  { %v3488_v24 = vpop.f32.mrf.mxu2  ;;  %v3725_v3 = vpop.f32.mrf.mxu3 }
 0x611   :  { %v2740_v56 = vmax.f32 %v2676_v59, 0.0  ;;  %v16464_v47 = vadd.f32 %v3725_v3, %v3484_v60 }
 0x612   :  { %v3271_v46 = vpop.f32.mrf.mxu1 }
 0x613   :  { %v3489_v63 = vadd.f32 %v3488_v24, %v3271_v46  ;;  %v16468_v48 = vpack.c.bf16 %v2740_v56, %v2739_v36  ;;  %v13640_v46 = vld [vmem:[#allocation7 + $0x110] sm:$0xff] }
 0x614   :  { %v2521_v15 = vpop.f32.mrf.mxu0  ;;  %4235 = vmatpush.bf16.msra.mxu1 %v13640_v46 }
 0x615   :  { %18326 = vst [vmem:[#allocation125_spill] sm:$0xff] %v16468_v48  ;;  %v2609_v49 = vadd.f32 %v2521_v15, %v15939_v40  ;;  %3310 = vmatmul.bf16.gmra.mxu1 %v16468_v48  ;;  %v16481_v40 = vpack.c.bf16 0.0, %v2740_v56  ;;  %v1862_v56 = vadd.f32 %v15959_v41, %v15925_v0  ;;  %v13650_v41 = vld [vmem:[#allocation7 + $0x160] sm:$0xff] }
 0x617   :  { %v2677_v53 = vadd.f32 %v16429_v28, %v2609_v49  ;;  %3936 = vmatmul.bf16.vlgmr.msrb.gmra.mxu0 %v16038_v6  ;;  %18327 = vst [vmem:[#allocation126_spill] sm:$0xff] %v16481_v40  ;;  %v13652_v49 = vld [vmem:[#allocation7 + $0x170] sm:$0xff] }
 0x618   :  { %v3490_v60 = vpop.f32.mrf.mxu2  ;;  %v3727_v19 = vpop.f32.mrf.mxu3  ;;  %4530 = vmatpush.bf16.msrb.mxu2 %v13652_v49 }
 0x619   :  { %v2741_v59 = vmax.f32 %v2677_v53, 0.0  ;;  %v16475_v3 = vadd.f32 %v3727_v19, %v3486_v17 }
 0x61a   :  { %v3273_v20 = vpop.f32.mrf.mxu1 }
 0x61b   :  { %v3491_v36 = vadd.f32 %v3490_v60, %v3273_v20  ;;  %v16479_v24 = vpack.c.bf16 %v2741_v59, %v18234_v12  ;;  %v13660_v20 = vld [vmem:[#allocation7 + $0x1b0] sm:$0xff]  ;;  %v18342_v12 = vld [vmem:[#allocation64_spill] sm:$0xff] }
 0x61c   :  { %v2523_v37 = vpop.f32.mrf.mxu0  ;;  %4832 = vmatpush.bf16.msrb.mxu3 %v13660_v20 }
 0x61d   :  { %v2610_v1 = vadd.f32 %v2523_v37, %v2368_v27  ;;  %3532 = vmatmul.bf16.gmra.mxu2 %v16479_v24  ;;  %3769 = vmatmul.bf16.gmra.mxu3 %v16481_v40  ;;  %v13651_v37 = vld [vmem:[#allocation7 + $0x168] sm:$0xff] }
 0x61e   :  { %4531 = vmatpush.bf16.msrb.mxu2 %v13651_v37 }
 0x61f   :  { %v2678_v6 = vadd.f32 %v16429_v28, %v2610_v1 }
 0x620   :  { %v3493_v17 = vpop.f32.mrf.mxu2  ;;  %v3730_v15 = vpop.f32.mrf.mxu3 }
 0x621   :  { %v2742_v8 = vmax.f32 %v2678_v6, 0.0  ;;  %v16486_v38 = vadd.f32 %v3730_v15, %v3489_v63  ;;  %v2116_v63 = vadd.f32 %v15949_v35, %v1862_v56 }
 0x622   :  { %v3276_v53 = vpop.f32.mrf.mxu1  ;;  %4532 = vmatpush.bf16.msrb.mxu2 %v13650_v41 }
 0x623   :  { %v3494_v60 = vadd.f32 %v3493_v17, %v3276_v53  ;;  %v16490_v19 = vpack.c.bf16 %v2742_v8, %v2741_v59 }
 0x624   :  { %v2526_v27 = vpop.f32.mrf.mxu0 }
 0x625   :  { %18328 = vst [vmem:[#allocation127_spill] sm:$0xff] %v16490_v19  ;;  %v2611_v46 = vadd.f32 %v2526_v27, %v15956_v62  ;;  %3315 = vmatmul.bf16.gmra.mxu1 %v16490_v19  ;;  %v2370_v62 = vadd.f32 %v15951_v25, %v2116_v63  ;;  %v13649_v27 = vld [vmem:[#allocation7 + $0x158] sm:$0xff] }
 0x626   :  { %4533 = vmatpush.bf16.msrb.mxu2 %v13649_v27  ;;  %v18332_v27 = vld [vmem:[#allocation77_spill] sm:$0xff] }
 0x627   :  { %v2679_v1 = vadd.f32 %v16429_v28, %v2611_v46  ;;  %3941 = vmatmul.bf16.gmra.mxu0 %v16056_v57  ;;  %v13648_v46 = vld [vmem:[#allocation7 + $0x150] sm:$0xff] }
 0x628   :  { %v3495_v6 = vpop.f32.mrf.mxu2  ;;  %v3732_v0 = vpop.f32.mrf.mxu3 }
 0x629   :  { %v2743_v59 = vmax.f32 %v2679_v1, 0.0  ;;  %v16497_v17 = vadd.f32 %v3732_v0, %v3491_v36 }
 0x62a   :  { %v3278_v15 = vpop.f32.mrf.mxu1  ;;  %4534 = vmatpush.bf16.msrb.mxu2 %v13648_v46 }
 0x62b   :  { %v16500_v49 = vpack.c.bf16 %v2743_v59, %v2742_v8  ;;  %v3496_v53 = vadd.f32 %v3495_v6, %v3278_v15  ;;  %v1864_v8 = vadd.f32 %v15976_v50, %v15945_v43  ;;  %v13647_v15 = vld [vmem:[#allocation7 + $0x148] sm:$0xff]  ;;  %v13646_v50 = vld [vmem:[#allocation7 + $0x140] sm:$0xff] }
 0x62c   :  { %v2528_v20 = vpop.f32.mrf.mxu0 }
 0x62d   :  { %18329 = vst [vmem:[#allocation128_spill] sm:$0xff] %v16500_v49  ;;  %v2612_v35 = vadd.f32 %v2528_v20, %v2370_v62  ;;  %3537 = vmatmul.bf16.gmra.mxu2 %v16500_v49  ;;  %3774 = vmatmul.bf16.gmra.mxu3 %v16500_v49  ;;  %v13659_v62 = vld [vmem:[#allocation7 + $0x1a8] sm:$0xff] }
 0x62e   :  { %4535 = vmatpush.bf16.msrb.mxu2 %v13647_v15  ;;  %4833 = vmatpush.bf16.msrb.mxu3 %v13659_v62 }
 0x62f   :  { %v2680_v56 = vadd.f32 %v16429_v28, %v2612_v35 }
 0x630   :  { %v3498_v37 = vpop.f32.mrf.mxu2  ;;  %v3735_v36 = vpop.f32.mrf.mxu3 }
 0x631   :  { %v2744_v1 = vmax.f32 %v2680_v56, 0.0  ;;  %v16505_v0 = vadd.f32 %v3735_v36, %v3494_v60  ;;  %v2118_v60 = vadd.f32 %v18332_v27, %v1864_v8  ;;  %v18333_v56 = vld [vmem:[#allocation31_spill] sm:$0xff]  ;;  %v13639_v27 = vld [vmem:[#allocation7 + $0x108] sm:$0xff] }
 0x632   :  { %v3281_v25 = vpop.f32.mrf.mxu1  ;;  %4536 = vmatpush.bf16.msrb.mxu2 %v13646_v50  ;;  %4236 = vmatpush.bf16.msra.mxu1 %v13639_v27  ;;  %v13638_v50 = vld [vmem:[#allocation7 + $0x100] sm:$0xff] }
 0x633   :  { %18330 = vst [vmem:[#allocation129_spill] sm:$0xff] %v16505_v0  ;;  %v3499_v63 = vadd.f32 %v3498_v37, %v3281_v25  ;;  %v16509_v6 = vpack.c.bf16 %v2744_v1, %v2743_v59  ;;  %v13658_v59 = vld [vmem:[#allocation7 + $0x1a0] sm:$0xff] }
 0x634   :  { %v2531_v41 = vpop.f32.mrf.mxu0  ;;  %4834 = vmatpush.bf16.msrb.mxu3 %v13658_v59  ;;  %v13656_v59 = vld [vmem:[#allocation7 + $0x190] sm:$0xff] }
 0x635   :  { %18331 = vst [vmem:[#allocation130_spill] sm:$0xff] %v16509_v6  ;;  %v2613_v20 = vadd.f32 %v2531_v41, %v15973_v54  ;;  %3320 = vmatmul.bf16.gmra.mxu1 %v16509_v6  ;;  %v18335_v54 = vld [vmem:[#allocation58_spill] sm:$0xff] }
 0x636   :  { %v2372_v41 = vadd.f32 %v18335_v54, %v2118_v60  ;;  %4237 = vmatpush.bf16.msra.mxu1 %v13638_v50  ;;  %v18339_v54 = vld [vmem:[#allocation66_spill] sm:$0xff] }
 0x637   :  { %v2681_v35 = vadd.f32 %v16429_v28, %v2613_v20  ;;  %3946 = vmatmul.bf16.gmra.mxu0 %v18333_v56  ;;  %v13657_v20 = vld [vmem:[#allocation7 + $0x198] sm:$0xff] }
 0x638   :  { %v3500_v36 = vpop.f32.mrf.mxu2  ;;  %v3737_v43 = vpop.f32.mrf.mxu3  ;;  %4835 = vmatpush.bf16.msrb.mxu3 %v13657_v20  ;;  %v13655_v20 = vld [vmem:[#allocation7 + $0x188] sm:$0xff] }
 0x639   :  { %v2745_v37 = vmax.f32 %v2681_v35, 0.0  ;;  %v16516_v46 = vadd.f32 %v3737_v43, %v3496_v53 }
 0x63a   :  { %v3283_v25 = vpop.f32.mrf.mxu1 }
 0x63b   :  { %18334 = vst [vmem:[#allocation77_spill] sm:$0xff] %v16516_v46  ;;  %v16519_v15 = vpack.c.bf16 %v2745_v37, %v2744_v1  ;;  %v3501_v62 = vadd.f32 %v3500_v36, %v3283_v25  ;;  %v18338_v25 = vld [vmem:[#allocation57_spill] sm:$0xff] }
 0x63c   :  { %v2533_v8 = vpop.f32.mrf.mxu0  ;;  %4836 = vmatpush.bf16.msrb.mxu3 %v13656_v59  ;;  %v18341_v46 = vld [vmem:[#allocation65_spill] sm:$0xff] }
 0x63d   :  { %18336 = vst [vmem:[#allocation31_spill] sm:$0xff] %v16519_v15  ;;  %v2614_v6 = vadd.f32 %v2533_v8, %v2372_v41  ;;  %3542 = vmatmul.bf16.gmra.mxu2 %v16519_v15  ;;  %3779 = vmatmul.bf16.gmra.mxu3 %v16519_v15  ;;  %v1866_v41 = vadd.f32 %v18339_v54, %v18338_v25 }
 0x63f   :  { %v2682_v53 = vadd.f32 %v16429_v28, %v2614_v6 }
 0x640   :  { %v3503_v35 = vpop.f32.mrf.mxu2  ;;  %v3740_v43 = vpop.f32.mrf.mxu3  ;;  %4837 = vmatpush.bf16.msrb.mxu3 %v13655_v20 }
 0x641   :  { %v2746_v60 = vmax.f32 %v2682_v53, 0.0  ;;  %v16524_v1 = vadd.f32 %v3740_v43, %v3499_v63  ;;  %v2120_v53 = vadd.f32 %v18342_v12, %v1866_v41  ;;  %v18343_v43 = vld [vmem:[#allocation28_spill] sm:$0xff] }
 0x642   :  { %v3286_v36 = vpop.f32.mrf.mxu1 }
 0x643   :  { %18337 = vst [vmem:[#allocation58_spill] sm:$0xff] %v16524_v1  ;;  %v3504_v8 = vadd.f32 %v3503_v35, %v3286_v36  ;;  %v16528_v19 = vpack.c.bf16 %v2746_v60, %v2745_v37  ;;  %v13654_v1 = vld [vmem:[#allocation7 + $0x180] sm:$0xff]  ;;  %v18345_v36 = vld [vmem:[#allocation62_spill] sm:$0xff] }
 0x644   :  { %v2536_v27 = vpop.f32.mrf.mxu0  ;;  %4838 = vmatpush.bf16.msrb.mxu3 %v13654_v1  ;;  %v2374_v54 = vadd.f32 %v18345_v36, %v2120_v53  ;;  %v18348_v1 = vld [vmem:[#allocation61_spill] sm:$0xff] }
 0x645   :  { %18340 = vst [vmem:[#allocation57_spill] sm:$0xff] %v16528_v19  ;;  %v2615_v6 = vadd.f32 %v2536_v27, %v18341_v46  ;;  %3325 = vmatmul.bf16.gmra.mxu1 %v16528_v19 }
 0x647   :  { %v2683_v63 = vadd.f32 %v16429_v28, %v2615_v6  ;;  %3951 = vmatmul.bf16.gmra.mxu0 %v18343_v43 }
 0x648   :  { %v3505_v50 = vpop.f32.mrf.mxu2  ;;  %v3742_v59 = vpop.f32.mrf.mxu3 }
 0x649   :  { %v2747_v25 = vmax.f32 %v2683_v63, 0.0  ;;  %v16535_v35 = vadd.f32 %v3742_v59, %v3501_v62 }
 0x64a   :  { %v3288_v37 = vpop.f32.mrf.mxu1 }
 0x64b   :  { %18344 = vst [vmem:[#allocation66_spill] sm:$0xff] %v16535_v35  ;;  %v16538_v46 = vpack.c.bf16 %v2747_v25, %v2746_v60  ;;  %v3506_v27 = vadd.f32 %v3505_v50, %v3288_v37  ;;  %v18349_v35 = vld [vmem:[#allocation72_spill] sm:$0xff]  ;;  %v18351_v37 = vld [vmem:[#allocation21_spill] sm:$0xff] }
 0x64c   :  { %v2538_v20 = vpop.f32.mrf.mxu0  ;;  %v1868_v53 = vadd.f32 %v18349_v35, %v18348_v1 }
 0x64d   :  { %18346 = vst [vmem:[#allocation65_spill] sm:$0xff] %v16538_v46  ;;  %v2616_v19 = vadd.f32 %v2538_v20, %v2374_v54  ;;  %3547 = vmatmul.bf16.gmra.mxu2 %v16538_v46  ;;  %3784 = vmatmul.bf16.gmra.mxu3 %v16538_v46  ;;  %v18352_v20 = vld [vmem:[#allocation69_spill] sm:$0xff] }
 0x64e   :  { %v2122_v48 = vadd.f32 %v18352_v20, %v1868_v53 }
 0x64f   :  { %v2684_v12 = vadd.f32 %v16429_v28, %v2616_v19 }
 0x650   :  { %v3508_v41 = vpop.f32.mrf.mxu2  ;;  %v3745_v6 = vpop.f32.mrf.mxu3 }
 0x651   :  { %v2748_v63 = vmax.f32 %v2684_v12, 0.0  ;;  %v16543_v62 = vadd.f32 %v3745_v6, %v3504_v8 }
 0x652   :  { %v3291_v59 = vpop.f32.mrf.mxu1 }
 0x653   :  { %18347 = vst [vmem:[#allocation64_spill] sm:$0xff] %v16543_v62  ;;  %v3509_v60 = vadd.f32 %v3508_v41, %v3291_v59  ;;  %v16547_v36 = vpack.c.bf16 %v2748_v63, %v2747_v25  ;;  %v18354_v62 = vld [vmem:[#allocation71_spill] sm:$0xff]  ;;  %v16556_v41 = vpack.c.bf16 0.0, %v2748_v63 }
 0x654   :  { %v2541_v50 = vpop.f32.mrf.mxu0  ;;  %v2376_v0 = vadd.f32 %v18354_v62, %v2122_v48  ;;  %v18357_v62 = vld [vmem:[#allocation68_spill] sm:$0xff] }
 0x655   :  { %18350 = vst [vmem:[#allocation28_spill] sm:$0xff] %v16547_v36  ;;  %v2617_v54 = vadd.f32 %v2541_v50, %v18351_v37  ;;  %3330 = vmatmul.bf16.gmra.mxu1 %v16547_v36  ;;  %v18362_v36 = vld [vmem:[#allocation78_spill] sm:$0xff] }
 0x656   :  { %18355 = vst [vmem:[#allocation61_spill] sm:$0xff] %v16556_v41 }
 0x657   :  { %3956 = vmatmul.bf16.gmra.mxu0 %v16118_v18  ;;  %v16559_v59 = vadd.f32 %v16429_v28, %v2617_v54 }
 0x658   :  { %v3510_v19 = vpop.f32.mrf.mxu2  ;;  %v3747_v12 = vpop.f32.mrf.mxu3 }
 0x659   :  { %v16553_v8 = vadd.f32 %v3747_v12, %v3506_v27  ;;  %v17969_v37 = vmax.f32 %v16559_v59, 0.0 }
 0x65a   :  { %v3293_v6 = vpop.f32.mrf.mxu1 }
 0x65b   :  { %18353 = vst [vmem:[#allocation62_spill] sm:$0xff] %v16553_v8  ;;  %v3511_v35 = vadd.f32 %v3510_v19, %v3293_v6  ;;  %v18358_v19 = vld [vmem:[#allocation80_spill] sm:$0xff] }
 0x65c   :  { %v2543_v25 = vpop.f32.mrf.mxu0  ;;  %v1870_v12 = vadd.f32 %v18358_v19, %v18357_v62 }
 0x65d   :  { %v2618_v1 = vadd.f32 %v2543_v25, %v2376_v0  ;;  %3789 = vmatmul.bf16.gmra.mxu3 %v16556_v41  ;;  %4537 = vmatmul.bf16.vlgmr.msrb.gmra.mxu2 %v16056_v57  ;;  %v18360_v57 = vld [vmem:[#allocation79_spill] sm:$0xff] }
 0x65e   :  { %v2124_v41 = vadd.f32 %v18362_v36, %v1870_v12 }
 0x65f   :  { %v2686_v53 = vadd.f32 %v16429_v28, %v2618_v1  ;;  %v18361_v1 = vld [vmem:[#allocation86_spill] sm:$0xff] }
 0x660   :  { %v3513_v50 = vpop.f32.mrf.mxu2  ;;  %v3750_v27 = vpop.f32.mrf.mxu3 }
 0x661   :  { %v2750_v20 = vmax.f32 %v2686_v53, 0.0  ;;  %v16565_v48 = vadd.f32 %v3750_v27, %v3509_v60 }
 0x662   :  { %v3296_v63 = vpop.f32.mrf.mxu1 }
 0x663   :  { %18356 = vst [vmem:[#allocation72_spill] sm:$0xff] %v16565_v48  ;;  %v3514_v54 = vadd.f32 %v3513_v50, %v3296_v63  ;;  %v16571_v0 = vpack.c.bf16 %v2750_v20, %v17969_v37  ;;  %v18364_v63 = vld [vmem:[#allocation76_spill] sm:$0xff] }
 0x664   :  { %v2546_v6 = vpop.f32.mrf.mxu0  ;;  %v2378_v19 = vadd.f32 %v18364_v63, %v2124_v41 }
 0x665   :  { %18359 = vst [vmem:[#allocation21_spill] sm:$0xff] %v16571_v0  ;;  %v2619_v25 = vadd.f32 %v2546_v6, %v18360_v57  ;;  %4238 = vmatmul.bf16.vlgmr.msra.gmra.mxu1 %v18361_v1 }
 0x667   :  { %v2687_v53 = vadd.f32 %v16429_v28, %v2619_v25  ;;  %3961 = vmatmul.bf16.gmra.mxu0 %v16141_v4 }
 0x668   :  { %v3515_v60 = vpop.f32.mrf.mxu2  ;;  %v3752_v27 = vpop.f32.mrf.mxu3 }
 0x669   :  { %v2751_v48 = vmax.f32 %v2687_v53, 0.0  ;;  %v16578_v62 = vadd.f32 %v3752_v27, %v3511_v35  ;;  %v18367_v27 = vld [vmem:[#allocation75_spill] sm:$0xff] }
 0x66a   :  { %v3298_v50 = vpop.f32.mrf.mxu1 }
 0x66b   :  { %18363 = vst [vmem:[#allocation69_spill] sm:$0xff] %v16578_v62  ;;  %v16581_v37 = vpack.c.bf16 %v2751_v48, %v2750_v20  ;;  %v3516_v0 = vadd.f32 %v3515_v60, %v3298_v50  ;;  %v18368_v62 = vld [vmem:[#allocation84_spill] sm:$0xff]  ;;  %v18370_v50 = vld [vmem:[#allocation85_spill] sm:$0xff] }
 0x66c   :  { %v2548_v6 = vpop.f32.mrf.mxu0  ;;  %v1872_v41 = vadd.f32 %v18368_v62, %v18367_v27 }
 0x66d   :  { %18365 = vst [vmem:[#allocation71_spill] sm:$0xff] %v16581_v37  ;;  %v2620_v57 = vadd.f32 %v2548_v6, %v2378_v19  ;;  %4542 = vmatmul.bf16.gmra.mxu2 %v18333_v56  ;;  %4839 = vmatmul.bf16.vlgmr.msrb.gmra.mxu3 %v16118_v18  ;;  %v18371_v56 = vld [vmem:[#allocation90_spill] sm:$0xff] }
 0x66e   :  { %v18372_v18 = vld [vmem:[#allocation82_spill] sm:$0xff] }
 0x66f   :  { %v2688_v36 = vadd.f32 %v16429_v28, %v2620_v57  ;;  %v2126_v6 = vadd.f32 %v18372_v18, %v1872_v41 }
 0x670   :  { %v3518_v12 = vpop.f32.mrf.mxu2  ;;  %v3755_v25 = vpop.f32.mrf.mxu3 }
 0x671   :  { %v2752_v1 = vmax.f32 %v2688_v36, 0.0  ;;  %v16586_v53 = vadd.f32 %v3755_v25, %v3514_v54 }
 0x672   :  { %v3301_v35 = vpop.f32.mrf.mxu1 }
 0x673   :  { %18366 = vst [vmem:[#allocation68_spill] sm:$0xff] %v16586_v53  ;;  %v3519_v20 = vadd.f32 %v3518_v12, %v3301_v35  ;;  %v16590_v63 = vpack.c.bf16 %v2752_v1, %v2751_v48  ;;  %v18374_v12 = vld [vmem:[#allocation83_spill] sm:$0xff] }
 0x674   :  { %v2551_v60 = vpop.f32.mrf.mxu0  ;;  %v2380_v48 = vadd.f32 %v18374_v12, %v2126_v6 }
 0x675   :  { %18369 = vst [vmem:[#allocation80_spill] sm:$0xff] %v16590_v63  ;;  %v2621_v19 = vadd.f32 %v2551_v60, %v18370_v50  ;;  %4243 = vmatmul.bf16.gmra.mxu1 %v18371_v56  ;;  %v18378_v63 = vld [vmem:[#allocation88_spill] sm:$0xff] }
 0x677   :  { %v2689_v57 = vadd.f32 %v16429_v28, %v2621_v19  ;;  %3966 = vmatmul.bf16.gmra.mxu0 %v16156_v58 }
 0x678   :  { %v3520_v54 = vpop.f32.mrf.mxu2  ;;  %v3757_v36 = vpop.f32.mrf.mxu3 }
 0x679   :  { %v2753_v25 = vmax.f32 %v2689_v57, 0.0  ;;  %v16597_v53 = vadd.f32 %v3757_v36, %v3516_v0  ;;  %v18377_v36 = vld [vmem:[#allocation81_spill] sm:$0xff] }
 0x67a   :  { %v3303_v62 = vpop.f32.mrf.mxu1  ;;  %v1874_v6 = vadd.f32 %v18378_v63, %v18377_v36 }
 0x67b   :  { %18373 = vst [vmem:[#allocation79_spill] sm:$0xff] %v16597_v53  ;;  %v16600_v35 = vpack.c.bf16 %v2753_v25, %v2752_v1  ;;  %v3521_v27 = vadd.f32 %v3520_v54, %v3303_v62  ;;  %v18380_v62 = vld [vmem:[#allocation87_spill] sm:$0xff] }
 0x67c   :  { %v2553_v60 = vpop.f32.mrf.mxu0 }
 0x67d   :  { %18375 = vst [vmem:[#allocation86_spill] sm:$0xff] %v16600_v35  ;;  %v2622_v50 = vadd.f32 %v2553_v60, %v2380_v48  ;;  %4547 = vmatmul.bf16.gmra.mxu2 %v18343_v43  ;;  %4844 = vmatmul.bf16.gmra.mxu3 %v16141_v4  ;;  %v18381_v43 = vld [vmem:[#allocation38_spill] sm:$0xff]  ;;  %v18382_v60 = vld [vmem:[#allocation89_spill] sm:$0xff] }
 0x67e   :  { %v2128_v53 = vadd.f32 %v18382_v60, %v1874_v6 }
 0x67f   :  { %v2690_v41 = vadd.f32 %v16429_v28, %v2622_v50 }
 0x680   :  { %v3523_v19 = vpop.f32.mrf.mxu2  ;;  %v3760_v56 = vpop.f32.mrf.mxu3 }
 0x681   :  { %v2754_v18 = vmax.f32 %v2690_v41, 0.0  ;;  %v16605_v57 = vadd.f32 %v3760_v56, %v3519_v20 }
 0x682   :  { %v3306_v0 = vpop.f32.mrf.mxu1 }
 0x683   :  { %18376 = vst [vmem:[#allocation78_spill] sm:$0xff] %v16605_v57  ;;  %v3524_v1 = vadd.f32 %v3523_v19, %v3306_v0  ;;  %v16609_v12 = vpack.c.bf16 %v2754_v18, %v2753_v25  ;;  %v18384_v19 = vld [vmem:[#allocation91_spill] sm:$0xff] }
 0x684   :  { %v2556_v54 = vpop.f32.mrf.mxu0  ;;  %v2382_v25 = vadd.f32 %v18384_v19, %v2128_v53 }
 0x685   :  { %18379 = vst [vmem:[#allocation76_spill] sm:$0xff] %v16609_v12  ;;  %v2623_v48 = vadd.f32 %v2556_v54, %v18380_v62  ;;  %4248 = vmatmul.bf16.gmra.mxu1 %v18381_v43  ;;  %v18386_v43 = vld [vmem:[#allocation47_spill] sm:$0xff] }
 0x687   :  { %v2691_v50 = vadd.f32 %v16429_v28, %v2623_v48  ;;  %3971 = vmatmul.bf16.gmra.mxu0 %v16169_v16 }
 0x688   :  { %v3525_v20 = vpop.f32.mrf.mxu2  ;;  %v3762_v41 = vpop.f32.mrf.mxu3 }
 0x689   :  { %v2755_v56 = vmax.f32 %v2691_v50, 0.0  ;;  %v16616_v57 = vadd.f32 %v3762_v41, %v3521_v27 }
 0x68a   :  { %v3308_v63 = vpop.f32.mrf.mxu1 }
 0x68b   :  { %18383 = vst [vmem:[#allocation75_spill] sm:$0xff] %v16616_v57  ;;  %v16619_v0 = vpack.c.bf16 %v2755_v56, %v2754_v18  ;;  %v3526_v36 = vadd.f32 %v3525_v20, %v3308_v63  ;;  %v18390_v63 = vld [vmem:[#allocation92_spill] sm:$0xff] }
 0x68c   :  { %v2558_v54 = vpop.f32.mrf.mxu0 }
 0x68d   :  { %18385 = vst [vmem:[#allocation84_spill] sm:$0xff] %v16619_v0  ;;  %v2624_v62 = vadd.f32 %v2558_v54, %v2382_v25  ;;  %4552 = vmatmul.bf16.gmra.mxu2 %v18386_v43  ;;  %4849 = vmatmul.bf16.gmra.mxu3 %v16156_v58  ;;  %v18391_v25 = vld [vmem:[#allocation24_spill] sm:$0xff] }
 0x68f   :  { %v16624_v6 = vadd.f32 %v16429_v28, %v2624_v62  ;;  %v18392_v28 = vld [vmem:[#allocation96_spill] sm:$0xff] }
 0x690   :  { %v3528_v48 = vpop.f32.mrf.mxu2  ;;  %v3765_v60 = vpop.f32.mrf.mxu3 }
 0x691   :  { %18387 = vst [vmem:[#allocation85_spill] sm:$0xff] %v16624_v6  ;;  %v17973_v27 = vmax.f32 %v16624_v6, 0.0  ;;  %v16627_v50 = vadd.f32 %v3765_v60, %v3524_v1 }
 0x692   :  { %v3311_v41 = vpop.f32.mrf.mxu1 }
 0x693   :  { %18388 = vst [vmem:[#allocation90_spill] sm:$0xff] %v16627_v50  ;;  %v3529_v53 = vadd.f32 %v3528_v48, %v3311_v41  ;;  %v16631_v18 = vpack.c.bf16 %v17973_v27, %v2755_v56  ;;  %v18395_v27 = vld [vmem:[#allocation23_spill] sm:$0xff] }
 0x694   :  { %v3937_v20 = vpop.f32.mrf.mxu0 }
 0x695   :  { %18389 = vst [vmem:[#allocation82_spill] sm:$0xff] %v16631_v18  ;;  %v16634_v19 = vadd.f32 %v3937_v20, %v18390_v63  ;;  %4253 = vmatmul.bf16.gmra.mxu1 %v18391_v25 }
 0x697   :  { %3976 = vmatmul.bf16.gmra.mxu0 %v18392_v28 }
 0x698   :  { %v3530_v54 = vpop.f32.mrf.mxu2  ;;  %v3767_v62 = vpop.f32.mrf.mxu3 }
 0x699   :  { %v16638_v43 = vadd.f32 %v3767_v62, %v3526_v36  ;;  %v18396_v36 = vld [vmem:[#allocation29_spill] sm:$0xff]  ;;  %v18397_v62 = vld [vmem:[#allocation98_spill] sm:$0xff] }
 0x69a   :  { %v3313_v1 = vpop.f32.mrf.mxu1 }
 0x69b   :  { %18393 = vst [vmem:[#allocation83_spill] sm:$0xff] %v16638_v43  ;;  %v3531_v60 = vadd.f32 %v3530_v54, %v3313_v1 }
 0x69c   :  { %v16640_v12 = vpop.f32.mrf.mxu0 }
 0x69d   :  { %4557 = vmatmul.bf16.gmra.mxu2 %v16141_v4  ;;  %4854 = vmatmul.bf16.gmra.mxu3 %v16169_v16 }
 0x6a0   :  { %v3533_v56 = vpop.f32.mrf.mxu2  ;;  %v3770_v48 = vpop.f32.mrf.mxu3 }
 0x6a1   :  { %v16644_v41 = vadd.f32 %v3770_v48, %v3529_v53 }
 0x6a2   :  { %v3316_v20 = vpop.f32.mrf.mxu1 }
 0x6a3   :  { %18394 = vst [vmem:[#allocation81_spill] sm:$0xff] %v16644_v41  ;;  %v3534_v63 = vadd.f32 %v3533_v56, %v3316_v20  ;;  %v18400_v41 = vld [vmem:[#allocation46_spill] sm:$0xff] }
 0x6a4   :  { %v3942_v25 = vpop.f32.mrf.mxu0 }
 0x6a5   :  { %v16647_v18 = vadd.f32 %v3942_v25, %v18395_v27  ;;  %4258 = vmatmul.bf16.gmra.mxu1 %v18396_v36 }
 0x6a7   :  { %3981 = vmatmul.bf16.gmra.mxu0 %v18397_v62 }
 0x6a8   :  { %v3535_v54 = vpop.f32.mrf.mxu2  ;;  %v3772_v1 = vpop.f32.mrf.mxu3 }
 0x6a9   :  { %v16651_v6 = vadd.f32 %v3772_v1, %v3531_v60  ;;  %v18401_v60 = vld [vmem:[#allocation94_spill] sm:$0xff] }
 0x6aa   :  { %v3318_v4 = vpop.f32.mrf.mxu1 }
 0x6ab   :  { %18398 = vst [vmem:[#allocation88_spill] sm:$0xff] %v16651_v6  ;;  %v3536_v43 = vadd.f32 %v3535_v54, %v3318_v4 }
 0x6ac   :  { %v16653_v50 = vpop.f32.mrf.mxu0 }
 0x6ad   :  { %4562 = vmatmul.bf16.gmra.mxu2 %v16156_v58  ;;  %4859 = vmatmul.bf16.gmra.mxu3 %v18392_v28 }
 0x6b0   :  { %v3538_v53 = vpop.f32.mrf.mxu2  ;;  %v3775_v56 = vpop.f32.mrf.mxu3 }
 0x6b1   :  { %v16657_v27 = vadd.f32 %v3775_v56, %v3534_v63 }
 0x6b2   :  { %v3321_v48 = vpop.f32.mrf.mxu1 }
 0x6b3   :  { %18399 = vst [vmem:[#allocation87_spill] sm:$0xff] %v16657_v27  ;;  %v3539_v20 = vadd.f32 %v3538_v53, %v3321_v48  ;;  %v18404_v27 = vld [vmem:[#allocation51_spill] sm:$0xff] }
 0x6b4   :  { %v3947_v25 = vpop.f32.mrf.mxu0 }
 0x6b5   :  { %v16660_v57 = vadd.f32 %v3947_v25, %v18400_v41  ;;  %4263 = vmatmul.bf16.gmra.mxu1 %v18401_v60 }
 0x6b7   :  { %3986 = vmatmul.bf16.gmra.mxu0 %v16221_v11 }
 0x6b8   :  { %v3540_v4 = vpop.f32.mrf.mxu2  ;;  %v3777_v54 = vpop.f32.mrf.mxu3 }
 0x6b9   :  { %v16664_v1 = vadd.f32 %v3777_v54, %v3536_v43  ;;  %v18405_v43 = vld [vmem:[#allocation33_spill] sm:$0xff] }
 0x6ba   :  { %v3323_v58 = vpop.f32.mrf.mxu1 }
 0x6bb   :  { %18402 = vst [vmem:[#allocation38_spill] sm:$0xff] %v16664_v1  ;;  %v3541_v28 = vadd.f32 %v3540_v4, %v3323_v58 }
 0x6bc   :  { %v16666_v6 = vpop.f32.mrf.mxu0 }
 0x6bd   :  { %4567 = vmatmul.bf16.gmra.mxu2 %v16169_v16  ;;  %4864 = vmatmul.bf16.gmra.mxu3 %v18397_v62 }
 0x6c0   :  { %v3543_v63 = vpop.f32.mrf.mxu2  ;;  %v3780_v53 = vpop.f32.mrf.mxu3 }
 0x6c1   :  { %v16670_v41 = vadd.f32 %v3780_v53, %v3539_v20  ;;  %v18407_v20 = vld [vmem:[#allocation97_spill] sm:$0xff] }
 0x6c2   :  { %v3326_v56 = vpop.f32.mrf.mxu1 }
 0x6c3   :  { %18403 = vst [vmem:[#allocation89_spill] sm:$0xff] %v16670_v41  ;;  %v3544_v48 = vadd.f32 %v3543_v63, %v3326_v56  ;;  %v13669_v41 = vld [vmem:[#allocation7 + $0x1f8] sm:$0xff] }
 0x6c4   :  { %v3952_v25 = vpop.f32.mrf.mxu0  ;;  %5133 = vmatpush.bf16.msra.mxu0 %v13669_v41 }
 0x6c5   :  { %v16673_v60 = vadd.f32 %v3952_v25, %v18404_v27  ;;  %4268 = vmatmul.bf16.gmra.mxu1 %v18405_v43 }
 0x6c7   :  { %3991 = vmatmul.bf16.gmra.mxu0 %v16238_v23 }
 0x6c8   :  { %v3545_v58 = vpop.f32.mrf.mxu2  ;;  %v3782_v4 = vpop.f32.mrf.mxu3 }
 0x6c9   :  { %v16677_v54 = vadd.f32 %v3782_v4, %v3541_v28  ;;  %v18409_v28 = vld [vmem:[#allocation34_spill] sm:$0xff] }
 0x6ca   :  { %v3328_v16 = vpop.f32.mrf.mxu1 }
 0x6cb   :  { %18406 = vst [vmem:[#allocation91_spill] sm:$0xff] %v16677_v54  ;;  %v3546_v1 = vadd.f32 %v3545_v58, %v3328_v16  ;;  %v13677_v16 = vld [vmem:[#allocation7 + $0x238] sm:$0xff]  ;;  %v18413_v54 = vld [vmem:[#allocation25_spill] sm:$0xff] }
 0x6cc   :  { %v16679_v36 = vpop.f32.mrf.mxu0  ;;  %5432 = vmatpush.bf16.msrb.mxu1 %v13677_v16  ;;  %v18412_v16 = vld [vmem:[#allocation93_spill] sm:$0xff] }
 0x6cd   :  { %4572 = vmatmul.bf16.gmra.mxu2 %v18407_v20  ;;  %4869 = vmatmul.bf16.gmra.mxu3 %v16221_v11 }
 0x6d0   :  { %v3548_v63 = vpop.f32.mrf.mxu2  ;;  %v3785_v53 = vpop.f32.mrf.mxu3 }
 0x6d1   :  { %v16683_v27 = vadd.f32 %v3785_v53, %v3544_v48 }
 0x6d2   :  { %v3331_v56 = vpop.f32.mrf.mxu1 }
 0x6d3   :  { %18408 = vst [vmem:[#allocation47_spill] sm:$0xff] %v16683_v27  ;;  %v3549_v25 = vadd.f32 %v3548_v63, %v3331_v56 }
 0x6d4   :  { %v3957_v43 = vpop.f32.mrf.mxu0 }
 0x6d5   :  { %v16686_v0 = vadd.f32 %v3957_v43, %v16210_v45  ;;  %4273 = vmatmul.bf16.gmra.mxu1 %v18409_v28  ;;  %v3396_v28 = vadd.f32 %v18413_v54, %v18412_v16 }
 0x6d7   :  { %3996 = vmatmul.bf16.gmra.mxu0 %v16256_v10 }
 0x6d8   :  { %v3550_v58 = vpop.f32.mrf.mxu2  ;;  %v3787_v4 = vpop.f32.mrf.mxu3 }
 0x6d9   :  { %v16690_v20 = vadd.f32 %v3787_v4, %v3546_v1 }
 0x6da   :  { %v3333_v48 = vpop.f32.mrf.mxu1 }
 0x6db   :  { %18410 = vst [vmem:[#allocation92_spill] sm:$0xff] %v16690_v20  ;;  %v3551_v53 = vadd.f32 %v3550_v58, %v3333_v48  ;;  %v18414_v58 = vld [vmem:[#allocation99_spill] sm:$0xff] }
 0x6dc   :  { %v3959_v27 = vpop.f32.mrf.mxu0 }
 0x6dd   :  { %v16693_v63 = vadd.f32 %v3959_v27, %v16219_v22  ;;  %4577 = vmatmul.bf16.gmra.mxu2 %v18397_v62  ;;  %4874 = vmatmul.bf16.gmra.mxu3 %v16238_v23  ;;  %v18415_v22 = vld [vmem:[#allocation59_spill] sm:$0xff]  ;;  %v18416_v62 = vld [vmem:[#allocation22_spill] sm:$0xff] }
 0x6de   :  { %v3796_v20 = vadd.f32 %v18416_v62, %v3396_v28 }
 0x6e0   :  { %v3790_v45 = vpop.f32.mrf.mxu3  ;;  %v4538_v41 = vpop.f32.mrf.mxu2 }
 0x6e1   :  { %v16697_v43 = vadd.f32 %v3790_v45, %v3549_v25  ;;  %v4098_v45 = vadd.f32 %v16640_v12, %v3796_v20  ;;  %v18421_v12 = vld [vmem:[#allocation32_spill] sm:$0xff] }
 0x6e2   :  { %v4239_v56 = vpop.f32.mrf.mxu1 }
 0x6e3   :  { %18411 = vst [vmem:[#allocation24_spill] sm:$0xff] %v16697_v43  ;;  %v4399_v1 = vadd.f32 %v4239_v56, %v16634_v19  ;;  %v18418_v56 = vld [vmem:[#allocation101_spill] sm:$0xff] }
 0x6e4   :  { %v3962_v4 = vpop.f32.mrf.mxu0 }
 0x6e5   :  { %v16703_v48 = vadd.f32 %v3962_v4, %v18414_v58  ;;  %4278 = vmatmul.bf16.gmra.mxu1 %v18415_v22  ;;  %v4698_v27 = vadd.f32 %v4538_v41, %v4399_v1  ;;  %v18420_v58 = vld [vmem:[#allocation42_spill] sm:$0xff] }
 0x6e7   :  { %4001 = vmatmul.bf16.gmra.mxu0 %v16275_v61 }
 0x6e8   :  { %v3792_v8 = vpop.f32.mrf.mxu3  ;;  %v4540_v25 = vpop.f32.mrf.mxu2 }
 0x6e9   :  { %v16709_v43 = vadd.f32 %v3792_v8, %v3551_v53  ;;  %v3401_v8 = vadd.f32 %v18421_v12, %v18420_v58 }
 0x6ea   :  { %v4241_v54 = vpop.f32.mrf.mxu1 }
 0x6eb   :  { %18417 = vst [vmem:[#allocation96_spill] sm:$0xff] %v16709_v43  ;;  %v4400_v16 = vadd.f32 %v4241_v54, %v4098_v45  ;;  %v18422_v45 = vld [vmem:[#allocation103_spill] sm:$0xff] }
 0x6ec   :  { %v3964_v19 = vpop.f32.mrf.mxu0 }
 0x6ed   :  { %v16712_v35 = vadd.f32 %v3964_v19, %v18418_v56  ;;  %4582 = vmatmul.bf16.gmra.mxu2 %v16221_v11  ;;  %4879 = vmatmul.bf16.gmra.mxu3 %v16256_v10  ;;  %v4699_v41 = vadd.f32 %v4540_v25, %v4400_v16  ;;  %v18423_v19 = vld [vmem:[#allocation40_spill] sm:$0xff]  ;;  %v18424_v11 = vld [vmem:[#allocation26_spill] sm:$0xff] }
 0x6ee   :  { %v3798_v10 = vadd.f32 %v18424_v11, %v3401_v8 }
 0x6f0   :  { %v4543_v62 = vpop.f32.mrf.mxu2  ;;  %v4840_v28 = vpop.f32.mrf.mxu3  ;;  %v4100_v16 = vadd.f32 %v16653_v50, %v3798_v10  ;;  %v18429_v50 = vld [vmem:[#allocation39_spill] sm:$0xff] }
 0x6f1   :  { %v16716_v1 = vadd.f32 %v4840_v28, %v4698_v27 }
 0x6f2   :  { %v4244_v4 = vpop.f32.mrf.mxu1 }
 0x6f3   :  { %18419 = vst [vmem:[#allocation23_spill] sm:$0xff] %v16716_v1  ;;  %v4401_v20 = vadd.f32 %v4244_v4, %v16647_v18  ;;  %v18426_v4 = vld [vmem:[#allocation63_spill] sm:$0xff] }
 0x6f4   :  { %v3967_v53 = vpop.f32.mrf.mxu0 }
 0x6f5   :  { %v16722_v54 = vadd.f32 %v3967_v53, %v18422_v45  ;;  %4283 = vmatmul.bf16.gmra.mxu1 %v18423_v19  ;;  %v4700_v56 = vadd.f32 %v4543_v62, %v4401_v20  ;;  %v18428_v45 = vld [vmem:[#allocation27_spill] sm:$0xff] }
 0x6f7   :  { %4006 = vmatmul.bf16.gmra.mxu0 %v16292_v2 }
 0x6f8   :  { %v4545_v25 = vpop.f32.mrf.mxu2  ;;  %v4842_v27 = vpop.f32.mrf.mxu3 }
 0x6f9   :  { %v16728_v28 = vadd.f32 %v4842_v27, %v4699_v41  ;;  %v3406_v41 = vadd.f32 %v18429_v50, %v18428_v45 }
 0x6fa   :  { %v4246_v58 = vpop.f32.mrf.mxu1 }
 0x6fb   :  { %18425 = vst [vmem:[#allocation46_spill] sm:$0xff] %v16728_v28  ;;  %v4402_v12 = vadd.f32 %v4246_v58, %v4100_v16  ;;  %v18430_v16 = vld [vmem:[#allocation41_spill] sm:$0xff] }
 0x6fc   :  { %v3969_v18 = vpop.f32.mrf.mxu0 }
 0x6fd   :  { %v16731_v1 = vadd.f32 %v3969_v18, %v18426_v4  ;;  %4587 = vmatmul.bf16.gmra.mxu2 %v16238_v23  ;;  %4884 = vmatmul.bf16.gmra.mxu3 %v16275_v61  ;;  %v4701_v62 = vadd.f32 %v4545_v25, %v4402_v12  ;;  %v18431_v18 = vld [vmem:[#allocation100_spill] sm:$0xff]  ;;  %v18432_v23 = vld [vmem:[#allocation35_spill] sm:$0xff]  ;;  %v18433_v25 = vld [vmem:[#allocation110_spill] sm:$0xff] }
 0x6fe   :  { %v3800_v28 = vadd.f32 %v18432_v23, %v3406_v41 }
 0x700   :  { %v4548_v11 = vpop.f32.mrf.mxu2  ;;  %v4845_v8 = vpop.f32.mrf.mxu3 }
 0x701   :  { %v16735_v20 = vadd.f32 %v4845_v8, %v4700_v56  ;;  %v4102_v8 = vadd.f32 %v16666_v6, %v3800_v28  ;;  %v18439_v6 = vld [vmem:[#allocation36_spill] sm:$0xff] }
 0x702   :  { %v4249_v53 = vpop.f32.mrf.mxu1 }
 0x703   :  { %18427 = vst [vmem:[#allocation51_spill] sm:$0xff] %v16735_v20  ;;  %v4403_v10 = vadd.f32 %v4249_v53, %v16660_v57  ;;  %v18435_v53 = vld [vmem:[#allocation44_spill] sm:$0xff] }
 0x704   :  { %v3972_v27 = vpop.f32.mrf.mxu0 }
 0x705   :  { %v16741_v58 = vadd.f32 %v3972_v27, %v18430_v16  ;;  %4288 = vmatmul.bf16.gmra.mxu1 %v18431_v18  ;;  %v4702_v4 = vadd.f32 %v4548_v11, %v4403_v10  ;;  %v18436_v27 = vld [vmem:[#allocation105_spill] sm:$0xff]  ;;  %v18438_v18 = vld [vmem:[#allocation95_spill] sm:$0xff] }
 0x706   :  { %v3411_v28 = vadd.f32 %v18439_v6, %v18438_v18 }
 0x707   :  { %4011 = vmatmul.bf16.gmra.mxu0 %v18433_v25 }
 0x708   :  { %v4550_v12 = vpop.f32.mrf.mxu2  ;;  %v4847_v56 = vpop.f32.mrf.mxu3 }
 0x709   :  { %v16747_v20 = vadd.f32 %v4847_v56, %v4701_v62  ;;  %v13668_v56 = vld [vmem:[#allocation7 + $0x1f0] sm:$0xff] }
 0x70a   :  { %v4251_v45 = vpop.f32.mrf.mxu1  ;;  %5134 = vmatpush.bf16.msra.mxu0 %v13668_v56 }
 0x70b   :  { %18434 = vst [vmem:[#allocation93_spill] sm:$0xff] %v16747_v20  ;;  %v4404_v50 = vadd.f32 %v4251_v45, %v4102_v8  ;;  %v18440_v45 = vld [vmem:[#allocation52_spill] sm:$0xff] }
 0x70c   :  { %v3974_v57 = vpop.f32.mrf.mxu0 }
 0x70d   :  { %v16750_v43 = vadd.f32 %v3974_v57, %v18435_v53  ;;  %4592 = vmatmul.bf16.gmra.mxu2 %v18436_v27  ;;  %4889 = vmatmul.bf16.gmra.mxu3 %v16292_v2  ;;  %v4703_v11 = vadd.f32 %v4550_v12, %v4404_v50  ;;  %v18441_v53 = vld [vmem:[#allocation104_spill] sm:$0xff]  ;;  %v13676_v12 = vld [vmem:[#allocation7 + $0x230] sm:$0xff]  ;;  %v18442_v50 = vld [vmem:[#allocation37_spill] sm:$0xff] }
 0x70e   :  { %v3802_v20 = vadd.f32 %v18442_v50, %v3411_v28  ;;  %5433 = vmatpush.bf16.msrb.mxu1 %v13676_v12 }
 0x710   :  { %v4553_v23 = vpop.f32.mrf.mxu2  ;;  %v4850_v41 = vpop.f32.mrf.mxu3  ;;  %v4104_v18 = vadd.f32 %v16679_v36, %v3802_v20 }
 0x711   :  { %v16754_v10 = vadd.f32 %v4850_v41, %v4702_v4 }
 0x712   :  { %v4254_v16 = vpop.f32.mrf.mxu1 }
 0x713   :  { %18437 = vst [vmem:[#allocation25_spill] sm:$0xff] %v16754_v10  ;;  %v4405_v62 = vadd.f32 %v4254_v16, %v16673_v60 }
 0x714   :  { %v3977_v8 = vpop.f32.mrf.mxu0 }
 0x715   :  { %v16760_v57 = vadd.f32 %v3977_v8, %v18440_v45  ;;  %4293 = vmatmul.bf16.gmra.mxu1 %v18441_v53  ;;  %v4704_v27 = vadd.f32 %v4553_v23, %v4405_v62  ;;  %v18443_v45 = vld [vmem:[#allocation67_spill] sm:$0xff] }
 0x717   :  { %4016 = vmatmul.bf16.gmra.mxu0 %v16327_v30 }
 0x718   :  { %v4555_v4 = vpop.f32.mrf.mxu2  ;;  %v4852_v41 = vpop.f32.mrf.mxu3 }
 0x719   :  { %v16766_v60 = vadd.f32 %v4852_v41, %v4703_v11  ;;  %v18444_v11 = vld [vmem:[#allocation45_spill] sm:$0xff]  ;;  %v18445_v41 = vld [vmem:[#allocation106_spill] sm:$0xff] }
 0x71a   :  { %v4256_v16 = vpop.f32.mrf.mxu1 }
 0x71b   :  { %v4406_v6 = vadd.f32 %v4256_v16, %v4104_v18 }
 0x71c   :  { %v3979_v8 = vpop.f32.mrf.mxu0 }
 0x71d   :  { %v16769_v10 = vadd.f32 %v3979_v8, %v18443_v45  ;;  %4597 = vmatmul.bf16.gmra.mxu2 %v16275_v61  ;;  %4894 = vmatmul.bf16.gmra.mxu3 %v18433_v25  ;;  %v4705_v23 = vadd.f32 %v4555_v4, %v4406_v6 }
 0x720   :  { %v4558_v28 = vpop.f32.mrf.mxu2  ;;  %v4855_v62 = vpop.f32.mrf.mxu3 }
 0x721   :  { %v16773_v56 = vadd.f32 %v4855_v62, %v4704_v27  ;;  %v18447_v62 = vld [vmem:[#allocation49_spill] sm:$0xff] }
 0x722   :  { %v4259_v12 = vpop.f32.mrf.mxu1 }
 0x723   :  { %v4407_v36 = vadd.f32 %v4259_v12, %v16686_v0 }
 0x724   :  { %v3982_v20 = vpop.f32.mrf.mxu0 }
 0x725   :  { %v16777_v50 = vadd.f32 %v3982_v20, %v18444_v11  ;;  %4298 = vmatmul.bf16.gmra.mxu1 %v18445_v41  ;;  %v4706_v18 = vadd.f32 %v4558_v28, %v4407_v36 }
 0x727   :  { %4021 = vmatmul.bf16.gmra.mxu0 %v16346_v13 }
 0x728   :  { %v4560_v16 = vpop.f32.mrf.mxu2  ;;  %v4857_v8 = vpop.f32.mrf.mxu3 }
 0x729   :  { %v16781_v45 = vadd.f32 %v4857_v8, %v4705_v23  ;;  %v18448_v8 = vld [vmem:[#allocation56_spill] sm:$0xff] }
 0x72a   :  { %v4261_v4 = vpop.f32.mrf.mxu1 }
 0x72b   :  { %18446 = vst [vmem:[#allocation99_spill] sm:$0xff] %v16781_v45  ;;  %v4408_v27 = vadd.f32 %v4261_v4, %v16693_v63  ;;  %v18449_v63 = vld [vmem:[#allocation107_spill] sm:$0xff] }
 0x72c   :  { %v3984_v6 = vpop.f32.mrf.mxu0 }
 0x72d   :  { %v16785_v61 = vadd.f32 %v3984_v6, %v18447_v62  ;;  %4602 = vmatmul.bf16.gmra.mxu2 %v16292_v2  ;;  %4899 = vmatmul.bf16.gmra.mxu3 %v16327_v30  ;;  %v4707_v0 = vadd.f32 %v4560_v16, %v4408_v27 }
 0x730   :  { %v4563_v12 = vpop.f32.mrf.mxu2  ;;  %v4860_v28 = vpop.f32.mrf.mxu3 }
 0x731   :  { %v16789_v36 = vadd.f32 %v4860_v28, %v4706_v18  ;;  %v18450_v28 = vld [vmem:[#allocation70_spill] sm:$0xff] }
 0x732   :  { %v4264_v20 = vpop.f32.mrf.mxu1 }
 0x733   :  { %v4409_v23 = vadd.f32 %v4264_v20, %v16703_v48 }
 0x734   :  { %v3987_v11 = vpop.f32.mrf.mxu0 }
 0x735   :  { %v16793_v45 = vadd.f32 %v3987_v11, %v18448_v8  ;;  %4303 = vmatmul.bf16.gmra.mxu1 %v18449_v63  ;;  %v4708_v4 = vadd.f32 %v4563_v12, %v4409_v23 }
 0x737   :  { %4026 = vmatmul.bf16.gmra.mxu0 %v16363_v5 }
 0x738   :  { %v4565_v6 = vpop.f32.mrf.mxu2  ;;  %v4862_v62 = vpop.f32.mrf.mxu3 }
 0x739   :  { %v16797_v30 = vadd.f32 %v4862_v62, %v4707_v0 }
 0x73a   :  { %v4266_v16 = vpop.f32.mrf.mxu1 }
 0x73b   :  { %v4410_v18 = vadd.f32 %v4266_v16, %v16712_v35  ;;  %v18452_v35 = vld [vmem:[#allocation109_spill] sm:$0xff] }
 0x73c   :  { %v3989_v27 = vpop.f32.mrf.mxu0 }
 0x73d   :  { %v16801_v2 = vadd.f32 %v3989_v27, %v18450_v28  ;;  %4607 = vmatmul.bf16.gmra.mxu2 %v18433_v25  ;;  %4904 = vmatmul.bf16.gmra.mxu3 %v16346_v13  ;;  %v4709_v48 = vadd.f32 %v4565_v6, %v4410_v18 }
 0x740   :  { %v4568_v20 = vpop.f32.mrf.mxu2  ;;  %v4865_v12 = vpop.f32.mrf.mxu3 }
 0x741   :  { %v16805_v23 = vadd.f32 %v4865_v12, %v4708_v4 }
 0x742   :  { %v4269_v11 = vpop.f32.mrf.mxu1 }
 0x743   :  { %18451 = vst [vmem:[#allocation59_spill] sm:$0xff] %v16805_v23  ;;  %v4411_v0 = vadd.f32 %v4269_v11, %v16722_v54  ;;  %v18454_v54 = vld [vmem:[#allocation112_spill] sm:$0xff]  ;;  %v18456_v23 = vld [vmem:[#allocation113_spill] sm:$0xff] }
 0x744   :  { %v3992_v8 = vpop.f32.mrf.mxu0 }
 0x745   :  { %v16809_v62 = vadd.f32 %v3992_v8, %v16335_v51  ;;  %4308 = vmatmul.bf16.gmra.mxu1 %v18452_v35  ;;  %v4710_v16 = vadd.f32 %v4568_v20, %v4411_v0 }
 0x747   :  { %4031 = vmatmul.bf16.gmra.mxu0 %v16380_v21 }
 0x748   :  { %v4570_v27 = vpop.f32.mrf.mxu2  ;;  %v4867_v28 = vpop.f32.mrf.mxu3 }
 0x749   :  { %v16813_v25 = vadd.f32 %v4867_v28, %v4709_v48  ;;  %v13667_v28 = vld [vmem:[#allocation7 + $0x1e8] sm:$0xff] }
 0x74a   :  { %v4271_v6 = vpop.f32.mrf.mxu1  ;;  %5135 = vmatpush.bf16.msra.mxu0 %v13667_v28 }
 0x74b   :  { %18453 = vst [vmem:[#allocation22_spill] sm:$0xff] %v16813_v25  ;;  %v4412_v4 = vadd.f32 %v4271_v6, %v16731_v1  ;;  %v18457_v6 = vld [vmem:[#allocation111_spill] sm:$0xff] }
 0x74c   :  { %v3994_v18 = vpop.f32.mrf.mxu0 }
 0x74d   :  { %v16817_v12 = vadd.f32 %v3994_v18, %v16344_v33  ;;  %4612 = vmatmul.bf16.gmra.mxu2 %v18454_v54  ;;  %4909 = vmatmul.bf16.gmra.mxu3 %v16363_v5  ;;  %v4711_v51 = vadd.f32 %v4570_v27, %v4412_v4  ;;  %v13675_v18 = vld [vmem:[#allocation7 + $0x228] sm:$0xff]  ;;  %v18458_v54 = vld [vmem:[#allocation60_spill] sm:$0xff] }
 0x74e   :  { %5434 = vmatpush.bf16.msrb.mxu1 %v13675_v18 }
 0x750   :  { %v4573_v11 = vpop.f32.mrf.mxu2  ;;  %v4870_v20 = vpop.f32.mrf.mxu3 }
 0x751   :  { %v16821_v0 = vadd.f32 %v4870_v20, %v4710_v16 }
 0x752   :  { %v4274_v8 = vpop.f32.mrf.mxu1 }
 0x753   :  { %18455 = vst [vmem:[#allocation101_spill] sm:$0xff] %v16821_v0  ;;  %v4413_v48 = vadd.f32 %v4274_v8, %v16741_v58 }
 0x754   :  { %v3997_v25 = vpop.f32.mrf.mxu0 }
 0x755   :  { %v16825_v1 = vadd.f32 %v3997_v25, %v18456_v23  ;;  %4313 = vmatmul.bf16.gmra.mxu1 %v18457_v6  ;;  %v4712_v33 = vadd.f32 %v4573_v11, %v4413_v48 }
 0x757   :  { %4036 = vmatmul.bf16.gmra.mxu0 %v16398_v29 }
 0x758   :  { %v4575_v27 = vpop.f32.mrf.mxu2  ;;  %v4872_v4 = vpop.f32.mrf.mxu3 }
 0x759   :  { %v16829_v16 = vadd.f32 %v4872_v4, %v4711_v51 }
 0x75a   :  { %v4276_v20 = vpop.f32.mrf.mxu1 }
 0x75b   :  { %v4414_v58 = vadd.f32 %v4276_v20, %v16750_v43  ;;  %v18459_v43 = vld [vmem:[#allocation50_spill] sm:$0xff] }
 0x75c   :  { %v3999_v8 = vpop.f32.mrf.mxu0 }
 0x75d   :  { %v16833_v0 = vadd.f32 %v3999_v8, %v18458_v54  ;;  %4617 = vmatmul.bf16.gmra.mxu2 %v16346_v13  ;;  %4914 = vmatmul.bf16.gmra.mxu3 %v16380_v21  ;;  %v4713_v25 = vadd.f32 %v4575_v27, %v4414_v58 }
 0x760   :  { %v4578_v23 = vpop.f32.mrf.mxu2  ;;  %v4875_v11 = vpop.f32.mrf.mxu3 }
 0x761   :  { %v16837_v48 = vadd.f32 %v4875_v11, %v4712_v33 }
 0x762   :  { %v4279_v28 = vpop.f32.mrf.mxu1 }
 0x763   :  { %v4415_v51 = vadd.f32 %v4279_v28, %v16760_v57 }
 0x764   :  { %v4002_v18 = vpop.f32.mrf.mxu0 }
 0x765   :  { %v16841_v4 = vadd.f32 %v4002_v18, %v16369_v26  ;;  %4318 = vmatmul.bf16.gmra.mxu1 %v18459_v43  ;;  %v4714_v54 = vadd.f32 %v4578_v23, %v4415_v51 }
 0x767   :  { %4041 = vmatmul.bf16.gmra.mxu0 %v16417_v31 }
 0x768   :  { %v4580_v20 = vpop.f32.mrf.mxu2  ;;  %v4877_v8 = vpop.f32.mrf.mxu3 }
 0x769   :  { %v16845_v13 = vadd.f32 %v4877_v8, %v4713_v25 }
 0x76a   :  { %v4281_v27 = vpop.f32.mrf.mxu1 }
 0x76b   :  { %v4416_v33 = vadd.f32 %v4281_v27, %v16769_v10  ;;  %v18460_v10 = vld [vmem:[#allocation114_spill] sm:$0xff] }
 0x76c   :  { %v4004_v58 = vpop.f32.mrf.mxu0 }
 0x76d   :  { %v16849_v11 = vadd.f32 %v4004_v58, %v16378_v9  ;;  %4622 = vmatmul.bf16.gmra.mxu2 %v16363_v5  ;;  %4919 = vmatmul.bf16.gmra.mxu3 %v16398_v29  ;;  %v4715_v26 = vadd.f32 %v4580_v20, %v4416_v33 }
 0x770   :  { %v4583_v57 = vpop.f32.mrf.mxu2  ;;  %v4880_v23 = vpop.f32.mrf.mxu3 }
 0x771   :  { %v16853_v28 = vadd.f32 %v4880_v23, %v4714_v54  ;;  %v18461_v23 = vld [vmem:[#allocation117_spill] sm:$0xff] }
 0x772   :  { %v4284_v51 = vpop.f32.mrf.mxu1 }
 0x773   :  { %v4417_v25 = vadd.f32 %v4284_v51, %v16777_v50 }
 0x774   :  { %v4007_v18 = vpop.f32.mrf.mxu0 }
 0x775   :  { %v16857_v8 = vadd.f32 %v4007_v18, %v16386_v55  ;;  %4323 = vmatmul.bf16.gmra.mxu1 %v18460_v10  ;;  %v4716_v9 = vadd.f32 %v4583_v57, %v4417_v25 }
 0x777   :  { %4046 = vmatmul.bf16.gmra.mxu0 %v16436_v52 }
 0x778   :  { %v4585_v27 = vpop.f32.mrf.mxu2  ;;  %v4882_v58 = vpop.f32.mrf.mxu3 }
 0x779   :  { %v16861_v29 = vadd.f32 %v4882_v58, %v4715_v26 }
 0x77a   :  { %v4286_v20 = vpop.f32.mrf.mxu1 }
 0x77b   :  { %v4418_v54 = vadd.f32 %v4286_v20, %v16785_v61  ;;  %v18462_v61 = vld [vmem:[#allocation73_spill] sm:$0xff] }
 0x77c   :  { %v4009_v33 = vpop.f32.mrf.mxu0 }
 0x77d   :  { %v16865_v5 = vadd.f32 %v4009_v33, %v18461_v23  ;;  %4627 = vmatmul.bf16.gmra.mxu2 %v16380_v21  ;;  %4924 = vmatmul.bf16.gmra.mxu3 %v16417_v31  ;;  %v4717_v55 = vadd.f32 %v4585_v27, %v4418_v54 }
 0x780   :  { %v4588_v50 = vpop.f32.mrf.mxu2  ;;  %v4885_v57 = vpop.f32.mrf.mxu3 }
 0x781   :  { %v16869_v51 = vadd.f32 %v4885_v57, %v4716_v9 }
 0x782   :  { %v4289_v25 = vpop.f32.mrf.mxu1 }
 0x783   :  { %v4419_v26 = vadd.f32 %v4289_v25, %v16793_v45  ;;  %v18464_v45 = vld [vmem:[#allocation118_spill] sm:$0xff] }
 0x784   :  { %v4012_v18 = vpop.f32.mrf.mxu0 }
 0x785   :  { %v16873_v58 = vadd.f32 %v4012_v18, %v16406_v14  ;;  %4328 = vmatmul.bf16.gmra.mxu1 %v18462_v61  ;;  %v4718_v20 = vadd.f32 %v4588_v50, %v4419_v26 }
 0x787   :  { %4051 = vmatmul.bf16.gmra.mxu0 %v16458_v34 }
 0x788   :  { %v4590_v33 = vpop.f32.mrf.mxu2  ;;  %v4887_v23 = vpop.f32.mrf.mxu3 }
 0x789   :  { %v16877_v21 = vadd.f32 %v4887_v23, %v4717_v55  ;;  %v13666_v23 = vld [vmem:[#allocation7 + $0x1e0] sm:$0xff] }
 0x78a   :  { %v4291_v27 = vpop.f32.mrf.mxu1  ;;  %5136 = vmatpush.bf16.msra.mxu0 %v13666_v23 }
 0x78b   :  { %18463 = vst [vmem:[#allocation42_spill] sm:$0xff] %v16877_v21  ;;  %v4420_v9 = vadd.f32 %v4291_v27, %v16801_v2  ;;  %v18465_v27 = vld [vmem:[#allocation116_spill] sm:$0xff] }
 0x78c   :  { %v4014_v54 = vpop.f32.mrf.mxu0 }
 0x78d   :  { %v16881_v57 = vadd.f32 %v4014_v54, %v16415_v39  ;;  %4632 = vmatmul.bf16.gmra.mxu2 %v18464_v45  ;;  %4929 = vmatmul.bf16.gmra.mxu3 %v16436_v52  ;;  %v4719_v14 = vadd.f32 %v4590_v33, %v4420_v9  ;;  %v13674_v54 = vld [vmem:[#allocation7 + $0x220] sm:$0xff] }
 0x78e   :  { %5435 = vmatpush.bf16.msrb.mxu1 %v13674_v54 }
 0x790   :  { %v4593_v25 = vpop.f32.mrf.mxu2  ;;  %v4890_v50 = vpop.f32.mrf.mxu3 }
 0x791   :  { %v16885_v26 = vadd.f32 %v4890_v50, %v4718_v20 }
 0x792   :  { %v4294_v18 = vpop.f32.mrf.mxu1 }
 0x793   :  { %v4421_v55 = vadd.f32 %v4294_v18, %v16809_v62 }
 0x794   :  { %v4017_v21 = vpop.f32.mrf.mxu0 }
 0x795   :  { %v16889_v2 = vadd.f32 %v4017_v21, %v16423_v7  ;;  %4333 = vmatmul.bf16.gmra.mxu1 %v18465_v27  ;;  %v4720_v39 = vadd.f32 %v4593_v25, %v4421_v55 }
 0x797   :  { %4056 = vmatmul.bf16.gmra.mxu0 %v16479_v24 }
 0x798   :  { %v4595_v33 = vpop.f32.mrf.mxu2  ;;  %v4892_v9 = vpop.f32.mrf.mxu3 }
 0x799   :  { %v16893_v20 = vadd.f32 %v4892_v9, %v4719_v14  ;;  %v18467_v9 = vld [vmem:[#allocation123_spill] sm:$0xff] }
 0x79a   :  { %v4296_v50 = vpop.f32.mrf.mxu1 }
 0x79b   :  { %18466 = vst [vmem:[#allocation32_spill] sm:$0xff] %v16893_v20  ;;  %v4422_v62 = vadd.f32 %v4296_v50, %v16817_v12  ;;  %v18468_v12 = vld [vmem:[#allocation119_spill] sm:$0xff] }
 0x79c   :  { %v4019_v18 = vpop.f32.mrf.mxu0 }
 0x79d   :  { %v16897_v45 = vadd.f32 %v4019_v18, %v16434_v32  ;;  %4637 = vmatmul.bf16.gmra.mxu2 %v16417_v31  ;;  %4934 = vmatmul.bf16.gmra.mxu3 %v16458_v34  ;;  %v4721_v21 = vadd.f32 %v4595_v33, %v4422_v62 }
 0x7a0   :  { %v4598_v7 = vpop.f32.mrf.mxu2  ;;  %v4895_v25 = vpop.f32.mrf.mxu3 }
 0x7a1   :  { %v16901_v55 = vadd.f32 %v4895_v25, %v4720_v39 }
 0x7a2   :  { %v4299_v23 = vpop.f32.mrf.mxu1 }
 0x7a3   :  { %v4423_v14 = vadd.f32 %v4299_v23, %v16825_v1 }
 0x7a4   :  { %v4022_v54 = vpop.f32.mrf.mxu0 }
 0x7a5   :  { %v16905_v20 = vadd.f32 %v4022_v54, %v18467_v9  ;;  %4338 = vmatmul.bf16.gmra.mxu1 %v18468_v12  ;;  %v4722_v32 = vadd.f32 %v4598_v7, %v4423_v14 }
 0x7a7   :  { %4061 = vmatmul.bf16.gmra.mxu0 %v16500_v49 }
 0x7a8   :  { %v4600_v50 = vpop.f32.mrf.mxu2  ;;  %v4897_v18 = vpop.f32.mrf.mxu3 }
 0x7a9   :  { %v16909_v31 = vadd.f32 %v4897_v18, %v4721_v21 }
 0x7aa   :  { %v4301_v33 = vpop.f32.mrf.mxu1 }
 0x7ab   :  { %v4424_v39 = vadd.f32 %v4301_v33, %v16833_v0  ;;  %v18469_v0 = vld [vmem:[#allocation121_spill] sm:$0xff] }
 0x7ac   :  { %v4024_v62 = vpop.f32.mrf.mxu0 }
 0x7ad   :  { %v16913_v25 = vadd.f32 %v4024_v62, %v16456_v42  ;;  %4642 = vmatmul.bf16.gmra.mxu2 %v16436_v52  ;;  %4939 = vmatmul.bf16.gmra.mxu3 %v16479_v24  ;;  %v4723_v1 = vadd.f32 %v4600_v50, %v4424_v39 }
 0x7b0   :  { %v4603_v23 = vpop.f32.mrf.mxu2  ;;  %v4900_v7 = vpop.f32.mrf.mxu3 }
 0x7b1   :  { %v16917_v14 = vadd.f32 %v4900_v7, %v4722_v32 }
 0x7b2   :  { %v4304_v54 = vpop.f32.mrf.mxu1 }
 0x7b3   :  { %v4425_v21 = vadd.f32 %v4304_v54, %v16841_v4 }
 0x7b4   :  { %v4027_v9 = vpop.f32.mrf.mxu0 }
 0x7b5   :  { %v16921_v18 = vadd.f32 %v4027_v9, %v16464_v47  ;;  %4343 = vmatmul.bf16.gmra.mxu1 %v18469_v0  ;;  %v4724_v42 = vadd.f32 %v4603_v23, %v4425_v21 }
 0x7b7   :  { %4066 = vmatmul.bf16.gmra.mxu0 %v16519_v15 }
 0x7b8   :  { %v4605_v33 = vpop.f32.mrf.mxu2  ;;  %v4902_v62 = vpop.f32.mrf.mxu3 }
 0x7b9   :  { %v16925_v24 = vadd.f32 %v4902_v62, %v4723_v1 }
 0x7ba   :  { %v4306_v50 = vpop.f32.mrf.mxu1 }
 0x7bb   :  { %v4426_v32 = vadd.f32 %v4306_v50, %v16849_v11 }
 0x7bc   :  { %v4029_v39 = vpop.f32.mrf.mxu0 }
 0x7bd   :  { %v16929_v7 = vadd.f32 %v4029_v39, %v16475_v3  ;;  %4647 = vmatmul.bf16.gmra.mxu2 %v16458_v34  ;;  %4944 = vmatmul.bf16.gmra.mxu3 %v16500_v49  ;;  %v4725_v47 = vadd.f32 %v4605_v33, %v4426_v32  ;;  %v18471_v34 = vld [vmem:[#allocation129_spill] sm:$0xff] }
 0x7c0   :  { %v4608_v4 = vpop.f32.mrf.mxu2  ;;  %v4905_v23 = vpop.f32.mrf.mxu3 }
 0x7c1   :  { %v16933_v54 = vadd.f32 %v4905_v23, %v4724_v42 }
 0x7c2   :  { %v4309_v21 = vpop.f32.mrf.mxu1 }
 0x7c3   :  { %v4427_v1 = vadd.f32 %v4309_v21, %v16857_v8 }
 0x7c4   :  { %v4032_v9 = vpop.f32.mrf.mxu0 }
 0x7c5   :  { %v16937_v62 = vadd.f32 %v4032_v9, %v16486_v38  ;;  %4348 = vmatmul.bf16.gmra.mxu1 %v16447_v44  ;;  %v4726_v3 = vadd.f32 %v4608_v4, %v4427_v1  ;;  %v13665_v9 = vld [vmem:[#allocation7 + $0x1d8] sm:$0xff] }
 0x7c6   :  { %5137 = vmatpush.bf16.msra.mxu0 %v13665_v9 }
 0x7c7   :  { %4071 = vmatmul.bf16.gmra.mxu0 %v16538_v46 }
 0x7c8   :  { %v4610_v11 = vpop.f32.mrf.mxu2  ;;  %v4907_v50 = vpop.f32.mrf.mxu3 }
 0x7c9   :  { %v16941_v39 = vadd.f32 %v4907_v50, %v4725_v47 }
 0x7ca   :  { %v4311_v33 = vpop.f32.mrf.mxu1 }
 0x7cb   :  { %v4428_v42 = vadd.f32 %v4311_v33, %v16865_v5  ;;  %v18472_v33 = vld [vmem:[#allocation125_spill] sm:$0xff] }
 0x7cc   :  { %v4034_v32 = vpop.f32.mrf.mxu0 }
 0x7cd   :  { %v16945_v23 = vadd.f32 %v4034_v32, %v16497_v17  ;;  %4652 = vmatmul.bf16.gmra.mxu2 %v16481_v40  ;;  %4949 = vmatmul.bf16.gmra.mxu3 %v16519_v15  ;;  %v4727_v38 = vadd.f32 %v4610_v11, %v4428_v42  ;;  %v18473_v17 = vmov 0.0   ;;  %v18474_v32 = vmax.f32 %v16559_v59, 0.0  ;;  %v13673_v11 = vld [vmem:[#allocation7 + $0x218] sm:$0xff] }
 0x7ce   :  { %5436 = vmatpush.bf16.msrb.mxu1 %v13673_v11  ;;  %v13693_v11 = vld [vmem:[#allocation10 + $0x78] sm:$0xff] }
 0x7cf   :  { %v3859_v40 = vpack.c.bf16 %v18474_v32, %v18473_v17  ;;  %v13685_v17 = vld [vmem:[#allocation10 + $0x38] sm:$0xff]  ;;  %6994 = vmatpush.bf16.msra.mxu3 %v13693_v11 }
 0x7d0   :  { %v4613_v8 = vpop.f32.mrf.mxu2  ;;  %v4910_v4 = vpop.f32.mrf.mxu3  ;;  %6933 = vmatpush.bf16.msra.mxu2 %v13685_v17 }
 0x7d1   :  { %v16949_v21 = vadd.f32 %v4910_v4, %v4726_v3 }
 0x7d2   :  { %v4314_v1 = vpop.f32.mrf.mxu1 }
 0x7d3   :  { %18470 = vst [vmem:[#allocation103_spill] sm:$0xff] %v16949_v21  ;;  %v4429_v47 = vadd.f32 %v4314_v1, %v16873_v58 }
 0x7d4   :  { %v4037_v50 = vpop.f32.mrf.mxu0 }
 0x7d5   :  { %v16953_v5 = vadd.f32 %v4037_v50, %v18471_v34  ;;  %4353 = vmatmul.bf16.gmra.mxu1 %v18472_v33  ;;  %v4728_v52 = vadd.f32 %v4613_v8, %v4429_v47  ;;  %v18476_v50 = vld [vmem:[#allocation77_spill] sm:$0xff] }
 0x7d7   :  { %4076 = vmatmul.bf16.gmra.mxu0 %v3859_v40 }
 0x7d8   :  { %v4615_v3 = vpop.f32.mrf.mxu2  ;;  %v4912_v42 = vpop.f32.mrf.mxu3 }
 0x7d9   :  { %v16959_v4 = vadd.f32 %v4912_v42, %v4727_v38  ;;  %v18478_v42 = vld [vmem:[#allocation58_spill] sm:$0xff] }
 0x7da   :  { %v4316_v58 = vpop.f32.mrf.mxu1 }
 0x7db   :  { %18475 = vst [vmem:[#allocation40_spill] sm:$0xff] %v16959_v4  ;;  %v4430_v1 = vadd.f32 %v4316_v58, %v16881_v57 }
 0x7dc   :  { %v4039_v34 = vpop.f32.mrf.mxu0 }
 0x7dd   :  { %v16963_v21 = vadd.f32 %v4039_v34, %v18476_v50  ;;  %4657 = vmatmul.bf16.gmra.mxu2 %v16500_v49  ;;  %4954 = vmatmul.bf16.gmra.mxu3 %v16538_v46  ;;  %v4729_v59 = vadd.f32 %v4615_v3, %v4430_v1  ;;  %v18479_v34 = vld [vmem:[#allocation127_spill] sm:$0xff] }
 0x7de   :  { %v13664_v49 = vld [vmem:[#allocation7 + $0x1d0] sm:$0xff] }
 0x7df   :  { %5138 = vmatpush.bf16.msra.mxu0 %v13664_v49  ;;  %v18483_v49 = vld [vmem:[#allocation64_spill] sm:$0xff] }
 0x7e0   :  { %v4618_v8 = vpop.f32.mrf.mxu2  ;;  %v4915_v47 = vpop.f32.mrf.mxu3 }
 0x7e1   :  { %v16967_v9 = vadd.f32 %v4915_v47, %v4728_v52 }
 0x7e2   :  { %v4319_v32 = vpop.f32.mrf.mxu1 }
 0x7e3   :  { %18477 = vst [vmem:[#allocation26_spill] sm:$0xff] %v16967_v9  ;;  %v4431_v38 = vadd.f32 %v4319_v32, %v16889_v2  ;;  %v18481_v32 = vld [vmem:[#allocation66_spill] sm:$0xff] }
 0x7e4   :  { %v4042_v57 = vpop.f32.mrf.mxu0 }
 0x7e5   :  { %v16971_v58 = vadd.f32 %v4042_v57, %v18478_v42  ;;  %4358 = vmatmul.bf16.gmra.mxu1 %v18479_v34  ;;  %v4730_v50 = vadd.f32 %v4618_v8, %v4431_v38  ;;  %v13663_v38 = vld [vmem:[#allocation7 + $0x1c8] sm:$0xff] }
 0x7e6   :  { %5139 = vmatpush.bf16.msra.mxu0 %v13663_v38 }
 0x7e7   :  { %4081 = vmatmul.bf16.gmra.mxu0 %v16581_v37 }
 0x7e8   :  { %v4620_v3 = vpop.f32.mrf.mxu2  ;;  %v4917_v1 = vpop.f32.mrf.mxu3 }
 0x7e9   :  { %v16975_v52 = vadd.f32 %v4917_v1, %v4729_v59  ;;  %v13662_v1 = vld [vmem:[#allocation7 + $0x1c0] sm:$0xff] }
 0x7ea   :  { %v4321_v47 = vpop.f32.mrf.mxu1  ;;  %5140 = vmatpush.bf16.msra.mxu0 %v13662_v1 }
 0x7eb   :  { %18480 = vst [vmem:[#allocation63_spill] sm:$0xff] %v16975_v52  ;;  %v4432_v2 = vadd.f32 %v4321_v47, %v16897_v45 }
 0x7ec   :  { %v4044_v17 = vpop.f32.mrf.mxu0 }
 0x7ed   :  { %v16979_v9 = vadd.f32 %v4044_v17, %v18481_v32  ;;  %4662 = vmatmul.bf16.gmra.mxu2 %v16519_v15  ;;  %4959 = vmatmul.bf16.gmra.mxu3 %v3859_v40  ;;  %v4731_v8 = vadd.f32 %v4620_v3, %v4432_v2  ;;  %v18484_v17 = vld [vmem:[#allocation130_spill] sm:$0xff] }
 0x7ee   :  { %v18485_v40 = vld [vmem:[#allocation86_spill] sm:$0xff] }
 0x7f0   :  { %v4623_v11 = vpop.f32.mrf.mxu2  ;;  %v4920_v57 = vpop.f32.mrf.mxu3 }
 0x7f1   :  { %v16982_v42 = vadd.f32 %v4920_v57, %v4730_v50 }
 0x7f2   :  { %v4324_v59 = vpop.f32.mrf.mxu1 }
 0x7f3   :  { %18482 = vst [vmem:[#allocation27_spill] sm:$0xff] %v16982_v42  ;;  %v4433_v52 = vadd.f32 %v4324_v59, %v16905_v20  ;;  %v18487_v42 = vld [vmem:[#allocation62_spill] sm:$0xff] }
 0x7f4   :  { %v4047_v45 = vpop.f32.mrf.mxu0 }
 0x7f5   :  { %v16986_v47 = vadd.f32 %v4047_v45, %v18483_v49  ;;  %4363 = vmatmul.bf16.gmra.mxu1 %v18484_v17  ;;  %v4732_v32 = vadd.f32 %v4623_v11, %v4433_v52 }
 0x7f7   :  { %4086 = vmatmul.bf16.gmra.mxu0 %v18485_v40 }
 0x7f8   :  { %v4625_v3 = vpop.f32.mrf.mxu2  ;;  %v4922_v2 = vpop.f32.mrf.mxu3 }
 0x7f9   :  { %v16990_v15 = vadd.f32 %v4922_v2, %v4731_v8  ;;  %v18489_v2 = vld [vmem:[#allocation72_spill] sm:$0xff] }
 0x7fa   :  { %v4326_v50 = vpop.f32.mrf.mxu1 }
 0x7fb   :  { %18486 = vst [vmem:[#allocation39_spill] sm:$0xff] %v16990_v15  ;;  %v4434_v38 = vadd.f32 %v4326_v50, %v16913_v25  ;;  %v18490_v25 = vld [vmem:[#allocation57_spill] sm:$0xff]  ;;  %v18491_v50 = vld [vmem:[#allocation84_spill] sm:$0xff] }
 0x7fc   :  { %v4049_v57 = vpop.f32.mrf.mxu0 }
 0x7fd   :  { %v16994_v20 = vadd.f32 %v4049_v57, %v18487_v42  ;;  %4667 = vmatmul.bf16.gmra.mxu2 %v16538_v46  ;;  %4964 = vmatmul.bf16.gmra.mxu3 %v16581_v37  ;;  %v4733_v59 = vadd.f32 %v4625_v3, %v4434_v38 }
 0x800   :  { %v4628_v1 = vpop.f32.mrf.mxu2  ;;  %v4925_v52 = vpop.f32.mrf.mxu3 }
 0x801   :  { %v16998_v11 = vadd.f32 %v4925_v52, %v4732_v32  ;;  %v18493_v52 = vld [vmem:[#allocation69_spill] sm:$0xff] }
 0x802   :  { %v4329_v45 = vpop.f32.mrf.mxu1 }
 0x803   :  { %18488 = vst [vmem:[#allocation41_spill] sm:$0xff] %v16998_v11  ;;  %v4435_v8 = vadd.f32 %v4329_v45, %v16921_v18  ;;  %v18494_v18 = vld [vmem:[#allocation61_spill] sm:$0xff] }
 0x804   :  { %v4052_v49 = vpop.f32.mrf.mxu0 }
 0x805   :  { %v17002_v15 = vadd.f32 %v4052_v49, %v18489_v2  ;;  %4368 = vmatmul.bf16.gmra.mxu1 %v18490_v25  ;;  %v4734_v42 = vadd.f32 %v4628_v1, %v4435_v8 }
 0x807   :  { %4091 = vmatmul.bf16.gmra.mxu0 %v18491_v50 }
 0x808   :  { %v4630_v57 = vpop.f32.mrf.mxu2  ;;  %v4927_v46 = vpop.f32.mrf.mxu3 }
 0x809   :  { %v17006_v4 = vadd.f32 %v4927_v46, %v4733_v59 }
 0x80a   :  { %v4331_v3 = vpop.f32.mrf.mxu1 }
 0x80b   :  { %18492 = vst [vmem:[#allocation35_spill] sm:$0xff] %v17006_v4  ;;  %v4436_v32 = vadd.f32 %v4331_v3, %v16929_v7  ;;  %v18496_v4 = vld [vmem:[#allocation68_spill] sm:$0xff] }
 0x80c   :  { %v4054_v38 = vpop.f32.mrf.mxu0  ;;  %v18497_v7 = vld [vmem:[#allocation28_spill] sm:$0xff] }
 0x80d   :  { %v17010_v11 = vadd.f32 %v4054_v38, %v18493_v52  ;;  %4672 = vmatmul.bf16.gmra.mxu2 %v18494_v18  ;;  %4969 = vmatmul.bf16.gmra.mxu3 %v18485_v40  ;;  %v4735_v45 = vadd.f32 %v4630_v57, %v4436_v32  ;;  %v13672_v38 = vld [vmem:[#allocation7 + $0x210] sm:$0xff]  ;;  %v18498_v52 = vld [vmem:[#allocation29_spill] sm:$0xff] }
 0x80e   :  { %5437 = vmatpush.bf16.msrb.mxu1 %v13672_v38  ;;  %v13684_v38 = vld [vmem:[#allocation10 + $0x30] sm:$0xff] }
 0x80f   :  { %6934 = vmatpush.bf16.msra.mxu2 %v13684_v38 }
 0x810   :  { %v4633_v49 = vpop.f32.mrf.mxu2  ;;  %v4930_v1 = vpop.f32.mrf.mxu3 }
 0x811   :  { %v17014_v8 = vadd.f32 %v4930_v1, %v4734_v42 }
 0x812   :  { %v4334_v2 = vpop.f32.mrf.mxu1 }
 0x813   :  { %18495 = vst [vmem:[#allocation44_spill] sm:$0xff] %v17014_v8  ;;  %v4437_v46 = vadd.f32 %v4334_v2, %v16937_v62  ;;  %v18500_v62 = vld [vmem:[#allocation79_spill] sm:$0xff] }
 0x814   :  { %v4057_v59 = vpop.f32.mrf.mxu0 }
 0x815   :  { %v17018_v25 = vadd.f32 %v4057_v59, %v18496_v4  ;;  %4373 = vmatmul.bf16.gmra.mxu1 %v18497_v7  ;;  %v4736_v3 = vadd.f32 %v4633_v49, %v4437_v46 }
 0x817   :  { %5141 = vmatmul.bf16.vlgmr.msra.gmra.mxu0 %v18498_v52 }
 0x818   :  { %v4635_v18 = vpop.f32.mrf.mxu2  ;;  %v4932_v57 = vpop.f32.mrf.mxu3 }
 0x819   :  { %v17022_v32 = vadd.f32 %v4932_v57, %v4735_v45  ;;  %v13692_v57 = vld [vmem:[#allocation10 + $0x70] sm:$0xff] }
 0x81a   :  { %v4336_v42 = vpop.f32.mrf.mxu1  ;;  %6995 = vmatpush.bf16.msra.mxu3 %v13692_v57 }
 0x81b   :  { %18499 = vst [vmem:[#allocation95_spill] sm:$0xff] %v17022_v32  ;;  %v4438_v1 = vadd.f32 %v4336_v42, %v16945_v23  ;;  %v18502_v42 = vld [vmem:[#allocation78_spill] sm:$0xff] }
 0x81c   :  { %v4059_v8 = vpop.f32.mrf.mxu0 }
 0x81d   :  { %v17026_v2 = vadd.f32 %v4059_v8, %v18500_v62  ;;  %4677 = vmatmul.bf16.gmra.mxu2 %v16581_v37  ;;  %4974 = vmatmul.bf16.gmra.mxu3 %v18491_v50  ;;  %v4737_v4 = vadd.f32 %v4635_v18, %v4438_v1  ;;  %v18503_v8 = vld [vmem:[#allocation21_spill] sm:$0xff]  ;;  %v18504_v37 = vld [vmem:[#allocation94_spill] sm:$0xff] }
 0x820   :  { %v4638_v49 = vpop.f32.mrf.mxu2  ;;  %v4935_v46 = vpop.f32.mrf.mxu3 }
 0x821   :  { %v17030_v59 = vadd.f32 %v4935_v46, %v4736_v3 }
 0x822   :  { %v4339_v52 = vpop.f32.mrf.mxu1 }
 0x823   :  { %18501 = vst [vmem:[#allocation36_spill] sm:$0xff] %v17030_v59  ;;  %v4439_v45 = vadd.f32 %v4339_v52, %v16953_v5  ;;  %v18508_v52 = vld [vmem:[#allocation75_spill] sm:$0xff] }
 0x824   :  { %v4062_v23 = vpop.f32.mrf.mxu0 }
 0x825   :  { %v17034_v32 = vadd.f32 %v4062_v23, %v18502_v42  ;;  %4378 = vmatmul.bf16.gmra.mxu1 %v18503_v8  ;;  %v4738_v62 = vadd.f32 %v4638_v49, %v4439_v45  ;;  %v18509_v23 = vmov 0.0|0.0  }
 0x827   :  { %5146 = vmatmul.bf16.gmra.mxu0 %v18504_v37 }
 0x828   :  { %v17038_v18 = vpop.f32.mrf.mxu2  ;;  %v4937_v3 = vpop.f32.mrf.mxu3 }
 0x829   :  { %18505 = vst [vmem:[#allocation52_spill] sm:$0xff] %v17038_v18  ;;  %v17040_v1 = vadd.f32 %v4937_v3, %v4737_v4  ;;  %v18511_v3 = vld [vmem:[#allocation90_spill] sm:$0xff] }
 0x82a   :  { %v4341_v46 = vpop.f32.mrf.mxu1 }
 0x82b   :  { %18506 = vst [vmem:[#allocation104_spill] sm:$0xff] %v17040_v1  ;;  %v17043_v5 = vadd.f32 %v4341_v46, %v16963_v21  ;;  %v18512_v21 = vld [vmem:[#allocation80_spill] sm:$0xff] }
 0x82c   :  { %v4064_v38 = vpop.f32.mrf.mxu0 }
 0x82d   :  { %18507 = vst [vmem:[#allocation37_spill] sm:$0xff] %v17043_v5  ;;  %v17046_v59 = vadd.f32 %v4064_v38, %v18508_v52  ;;  %4682 = vmatmul.bf16.gmra.mxu2 %v18485_v40  ;;  %4979 = vmatmul.bf16.gmra.mxu3 %v18509_v23  ;;  %v18513_v38 = vld [vmem:[#allocation33_spill] sm:$0xff] }
 0x830   :  { %v4643_v49 = vpop.f32.mrf.mxu2  ;;  %v4940_v45 = vpop.f32.mrf.mxu3 }
 0x831   :  { %v17050_v37 = vadd.f32 %v4940_v45, %v4738_v62 }
 0x832   :  { %v4344_v57 = vpop.f32.mrf.mxu1 }
 0x833   :  { %18510 = vst [vmem:[#allocation67_spill] sm:$0xff] %v17050_v37  ;;  %v4441_v4 = vadd.f32 %v4344_v57, %v16971_v58  ;;  %v13671_v37 = vld [vmem:[#allocation7 + $0x208] sm:$0xff]  ;;  %v18517_v58 = vld [vmem:[#allocation83_spill] sm:$0xff] }
 0x834   :  { %v4067_v42 = vpop.f32.mrf.mxu0  ;;  %5438 = vmatpush.bf16.msrb.mxu1 %v13671_v37 }
 0x835   :  { %v17054_v18 = vadd.f32 %v4067_v42, %v18511_v3  ;;  %4383 = vmatmul.bf16.gmra.mxu1 %v18512_v21  ;;  %v4740_v46 = vadd.f32 %v4643_v49, %v4441_v4  ;;  %v13670_v42 = vld [vmem:[#allocation7 + $0x200] sm:$0xff] }
 0x837   :  { %5151 = vmatmul.bf16.gmra.mxu0 %v18513_v38 }
 0x838   :  { %v17058_v52 = vpop.f32.mrf.mxu2  ;;  %v17060_v40 = vpop.f32.mrf.mxu3  ;;  %5439 = vmatpush.bf16.msrb.mxu1 %v13670_v42 }
 0x839   :  { %18514 = vst [vmem:[#allocation45_spill] sm:$0xff] %v17058_v52  ;;  %v18519_v52 = vld [vmem:[#allocation81_spill] sm:$0xff] }
 0x83a   :  { %18515 = vst [vmem:[#allocation106_spill] sm:$0xff] %v17060_v40  ;;  %v4346_v5 = vpop.f32.mrf.mxu1 }
 0x83b   :  { %v17063_v62 = vadd.f32 %v4346_v5, %v16979_v9 }
 0x83c   :  { %v4069_v45 = vpop.f32.mrf.mxu0 }
 0x83d   :  { %18516 = vst [vmem:[#allocation49_spill] sm:$0xff] %v17063_v62  ;;  %v17066_v57 = vadd.f32 %v4069_v45, %v18517_v58  ;;  %4687 = vmatmul.bf16.gmra.mxu2 %v18491_v50  ;;  %4984 = vmatmul.bf16.gmra.mxu3 %v18509_v23  ;;  %v18520_v45 = vld [vmem:[#allocation76_spill] sm:$0xff]  ;;  %v18521_v50 = vld [vmem:[#allocation34_spill] sm:$0xff] }
 0x840   :  { %v4648_v49 = vpop.f32.mrf.mxu2  ;;  %v4945_v4 = vpop.f32.mrf.mxu3 }
 0x841   :  { %v17070_v3 = vadd.f32 %v4945_v4, %v4740_v46  ;;  %v18525_v4 = vld [vmem:[#allocation85_spill] sm:$0xff] }
 0x842   :  { %v4349_v38 = vpop.f32.mrf.mxu1  ;;  %v18526_v42 = vmax.f32 %v18525_v4, 0.0 }
 0x843   :  { %18518 = vst [vmem:[#allocation56_spill] sm:$0xff] %v17070_v3  ;;  %v4443_v9 = vadd.f32 %v4349_v38, %v16986_v47  ;;  %v18537_v3 = vld [vmem:[#allocation89_spill] sm:$0xff] }
 0x844   :  { %v4072_v5 = vpop.f32.mrf.mxu0  ;;  %v17087_v47 = vpack.c.bf16 0.0, %v18526_v42  ;;  %v18531_v42 = vld [vmem:[#allocation82_spill] sm:$0xff] }
 0x845   :  { %v17074_v62 = vadd.f32 %v4072_v5, %v18519_v52  ;;  %4388 = vmatmul.bf16.gmra.mxu1 %v18520_v45  ;;  %v4742_v58 = vadd.f32 %v4648_v49, %v4443_v9  ;;  %v18528_v52 = vld [vmem:[#allocation88_spill] sm:$0xff] }
 0x846   :  { %18527 = vst [vmem:[#allocation113_spill] sm:$0xff] %v17087_v47 }
 0x847   :  { %5156 = vmatmul.bf16.gmra.mxu0 %v18521_v50 }
 0x848   :  { %v17078_v40 = vpop.f32.mrf.mxu2  ;;  %v17080_v37 = vpop.f32.mrf.mxu3 }
 0x849   :  { %18522 = vst [vmem:[#allocation107_spill] sm:$0xff] %v17078_v40 }
 0x84a   :  { %18523 = vst [vmem:[#allocation70_spill] sm:$0xff] %v17080_v37  ;;  %v4351_v1 = vpop.f32.mrf.mxu1 }
 0x84b   :  { %v17083_v46 = vadd.f32 %v4351_v1, %v16994_v20 }
 0x84c   :  { %v4074_v38 = vpop.f32.mrf.mxu0 }
 0x84d   :  { %18524 = vst [vmem:[#allocation109_spill] sm:$0xff] %v17083_v46  ;;  %v17090_v5 = vadd.f32 %v4074_v38, %v18528_v52  ;;  %4692 = vmatmul.bf16.gmra.mxu2 %v17087_v47  ;;  %4989 = vmatmul.bf16.gmra.mxu3 %v18509_v23  ;;  %v18530_v46 = vld [vmem:[#allocation87_spill] sm:$0xff] }
 0x850   :  { %v4653_v50 = vpop.f32.mrf.mxu2  ;;  %v4950_v49 = vpop.f32.mrf.mxu3 }
 0x851   :  { %v17094_v9 = vadd.f32 %v4950_v49, %v4742_v58 }
 0x852   :  { %v4354_v40 = vpop.f32.mrf.mxu1 }
 0x853   :  { %18529 = vst [vmem:[#allocation111_spill] sm:$0xff] %v17094_v9  ;;  %v4445_v20 = vadd.f32 %v4354_v40, %v17002_v15  ;;  %v18535_v9 = vld [vmem:[#allocation38_spill] sm:$0xff] }
 0x854   :  { %v4077_v1 = vpop.f32.mrf.mxu0 }
 0x855   :  { %v17098_v4 = vadd.f32 %v4077_v1, %v18530_v46  ;;  %4393 = vmatmul.bf16.gmra.mxu1 %v18531_v42  ;;  %v4744_v37 = vadd.f32 %v4653_v50, %v4445_v20  ;;  %v13683_v50 = vld [vmem:[#allocation10 + $0x28] sm:$0xff] }
 0x856   :  { %6935 = vmatpush.bf16.msra.mxu2 %v13683_v50  ;;  %v18542_v50 = vld [vmem:[#allocation91_spill] sm:$0xff] }
 0x857   :  { %5161 = vmatmul.bf16.gmra.mxu0 %v18415_v22 }
 0x858   :  { %v17102_v38 = vpop.f32.mrf.mxu2  ;;  %v17104_v52 = vpop.f32.mrf.mxu3 }
 0x859   :  { %18532 = vst [vmem:[#allocation60_spill] sm:$0xff] %v17102_v38  ;;  %v13691_v38 = vld [vmem:[#allocation10 + $0x68] sm:$0xff] }
 0x85a   :  { %18533 = vst [vmem:[#allocation50_spill] sm:$0xff] %v17104_v52  ;;  %v4356_v47 = vpop.f32.mrf.mxu1  ;;  %6996 = vmatpush.bf16.msra.mxu3 %v13691_v38 }
 0x85b   :  { %v17107_v58 = vadd.f32 %v4356_v47, %v17010_v11  ;;  %v18538_v47 = vld [vmem:[#allocation43_spill] sm:$0xff] }
 0x85c   :  { %v4079_v49 = vpop.f32.mrf.mxu0 }
 0x85d   :  { %18534 = vst [vmem:[#allocation114_spill] sm:$0xff] %v17107_v58  ;;  %v17110_v15 = vadd.f32 %v4079_v49, %v18535_v9  ;;  %4994 = vmatmul.bf16.gmra.mxu3 %v18509_v23 }
 0x860   :  { %v4658_v40 = vpop.f32.mrf.mxu2  ;;  %v4955_v46 = vpop.f32.mrf.mxu3 }
 0x861   :  { %v17113_v1 = vadd.f32 %v4955_v46, %v4744_v37 }
 0x862   :  { %v4359_v22 = vpop.f32.mrf.mxu1 }
 0x863   :  { %18536 = vst [vmem:[#allocation117_spill] sm:$0xff] %v17113_v1  ;;  %v4447_v20 = vadd.f32 %v4359_v22, %v17018_v25 }
 0x864   :  { %v4082_v52 = vpop.f32.mrf.mxu0 }
 0x865   :  { %v17117_v11 = vadd.f32 %v4082_v52, %v18537_v3  ;;  %5440 = vmatmul.bf16.vlgmr.msrb.gmra.mxu1 %v18538_v47  ;;  %v4746_v9 = vadd.f32 %v4658_v40, %v4447_v20  ;;  %v18544_v20 = vld [vmem:[#allocation47_spill] sm:$0xff] }
 0x867   :  { %5166 = vmatmul.bf16.gmra.mxu0 %v18423_v19 }
 0x868   :  { %v17121_v49 = vpop.f32.mrf.mxu2  ;;  %v17123_v37 = vpop.f32.mrf.mxu3 }
 0x869   :  { %18539 = vst [vmem:[#allocation73_spill] sm:$0xff] %v17121_v49 }
 0x86a   :  { %18540 = vst [vmem:[#allocation116_spill] sm:$0xff] %v17123_v37  ;;  %v4361_v46 = vpop.f32.mrf.mxu1  ;;  %v18545_v37 = vld [vmem:[#allocation30_spill] sm:$0xff] }
 0x86b   :  { %v17126_v58 = vadd.f32 %v4361_v46, %v17026_v2  ;;  %v18546_v2 = vld [vmem:[#allocation100_spill] sm:$0xff] }
 0x86c   :  { %v4084_v25 = vpop.f32.mrf.mxu0 }
 0x86d   :  { %18541 = vst [vmem:[#allocation123_spill] sm:$0xff] %v17126_v58  ;;  %v17129_v22 = vadd.f32 %v4084_v25, %v18542_v50  ;;  %v18550_v58 = vld [vmem:[#allocation92_spill] sm:$0xff] }
 0x870   :  { %v4663_v3 = vpop.f32.mrf.mxu2  ;;  %v4960_v52 = vpop.f32.mrf.mxu3 }
 0x871   :  { %v17131_v1 = vadd.f32 %v4960_v52, %v4746_v9 }
 0x872   :  { %v4364_v40 = vpop.f32.mrf.mxu1 }
 0x873   :  { %18543 = vst [vmem:[#allocation119_spill] sm:$0xff] %v17131_v1  ;;  %v4449_v38 = vadd.f32 %v4364_v40, %v17034_v32 }
 0x874   :  { %v4087_v19 = vpop.f32.mrf.mxu0 }
 0x875   :  { %v17135_v47 = vadd.f32 %v4087_v19, %v18544_v20  ;;  %5445 = vmatmul.bf16.gmra.mxu1 %v18545_v37  ;;  %v4748_v49 = vadd.f32 %v4663_v3, %v4449_v38 }
 0x877   :  { %5171 = vmatmul.bf16.gmra.mxu0 %v18546_v2  ;;  %v18551_v2 = vld [vmem:[#allocation24_spill] sm:$0xff] }
 0x878   :  { %v17139_v46 = vpop.f32.mrf.mxu2  ;;  %v17141_v25 = vpop.f32.mrf.mxu3 }
 0x879   :  { %18547 = vst [vmem:[#allocation121_spill] sm:$0xff] %v17139_v46 }
 0x87a   :  { %18548 = vst [vmem:[#allocation129_spill] sm:$0xff] %v17141_v25  ;;  %v4366_v50 = vpop.f32.mrf.mxu1  ;;  %v18552_v25 = vld [vmem:[#allocation55_spill] sm:$0xff] }
 0x87b   :  { %v17144_v9 = vadd.f32 %v4366_v50, %v17046_v59 }
 0x87c   :  { %v4089_v52 = vpop.f32.mrf.mxu0 }
 0x87d   :  { %18549 = vst [vmem:[#allocation125_spill] sm:$0xff] %v17144_v9  ;;  %v17147_v32 = vadd.f32 %v4089_v52, %v18550_v58 }
 0x880   :  { %v4668_v40 = vpop.f32.mrf.mxu2  ;;  %v4965_v19 = vpop.f32.mrf.mxu3 }
 0x881   :  { %v17149_v20 = vadd.f32 %v4965_v19, %v4748_v49  ;;  %v18556_v19 = vld [vmem:[#allocation96_spill] sm:$0xff] }
 0x882   :  { %v4369_v37 = vpop.f32.mrf.mxu1 }
 0x883   :  { %v4451_v3 = vadd.f32 %v4369_v37, %v17054_v18 }
 0x884   :  { %v4092_v38 = vpop.f32.mrf.mxu0 }
 0x885   :  { %v17153_v46 = vadd.f32 %v4092_v38, %v18551_v2  ;;  %5450 = vmatmul.bf16.gmra.mxu1 %v18552_v25  ;;  %v4750_v1 = vadd.f32 %v4668_v40, %v4451_v3  ;;  %v18557_v3 = vld [vmem:[#allocation23_spill] sm:$0xff] }
 0x887   :  { %5176 = vmatmul.bf16.gmra.mxu0 %v18441_v53 }
 0x888   :  { %v17157_v59 = vpop.f32.mrf.mxu2  ;;  %v17159_v58 = vpop.f32.mrf.mxu3 }
 0x889   :  { %18553 = vst [vmem:[#allocation77_spill] sm:$0xff] %v17157_v59 }
 0x88a   :  { %18554 = vst [vmem:[#allocation58_spill] sm:$0xff] %v17159_v58  ;;  %v4371_v50 = vpop.f32.mrf.mxu1  ;;  %v18558_v58 = vld [vmem:[#allocation97_spill] sm:$0xff] }
 0x88b   :  { %v17162_v49 = vadd.f32 %v4371_v50, %v17066_v57 }
 0x88c   :  { %v4094_v52 = vpop.f32.mrf.mxu0 }
 0x88d   :  { %18555 = vst [vmem:[#allocation127_spill] sm:$0xff] %v17162_v49  ;;  %v17165_v18 = vadd.f32 %v4094_v52, %v18556_v19  ;;  %v13682_v19 = vld [vmem:[#allocation10 + $0x20] sm:$0xff] }
 0x88e   :  { %6936 = vmatpush.bf16.msra.mxu2 %v13682_v19  ;;  %v13679_v19 = vld [vmem:[#allocation10 + $0x8] sm:$0xff] }
 0x890   :  { %v4673_v37 = vpop.f32.mrf.mxu2  ;;  %v4970_v38 = vpop.f32.mrf.mxu3 }
 0x891   :  { %v17167_v2 = vadd.f32 %v4970_v38, %v4750_v1 }
 0x892   :  { %v4374_v25 = vpop.f32.mrf.mxu1 }
 0x893   :  { %v4453_v40 = vadd.f32 %v4374_v25, %v17074_v62  ;;  %v18562_v62 = vld [vmem:[#allocation46_spill] sm:$0xff] }
 0x894   :  { %v5142_v53 = vpop.f32.mrf.mxu0 }
 0x895   :  { %v17171_v9 = vadd.f32 %v5142_v53, %v18557_v3  ;;  %5455 = vmatmul.bf16.gmra.mxu1 %v18558_v58  ;;  %v4752_v59 = vadd.f32 %v4673_v37, %v4453_v40  ;;  %v13681_v53 = vld [vmem:[#allocation10 + $0x18] sm:$0xff] }
 0x896   :  { %6937 = vmatpush.bf16.msra.mxu2 %v13681_v53 }
 0x897   :  { %5181 = vmatmul.bf16.gmra.mxu0 %v18445_v41 }
 0x898   :  { %v17175_v57 = vpop.f32.mrf.mxu2  ;;  %v17177_v50 = vpop.f32.mrf.mxu3 }
 0x899   :  { %18559 = vst [vmem:[#allocation66_spill] sm:$0xff] %v17175_v57  ;;  %v13690_v57 = vld [vmem:[#allocation10 + $0x60] sm:$0xff] }
 0x89a   :  { %18560 = vst [vmem:[#allocation64_spill] sm:$0xff] %v17177_v50  ;;  %v4376_v52 = vpop.f32.mrf.mxu1  ;;  %v13680_v50 = vld [vmem:[#allocation10 + $0x10] sm:$0xff]  ;;  %6997 = vmatpush.bf16.msra.mxu3 %v13690_v57  ;;  %v18569_v57 = vld [vmem:[#allocation93_spill] sm:$0xff] }
 0x89b   :  { %v17180_v1 = vadd.f32 %v4376_v52, %v17090_v5  ;;  %v18564_v5 = vld [vmem:[#allocation51_spill] sm:$0xff]  ;;  %6938 = vmatpush.bf16.msra.mxu2 %v13680_v50 }
 0x89c   :  { %v5144_v38 = vpop.f32.mrf.mxu0 }
 0x89d   :  { %18561 = vst [vmem:[#allocation130_spill] sm:$0xff] %v17180_v1  ;;  %v17183_v25 = vadd.f32 %v5144_v38, %v18562_v62  ;;  %v18565_v1 = vld [vmem:[#allocation98_spill] sm:$0xff] }
 0x89f   :  { %6939 = vmatpush.bf16.msra.mxu2 %v13679_v19 }
 0x8a0   :  { %v4678_v3 = vpop.f32.mrf.mxu2  ;;  %v4975_v58 = vpop.f32.mrf.mxu3 }
 0x8a1   :  { %v17185_v37 = vadd.f32 %v4975_v58, %v4752_v59  ;;  %v13689_v59 = vld [vmem:[#allocation10 + $0x58] sm:$0xff] }
 0x8a2   :  { %v4379_v41 = vpop.f32.mrf.mxu1  ;;  %6998 = vmatpush.bf16.msra.mxu3 %v13689_v59 }
 0x8a3   :  { %18563 = vst [vmem:[#allocation62_spill] sm:$0xff] %v17185_v37  ;;  %v4455_v40 = vadd.f32 %v4379_v41, %v17098_v4  ;;  %v13688_v41 = vld [vmem:[#allocation10 + $0x50] sm:$0xff]  ;;  %v13709_v37 = vld [vmem:[#allocation10 + $0xf8] sm:$0xff] }
 0x8a4   :  { %v5147_v49 = vpop.f32.mrf.mxu0 }
 0x8a5   :  { %v17189_v52 = vadd.f32 %v5147_v49, %v18564_v5  ;;  %5460 = vmatmul.bf16.gmra.mxu1 %v18565_v1  ;;  %v4754_v38 = vadd.f32 %v4678_v3, %v4455_v40  ;;  %v13678_v49 = vld [vmem:[#allocation10] sm:$0xff]  ;;  %v13701_v3 = vld [vmem:[#allocation10 + $0xb8] sm:$0xff] }
 0x8a6   :  { %6999 = vmatpush.bf16.msra.mxu3 %v13688_v41  ;;  %6940 = vmatpush.bf16.msra.mxu2 %v13678_v49  ;;  %v18571_v49 = vld [vmem:[#allocation48_spill] sm:$0xff] }
 0x8a7   :  { %5186 = vmatmul.bf16.gmra.mxu0 %v18449_v63  ;;  %v13687_v63 = vld [vmem:[#allocation10 + $0x48] sm:$0xff] }
 0x8a8   :  { %v17193_v62 = vpop.f32.mrf.mxu2  ;;  %v17195_v53 = vpop.f32.mrf.mxu3 }
 0x8a9   :  { %18566 = vst [vmem:[#allocation72_spill] sm:$0xff] %v17193_v62 }
 0x8aa   :  { %18567 = vst [vmem:[#allocation69_spill] sm:$0xff] %v17195_v53  ;;  %v4381_v4 = vpop.f32.mrf.mxu1  ;;  %7055 = vmatpush.bf16.msrb.mxu2 %v13701_v3  ;;  %v13700_v53 = vld [vmem:[#allocation10 + $0xb0] sm:$0xff]  ;;  %7000 = vmatpush.bf16.msra.mxu3 %v13687_v63 }
 0x8ab   :  { %v17198_v58 = vadd.f32 %v4381_v4, %v17110_v15  ;;  %v13686_v4 = vld [vmem:[#allocation10 + $0x40] sm:$0xff] }
 0x8ac   :  { %v5149_v1 = vpop.f32.mrf.mxu0 }
 0x8ad   :  { %18568 = vst [vmem:[#allocation68_spill] sm:$0xff] %v17198_v58  ;;  %v17201_v50 = vadd.f32 %v5149_v1, %v18569_v57  ;;  %v13699_v58 = vld [vmem:[#allocation10 + $0xa8] sm:$0xff] }
 0x8ae   :  { %7056 = vmatpush.bf16.msrb.mxu2 %v13700_v53  ;;  %v18570_v1 = vld [vmem:[#allocation25_spill] sm:$0xff]  ;;  %7001 = vmatpush.bf16.msra.mxu3 %v13686_v4  ;;  %v13708_v53 = vld [vmem:[#allocation10 + $0xf0] sm:$0xff] }
 0x8af   :  { %v13706_v4 = vld [vmem:[#allocation10 + $0xe0] sm:$0xff] }
 0x8b0   :  { %v4683_v40 = vpop.f32.mrf.mxu2  ;;  %v4980_v5 = vpop.f32.mrf.mxu3 }
 0x8b1   :  { %v17203_v59 = vadd.f32 %v4980_v5, %v4754_v38 }
 0x8b2   :  { %v4384_v19 = vpop.f32.mrf.mxu1  ;;  %7116 = vmatpush.bf16.msrb.mxu3 %v13709_v37  ;;  %7057 = vmatpush.bf16.msrb.mxu2 %v13699_v58 }
 0x8b3   :  { %v4457_v15 = vadd.f32 %v4384_v19, %v17117_v11  ;;  %v13698_v11 = vld [vmem:[#allocation10 + $0xa0] sm:$0xff]  ;;  %v13697_v19 = vld [vmem:[#allocation10 + $0x98] sm:$0xff] }
 0x8b4   :  { %v5152_v62 = vpop.f32.mrf.mxu0 }
 0x8b5   :  { %v17207_v57 = vadd.f32 %v5152_v62, %v18570_v1  ;;  %5465 = vmatmul.bf16.gmra.mxu1 %v18571_v49  ;;  %v4756_v41 = vadd.f32 %v4683_v40, %v4457_v15  ;;  %v13707_v40 = vld [vmem:[#allocation10 + $0xe8] sm:$0xff]  ;;  %v13696_v15 = vld [vmem:[#allocation10 + $0x90] sm:$0xff] }
 0x8b6   :  { %7117 = vmatpush.bf16.msrb.mxu3 %v13708_v53  ;;  %7058 = vmatpush.bf16.msrb.mxu2 %v13698_v11  ;;  %v13695_v53 = vld [vmem:[#allocation10 + $0x88] sm:$0xff] }
 0x8b7   :  { %5191 = vmatmul.bf16.gmra.mxu0 %v18452_v35 }
 0x8b8   :  { %v17211_v38 = vpop.f32.mrf.mxu2  ;;  %v17213_v3 = vpop.f32.mrf.mxu3 }
 0x8b9   :  { %18572 = vst [vmem:[#allocation28_spill] sm:$0xff] %v17213_v3 }
 0x8ba   :  { %v4386_v63 = vpop.f32.mrf.mxu1  ;;  %7118 = vmatpush.bf16.msrb.mxu3 %v13707_v40  ;;  %7059 = vmatpush.bf16.msrb.mxu2 %v13697_v19  ;;  %v13694_v19 = vld [vmem:[#allocation10 + $0x80] sm:$0xff]  ;;  %v13704_v40 = vld [vmem:[#allocation10 + $0xd0] sm:$0xff] }
 0x8bb   :  { %v17216_v5 = vadd.f32 %v4386_v63, %v17129_v22  ;;  %v13705_v63 = vld [vmem:[#allocation10 + $0xd8] sm:$0xff] }
 0x8bc   :  { %v5154_v62 = vpop.f32.mrf.mxu0 }
 0x8bd   :  { %v17219_v37 = vadd.f32 %v5154_v62, %v16766_v60  ;;  %v18573_v60 = vld [vmem:[#allocation102_spill] sm:$0xff] }
 0x8be   :  { %7119 = vmatpush.bf16.msrb.mxu3 %v13706_v4  ;;  %7060 = vmatpush.bf16.msrb.mxu2 %v13696_v15  ;;  %v18575_v4 = vld [vmem:[#allocation99_spill] sm:$0xff] }
 0x8c0   :  { %v4688_v35 = vpop.f32.mrf.mxu2  ;;  %v4985_v58 = vpop.f32.mrf.mxu3 }
 0x8c1   :  { %v17221_v1 = vadd.f32 %v4985_v58, %v4756_v41 }
 0x8c2   :  { %v4389_v49 = vpop.f32.mrf.mxu1  ;;  %7120 = vmatpush.bf16.msrb.mxu3 %v13705_v63  ;;  %7061 = vmatpush.bf16.msrb.mxu2 %v13695_v53 }
 0x8c3   :  { %v4459_v22 = vadd.f32 %v4389_v49, %v17135_v47 }
 0x8c4   :  { %v5157_v11 = vpop.f32.mrf.mxu0 }
 0x8c5   :  { %v17225_v3 = vadd.f32 %v5157_v11, %v16773_v56  ;;  %5470 = vmatmul.bf16.gmra.mxu1 %v18573_v60  ;;  %v4758_v62 = vadd.f32 %v4688_v35, %v4459_v22  ;;  %v13703_v35 = vld [vmem:[#allocation10 + $0xc8] sm:$0xff]  ;;  %v13702_v11 = vld [vmem:[#allocation10 + $0xc0] sm:$0xff] }
 0x8c6   :  { %7121 = vmatpush.bf16.msrb.mxu3 %v13704_v40  ;;  %7062 = vmatpush.bf16.msrb.mxu2 %v13694_v19  ;;  %v18576_v19 = vld [vmem:[#allocation105_spill] sm:$0xff] }
 0x8c7   :  { %5196 = vmatmul.bf16.gmra.mxu0 %v18457_v6 }
 0x8c8   :  { %v17229_v41 = vpop.f32.mrf.mxu3  ;;  %v17231_v58 = vpop.f32.mrf.mxu2 }
 0x8c9   :  { %18574 = vst [vmem:[#allocation29_spill] sm:$0xff] %v17231_v58 }
 0x8ca   :  { %v4391_v47 = vpop.f32.mrf.mxu1  ;;  %7122 = vmatpush.bf16.msrb.mxu3 %v13703_v35 }
 0x8cb   :  { %v17234_v15 = vadd.f32 %v4391_v47, %v17147_v32 }
 0x8cc   :  { %v5159_v56 = vpop.f32.mrf.mxu0 }
 0x8cd   :  { %v17237_v49 = vadd.f32 %v5159_v56, %v18575_v4 }
 0x8ce   :  { %7123 = vmatpush.bf16.msrb.mxu3 %v13702_v11 }
 0x8d0   :  { %v4990_v6 = vpop.f32.mrf.mxu3  ;;  %v4693_v60 = vpop.f32.mrf.mxu2 }
 0x8d1   :  { %v17239_v22 = vadd.f32 %v4990_v6, %v4758_v62 }
 0x8d2   :  { %v4394_v53 = vpop.f32.mrf.mxu1 }
 0x8d3   :  { %v4461_v63 = vadd.f32 %v4394_v53, %v17153_v46 }
 0x8d4   :  { %v5162_v40 = vpop.f32.mrf.mxu0 }
 0x8d5   :  { %v17243_v32 = vadd.f32 %v5162_v40, %v16789_v36  ;;  %5475 = vmatmul.bf16.gmra.mxu1 %v18576_v19  ;;  %v4760_v47 = vadd.f32 %v4693_v60, %v4461_v63  ;;  %v17257_v36 = vld [vmem:[#allocation8] ss:$0 sm:$0xff]  ;;  %v18580_v40 = vld [vmem:[#allocation59_spill] sm:$0xff] }
 0x8d7   :  { %5201 = vmatmul.bf16.gmra.mxu0 %v18459_v43 }
 0x8d8   :  { %v17247_v56 = vpop.f32.mrf.mxu3 }
 0x8d9   :  { %18577 = vst [vmem:[#allocation79_spill] sm:$0xff] %v17247_v56 }
 0x8da   :  { %v4396_v4 = vpop.f32.mrf.mxu1 }
 0x8db   :  { %v17250_v62 = vadd.f32 %v4396_v4, %v17165_v18  ;;  %v18581_v18 = vld [vmem:[#allocation74_spill] sm:$0xff] }
 0x8dc   :  { %v5164_v35 = vpop.f32.mrf.mxu0 }
 0x8dd   :  { %18578 = vst [vmem:[#allocation78_spill] sm:$0xff] %v17250_v62  ;;  %v17253_v46 = vadd.f32 %v5164_v35, %v16797_v30  ;;  %v13717_v30 = vld [vmem:[#allocation10 + $0x138] sm:$0xff] }
 0x8e0   :  { %v4995_v6 = vpop.f32.mrf.mxu3 }
 0x8e1   :  { %v17255_v11 = vadd.f32 %v4995_v6, %v4760_v47  ;;  %v13941_v47 = vld [vmem:[#allocation10 + $0x838] sm:$0xff] }
 0x8e2   :  { %v5441_v53 = vpop.f32.mrf.mxu1  ;;  %v13949_v6 = vld [vmem:[#allocation10 + $0x878] sm:$0xff]  ;;  %8885 = vmatpush.bf16.msrb.mxu0 %v13941_v47 }
 0x8e3   :  { %18579 = vst [vmem:[#allocation21_spill] sm:$0xff] %v17255_v11  ;;  %v5601_v63 = vadd.f32 %v5441_v53, %v17171_v9  ;;  %v13716_v53 = vld [vmem:[#allocation10 + $0x130] sm:$0xff]  ;;  %8946 = vmatpush.bf16.msra.mxu1 %v13949_v6  ;;  %v18584_v6 = vld [vmem:[#allocation108_spill] sm:$0xff] }
 0x8e4   :  { %v5167_v60 = vpop.f32.mrf.mxu0 }
 0x8e5   :  { %v5669_v43 = vadd.f32 %v17257_v36, %v5601_v63  ;;  %v17262_v19 = vadd.f32 %v5167_v60, %v18580_v40  ;;  %5480 = vmatmul.bf16.gmra.mxu1 %v18581_v18  ;;  %v18582_v60 = vld [vmem:[#allocation22_spill] sm:$0xff]  ;;  %v13725_v18 = vld [vmem:[#allocation10 + $0x178] sm:$0xff] }
 0x8e7   :  { %v5733_v4 = vmax.f32 %v5669_v43, 0.0  ;;  %5206 = vmatmul.bf16.gmra.mxu0 %v18460_v10  ;;  %v13715_v10 = vld [vmem:[#allocation10 + $0x128] sm:$0xff] }
 0x8e9   :  { %v5797_v35 = vpack.c.bf16 %v5733_v4, %v5733_v4 }
 0x8ea   :  { %v5443_v62 = vpop.f32.mrf.mxu1 }
 0x8eb   :  { %v5602_v11 = vadd.f32 %v5443_v62, %v17183_v25  ;;  %6941 = vmatmul.bf16.vlgmr.msra.gmra.mxu2 %v5797_v35  ;;  %v13714_v62 = vld [vmem:[#allocation10 + $0x120] sm:$0xff] }
 0x8ec   :  { %7177 = vmatpush.bf16.msra.mxu2 %v13717_v30  ;;  %v5169_v9 = vpop.f32.mrf.mxu0  ;;  %v13724_v30 = vld [vmem:[#allocation10 + $0x170] sm:$0xff] }
 0x8ed   :  { %v5670_v63 = vadd.f32 %v17257_v36, %v5602_v11  ;;  %v17269_v40 = vadd.f32 %v5169_v9, %v18582_v60  ;;  %v18583_v11 = vld [vmem:[#allocation101_spill] sm:$0xff] }
 0x8ef   :  { %v5734_v43 = vmax.f32 %v5670_v63, 0.0 }
 0x8f0   :  { %7178 = vmatpush.bf16.msra.mxu2 %v13716_v53  ;;  %v13713_v53 = vld [vmem:[#allocation10 + $0x118] sm:$0xff] }
 0x8f1   :  { %v5798_v4 = vpack.c.bf16 %v5734_v43, %v5734_v43  ;;  %v13712_v43 = vld [vmem:[#allocation10 + $0x110] sm:$0xff] }
 0x8f2   :  { %v5446_v56 = vpop.f32.mrf.mxu1 }
 0x8f3   :  { %v5603_v58 = vadd.f32 %v5446_v56, %v17189_v52  ;;  %7002 = vmatmul.bf16.vlgmr.msra.gmra.mxu3 %v5798_v4  ;;  %v13723_v52 = vld [vmem:[#allocation10 + $0x168] sm:$0xff] }
 0x8f4   :  { %7179 = vmatpush.bf16.msra.mxu2 %v13715_v10  ;;  %7238 = vmatpush.bf16.msra.mxu3 %v13725_v18  ;;  %v5172_v25 = vpop.f32.mrf.mxu0  ;;  %v13722_v10 = vld [vmem:[#allocation10 + $0x160] sm:$0xff] }
 0x8f5   :  { %v5671_v35 = vadd.f32 %v17257_v36, %v5603_v58  ;;  %v17274_v47 = vadd.f32 %v5172_v25, %v18583_v11  ;;  %5485 = vmatmul.bf16.gmra.mxu1 %v18584_v6  ;;  %v13711_v25 = vld [vmem:[#allocation10 + $0x108] sm:$0xff]  ;;  %v13710_v6 = vld [vmem:[#allocation10 + $0x100] sm:$0xff] }
 0x8f7   :  { %v5735_v9 = vmax.f32 %v5671_v35, 0.0  ;;  %5211 = vmatmul.bf16.gmra.mxu0 %v18462_v61 }
 0x8f8   :  { %7180 = vmatpush.bf16.msra.mxu2 %v13714_v62  ;;  %7239 = vmatpush.bf16.msra.mxu3 %v13724_v30  ;;  %v13721_v62 = vld [vmem:[#allocation10 + $0x158] sm:$0xff] }
 0x8f9   :  { %v5799_v56 = vpack.c.bf16 %v5735_v9, %v5735_v9  ;;  %v13720_v9 = vld [vmem:[#allocation10 + $0x150] sm:$0xff] }
 0x8fa   :  { %v5448_v63 = vpop.f32.mrf.mxu1 }
 0x8fb   :  { %v5604_v60 = vadd.f32 %v5448_v63, %v17201_v50  ;;  %7063 = vmatmul.bf16.vlgmr.msrb.gmra.mxu2 %v5799_v56  ;;  %v13733_v56 = vld [vmem:[#allocation10 + $0x1b8] sm:$0xff] }
 0x8fc   :  { %7181 = vmatpush.bf16.msra.mxu2 %v13713_v53  ;;  %7240 = vmatpush.bf16.msra.mxu3 %v13723_v52  ;;  %v5174_v58 = vpop.f32.mrf.mxu0  ;;  %v18585_v52 = vld [vmem:[#allocation110_spill] sm:$0xff] }
 0x8fd   :  { %v5672_v18 = vadd.f32 %v17257_v36, %v5604_v60  ;;  %v17281_v4 = vadd.f32 %v5174_v58, %v16829_v16  ;;  %v13732_v58 = vld [vmem:[#allocation10 + $0x1b0] sm:$0xff] }
 0x8ff   :  { %v5736_v61 = vmax.f32 %v5672_v18, 0.0 }
 0x900   :  { %7182 = vmatpush.bf16.msra.mxu2 %v13712_v43  ;;  %7241 = vmatpush.bf16.msra.mxu3 %v13722_v10 }
 0x901   :  { %v5800_v30 = vpack.c.bf16 %v5736_v61, %v5736_v61 }
 0x902   :  { %v5451_v35 = vpop.f32.mrf.mxu1 }
 0x903   :  { %v5605_v50 = vadd.f32 %v5451_v35, %v17207_v57  ;;  %7124 = vmatmul.bf16.vlgmr.msrb.gmra.mxu3 %v5800_v30  ;;  %v13719_v57 = vld [vmem:[#allocation10 + $0x148] sm:$0xff] }
 0x904   :  { %7183 = vmatpush.bf16.msra.mxu2 %v13711_v25  ;;  %7242 = vmatpush.bf16.msra.mxu3 %v13721_v62  ;;  %v5177_v11 = vpop.f32.mrf.mxu0  ;;  %v13741_v62 = vld [vmem:[#allocation10 + $0x1f8] sm:$0xff] }
 0x905   :  { %v5673_v53 = vadd.f32 %v17257_v36, %v5605_v50  ;;  %v17286_v16 = vadd.f32 %v5177_v11, %v16837_v48  ;;  %5490 = vmatmul.bf16.gmra.mxu1 %v18585_v52  ;;  %v13718_v48 = vld [vmem:[#allocation10 + $0x140] sm:$0xff]  ;;  %v13740_v11 = vld [vmem:[#allocation10 + $0x1f0] sm:$0xff] }
 0x906   :  { %v13730_v50 = vld [vmem:[#allocation10 + $0x1a0] sm:$0xff] }
 0x907   :  { %v5737_v63 = vmax.f32 %v5673_v53, 0.0  ;;  %5216 = vmatmul.bf16.gmra.mxu0 %v18465_v27  ;;  %v13731_v27 = vld [vmem:[#allocation10 + $0x1a8] sm:$0xff]  ;;  %v18586_v52 = vld [vmem:[#allocation112_spill] sm:$0xff] }
 0x908   :  { %7184 = vmatpush.bf16.msra.mxu2 %v13710_v6  ;;  %7243 = vmatpush.bf16.msra.mxu3 %v13720_v9  ;;  %v13739_v53 = vld [vmem:[#allocation10 + $0x1e8] sm:$0xff] }
 0x909   :  { %v5801_v60 = vpack.c.bf16 %v5737_v63, %v5737_v63  ;;  %v13738_v63 = vld [vmem:[#allocation10 + $0x1e0] sm:$0xff] }
 0x90a   :  { %v5453_v43 = vpop.f32.mrf.mxu1 }
 0x90b   :  { %v5606_v10 = vadd.f32 %v5453_v43, %v17219_v37  ;;  %7185 = vmatmul.bf16.vlgmr.msra.gmra.mxu2 %v5801_v60 }
 0x90c   :  { %7299 = vmatpush.bf16.msrb.mxu2 %v13733_v56  ;;  %7244 = vmatpush.bf16.msra.mxu3 %v13719_v57  ;;  %v5179_v18 = vpop.f32.mrf.mxu0  ;;  %v13728_v56 = vld [vmem:[#allocation10 + $0x190] sm:$0xff] }
 0x90d   :  { %v5674_v61 = vadd.f32 %v17257_v36, %v5606_v10  ;;  %v17293_v25 = vadd.f32 %v5179_v18, %v16845_v13  ;;  %v13729_v13 = vld [vmem:[#allocation10 + $0x198] sm:$0xff] }
 0x90e   :  { %v13737_v10 = vld [vmem:[#allocation10 + $0x1d8] sm:$0xff] }
 0x90f   :  { %v5738_v30 = vmax.f32 %v5674_v61, 0.0 }
 0x910   :  { %7300 = vmatpush.bf16.msrb.mxu2 %v13732_v58  ;;  %7245 = vmatpush.bf16.msra.mxu3 %v13718_v48  ;;  %v13736_v48 = vld [vmem:[#allocation10 + $0x1d0] sm:$0xff] }
 0x911   :  { %v5802_v35 = vpack.c.bf16 %v5738_v30, %v5738_v30 }
 0x912   :  { %v5456_v37 = vpop.f32.mrf.mxu1 }
 0x913   :  { %7246 = vmatmul.bf16.vlgmr.msra.gmra.mxu3 %v5802_v35  ;;  %v5607_v57 = vadd.f32 %v5456_v37, %v17225_v3  ;;  %v13749_v3 = vld [vmem:[#allocation10 + $0x238] sm:$0xff]  ;;  %v18587_v37 = vld [vmem:[#allocation53_spill] sm:$0xff] }
 0x914   :  { %7301 = vmatpush.bf16.msrb.mxu2 %v13731_v27  ;;  %7360 = vmatpush.bf16.msrb.mxu3 %v13741_v62  ;;  %v5182_v6 = vpop.f32.mrf.mxu0 }
 0x915   :  { %v17296_v9 = vadd.f32 %v5182_v6, %v16853_v28  ;;  %5495 = vmatmul.bf16.gmra.mxu1 %v18586_v52  ;;  %v13727_v28 = vld [vmem:[#allocation10 + $0x188] sm:$0xff]  ;;  %v5675_v18 = vadd.f32 %v17257_v36, %v5607_v57  ;;  %v13748_v6 = vld [vmem:[#allocation10 + $0x230] sm:$0xff] }
 0x917   :  { %5221 = vmatmul.bf16.gmra.mxu0 %v18468_v12  ;;  %v13726_v12 = vld [vmem:[#allocation10 + $0x180] sm:$0xff]  ;;  %v5739_v61 = vmax.f32 %v5675_v18, 0.0 }
 0x918   :  { %7302 = vmatpush.bf16.msrb.mxu2 %v13730_v50  ;;  %7361 = vmatpush.bf16.msrb.mxu3 %v13740_v11 }
 0x919   :  { %v5803_v50 = vpack.c.bf16 %v5739_v61, %v5739_v61 }
 0x91a   :  { %v5458_v60 = vpop.f32.mrf.mxu1 }
 0x91b   :  { %v5608_v27 = vadd.f32 %v5458_v60, %v17237_v49  ;;  %v13734_v49 = vld [vmem:[#allocation10 + $0x1c0] sm:$0xff]  ;;  %v18588_v60 = vld [vmem:[#allocation42_spill] sm:$0xff] }
 0x91c   :  { %7303 = vmatpush.bf16.msrb.mxu2 %v13729_v13  ;;  %7362 = vmatpush.bf16.msrb.mxu3 %v13739_v53  ;;  %v5184_v58 = vpop.f32.mrf.mxu0  ;;  %v13940_v13 = vld [vmem:[#allocation10 + $0x830] sm:$0xff] }
 0x91d   :  { %v17302_v43 = vadd.f32 %v5184_v58, %v16861_v29  ;;  %v13735_v29 = vld [vmem:[#allocation10 + $0x1c8] sm:$0xff]  ;;  %v5676_v11 = vadd.f32 %v17257_v36, %v5608_v27  ;;  %v13948_v53 = vld [vmem:[#allocation10 + $0x870] sm:$0xff]  ;;  %8886 = vmatpush.bf16.msrb.mxu0 %v13940_v13  ;;  %v18590_v13 = vld [vmem:[#allocation32_spill] sm:$0xff] }
 0x91e   :  { %8947 = vmatpush.bf16.msra.mxu1 %v13948_v53 }
 0x91f   :  { %v5740_v52 = vmax.f32 %v5676_v11, 0.0 }
 0x920   :  { %7304 = vmatpush.bf16.msrb.mxu2 %v13728_v56  ;;  %7363 = vmatpush.bf16.msrb.mxu3 %v13738_v63  ;;  %v13747_v56 = vld [vmem:[#allocation10 + $0x228] sm:$0xff]  ;;  %v13757_v63 = vld [vmem:[#allocation10 + $0x278] sm:$0xff] }
 0x922   :  { %v5461_v62 = vpop.f32.mrf.mxu1 }
 0x924   :  { %7305 = vmatpush.bf16.msrb.mxu2 %v13727_v28  ;;  %7364 = vmatpush.bf16.msrb.mxu3 %v13737_v10  ;;  %v5187_v30 = vpop.f32.mrf.mxu0  ;;  %v5804_v28 = vpack.c.bf16 %v5740_v52, %v5740_v52  ;;  %v13756_v10 = vld [vmem:[#allocation10 + $0x270] sm:$0xff]  ;;  %v13742_v52 = vld [vmem:[#allocation10 + $0x200] sm:$0xff] }
 0x925   :  { %v17307_v35 = vadd.f32 %v5187_v30, %v16869_v51  ;;  %5500 = vmatmul.bf16.gmra.mxu1 %v18587_v37  ;;  %v13744_v30 = vld [vmem:[#allocation10 + $0x210] sm:$0xff]  ;;  %v13743_v37 = vld [vmem:[#allocation10 + $0x208] sm:$0xff] }
 0x927   :  { %5226 = vmatmul.bf16.gmra.mxu0 %v18469_v0  ;;  %v13746_v0 = vld [vmem:[#allocation10 + $0x220] sm:$0xff] }
 0x928   :  { %7306 = vmatpush.bf16.msrb.mxu2 %v13726_v12  ;;  %7365 = vmatpush.bf16.msrb.mxu3 %v13736_v48  ;;  %v13745_v12 = vld [vmem:[#allocation10 + $0x218] sm:$0xff]  ;;  %v13755_v48 = vld [vmem:[#allocation10 + $0x268] sm:$0xff] }
 0x92a   :  { %v5463_v51 = vpop.f32.mrf.mxu1 }
 0x92b   :  { %7307 = vmatmul.bf16.vlgmr.msrb.gmra.mxu2 %v5803_v50  ;;  %v13754_v50 = vld [vmem:[#allocation10 + $0x260] sm:$0xff] }
 0x92c   :  { %7421 = vmatpush.bf16.msra.mxu2 %v13749_v3  ;;  %7366 = vmatpush.bf16.msrb.mxu3 %v13735_v29  ;;  %v5189_v57 = vpop.f32.mrf.mxu0  ;;  %v18589_v3 = vld [vmem:[#allocation115_spill] sm:$0xff]  ;;  %v5609_v29 = vadd.f32 %v5461_v62, %v17243_v32 }
 0x92d   :  { %v17313_v58 = vadd.f32 %v5189_v57, %v18588_v60  ;;  %v13752_v32 = vld [vmem:[#allocation10 + $0x250] sm:$0xff]  ;;  %v13765_v62 = vld [vmem:[#allocation10 + $0x2b8] sm:$0xff]  ;;  %v13751_v60 = vld [vmem:[#allocation10 + $0x248] sm:$0xff] }
 0x930   :  { %7422 = vmatpush.bf16.msra.mxu2 %v13748_v6  ;;  %7367 = vmatpush.bf16.msrb.mxu3 %v13734_v49  ;;  %v5677_v6 = vadd.f32 %v17257_v36, %v5609_v29  ;;  %v13753_v49 = vld [vmem:[#allocation10 + $0x258] sm:$0xff]  ;;  %v13762_v29 = vld [vmem:[#allocation10 + $0x2a0] sm:$0xff] }
 0x932   :  { %v17315_v18 = vpop.f32.mrf.mxu1 }
 0x933   :  { %7368 = vmatmul.bf16.vlgmr.msrb.gmra.mxu3 %v5804_v28  ;;  %v13764_v28 = vld [vmem:[#allocation10 + $0x2b0] sm:$0xff] }
 0x934   :  { %7423 = vmatpush.bf16.msra.mxu2 %v13747_v56  ;;  %7482 = vmatpush.bf16.msra.mxu3 %v13757_v63  ;;  %v5192_v61 = vpop.f32.mrf.mxu0  ;;  %v5741_v56 = vmax.f32 %v5677_v6, 0.0 }
 0x935   :  { %v17318_v27 = vadd.f32 %v5192_v61, %v16885_v26  ;;  %5505 = vmatmul.bf16.gmra.mxu1 %v18589_v3  ;;  %v13773_v3 = vld [vmem:[#allocation10 + $0x2f8] sm:$0xff] }
 0x936   :  { %v5805_v57 = vpack.c.bf16 %v5741_v56, %v5741_v56 }
 0x937   :  { %5231 = vmatmul.bf16.gmra.mxu0 %v16447_v44  ;;  %v5610_v44 = vadd.f32 %v5463_v51, %v17253_v46  ;;  %v13750_v46 = vld [vmem:[#allocation10 + $0x240] sm:$0xff]  ;;  %v13763_v51 = vld [vmem:[#allocation10 + $0x2a8] sm:$0xff] }
 0x938   :  { %7424 = vmatpush.bf16.msra.mxu2 %v13746_v0  ;;  %7483 = vmatpush.bf16.msra.mxu3 %v13756_v10 }
 0x939   :  { %v5678_v0 = vadd.f32 %v17257_v36, %v5610_v44  ;;  %v13759_v44 = vld [vmem:[#allocation10 + $0x288] sm:$0xff] }
 0x93a   :  { %v17323_v11 = vpop.f32.mrf.mxu1 }
 0x93b   :  { %v5742_v61 = vmax.f32 %v5678_v0, 0.0 }
 0x93c   :  { %7425 = vmatpush.bf16.msra.mxu2 %v13745_v12  ;;  %7484 = vmatpush.bf16.msra.mxu3 %v13755_v48  ;;  %v5194_v26 = vpop.f32.mrf.mxu0  ;;  %v18591_v48 = vld [vmem:[#allocation54_spill] sm:$0xff] }
 0x93d   :  { %v17327_v53 = vadd.f32 %v5194_v26, %v18590_v13  ;;  %v13771_v26 = vld [vmem:[#allocation10 + $0x2e8] sm:$0xff] }
 0x940   :  { %7426 = vmatpush.bf16.msra.mxu2 %v13744_v30  ;;  %7485 = vmatpush.bf16.msra.mxu3 %v13754_v50  ;;  %v5806_v50 = vpack.c.bf16 %v5742_v61, %v5742_v61  ;;  %v13780_v61 = vld [vmem:[#allocation10 + $0x330] sm:$0xff] }
 0x942   :  { %v17330_v63 = vpop.f32.mrf.mxu1 }
 0x944   :  { %7427 = vmatpush.bf16.msra.mxu2 %v13743_v37  ;;  %7486 = vmatpush.bf16.msra.mxu3 %v13753_v49  ;;  %v5197_v10 = vpop.f32.mrf.mxu0  ;;  %v13772_v37 = vld [vmem:[#allocation10 + $0x2f0] sm:$0xff]  ;;  %v13761_v49 = vld [vmem:[#allocation10 + $0x298] sm:$0xff] }
 0x945   :  { %v17334_v12 = vadd.f32 %v5197_v10, %v16901_v55  ;;  %5510 = vmatmul.bf16.gmra.mxu1 %v18591_v48  ;;  %v13768_v10 = vld [vmem:[#allocation10 + $0x2d0] sm:$0xff]  ;;  %v5612_v48 = vadd.f32 %v17323_v11, %v17269_v40  ;;  %v13766_v40 = vld [vmem:[#allocation10 + $0x2c0] sm:$0xff] }
 0x947   :  { %5236 = vmatmul.bf16.gmra.mxu0 %v18472_v33  ;;  %v13760_v33 = vld [vmem:[#allocation10 + $0x290] sm:$0xff] }
 0x948   :  { %7428 = vmatpush.bf16.msra.mxu2 %v13742_v52  ;;  %7487 = vmatpush.bf16.msra.mxu3 %v13752_v32  ;;  %v5611_v52 = vadd.f32 %v17315_v18, %v17262_v19  ;;  %v13770_v32 = vld [vmem:[#allocation10 + $0x2e0] sm:$0xff] }
 0x949   :  { %v13758_v19 = vld [vmem:[#allocation10 + $0x280] sm:$0xff] }
 0x94a   :  { %v17338_v30 = vpop.f32.mrf.mxu1 }
 0x94b   :  { %7429 = vmatmul.bf16.vlgmr.msra.gmra.mxu2 %v5805_v57  ;;  %v5679_v57 = vadd.f32 %v17257_v36, %v5611_v52  ;;  %v13778_v52 = vld [vmem:[#allocation10 + $0x320] sm:$0xff] }
 0x94c   :  { %7543 = vmatpush.bf16.msrb.mxu2 %v13765_v62  ;;  %7488 = vmatpush.bf16.msra.mxu3 %v13751_v60  ;;  %v5199_v55 = vpop.f32.mrf.mxu0  ;;  %v13769_v60 = vld [vmem:[#allocation10 + $0x2d8] sm:$0xff] }
 0x94d   :  { %v17341_v6 = vadd.f32 %v5199_v55, %v16909_v31  ;;  %v18592_v31 = vld [vmem:[#allocation118_spill] sm:$0xff]  ;;  %v5743_v18 = vmax.f32 %v5679_v57, 0.0 }
 0x950   :  { %7544 = vmatpush.bf16.msrb.mxu2 %v13764_v28  ;;  %7489 = vmatpush.bf16.msra.mxu3 %v13750_v46 }
 0x952   :  { %v17343_v13 = vpop.f32.mrf.mxu1 }
 0x953   :  { %7490 = vmatmul.bf16.vlgmr.msra.gmra.mxu3 %v5806_v50 }
 0x954   :  { %7545 = vmatpush.bf16.msrb.mxu2 %v13763_v51  ;;  %7604 = vmatpush.bf16.msrb.mxu3 %v13773_v3  ;;  %v5202_v56 = vpop.f32.mrf.mxu0  ;;  %v5807_v51 = vpack.c.bf16 %v5743_v18, %v5743_v18  ;;  %v5680_v3 = vadd.f32 %v17257_v36, %v5612_v48  ;;  %v17377_v18 = vpop.f32.mrf.mxu3 }
 0x955   :  { %v17348_v62 = vadd.f32 %v5202_v56, %v16917_v14  ;;  %5515 = vmatmul.bf16.gmra.mxu1 %v18592_v31  ;;  %v13781_v14 = vld [vmem:[#allocation10 + $0x338] sm:$0xff]  ;;  %v13788_v56 = vld [vmem:[#allocation10 + $0x370] sm:$0xff]  ;;  %v13947_v31 = vld [vmem:[#allocation10 + $0x868] sm:$0xff] }
 0x956   :  { %v5744_v11 = vmax.f32 %v5680_v3, 0.0  ;;  %8948 = vmatpush.bf16.msra.mxu1 %v13947_v31  ;;  %v13775_v3 = vld [vmem:[#allocation10 + $0x308] sm:$0xff] }
 0x957   :  { %5241 = vmatmul.bf16.gmra.mxu0 %v18479_v34  ;;  %v13767_v34 = vld [vmem:[#allocation10 + $0x2c8] sm:$0xff] }
 0x958   :  { %7546 = vmatpush.bf16.msrb.mxu2 %v13762_v29  ;;  %7605 = vmatpush.bf16.msrb.mxu3 %v13772_v37  ;;  %v13779_v37 = vld [vmem:[#allocation10 + $0x328] sm:$0xff] }
 0x95a   :  { %v17353_v28 = vpop.f32.mrf.mxu1 }
 0x95c   :  { %7547 = vmatpush.bf16.msrb.mxu2 %v13761_v49  ;;  %7606 = vmatpush.bf16.msrb.mxu3 %v13771_v26  ;;  %v5204_v0 = vpop.f32.mrf.mxu0  ;;  %v13789_v49 = vld [vmem:[#allocation10 + $0x378] sm:$0xff]  ;;  %v17367_v26 = vpop.f32.mrf.mxu2 }
 0x95d   :  { %v17358_v46 = vadd.f32 %v5204_v0, %v16925_v24 }
 0x960   :  { %7548 = vmatpush.bf16.msrb.mxu2 %v13760_v33  ;;  %7607 = vmatpush.bf16.msrb.mxu3 %v13770_v32  ;;  %v18593_v33 = vld [vmem:[#allocation120_spill] sm:$0xff]  ;;  %v13939_v32 = vld [vmem:[#allocation10 + $0x828] sm:$0xff] }
 0x961   :  { %8887 = vmatpush.bf16.msrb.mxu0 %v13939_v32 }
 0x962   :  { %v5481_v29 = vpop.f32.mrf.mxu1 }
 0x963   :  { %v17362_v50 = vadd.f32 %v5481_v29, %v17296_v9  ;;  %v5808_v9 = vpack.c.bf16 %v5744_v11, %v5744_v11  ;;  %v13785_v29 = vld [vmem:[#allocation10 + $0x358] sm:$0xff] }
 0x964   :  { %7549 = vmatpush.bf16.msrb.mxu2 %v13759_v44  ;;  %7608 = vmatpush.bf16.msrb.mxu3 %v13769_v60  ;;  %v5207_v55 = vpop.f32.mrf.mxu0 }
 0x965   :  { %v17365_v24 = vadd.f32 %v5207_v55, %v16933_v54  ;;  %5520 = vmatmul.bf16.gmra.mxu1 %v18593_v33 }
 0x967   :  { %5246 = vmatmul.bf16.gmra.mxu0 %v18484_v17  ;;  %v13777_v17 = vld [vmem:[#allocation10 + $0x318] sm:$0xff] }
 0x968   :  { %7550 = vmatpush.bf16.msrb.mxu2 %v13758_v19  ;;  %7609 = vmatpush.bf16.msrb.mxu3 %v13768_v10  ;;  %v13787_v19 = vld [vmem:[#allocation10 + $0x368] sm:$0xff]  ;;  %v13776_v10 = vld [vmem:[#allocation10 + $0x310] sm:$0xff] }
 0x96a   :  { %v5483_v44 = vpop.f32.mrf.mxu1 }
 0x96b   :  { %7551 = vmatmul.bf16.vlgmr.msrb.gmra.mxu2 %v5807_v51  ;;  %v17372_v54 = vadd.f32 %v5483_v44, %v17302_v43  ;;  %v5613_v43 = vadd.f32 %v17330_v63, %v17274_v47  ;;  %v18596_v47 = vld [vmem:[#allocation57_spill] sm:$0xff]  ;;  %v13784_v63 = vld [vmem:[#allocation10 + $0x350] sm:$0xff]  ;;  %v18597_v44 = vld [vmem:[#allocation40_spill] sm:$0xff] }
 0x96c   :  { %7665 = vmatpush.bf16.msra.mxu2 %v13781_v14  ;;  %7610 = vmatpush.bf16.msrb.mxu3 %v13767_v34  ;;  %v5209_v57 = vpop.f32.mrf.mxu0  ;;  %v13786_v14 = vld [vmem:[#allocation10 + $0x360] sm:$0xff] }
 0x96d   :  { %v17375_v60 = vadd.f32 %v5209_v57, %v16941_v39  ;;  %v18594_v39 = vld [vmem:[#allocation103_spill] sm:$0xff]  ;;  %v5681_v55 = vadd.f32 %v17257_v36, %v5613_v43 }
 0x96e   :  { %v6942_v0 = vpop.f32.mrf.mxu2  ;;  %v13796_v43 = vld [vmem:[#allocation10 + $0x3b0] sm:$0xff] }
 0x96f   :  { %v5745_v33 = vmax.f32 %v5681_v55, 0.0  ;;  %v18598_v55 = vld [vmem:[#allocation26_spill] sm:$0xff] }
 0x970   :  { %7666 = vmatpush.bf16.msra.mxu2 %v13780_v61  ;;  %7611 = vmatpush.bf16.msrb.mxu3 %v13766_v40  ;;  %v18595_v40 = vld [vmem:[#allocation122_spill] sm:$0xff] }
 0x972   :  { %v5486_v48 = vpop.f32.mrf.mxu1 }
 0x973   :  { %7612 = vmatmul.bf16.vlgmr.msrb.gmra.mxu3 %v5808_v9  ;;  %v17382_v51 = vadd.f32 %v5486_v48, %v17307_v35  ;;  %v13774_v35 = vld [vmem:[#allocation10 + $0x300] sm:$0xff] }
 0x974   :  { %7667 = vmatpush.bf16.msra.mxu2 %v13779_v37  ;;  %7726 = vmatpush.bf16.msra.mxu3 %v13789_v49  ;;  %v5212_v34 = vpop.f32.mrf.mxu0 }
 0x975   :  { %v17385_v61 = vadd.f32 %v5212_v34, %v18594_v39  ;;  %5525 = vmatmul.bf16.gmra.mxu1 %v18595_v40  ;;  %v13795_v34 = vld [vmem:[#allocation10 + $0x3a8] sm:$0xff]  ;;  %v13805_v39 = vld [vmem:[#allocation10 + $0x3f8] sm:$0xff] }
 0x976   :  { %v6944_v11 = vpop.f32.mrf.mxu2  ;;  %v7003_v37 = vpop.f32.mrf.mxu3 }
 0x977   :  { %v10789_v49 = vadd.f32 %v7003_v37, %v6942_v0  ;;  %5251 = vmatmul.bf16.gmra.mxu0 %v18596_v47  ;;  %v13794_v47 = vld [vmem:[#allocation10 + $0x3a0] sm:$0xff] }
 0x978   :  { %7668 = vmatpush.bf16.msra.mxu2 %v13778_v52  ;;  %7727 = vmatpush.bf16.msra.mxu3 %v13788_v56  ;;  %v5614_v52 = vadd.f32 %v17338_v30, %v17281_v4  ;;  %v13797_v56 = vld [vmem:[#allocation10 + $0x3b8] sm:$0xff]  ;;  %v13782_v30 = vld [vmem:[#allocation10 + $0x340] sm:$0xff] }
 0x97a   :  { %v5488_v9 = vpop.f32.mrf.mxu1  ;;  %v5682_v0 = vadd.f32 %v17257_v36, %v5614_v52  ;;  %v13793_v52 = vld [vmem:[#allocation10 + $0x398] sm:$0xff] }
 0x97b   :  { %v17393_v32 = vadd.f32 %v5488_v9, %v17313_v58  ;;  %v13803_v9 = vld [vmem:[#allocation10 + $0x3e8] sm:$0xff] }
 0x97c   :  { %7669 = vmatpush.bf16.msra.mxu2 %v13777_v17  ;;  %7728 = vmatpush.bf16.msra.mxu3 %v13787_v19  ;;  %v5214_v31 = vpop.f32.mrf.mxu0  ;;  %v13783_v17 = vld [vmem:[#allocation10 + $0x348] sm:$0xff]  ;;  %v5809_v19 = vpack.c.bf16 %v5745_v33, %v5745_v33  ;;  %v5746_v58 = vmax.f32 %v5682_v0, 0.0 }
 0x97d   :  { %v17396_v57 = vadd.f32 %v5214_v31, %v18597_v44  ;;  %v18600_v44 = vld [vmem:[#allocation63_spill] sm:$0xff] }
 0x97e   :  { %v5810_v11 = vpack.c.bf16 %v5746_v58, %v5746_v58 }
 0x980   :  { %7670 = vmatpush.bf16.msra.mxu2 %v13776_v10  ;;  %7729 = vmatpush.bf16.msra.mxu3 %v13786_v14  ;;  %v7005_v10 = vpop.f32.mrf.mxu3  ;;  %v7064_v14 = vpop.f32.mrf.mxu2 }
 0x981   :  { %v10790_v4 = vadd.f32 %v10789_v49, %v7064_v14  ;;  %v13792_v10 = vld [vmem:[#allocation10 + $0x390] sm:$0xff]  ;;  %v13802_v14 = vld [vmem:[#allocation10 + $0x3e0] sm:$0xff] }
 0x982   :  { %v5491_v48 = vpop.f32.mrf.mxu1 }
 0x984   :  { %7671 = vmatpush.bf16.msra.mxu2 %v13775_v3  ;;  %7730 = vmatpush.bf16.msra.mxu3 %v13785_v29  ;;  %v17400_v3 = vadd.f32 %v5491_v48, %v17318_v27  ;;  %v5217_v29 = vpop.f32.mrf.mxu0 }
 0x985   :  { %v17403_v40 = vadd.f32 %v5217_v29, %v18598_v55 }
 0x987   :  { %5256 = vmatmul.bf16.gmra.mxu0 %v18497_v7  ;;  %v5615_v7 = vadd.f32 %v17343_v13, %v17286_v16  ;;  %v13790_v16 = vld [vmem:[#allocation10 + $0x380] sm:$0xff]  ;;  %v13800_v13 = vld [vmem:[#allocation10 + $0x3d0] sm:$0xff] }
 0x988   :  { %7672 = vmatpush.bf16.msra.mxu2 %v13774_v35  ;;  %7731 = vmatpush.bf16.msra.mxu3 %v13784_v63  ;;  %v7066_v37 = vpop.f32.mrf.mxu2  ;;  %v7125_v49 = vpop.f32.mrf.mxu3  ;;  %v13804_v35 = vld [vmem:[#allocation10 + $0x3f0] sm:$0xff]  ;;  %v18599_v63 = vld [vmem:[#allocation124_spill] sm:$0xff] }
 0x989   :  { %5530 = vmatmul.bf16.gmra.mxu1 %v18599_v63  ;;  %v10791_v33 = vadd.f32 %v10790_v4, %v7125_v49  ;;  %v13791_v4 = vld [vmem:[#allocation10 + $0x388] sm:$0xff]  ;;  %v5616_v49 = vadd.f32 %v17353_v28, %v17293_v25  ;;  %v13813_v63 = vld [vmem:[#allocation10 + $0x438] sm:$0xff] }
 0x98a   :  { %v5493_v27 = vpop.f32.mrf.mxu1  ;;  %v18603_v25 = vld [vmem:[#allocation39_spill] sm:$0xff] }
 0x98b   :  { %7673 = vmatmul.bf16.vlgmr.msra.gmra.mxu2 %v5809_v19 }
 0x98c   :  { %7787 = vmatpush.bf16.msrb.mxu2 %v13797_v56  ;;  %7732 = vmatpush.bf16.msra.mxu3 %v13783_v17  ;;  %v17408_v56 = vadd.f32 %v5493_v27, %v17327_v53  ;;  %v5219_v31 = vpop.f32.mrf.mxu0  ;;  %v5683_v53 = vadd.f32 %v17257_v36, %v5615_v7  ;;  %v5684_v27 = vadd.f32 %v17257_v36, %v5616_v49  ;;  %v13808_v49 = vld [vmem:[#allocation10 + $0x410] sm:$0xff] }
 0x98d   :  { %v17411_v17 = vadd.f32 %v5219_v31, %v18600_v44 }
 0x98e   :  { %v5747_v37 = vmax.f32 %v5683_v53, 0.0  ;;  %v13820_v53 = vld [vmem:[#allocation10 + $0x470] sm:$0xff] }
 0x990   :  { %7788 = vmatpush.bf16.msrb.mxu2 %v13796_v43  ;;  %7733 = vmatpush.bf16.msra.mxu3 %v13782_v30  ;;  %v7127_v19 = vpop.f32.mrf.mxu3  ;;  %v7186_v0 = vpop.f32.mrf.mxu2  ;;  %v13801_v30 = vld [vmem:[#allocation10 + $0x3d8] sm:$0xff] }
 0x991   :  { %v10792_v43 = vadd.f32 %v10791_v33, %v7186_v0  ;;  %v5811_v33 = vpack.c.bf16 %v5747_v37, %v5747_v37  ;;  %v5748_v0 = vmax.f32 %v5684_v27, 0.0  ;;  %v18606_v27 = vld [vmem:[#allocation35_spill] sm:$0xff] }
 0x992   :  { %v5496_v58 = vpop.f32.mrf.mxu1 }
 0x993   :  { %7734 = vmatmul.bf16.vlgmr.msra.gmra.mxu3 %v5810_v11  ;;  %v17417_v48 = vadd.f32 %v5496_v58, %v17334_v12  ;;  %v13799_v12 = vld [vmem:[#allocation10 + $0x3c8] sm:$0xff]  ;;  %v5812_v7 = vpack.c.bf16 %v5748_v0, %v5748_v0 }
 0x994   :  { %7789 = vmatpush.bf16.msrb.mxu2 %v13795_v34  ;;  %7848 = vmatpush.bf16.msrb.mxu3 %v13805_v39  ;;  %v5222_v34 = vpop.f32.mrf.mxu0  ;;  %v18601_v39 = vld [vmem:[#allocation27_spill] sm:$0xff]  ;;  %v18604_v58 = vld [vmem:[#allocation41_spill] sm:$0xff] }
 0x995   :  { %v17420_v29 = vadd.f32 %v5222_v34, %v18601_v39  ;;  %v18605_v39 = vld [vmem:[#allocation128_spill] sm:$0xff] }
 0x997   :  { %5261 = vmatmul.bf16.gmra.mxu0 %v18503_v8  ;;  %v13798_v8 = vld [vmem:[#allocation10 + $0x3c0] sm:$0xff] }
 0x998   :  { %7790 = vmatpush.bf16.msrb.mxu2 %v13794_v47  ;;  %7849 = vmatpush.bf16.msrb.mxu3 %v13804_v35  ;;  %v7188_v55 = vpop.f32.mrf.mxu2  ;;  %v7247_v11 = vpop.f32.mrf.mxu3  ;;  %v18602_v47 = vld [vmem:[#allocation126_spill] sm:$0xff] }
 0x999   :  { %5535 = vmatmul.bf16.gmra.mxu1 %v18602_v47  ;;  %v10793_v35 = vadd.f32 %v10792_v43, %v7247_v11  ;;  %v13809_v55 = vld [vmem:[#allocation10 + $0x418] sm:$0xff]  ;;  %v13819_v11 = vld [vmem:[#allocation10 + $0x468] sm:$0xff] }
 0x99c   :  { %7791 = vmatpush.bf16.msrb.mxu2 %v13793_v52  ;;  %7850 = vmatpush.bf16.msrb.mxu3 %v13803_v9  ;;  %v5498_v52 = vpop.f32.mrf.mxu1  ;;  %v13812_v9 = vld [vmem:[#allocation10 + $0x430] sm:$0xff]  ;;  %v5224_v44 = vpop.f32.mrf.mxu0 }
 0x99d   :  { %v17428_v31 = vadd.f32 %v5498_v52, %v17341_v6  ;;  %v17431_v28 = vadd.f32 %v5224_v44, %v18603_v25  ;;  %v13817_v44 = vld [vmem:[#allocation10 + $0x458] sm:$0xff] }
 0x9a0   :  { %7792 = vmatpush.bf16.msrb.mxu2 %v13792_v10  ;;  %7851 = vmatpush.bf16.msrb.mxu3 %v13802_v14  ;;  %v7249_v19 = vpop.f32.mrf.mxu3  ;;  %v13811_v10 = vld [vmem:[#allocation10 + $0x428] sm:$0xff]  ;;  %v13821_v14 = vld [vmem:[#allocation10 + $0x478] sm:$0xff] }
 0x9a4   :  { %7793 = vmatpush.bf16.msrb.mxu2 %v13791_v4  ;;  %7852 = vmatpush.bf16.msrb.mxu3 %v13801_v30  ;;  %v5501_v43 = vpop.f32.mrf.mxu1  ;;  %v13810_v4 = vld [vmem:[#allocation10 + $0x420] sm:$0xff]  ;;  %v5227_v30 = vpop.f32.mrf.mxu0 }
 0x9a5   :  { %v17434_v6 = vadd.f32 %v5501_v43, %v17348_v62  ;;  %v17437_v34 = vadd.f32 %v5227_v30, %v18604_v58  ;;  %v13815_v58 = vld [vmem:[#allocation10 + $0x448] sm:$0xff] }
 0x9a7   :  { %5266 = vmatmul.bf16.gmra.mxu0 %v18512_v21  ;;  %v13807_v21 = vld [vmem:[#allocation10 + $0x408] sm:$0xff] }
 0x9a8   :  { %7794 = vmatpush.bf16.msrb.mxu2 %v13790_v16  ;;  %7853 = vmatpush.bf16.msrb.mxu3 %v13800_v13  ;;  %v13938_v16 = vld [vmem:[#allocation10 + $0x820] sm:$0xff] }
 0x9a9   :  { %5540 = vmatmul.bf16.gmra.mxu1 %v18605_v39  ;;  %v13946_v13 = vld [vmem:[#allocation10 + $0x860] sm:$0xff]  ;;  %8888 = vmatpush.bf16.msrb.mxu0 %v13938_v16  ;;  %v13828_v39 = vld [vmem:[#allocation10 + $0x4b0] sm:$0xff] }
 0x9aa   :  { %8949 = vmatpush.bf16.msra.mxu1 %v13946_v13 }
 0x9ab   :  { %7795 = vmatmul.bf16.vlgmr.msrb.gmra.mxu2 %v5811_v33  ;;  %v13818_v33 = vld [vmem:[#allocation10 + $0x460] sm:$0xff] }
 0x9ac   :  { %7909 = vmatpush.bf16.msra.mxu2 %v13813_v63  ;;  %7854 = vmatpush.bf16.msrb.mxu3 %v13799_v12  ;;  %v5503_v37 = vpop.f32.mrf.mxu1  ;;  %v5229_v12 = vpop.f32.mrf.mxu0 }
 0x9ad   :  { %v17442_v47 = vadd.f32 %v5503_v37, %v17358_v46  ;;  %v17445_v52 = vadd.f32 %v5229_v12, %v18606_v27  ;;  %v13806_v46 = vld [vmem:[#allocation10 + $0x400] sm:$0xff]  ;;  %v13836_v27 = vld [vmem:[#allocation10 + $0x4f0] sm:$0xff] }
 0x9ae   :  { %v7308_v62 = vpop.f32.mrf.mxu2  ;;  %v13814_v37 = vld [vmem:[#allocation10 + $0x440] sm:$0xff] }
 0x9af   :  { %v10794_v63 = vadd.f32 %v10793_v35, %v7308_v62  ;;  %v13827_v62 = vld [vmem:[#allocation10 + $0x4a8] sm:$0xff] }
 0x9b0   :  { %7910 = vmatpush.bf16.msra.mxu2 %v13812_v9  ;;  %7855 = vmatpush.bf16.msrb.mxu3 %v13798_v8  ;;  %v5685_v9 = vadd.f32 %v17257_v36, %v17362_v50  ;;  %v18608_v50 = vld [vmem:[#allocation31_spill] sm:$0xff] }
 0x9b2   :  { %v5749_v8 = vmax.f32 %v5685_v9, 0.0  ;;  %v13825_v9 = vld [vmem:[#allocation10 + $0x498] sm:$0xff] }
 0x9b3   :  { %7856 = vmatmul.bf16.vlgmr.msrb.gmra.mxu3 %v5812_v7  ;;  %v13829_v7 = vld [vmem:[#allocation10 + $0x4b8] sm:$0xff] }
 0x9b4   :  { %7911 = vmatpush.bf16.msra.mxu2 %v13811_v10  ;;  %7970 = vmatpush.bf16.msra.mxu3 %v13821_v14  ;;  %v5506_v25 = vpop.f32.mrf.mxu1  ;;  %v5232_v10 = vpop.f32.mrf.mxu0  ;;  %v13816_v14 = vld [vmem:[#allocation10 + $0x450] sm:$0xff] }
 0x9b5   :  { %v17450_v35 = vadd.f32 %v5506_v25, %v17365_v24  ;;  %v5686_v24 = vadd.f32 %v17257_v36, %v17372_v54  ;;  %v13826_v54 = vld [vmem:[#allocation10 + $0x4a0] sm:$0xff]  ;;  %v13835_v25 = vld [vmem:[#allocation10 + $0x4e8] sm:$0xff] }
 0x9b6   :  { %v7310_v19 = vpop.f32.mrf.mxu2  ;;  %v7369_v0 = vpop.f32.mrf.mxu3 }
 0x9b7   :  { %v10795_v43 = vadd.f32 %v10794_v63, %v7369_v0  ;;  %5271 = vmatmul.bf16.gmra.mxu0 %v18520_v45  ;;  %v18609_v63 = vld [vmem:[#allocation95_spill] sm:$0xff]  ;;  %v18610_v19 = vld [vmem:[#allocation36_spill] sm:$0xff] }
 0x9b8   :  { %7912 = vmatpush.bf16.msra.mxu2 %v13810_v4  ;;  %7971 = vmatpush.bf16.msra.mxu3 %v13820_v53  ;;  %v18607_v4 = vld [vmem:[#allocation44_spill] sm:$0xff]  ;;  %v5813_v53 = vpack.c.bf16 %v5749_v8, %v5749_v8  ;;  %v18611_v8 = vld [vmem:[#allocation65_spill] sm:$0xff] }
 0x9b9   :  { %v17453_v30 = vadd.f32 %v5232_v10, %v18607_v4  ;;  %5545 = vmatmul.bf16.gmra.mxu1 %v18608_v50  ;;  %v13824_v10 = vld [vmem:[#allocation10 + $0x490] sm:$0xff]  ;;  %v13823_v50 = vld [vmem:[#allocation10 + $0x488] sm:$0xff] }
 0x9bc   :  { %7913 = vmatpush.bf16.msra.mxu2 %v13809_v55  ;;  %7972 = vmatpush.bf16.msra.mxu3 %v13819_v11  ;;  %v5508_v55 = vpop.f32.mrf.mxu1  ;;  %v5234_v13 = vpop.f32.mrf.mxu0 }
 0x9bd   :  { %v17460_v11 = vadd.f32 %v5508_v55, %v17375_v60  ;;  %v17463_v12 = vadd.f32 %v5234_v13, %v18609_v63  ;;  %v13936_v63 = vld [vmem:[#allocation10 + $0x810] sm:$0xff] }
 0x9be   :  { %v7371_v16 = vpop.f32.mrf.mxu3 }
 0x9bf   :  { %v13937_v16 = vld [vmem:[#allocation10 + $0x818] sm:$0xff] }
 0x9c0   :  { %7914 = vmatpush.bf16.msra.mxu2 %v13808_v49  ;;  %7973 = vmatpush.bf16.msra.mxu3 %v13818_v33  ;;  %v5750_v49 = vmax.f32 %v5686_v24, 0.0  ;;  %v13837_v33 = vld [vmem:[#allocation10 + $0x4f8] sm:$0xff] }
 0x9c1   :  { %v18612_v24 = vld [vmem:[#allocation104_spill] sm:$0xff]  ;;  %8889 = vmatpush.bf16.msrb.mxu0 %v13937_v16 }
 0x9c2   :  { %v5814_v45 = vpack.c.bf16 %v5750_v49, %v5750_v49 }
 0x9c4   :  { %7915 = vmatpush.bf16.msra.mxu2 %v13807_v21  ;;  %7974 = vmatpush.bf16.msra.mxu3 %v13817_v44  ;;  %v5511_v21 = vpop.f32.mrf.mxu1  ;;  %v5237_v44 = vpop.f32.mrf.mxu0 }
 0x9c5   :  { %v17466_v60 = vadd.f32 %v5511_v21, %v17385_v61  ;;  %8890 = vmatpush.bf16.msrb.mxu0 %v13936_v63  ;;  %v13972_v63 = vld [vmem:[#allocation10 + $0x930] sm:$0xff] }
 0x9c7   :  { %5276 = vmatmul.bf16.gmra.mxu0 %v18531_v42 }
 0x9c8   :  { %7916 = vmatpush.bf16.msra.mxu2 %v13806_v46  ;;  %7975 = vmatpush.bf16.msra.mxu3 %v13816_v14  ;;  %v17469_v46 = vadd.f32 %v5237_v44, %v18610_v19  ;;  %v13935_v19 = vld [vmem:[#allocation10 + $0x808] sm:$0xff] }
 0x9c9   :  { %5550 = vmatmul.bf16.gmra.mxu1 %v18611_v8  ;;  %v18614_v8 = vld [vmem:[#allocation61_spill] sm:$0xff]  ;;  %8891 = vmatpush.bf16.msrb.mxu0 %v13935_v19 }
 0x9cb   :  { %7917 = vmatmul.bf16.vlgmr.msra.gmra.mxu2 %v5813_v53  ;;  %v5687_v53 = vadd.f32 %v17257_v36, %v17382_v51 }
 0x9cc   :  { %8031 = vmatpush.bf16.msrb.mxu2 %v13829_v7  ;;  %7976 = vmatpush.bf16.msra.mxu3 %v13815_v58  ;;  %v13834_v7 = vld [vmem:[#allocation10 + $0x4e0] sm:$0xff]  ;;  %v5513_v61 = vpop.f32.mrf.mxu1  ;;  %v5239_v58 = vpop.f32.mrf.mxu0 }
 0x9cd   :  { %v17474_v4 = vadd.f32 %v5513_v61, %v17396_v57  ;;  %v17479_v55 = vadd.f32 %v5239_v58, %v18612_v24  ;;  %v5751_v13 = vmax.f32 %v5687_v53, 0.0  ;;  %v13934_v53 = vld [vmem:[#allocation10 + $0x800] sm:$0xff]  ;;  %v18617_v24 = vld [vmem:[#allocation106_spill] sm:$0xff] }
 0x9ce   :  { %v7430_v0 = vpop.f32.mrf.mxu2  ;;  %8892 = vmatpush.bf16.msrb.mxu0 %v13934_v53 }
 0x9cf   :  { %v10796_v14 = vadd.f32 %v10795_v43, %v7430_v0  ;;  %v13822_v43 = vld [vmem:[#allocation10 + $0x480] sm:$0xff]  ;;  %v5815_v51 = vpack.c.bf16 %v5751_v13, %v5751_v13 }
 0x9d0   :  { %8032 = vmatpush.bf16.msrb.mxu2 %v13828_v39  ;;  %7977 = vmatpush.bf16.msra.mxu3 %v13814_v37  ;;  %v13833_v39 = vld [vmem:[#allocation10 + $0x4d8] sm:$0xff]  ;;  %v13832_v37 = vld [vmem:[#allocation10 + $0x4d0] sm:$0xff]  ;;  %v13830_v0 = vld [vmem:[#allocation10 + $0x4c0] sm:$0xff] }
 0x9d3   :  { %7978 = vmatmul.bf16.vlgmr.msra.gmra.mxu3 %v5814_v45  ;;  %v13831_v45 = vld [vmem:[#allocation10 + $0x4c8] sm:$0xff] }
 0x9d4   :  { %8033 = vmatpush.bf16.msrb.mxu2 %v13827_v62  ;;  %8092 = vmatpush.bf16.msrb.mxu3 %v13837_v33  ;;  %v13845_v62 = vld [vmem:[#allocation10 + $0x538] sm:$0xff]  ;;  %v5516_v33 = vpop.f32.mrf.mxu1 }
 0x9d5   :  { %v17482_v36 = vadd.f32 %v5516_v33, %v17403_v40  ;;  %v13841_v33 = vld [vmem:[#allocation10 + $0x518] sm:$0xff] }
 0x9d6   :  { %v7432_v42 = vpop.f32.mrf.mxu2  ;;  %v7491_v57 = vpop.f32.mrf.mxu3 }
 0x9d7   :  { %v10797_v49 = vadd.f32 %v10796_v14, %v7491_v57  ;;  %5281 = vmatmul.bf16.gmra.mxu0 %v18509_v23  ;;  %v18616_v14 = vld [vmem:[#allocation52_spill] sm:$0xff] }
 0x9d8   :  { %8034 = vmatpush.bf16.msrb.mxu2 %v13826_v54  ;;  %8093 = vmatpush.bf16.msrb.mxu3 %v13836_v27  ;;  %v5242_v54 = vpop.f32.mrf.mxu0  ;;  %v17484_v27 = vld [vmem:[#allocation8] ss:$0 sm:$0xff] }
 0x9d9   :  { %v5688_v21 = vadd.f32 %v17484_v27, %v17393_v32  ;;  %5555 = vmatmul.bf16.gmra.mxu1 %v18614_v8  ;;  %v13843_v32 = vld [vmem:[#allocation10 + $0x528] sm:$0xff]  ;;  %v13840_v8 = vld [vmem:[#allocation10 + $0x510] sm:$0xff]  ;;  %v5689_v53 = vadd.f32 %v17484_v27, %v17400_v3 }
 0x9db   :  { %v5752_v61 = vmax.f32 %v5688_v21, 0.0  ;;  %v5753_v3 = vmax.f32 %v5689_v53, 0.0 }
 0x9dc   :  { %8035 = vmatpush.bf16.msrb.mxu2 %v13825_v9  ;;  %8094 = vmatpush.bf16.msrb.mxu3 %v13835_v25  ;;  %v18613_v9 = vld [vmem:[#allocation67_spill] sm:$0xff]  ;;  %v5518_v58 = vpop.f32.mrf.mxu1 }
 0x9dd   :  { %v17489_v44 = vadd.f32 %v5242_v54, %v18613_v9  ;;  %v13844_v25 = vld [vmem:[#allocation10 + $0x530] sm:$0xff]  ;;  %v17497_v42 = vadd.f32 %v5518_v58, %v17411_v17  ;;  %v5816_v13 = vpack.c.bf16 %v5752_v61, %v5752_v61  ;;  %v13971_v54 = vld [vmem:[#allocation10 + $0x928] sm:$0xff]  ;;  %v18618_v9 = vld [vmem:[#allocation56_spill] sm:$0xff] }
 0x9de   :  { %v7493_v40 = vpop.f32.mrf.mxu3 }
 0x9df   :  { %v13850_v40 = vld [vmem:[#allocation10 + $0x560] sm:$0xff] }
 0x9e0   :  { %8036 = vmatpush.bf16.msrb.mxu2 %v13824_v10  ;;  %8095 = vmatpush.bf16.msrb.mxu3 %v13834_v7  ;;  %v18615_v10 = vld [vmem:[#allocation37_spill] sm:$0xff] }
 0x9e1   :  { %v4739_v7 = vadd.f32 %v18616_v14, %v18615_v10  ;;  %v13970_v10 = vld [vmem:[#allocation10 + $0x920] sm:$0xff] }
 0x9e2   :  { %v18620_v14 = vld [vmem:[#allocation49_spill] sm:$0xff] }
 0x9e3   :  { %v5041_v16 = vadd.f32 %v18617_v24, %v4739_v7  ;;  %v18621_v7 = vld [vmem:[#allocation45_spill] sm:$0xff]  ;;  %v18622_v24 = vld [vmem:[#allocation70_spill] sm:$0xff] }
 0x9e4   :  { %8037 = vmatpush.bf16.msrb.mxu2 %v13823_v50  ;;  %8096 = vmatpush.bf16.msrb.mxu3 %v13833_v39  ;;  %v13853_v50 = vld [vmem:[#allocation10 + $0x578] sm:$0xff]  ;;  %v17501_v17 = vpop.f32.mrf.mxu1  ;;  %v4741_v61 = vadd.f32 %v18621_v7, %v18620_v14  ;;  %v13967_v14 = vld [vmem:[#allocation10 + $0x908] sm:$0xff] }
 0x9e5   :  { %v13973_v39 = vld [vmem:[#allocation10 + $0x938] sm:$0xff] }
 0x9e6   :  { %9129 = vmatpush.bf16.msra.mxu0 %v13973_v39  ;;  %v13945_v39 = vld [vmem:[#allocation10 + $0x858] sm:$0xff] }
 0x9e7   :  { %5286 = vmatmul.bf16.gmra.mxu0 %v18509_v23  ;;  %8950 = vmatpush.bf16.msra.mxu1 %v13945_v39  ;;  %v18623_v7 = vld [vmem:[#allocation111_spill] sm:$0xff] }
 0x9e8   :  { %8038 = vmatpush.bf16.msrb.mxu2 %v13822_v43  ;;  %8097 = vmatpush.bf16.msrb.mxu3 %v13832_v37  ;;  %v5244_v43 = vpop.f32.mrf.mxu0  ;;  %v13842_v37 = vld [vmem:[#allocation10 + $0x520] sm:$0xff]  ;;  %v13869_v39 = vld [vmem:[#allocation10 + $0x5f8] sm:$0xff] }
 0x9e9   :  { %v17499_v57 = vadd.f32 %v5244_v43, %v5041_v16  ;;  %v5043_v16 = vadd.f32 %v18622_v24, %v4741_v61  ;;  %v18626_v24 = vld [vmem:[#allocation107_spill] sm:$0xff] }
 0x9ea   :  { %9130 = vmatpush.bf16.msra.mxu0 %v13972_v63 }
 0x9eb   :  { %8039 = vmatmul.bf16.vlgmr.msrb.gmra.mxu2 %v5815_v51  ;;  %v13851_v51 = vld [vmem:[#allocation10 + $0x568] sm:$0xff] }
 0x9ec   :  { %8153 = vmatpush.bf16.msra.mxu2 %v13845_v62  ;;  %8098 = vmatpush.bf16.msrb.mxu3 %v13831_v45  ;;  %v13852_v62 = vld [vmem:[#allocation10 + $0x570] sm:$0xff]  ;;  %v5523_v58 = vpop.f32.mrf.mxu1 }
 0x9ed   :  { %v17514_v43 = vadd.f32 %v5523_v58, %v17431_v28  ;;  %v5817_v28 = vpack.c.bf16 %v5753_v3, %v5753_v3  ;;  %v18624_v58 = vld [vmem:[#allocation86_spill] sm:$0xff] }
 0x9ee   :  { %v7552_v21 = vpop.f32.mrf.mxu2  ;;  %9131 = vmatpush.bf16.msra.mxu0 %v13971_v54 }
 0x9ef   :  { %v10798_v19 = vadd.f32 %v10797_v49, %v7552_v21  ;;  %v13969_v49 = vld [vmem:[#allocation10 + $0x918] sm:$0xff]  ;;  %v13968_v21 = vld [vmem:[#allocation10 + $0x910] sm:$0xff] }
 0x9f0   :  { %8154 = vmatpush.bf16.msra.mxu2 %v13844_v25  ;;  %8099 = vmatpush.bf16.msrb.mxu3 %v13830_v0  ;;  %v5247_v45 = vpop.f32.mrf.mxu0  ;;  %v18619_v0 = vld [vmem:[#allocation71_spill] sm:$0xff] }
 0x9f1   :  { %v17504_v25 = vadd.f32 %v5247_v45, %v18618_v9  ;;  %5560 = vmatmul.bf16.gmra.mxu1 %v18619_v0  ;;  %v13861_v45 = vld [vmem:[#allocation10 + $0x5b8] sm:$0xff]  ;;  %v13847_v9 = vld [vmem:[#allocation10 + $0x548] sm:$0xff]  ;;  %v13860_v0 = vld [vmem:[#allocation10 + $0x5b0] sm:$0xff] }
 0x9f2   :  { %9132 = vmatpush.bf16.msra.mxu0 %v13970_v10 }
 0x9f3   :  { %8100 = vmatmul.bf16.vlgmr.msrb.gmra.mxu3 %v5816_v13 }
 0x9f4   :  { %8155 = vmatpush.bf16.msra.mxu2 %v13843_v32  ;;  %8214 = vmatpush.bf16.msra.mxu3 %v13853_v50  ;;  %v13839_v32 = vld [vmem:[#allocation10 + $0x508] sm:$0xff]  ;;  %v13849_v50 = vld [vmem:[#allocation10 + $0x558] sm:$0xff] }
 0x9f6   :  { %v7613_v63 = vpop.f32.mrf.mxu3  ;;  %9133 = vmatpush.bf16.msra.mxu0 %v13969_v49  ;;  %v13966_v49 = vld [vmem:[#allocation10 + $0x900] sm:$0xff] }
 0x9f7   :  { %v10799_v54 = vadd.f32 %v10798_v19, %v7613_v63  ;;  %5291 = vmatmul.bf16.gmra.mxu0 %v18509_v23  ;;  %v13858_v63 = vld [vmem:[#allocation10 + $0x5a0] sm:$0xff] }
 0x9f8   :  { %8156 = vmatpush.bf16.msra.mxu2 %v13842_v37  ;;  %8215 = vmatpush.bf16.msra.mxu3 %v13852_v62  ;;  %v5249_v13 = vpop.f32.mrf.mxu0  ;;  %v7554_v37 = vpop.f32.mrf.mxu2 }
 0x9f9   :  { %v17516_v62 = vadd.f32 %v5249_v13, %v5043_v16 }
 0x9fa   :  { %9134 = vmatpush.bf16.msra.mxu0 %v13968_v21 }
 0x9fc   :  { %8157 = vmatpush.bf16.msra.mxu2 %v13841_v33  ;;  %8216 = vmatpush.bf16.msra.mxu3 %v13851_v51  ;;  %v13838_v33 = vld [vmem:[#allocation10 + $0x500] sm:$0xff]  ;;  %v13848_v51 = vld [vmem:[#allocation10 + $0x550] sm:$0xff] }
 0x9fe   :  { %9135 = vmatpush.bf16.msra.mxu0 %v13967_v14  ;;  %v13866_v14 = vld [vmem:[#allocation10 + $0x5e0] sm:$0xff] }
 0xa00   :  { %8158 = vmatpush.bf16.msra.mxu2 %v13840_v8  ;;  %8217 = vmatpush.bf16.msra.mxu3 %v13850_v40  ;;  %v5690_v8 = vadd.f32 %v17484_v27, %v17408_v56  ;;  %v5526_v40 = vpop.f32.mrf.mxu1  ;;  %v5252_v19 = vpop.f32.mrf.mxu0  ;;  %v13859_v56 = vld [vmem:[#allocation10 + $0x5a8] sm:$0xff] }
 0xa01   :  { %v17521_v10 = vadd.f32 %v5526_v40, %v17437_v34  ;;  %v17524_v61 = vadd.f32 %v5252_v19, %v18623_v7  ;;  %5565 = vmatmul.bf16.gmra.mxu1 %v18624_v58  ;;  %v18625_v34 = vld [vmem:[#allocation109_spill] sm:$0xff]  ;;  %v13865_v58 = vld [vmem:[#allocation10 + $0x5d8] sm:$0xff] }
 0xa02   :  { %v5754_v53 = vmax.f32 %v5690_v8, 0.0  ;;  %v4743_v16 = vadd.f32 %v18626_v24, %v18625_v34  ;;  %9136 = vmatpush.bf16.msra.mxu0 %v13966_v49  ;;  %v13867_v8 = vld [vmem:[#allocation10 + $0x5e8] sm:$0xff]  ;;  %v5633_v49 = vadd.f32 %v17501_v17, %v17420_v29  ;;  %v13854_v24 = vld [vmem:[#allocation10 + $0x580] sm:$0xff] }
 0xa03   :  { %v13863_v29 = vld [vmem:[#allocation10 + $0x5c8] sm:$0xff] }
 0xa04   :  { %8159 = vmatpush.bf16.msra.mxu2 %v13839_v32  ;;  %8218 = vmatpush.bf16.msra.mxu3 %v13849_v50  ;;  %v7615_v32 = vpop.f32.mrf.mxu3  ;;  %v13846_v50 = vld [vmem:[#allocation10 + $0x540] sm:$0xff]  ;;  %v5818_v13 = vpack.c.bf16 %v5754_v53, %v5754_v53  ;;  %v13855_v53 = vld [vmem:[#allocation10 + $0x588] sm:$0xff] }
 0xa07   :  { %5296 = vmatmul.bf16.gmra.mxu0 %v18509_v23 }
 0xa08   :  { %8160 = vmatpush.bf16.msra.mxu2 %v13838_v33  ;;  %8219 = vmatpush.bf16.msra.mxu3 %v13848_v51  ;;  %v5528_v37 = vpop.f32.mrf.mxu1  ;;  %v13868_v33 = vld [vmem:[#allocation10 + $0x5f0] sm:$0xff]  ;;  %v5254_v21 = vpop.f32.mrf.mxu0 }
 0xa09   :  { %v18627_v51 = vld [vmem:[#allocation50_spill] sm:$0xff] }
 0xa0a   :  { %v5045_v3 = vadd.f32 %v18627_v51, %v4743_v16  ;;  %v13864_v16 = vld [vmem:[#allocation10 + $0x5d0] sm:$0xff] }
 0xa0b   :  { %8161 = vmatmul.bf16.vlgmr.msra.gmra.mxu2 %v5817_v28  ;;  %v13857_v28 = vld [vmem:[#allocation10 + $0x598] sm:$0xff] }
 0xa0c   :  { %8275 = vmatpush.bf16.msrb.mxu2 %v13861_v45  ;;  %8220 = vmatpush.bf16.msra.mxu3 %v13847_v9  ;;  %v17532_v45 = vadd.f32 %v5528_v37, %v17445_v52  ;;  %v17534_v9 = vadd.f32 %v5254_v21, %v5045_v3  ;;  %v5701_v3 = vadd.f32 %v17484_v27, %v5633_v49 }
 0xa0d   :  { %v5692_v21 = vadd.f32 %v17484_v27, %v17428_v31  ;;  %v14005_v31 = vld [vmem:[#allocation10 + $0xa38] sm:$0xff] }
 0xa0e   :  { %v7674_v40 = vpop.f32.mrf.mxu2 }
 0xa0f   :  { %v10800_v19 = vadd.f32 %v10799_v54, %v7674_v40 }
 0xa10   :  { %8276 = vmatpush.bf16.msrb.mxu2 %v13860_v0  ;;  %8221 = vmatpush.bf16.msra.mxu3 %v13846_v50  ;;  %v13856_v0 = vld [vmem:[#allocation10 + $0x590] sm:$0xff]  ;;  %v5531_v7 = vpop.f32.mrf.mxu1  ;;  %v5257_v32 = vpop.f32.mrf.mxu0  ;;  %v18628_v50 = vld [vmem:[#allocation117_spill] sm:$0xff] }
 0xa11   :  { %v17537_v52 = vadd.f32 %v5257_v32, %v18628_v50 }
 0xa13   :  { %8222 = vmatmul.bf16.vlgmr.msra.gmra.mxu3 %v5818_v13 }
 0xa14   :  { %8277 = vmatpush.bf16.msrb.mxu2 %v13859_v56  ;;  %8336 = vmatpush.bf16.msrb.mxu3 %v13869_v39  ;;  %v5691_v56 = vadd.f32 %v17484_v27, %v17417_v48  ;;  %v18629_v39 = vld [vmem:[#allocation84_spill] sm:$0xff] }
 0xa15   :  { %5570 = vmatmul.bf16.gmra.mxu1 %v18629_v39 }
 0xa16   :  { %v7676_v54 = vpop.f32.mrf.mxu2  ;;  %v7735_v34 = vpop.f32.mrf.mxu3  ;;  %v5755_v13 = vmax.f32 %v5691_v56, 0.0 }
 0xa17   :  { %v10801_v37 = vadd.f32 %v10800_v19, %v7735_v34  ;;  %v13875_v19 = vld [vmem:[#allocation10 + $0x628] sm:$0xff]  ;;  %v13874_v34 = vld [vmem:[#allocation10 + $0x620] sm:$0xff] }
 0xa18   :  { %8278 = vmatpush.bf16.msrb.mxu2 %v13858_v63  ;;  %8337 = vmatpush.bf16.msrb.mxu3 %v13868_v33  ;;  %v5533_v63 = vpop.f32.mrf.mxu1  ;;  %v13877_v33 = vld [vmem:[#allocation10 + $0x638] sm:$0xff]  ;;  %v17548_v48 = vpop.f32.mrf.mxu0  ;;  %v5819_v17 = vpack.c.bf16 %v5755_v13, %v5755_v13  ;;  %v18631_v54 = vld [vmem:[#allocation113_spill] sm:$0xff] }
 0xa19   :  { %v17546_v51 = vadd.f32 %v5533_v63, %v17463_v12  ;;  %v5756_v12 = vmax.f32 %v5692_v21, 0.0  ;;  %v13873_v63 = vld [vmem:[#allocation10 + $0x618] sm:$0xff] }
 0xa1b   :  { %v5820_v49 = vpack.c.bf16 %v5756_v12, %v5756_v12 }
 0xa1c   :  { %8279 = vmatpush.bf16.msrb.mxu2 %v13857_v28  ;;  %8338 = vmatpush.bf16.msrb.mxu3 %v13867_v8  ;;  %v13876_v28 = vld [vmem:[#allocation10 + $0x630] sm:$0xff]  ;;  %v5765_v8 = vmax.f32 %v5701_v3, 0.0 }
 0xa1e   :  { %v7737_v40 = vpop.f32.mrf.mxu3  ;;  %v5829_v39 = vpack.c.bf16 %v5765_v8, %v5765_v8  ;;  %v13872_v8 = vld [vmem:[#allocation10 + $0x610] sm:$0xff] }
 0xa20   :  { %8280 = vmatpush.bf16.msrb.mxu2 %v13856_v0  ;;  %8339 = vmatpush.bf16.msrb.mxu3 %v13866_v14  ;;  %v13862_v0 = vld [vmem:[#allocation10 + $0x5c0] sm:$0xff]  ;;  %v5536_v14 = vpop.f32.mrf.mxu1  ;;  %v5262_v50 = vpop.f32.mrf.mxu0 }
 0xa21   :  { %v17554_v32 = vadd.f32 %v5536_v14, %v17469_v46  ;;  %8893 = vmatmul.bf16.vlgmr.msrb.gmra.mxu0 %v5829_v39  ;;  %v14004_v46 = vld [vmem:[#allocation10 + $0xa30] sm:$0xff]  ;;  %v13871_v14 = vld [vmem:[#allocation10 + $0x608] sm:$0xff] }
 0xa22   :  { %9373 = vmatpush.bf16.msrb.mxu0 %v14005_v31 }
 0xa24   :  { %8281 = vmatpush.bf16.msrb.mxu2 %v13855_v53  ;;  %8340 = vmatpush.bf16.msrb.mxu3 %v13865_v58  ;;  %v13885_v53 = vld [vmem:[#allocation10 + $0x678] sm:$0xff] }
 0xa25   :  { %v18630_v58 = vld [vmem:[#allocation119_spill] sm:$0xff]  ;;  %5575 = vmatmul.bf16.gmra.mxu1 %v18631_v54 }
 0xa26   :  { %v17557_v56 = vadd.f32 %v5262_v50, %v18630_v58  ;;  %9374 = vmatpush.bf16.msrb.mxu0 %v14004_v46  ;;  %v13943_v58 = vld [vmem:[#allocation10 + $0x848] sm:$0xff]  ;;  %v13880_v46 = vld [vmem:[#allocation10 + $0x650] sm:$0xff] }
 0xa28   :  { %8282 = vmatpush.bf16.msrb.mxu2 %v13854_v24  ;;  %8341 = vmatpush.bf16.msrb.mxu3 %v13864_v16  ;;  %v13884_v24 = vld [vmem:[#allocation10 + $0x670] sm:$0xff]  ;;  %v5637_v16 = vadd.f32 %v5531_v7, %v17453_v30  ;;  %v5538_v13 = vpop.f32.mrf.mxu1  ;;  %v17564_v3 = vpop.f32.mrf.mxu0  ;;  %v13882_v30 = vld [vmem:[#allocation10 + $0x660] sm:$0xff] }
 0xa29   :  { %v13944_v7 = vld [vmem:[#allocation10 + $0x850] sm:$0xff] }
 0xa2a   :  { %v5705_v21 = vadd.f32 %v17484_v27, %v5637_v16  ;;  %8951 = vmatpush.bf16.msra.mxu1 %v13944_v7  ;;  %v13893_v16 = vld [vmem:[#allocation10 + $0x6b8] sm:$0xff]  ;;  %v5694_v7 = vadd.f32 %v17484_v27, %v17442_v47 }
 0xa2b   :  { %8283 = vmatmul.bf16.vlgmr.msrb.gmra.mxu2 %v5819_v17  ;;  %v14003_v17 = vld [vmem:[#allocation10 + $0xa28] sm:$0xff] }
 0xa2c   :  { %8397 = vmatpush.bf16.msra.mxu2 %v13877_v33  ;;  %8342 = vmatpush.bf16.msrb.mxu3 %v13863_v29  ;;  %v17562_v33 = vadd.f32 %v5538_v13, %v17479_v55  ;;  %v13883_v29 = vld [vmem:[#allocation10 + $0x668] sm:$0xff]  ;;  %v5769_v12 = vmax.f32 %v5705_v21, 0.0  ;;  %v13942_v13 = vld [vmem:[#allocation10 + $0x840] sm:$0xff] }
 0xa2d   :  { %9375 = vmatpush.bf16.msrb.mxu0 %v14003_v17 }
 0xa2e   :  { %v5833_v39 = vpack.c.bf16 %v5769_v12, %v5769_v12  ;;  %8952 = vmatpush.bf16.msra.mxu1 %v13943_v58  ;;  %v13979_v58 = vld [vmem:[#allocation10 + $0x968] sm:$0xff] }
 0xa30   :  { %8398 = vmatpush.bf16.msra.mxu2 %v13876_v28  ;;  %8343 = vmatpush.bf16.msrb.mxu3 %v13862_v0  ;;  %v7796_v28 = vpop.f32.mrf.mxu2  ;;  %v14002_v0 = vld [vmem:[#allocation10 + $0xa20] sm:$0xff]  ;;  %v5541_v55 = vpop.f32.mrf.mxu1 }
 0xa31   :  { %v10802_v40 = vadd.f32 %v10801_v37, %v7796_v28  ;;  %v5267_v50 = vpop.f32.mrf.mxu0  ;;  %9376 = vmatpush.bf16.msrb.mxu0 %v14002_v0  ;;  %v14001_v37 = vld [vmem:[#allocation10 + $0xa18] sm:$0xff]  ;;  %v13999_v0 = vld [vmem:[#allocation10 + $0xa08] sm:$0xff] }
 0xa32   :  { %v17570_v31 = vadd.f32 %v5267_v50, %v17149_v20  ;;  %9137 = vmatmul.bf16.vlgmr.msra.gmra.mxu0 %v5833_v39  ;;  %v14000_v20 = vld [vmem:[#allocation10 + $0xa10] sm:$0xff]  ;;  %8953 = vmatpush.bf16.msra.mxu1 %v13942_v13  ;;  %v13901_v50 = vld [vmem:[#allocation10 + $0x6f8] sm:$0xff] }
 0xa33   :  { %8344 = vmatmul.bf16.vlgmr.msrb.gmra.mxu3 %v5820_v49  ;;  %v14037_v39 = vld [vmem:[#allocation10 + $0xb38] sm:$0xff] }
 0xa34   :  { %8399 = vmatpush.bf16.msra.mxu2 %v13875_v19  ;;  %8458 = vmatpush.bf16.msra.mxu3 %v13885_v53  ;;  %v5693_v19 = vadd.f32 %v17484_v27, %v17434_v6  ;;  %v13881_v53 = vld [vmem:[#allocation10 + $0x658] sm:$0xff] }
 0xa35   :  { %5580 = vmatmul.bf16.gmra.mxu1 %v18509_v23  ;;  %9377 = vmatpush.bf16.msrb.mxu0 %v14001_v37 }
 0xa36   :  { %v7857_v54 = vpop.f32.mrf.mxu3 }
 0xa37   :  { %v17573_v6 = vadd.f32 %v10802_v40, %v7857_v54  ;;  %v13879_v40 = vld [vmem:[#allocation10 + $0x648] sm:$0xff]  ;;  %v13890_v54 = vld [vmem:[#allocation10 + $0x6a0] sm:$0xff] }
 0xa38   :  { %8400 = vmatpush.bf16.msra.mxu2 %v13874_v34  ;;  %8459 = vmatpush.bf16.msra.mxu3 %v13884_v24  ;;  %v7798_v49 = vpop.f32.mrf.mxu2  ;;  %v13870_v34 = vld [vmem:[#allocation10 + $0x600] sm:$0xff]  ;;  %v5757_v24 = vmax.f32 %v5693_v19, 0.0  ;;  %v5543_v17 = vpop.f32.mrf.mxu1  ;;  %v5758_v19 = vmax.f32 %v5694_v7, 0.0  ;;  %v13888_v7 = vld [vmem:[#allocation10 + $0x690] sm:$0xff] }
 0xa39   :  { %v17577_v28 = vadd.f32 %v5543_v17, %v17499_v57  ;;  %9378 = vmatpush.bf16.msrb.mxu0 %v14000_v20  ;;  %v13878_v57 = vld [vmem:[#allocation10 + $0x640] sm:$0xff]  ;;  %v13977_v17 = vld [vmem:[#allocation10 + $0x958] sm:$0xff] }
 0xa3a   :  { %v5821_v21 = vpack.c.bf16 %v5757_v24, %v5757_v24 }
 0xa3c   :  { %8401 = vmatpush.bf16.msra.mxu2 %v13873_v63  ;;  %8460 = vmatpush.bf16.msra.mxu3 %v13883_v29  ;;  %v13981_v63 = vld [vmem:[#allocation10 + $0x978] sm:$0xff]  ;;  %v5641_v29 = vadd.f32 %v5541_v55, %v17489_v44  ;;  %v13980_v44 = vld [vmem:[#allocation10 + $0x970] sm:$0xff] }
 0xa3d   :  { %9190 = vmatpush.bf16.msrb.mxu1 %v13981_v63  ;;  %9379 = vmatpush.bf16.msrb.mxu0 %v13999_v0  ;;  %v14036_v63 = vld [vmem:[#allocation10 + $0xb30] sm:$0xff] }
 0xa3e   :  { %v5709_v12 = vadd.f32 %v17484_v27, %v5641_v29  ;;  %v7859_v55 = vpop.f32.mrf.mxu3  ;;  %v13899_v29 = vld [vmem:[#allocation10 + $0x6e8] sm:$0xff] }
 0xa3f   :  { %v13976_v55 = vld [vmem:[#allocation10 + $0x950] sm:$0xff] }
 0xa40   :  { %8402 = vmatpush.bf16.msra.mxu2 %v13872_v8  ;;  %8461 = vmatpush.bf16.msra.mxu3 %v13882_v30  ;;  %v17579_v8 = vpop.f32.mrf.mxu0  ;;  %v13892_v30 = vld [vmem:[#allocation10 + $0x6b0] sm:$0xff]  ;;  %v5773_v37 = vmax.f32 %v5709_v12, 0.0  ;;  %v5546_v47 = vpop.f32.mrf.mxu1  ;;  %v13898_v12 = vld [vmem:[#allocation10 + $0x6e0] sm:$0xff] }
 0xa41   :  { %9191 = vmatpush.bf16.msrb.mxu1 %v13980_v44  ;;  %v17585_v49 = vadd.f32 %v5546_v47, %v17504_v25  ;;  %v13889_v25 = vld [vmem:[#allocation10 + $0x698] sm:$0xff] }
 0xa42   :  { %v5837_v13 = vpack.c.bf16 %v5773_v37, %v5773_v37  ;;  %v13886_v37 = vld [vmem:[#allocation10 + $0x680] sm:$0xff] }
 0xa44   :  { %8403 = vmatpush.bf16.msra.mxu2 %v13871_v14  ;;  %8462 = vmatpush.bf16.msra.mxu3 %v13881_v53  ;;  %v13891_v14 = vld [vmem:[#allocation10 + $0x6a8] sm:$0xff]  ;;  %v13998_v53 = vld [vmem:[#allocation10 + $0xa00] sm:$0xff] }
 0xa45   :  { %9192 = vmatpush.bf16.msrb.mxu1 %v13979_v58  ;;  %9380 = vmatpush.bf16.msrb.mxu0 %v13998_v53  ;;  %v14033_v53 = vld [vmem:[#allocation10 + $0xb18] sm:$0xff] }
 0xa46   :  { %5585 = vmatmul.bf16.gmra.mxu1 %v18509_v23 }
 0xa48   :  { %8404 = vmatpush.bf16.msra.mxu2 %v13870_v34  ;;  %8463 = vmatpush.bf16.msra.mxu3 %v13880_v46  ;;  %v5822_v34 = vpack.c.bf16 %v5758_v19, %v5758_v19  ;;  %v5272_v24 = vpop.f32.mrf.mxu0  ;;  %v13900_v46 = vld [vmem:[#allocation10 + $0x6f0] sm:$0xff]  ;;  %v5695_v19 = vadd.f32 %v17484_v27, %v17450_v35 }
 0xa49   :  { %v17588_v20 = vadd.f32 %v5272_v24, %v17167_v2  ;;  %9617 = vmatpush.bf16.msra.mxu0 %v14037_v39  ;;  %v13909_v24 = vld [vmem:[#allocation10 + $0x738] sm:$0xff] }
 0xa4a   :  { %9381 = vmatmul.bf16.vlgmr.msrb.gmra.mxu0 %v5837_v13  ;;  %v5759_v39 = vmax.f32 %v5695_v19, 0.0  ;;  %v14032_v13 = vld [vmem:[#allocation10 + $0xb10] sm:$0xff] }
 0xa4b   :  { %8405 = vmatmul.bf16.vlgmr.msra.gmra.mxu2 %v5821_v21  ;;  %v14035_v21 = vld [vmem:[#allocation10 + $0xb28] sm:$0xff] }
 0xa4c   :  { %8519 = vmatpush.bf16.msrb.mxu2 %v13893_v16  ;;  %8464 = vmatpush.bf16.msra.mxu3 %v13879_v40  ;;  %v13978_v16 = vld [vmem:[#allocation10 + $0x960] sm:$0xff]  ;;  %v5548_v40 = vpop.f32.mrf.mxu1 }
 0xa4d   :  { %9193 = vmatpush.bf16.msrb.mxu1 %v13978_v16  ;;  %9618 = vmatpush.bf16.msra.mxu0 %v14036_v63  ;;  %v18632_v16 = vld [vmem:[#allocation62_spill] sm:$0xff]  ;;  %v13974_v63 = vld [vmem:[#allocation10 + $0x940] sm:$0xff] }
 0xa4e   :  { %v7918_v2 = vpop.f32.mrf.mxu2 }
 0xa4f   :  { %v10804_v0 = vadd.f32 %v17573_v6, %v7918_v2  ;;  %v14031_v2 = vld [vmem:[#allocation10 + $0xb08] sm:$0xff] }
 0xa50   :  { %8520 = vmatpush.bf16.msrb.mxu2 %v13892_v30  ;;  %8465 = vmatpush.bf16.msra.mxu3 %v13878_v57  ;;  %v17592_v30 = vadd.f32 %v5548_v40, %v17516_v62  ;;  %v17595_v44 = vpop.f32.mrf.mxu0  ;;  %v14034_v57 = vld [vmem:[#allocation10 + $0xb20] sm:$0xff]  ;;  %v13897_v62 = vld [vmem:[#allocation10 + $0x6d8] sm:$0xff]  ;;  %v5696_v40 = vadd.f32 %v17484_v27, %v17460_v11 }
 0xa51   :  { %9194 = vmatpush.bf16.msrb.mxu1 %v13977_v17  ;;  %9619 = vmatpush.bf16.msra.mxu0 %v14035_v21  ;;  %v13895_v17 = vld [vmem:[#allocation10 + $0x6c8] sm:$0xff]  ;;  %v13908_v21 = vld [vmem:[#allocation10 + $0x730] sm:$0xff]  ;;  %v13917_v11 = vld [vmem:[#allocation10 + $0x778] sm:$0xff] }
 0xa52   :  { %v5760_v19 = vmax.f32 %v5696_v40, 0.0  ;;  %v14066_v40 = vld [vmem:[#allocation10 + $0xc20] sm:$0xff] }
 0xa53   :  { %8466 = vmatmul.bf16.vlgmr.msra.gmra.mxu3 %v5822_v34  ;;  %v13896_v34 = vld [vmem:[#allocation10 + $0x6d0] sm:$0xff] }
 0xa54   :  { %8521 = vmatpush.bf16.msrb.mxu2 %v13891_v14  ;;  %8580 = vmatpush.bf16.msrb.mxu3 %v13901_v50  ;;  %v13887_v14 = vld [vmem:[#allocation10 + $0x688] sm:$0xff]  ;;  %v5551_v58 = vpop.f32.mrf.mxu1 }
 0xa55   :  { %9195 = vmatpush.bf16.msrb.mxu1 %v13976_v55  ;;  %v13975_v50 = vld [vmem:[#allocation10 + $0x948] sm:$0xff]  ;;  %9620 = vmatpush.bf16.msra.mxu0 %v14034_v57  ;;  %v13894_v57 = vld [vmem:[#allocation10 + $0x6c0] sm:$0xff] }
 0xa56   :  { %v7920_v6 = vpop.f32.mrf.mxu2  ;;  %v7979_v47 = vpop.f32.mrf.mxu3  ;;  %5590 = vmatmul.bf16.gmra.mxu1 %v18509_v23 }
 0xa57   :  { %v5824_v6 = vpack.c.bf16 %v5760_v19, %v5760_v19 }
 0xa58   :  { %8522 = vmatpush.bf16.msrb.mxu2 %v13890_v54  ;;  %8581 = vmatpush.bf16.msrb.mxu3 %v13900_v46  ;;  %v5277_v54 = vpop.f32.mrf.mxu0  ;;  %v10805_v46 = vadd.f32 %v10804_v0, %v7979_v47  ;;  %v14068_v47 = vld [vmem:[#allocation10 + $0xc30] sm:$0xff] }
 0xa59   :  { %9196 = vmatpush.bf16.msrb.mxu1 %v13975_v50  ;;  %v17600_v35 = vadd.f32 %v5277_v54, %v18632_v16  ;;  %9621 = vmatpush.bf16.msra.mxu0 %v14033_v53  ;;  %v14069_v53 = vld [vmem:[#allocation10 + $0xc38] sm:$0xff] }
 0xa5c   :  { %8523 = vmatpush.bf16.msrb.mxu2 %v13889_v25  ;;  %8582 = vmatpush.bf16.msrb.mxu3 %v13899_v29  ;;  %v5645_v25 = vadd.f32 %v5551_v58, %v17524_v61  ;;  %v5823_v29 = vpack.c.bf16 %v5759_v39, %v5759_v39  ;;  %v5553_v0 = vpop.f32.mrf.mxu1  ;;  %v13906_v58 = vld [vmem:[#allocation10 + $0x720] sm:$0xff] }
 0xa5d   :  { %9622 = vmatpush.bf16.msra.mxu0 %v14032_v13  ;;  %9197 = vmatpush.bf16.msrb.mxu1 %v13974_v63  ;;  %v17608_v61 = vadd.f32 %v5553_v0, %v17534_v9  ;;  %v13916_v9 = vld [vmem:[#allocation10 + $0x770] sm:$0xff]  ;;  %v13915_v13 = vld [vmem:[#allocation10 + $0x768] sm:$0xff]  ;;  %v13913_v0 = vld [vmem:[#allocation10 + $0x758] sm:$0xff] }
 0xa5e   :  { %v14067_v63 = vld [vmem:[#allocation10 + $0xc28] sm:$0xff] }
 0xa60   :  { %8524 = vmatpush.bf16.msrb.mxu2 %v13888_v7  ;;  %8583 = vmatpush.bf16.msrb.mxu3 %v13898_v12  ;;  %v5713_v7 = vadd.f32 %v17484_v27, %v5645_v25  ;;  %v7981_v12 = vpop.f32.mrf.mxu3  ;;  %v17610_v55 = vpop.f32.mrf.mxu0 }
 0xa61   :  { %9623 = vmatpush.bf16.msra.mxu0 %v14031_v2  ;;  %v5702_v2 = vadd.f32 %v17484_v27, %v17514_v43  ;;  %v14065_v12 = vld [vmem:[#allocation10 + $0xc18] sm:$0xff] }
 0xa62   :  { %v5777_v50 = vmax.f32 %v5713_v7, 0.0  ;;  %v13903_v7 = vld [vmem:[#allocation10 + $0x708] sm:$0xff]  ;;  %v13925_v43 = vld [vmem:[#allocation10 + $0x7b8] sm:$0xff] }
 0xa64   :  { %8525 = vmatpush.bf16.msrb.mxu2 %v13887_v14  ;;  %8584 = vmatpush.bf16.msrb.mxu3 %v13897_v62  ;;  %v13907_v14 = vld [vmem:[#allocation10 + $0x728] sm:$0xff]  ;;  %v14030_v62 = vld [vmem:[#allocation10 + $0xb00] sm:$0xff]  ;;  %v5556_v39 = vpop.f32.mrf.mxu1 }
 0xa65   :  { %9624 = vmatpush.bf16.msra.mxu0 %v14030_v62  ;;  %v17613_v54 = vadd.f32 %v5556_v39, %v17537_v52  ;;  %v13914_v52 = vld [vmem:[#allocation10 + $0x760] sm:$0xff]  ;;  %v13912_v62 = vld [vmem:[#allocation10 + $0x750] sm:$0xff] }
 0xa66   :  { %5595 = vmatmul.bf16.gmra.mxu1 %v18509_v23  ;;  %v5697_v23 = vadd.f32 %v17484_v27, %v17466_v60 }
 0xa68   :  { %8526 = vmatpush.bf16.msrb.mxu2 %v13886_v37  ;;  %8585 = vmatpush.bf16.msrb.mxu3 %v13896_v34  ;;  %v5841_v37 = vpack.c.bf16 %v5777_v50, %v5777_v50  ;;  %v5282_v34 = vpop.f32.mrf.mxu0  ;;  %v5761_v19 = vmax.f32 %v5697_v23, 0.0 }
 0xa69   :  { %9861 = vmatpush.bf16.msrb.mxu0 %v14069_v53  ;;  %v17616_v16 = vadd.f32 %v5282_v34, %v17203_v59  ;;  %v13911_v34 = vld [vmem:[#allocation10 + $0x748] sm:$0xff] }
 0xa6a   :  { %9625 = vmatmul.bf16.vlgmr.msra.gmra.mxu0 %v5841_v37  ;;  %v5825_v39 = vpack.c.bf16 %v5761_v19, %v5761_v19 }
 0xa6b   :  { %8527 = vmatmul.bf16.vlgmr.msrb.gmra.mxu2 %v5823_v29  ;;  %v13904_v29 = vld [vmem:[#allocation10 + $0x710] sm:$0xff] }
 0xa6c   :  { %8641 = vmatpush.bf16.msra.mxu2 %v13909_v24  ;;  %8586 = vmatpush.bf16.msrb.mxu3 %v13895_v17  ;;  %v13905_v24 = vld [vmem:[#allocation10 + $0x718] sm:$0xff] }
 0xa6d   :  { %9862 = vmatpush.bf16.msrb.mxu0 %v14068_v47 }
 0xa6e   :  { %v8040_v25 = vpop.f32.mrf.mxu2 }
 0xa6f   :  { %v10806_v17 = vadd.f32 %v10805_v46, %v8040_v25  ;;  %v5766_v46 = vmax.f32 %v5702_v2, 0.0  ;;  %v14012_v25 = vld [vmem:[#allocation10 + $0xa70] sm:$0xff] }
 0xa70   :  { %8642 = vmatpush.bf16.msra.mxu2 %v13908_v21  ;;  %8587 = vmatpush.bf16.msrb.mxu3 %v13894_v57  ;;  %v17619_v21 = vpop.f32.mrf.mxu1  ;;  %v17623_v59 = vpop.f32.mrf.mxu0 }
 0xa71   :  { %9863 = vmatpush.bf16.msrb.mxu0 %v14067_v63  ;;  %v14063_v63 = vld [vmem:[#allocation10 + $0xc08] sm:$0xff] }
 0xa73   :  { %8588 = vmatmul.bf16.vlgmr.msrb.gmra.mxu3 %v5824_v6  ;;  %v14013_v6 = vld [vmem:[#allocation10 + $0xa78] sm:$0xff] }
 0xa74   :  { %8643 = vmatpush.bf16.msra.mxu2 %v13907_v14  ;;  %8702 = vmatpush.bf16.msra.mxu3 %v13917_v11  ;;  %v13902_v14 = vld [vmem:[#allocation10 + $0x700] sm:$0xff] }
 0xa75   :  { %9864 = vmatpush.bf16.msrb.mxu0 %v14066_v40 }
 0xa76   :  { %v8042_v57 = vpop.f32.mrf.mxu2  ;;  %v8101_v11 = vpop.f32.mrf.mxu3 }
 0xa77   :  { %v17627_v50 = vadd.f32 %v10806_v17, %v8101_v11  ;;  %v13910_v17 = vld [vmem:[#allocation10 + $0x740] sm:$0xff]  ;;  %v13932_v11 = vld [vmem:[#allocation10 + $0x7f0] sm:$0xff] }
 0xa78   :  { %8644 = vmatpush.bf16.msra.mxu2 %v13906_v58  ;;  %8703 = vmatpush.bf16.msra.mxu3 %v13916_v9  ;;  %v5561_v53 = vpop.f32.mrf.mxu1  ;;  %v14064_v58 = vld [vmem:[#allocation10 + $0xc10] sm:$0xff]  ;;  %v5830_v9 = vpack.c.bf16 %v5766_v46, %v5766_v46  ;;  %v5287_v37 = vpop.f32.mrf.mxu0  ;;  %v14101_v46 = vld [vmem:[#allocation10 + $0xd38] sm:$0xff] }
 0xa79   :  { %9865 = vmatpush.bf16.msrb.mxu0 %v14065_v12  ;;  %v5649_v60 = vadd.f32 %v5561_v53, %v17557_v56  ;;  %v17631_v47 = vadd.f32 %v5287_v37, %v17221_v1  ;;  %v14011_v12 = vld [vmem:[#allocation10 + $0xa68] sm:$0xff] }
 0xa7a   :  { %8954 = vmatmul.bf16.vlgmr.msra.gmra.mxu1 %v5830_v9  ;;  %v14009_v9 = vld [vmem:[#allocation10 + $0xa58] sm:$0xff]  ;;  %v14099_v37 = vld [vmem:[#allocation10 + $0xd28] sm:$0xff] }
 0xa7b   :  { %v5717_v56 = vadd.f32 %v17484_v27, %v5649_v60  ;;  %9434 = vmatpush.bf16.msra.mxu1 %v14013_v6  ;;  %v13931_v60 = vld [vmem:[#allocation10 + $0x7e8] sm:$0xff] }
 0xa7c   :  { %8645 = vmatpush.bf16.msra.mxu2 %v13905_v24  ;;  %8704 = vmatpush.bf16.msra.mxu3 %v13915_v13  ;;  %v13924_v24 = vld [vmem:[#allocation10 + $0x7b0] sm:$0xff]  ;;  %v5698_v13 = vadd.f32 %v17484_v27, %v17474_v4  ;;  %v13933_v4 = vld [vmem:[#allocation10 + $0x7f8] sm:$0xff] }
 0xa7d   :  { %9866 = vmatpush.bf16.msrb.mxu0 %v14064_v58 }
 0xa7e   :  { %v8103_v1 = vpop.f32.mrf.mxu3  ;;  %v5762_v40 = vmax.f32 %v5698_v13, 0.0  ;;  %v13920_v13 = vld [vmem:[#allocation10 + $0x790] sm:$0xff] }
 0xa7f   :  { %9435 = vmatpush.bf16.msra.mxu1 %v14012_v25  ;;  %v18633_v1 = vld [vmem:[#allocation29_spill] sm:$0xff] }
 0xa80   :  { %8646 = vmatpush.bf16.msra.mxu2 %v13904_v29  ;;  %8705 = vmatpush.bf16.msra.mxu3 %v13914_v52  ;;  %v4757_v29 = vadd.f32 %v17211_v38, %v17216_v5  ;;  %v13923_v52 = vld [vmem:[#allocation10 + $0x7a8] sm:$0xff]  ;;  %v17638_v2 = vpop.f32.mrf.mxu1  ;;  %v5706_v38 = vadd.f32 %v17484_v27, %v17546_v51  ;;  %v5289_v5 = vpop.f32.mrf.mxu0  ;;  %v5826_v19 = vpack.c.bf16 %v5762_v40, %v5762_v40  ;;  %v13921_v51 = vld [vmem:[#allocation10 + $0x798] sm:$0xff] }
 0xa81   :  { %9867 = vmatpush.bf16.msrb.mxu0 %v14063_v63 }
 0xa82   :  { %v5059_v23 = vadd.f32 %v17229_v41, %v4757_v29  ;;  %v14010_v41 = vld [vmem:[#allocation10 + $0xa60] sm:$0xff]  ;;  %v5770_v53 = vmax.f32 %v5706_v38, 0.0 }
 0xa83   :  { %9436 = vmatpush.bf16.msra.mxu1 %v14011_v12  ;;  %v14098_v29 = vld [vmem:[#allocation10 + $0xd20] sm:$0xff] }
 0xa84   :  { %8647 = vmatpush.bf16.msra.mxu2 %v13903_v7  ;;  %8706 = vmatpush.bf16.msra.mxu3 %v13913_v0  ;;  %v14062_v7 = vld [vmem:[#allocation10 + $0xc00] sm:$0xff]  ;;  %v5781_v0 = vmax.f32 %v5717_v56, 0.0  ;;  %v17643_v57 = vadd.f32 %v5289_v5, %v5059_v23 }
 0xa85   :  { %9868 = vmatpush.bf16.msrb.mxu0 %v14062_v7  ;;  %v13930_v56 = vld [vmem:[#allocation10 + $0x7e0] sm:$0xff]  ;;  %v18634_v7 = vld [vmem:[#allocation79_spill] sm:$0xff] }
 0xa86   :  { %v13918_v38 = vld [vmem:[#allocation10 + $0x780] sm:$0xff] }
 0xa87   :  { %9437 = vmatpush.bf16.msra.mxu1 %v14010_v41  ;;  %v14006_v41 = vld [vmem:[#allocation10 + $0xa40] sm:$0xff] }
 0xa88   :  { %8648 = vmatpush.bf16.msra.mxu2 %v13902_v14  ;;  %8707 = vmatpush.bf16.msra.mxu3 %v13912_v62  ;;  %v13922_v14 = vld [vmem:[#allocation10 + $0x7a0] sm:$0xff]  ;;  %v5845_v62 = vpack.c.bf16 %v5781_v0, %v5781_v0  ;;  %v5566_v58 = vpop.f32.mrf.mxu1  ;;  %v14097_v0 = vld [vmem:[#allocation10 + $0xd18] sm:$0xff] }
 0xa89   :  { %10105 = vmatpush.bf16.msra.mxu0 %v14101_v46  ;;  %v17646_v6 = vadd.f32 %v5566_v58, %v17570_v31  ;;  %v14008_v31 = vld [vmem:[#allocation10 + $0xa50] sm:$0xff]  ;;  %v5710_v46 = vadd.f32 %v17484_v27, %v17577_v28  ;;  %v13927_v28 = vld [vmem:[#allocation10 + $0x7c8] sm:$0xff] }
 0xa8a   :  { %9869 = vmatmul.bf16.vlgmr.msrb.gmra.mxu0 %v5845_v62  ;;  %v13956_v58 = vld [vmem:[#allocation10 + $0x8b0] sm:$0xff] }
 0xa8b   :  { %8649 = vmatmul.bf16.vlgmr.msra.gmra.mxu2 %v5825_v39  ;;  %v5834_v39 = vpack.c.bf16 %v5770_v53, %v5770_v53  ;;  %9438 = vmatpush.bf16.msra.mxu1 %v14009_v9  ;;  %v14045_v53 = vld [vmem:[#allocation10 + $0xb78] sm:$0xff] }
 0xa8c   :  { %8763 = vmatpush.bf16.msrb.mxu2 %v13925_v43  ;;  %8708 = vmatpush.bf16.msra.mxu3 %v13911_v34  ;;  %v14100_v43 = vld [vmem:[#allocation10 + $0xd30] sm:$0xff]  ;;  %v5292_v34 = vpop.f32.mrf.mxu0 }
 0xa8d   :  { %10106 = vmatpush.bf16.msra.mxu0 %v14100_v43  ;;  %9198 = vmatmul.bf16.vlgmr.msrb.gmra.mxu1 %v5834_v39  ;;  %v14096_v43 = vld [vmem:[#allocation10 + $0xd10] sm:$0xff]  ;;  %v14095_v39 = vld [vmem:[#allocation10 + $0xd08] sm:$0xff] }
 0xa8e   :  { %v8162_v63 = vpop.f32.mrf.mxu2 }
 0xa8f   :  { %v10808_v25 = vadd.f32 %v17627_v50, %v8162_v63  ;;  %9439 = vmatpush.bf16.msra.mxu1 %v14008_v31  ;;  %v14007_v50 = vld [vmem:[#allocation10 + $0xa48] sm:$0xff]  ;;  %v14044_v63 = vld [vmem:[#allocation10 + $0xb70] sm:$0xff] }
 0xa90   :  { %8764 = vmatpush.bf16.msrb.mxu2 %v13924_v24  ;;  %8709 = vmatpush.bf16.msra.mxu3 %v13910_v17  ;;  %v17649_v24 = vadd.f32 %v5292_v34, %v17239_v22  ;;  %v4759_v17 = vadd.f32 %v18633_v1, %v17234_v15  ;;  %v5699_v22 = vadd.f32 %v17484_v27, %v17482_v36  ;;  %v17656_v40 = vpop.f32.mrf.mxu1 }
 0xa91   :  { %10107 = vmatpush.bf16.msra.mxu0 %v14099_v37 }
 0xa92   :  { %v5061_v23 = vadd.f32 %v18634_v7, %v4759_v17  ;;  %v5763_v5 = vmax.f32 %v5699_v22, 0.0  ;;  %v13955_v17 = vld [vmem:[#allocation10 + $0x8a8] sm:$0xff]  ;;  %v13965_v22 = vld [vmem:[#allocation10 + $0x8f8] sm:$0xff] }
 0xa93   :  { %8710 = vmatmul.bf16.vlgmr.msra.gmra.mxu3 %v5826_v19  ;;  %v13928_v19 = vld [vmem:[#allocation10 + $0x7d0] sm:$0xff]  ;;  %9440 = vmatpush.bf16.msra.mxu1 %v14007_v50  ;;  %v14043_v7 = vld [vmem:[#allocation10 + $0xb68] sm:$0xff] }
 0xa94   :  { %8765 = vmatpush.bf16.msrb.mxu2 %v13923_v52  ;;  %8824 = vmatpush.bf16.msrb.mxu3 %v13933_v4  ;;  %v13919_v52 = vld [vmem:[#allocation10 + $0x788] sm:$0xff]  ;;  %v13929_v4 = vld [vmem:[#allocation10 + $0x7d8] sm:$0xff]  ;;  %v5294_v12 = vpop.f32.mrf.mxu0  ;;  %v5827_v27 = vpack.c.bf16 %v5763_v5, %v5763_v5 }
 0xa95   :  { %10108 = vmatpush.bf16.msra.mxu0 %v14098_v29  ;;  %v17661_v15 = vadd.f32 %v5294_v12, %v5061_v23  ;;  %v14133_v23 = vld [vmem:[#allocation10 + $0xe38] sm:$0xff]  ;;  %v18636_v50 = vld [vmem:[#allocation78_spill] sm:$0xff]  ;;  %v13954_v12 = vld [vmem:[#allocation10 + $0x8a0] sm:$0xff] }
 0xa96   :  { %v8164_v36 = vpop.f32.mrf.mxu2 }
 0xa97   :  { %9441 = vmatpush.bf16.msra.mxu1 %v14006_v41  ;;  %v13964_v36 = vld [vmem:[#allocation10 + $0x8f0] sm:$0xff] }
 0xa98   :  { %8766 = vmatpush.bf16.msrb.mxu2 %v13922_v14  ;;  %8825 = vmatpush.bf16.msrb.mxu3 %v13932_v11  ;;  %v8223_v14 = vpop.f32.mrf.mxu3  ;;  %v13957_v11 = vld [vmem:[#allocation10 + $0x8b8] sm:$0xff]  ;;  %v5571_v37 = vpop.f32.mrf.mxu1  ;;  %v14132_v41 = vld [vmem:[#allocation10 + $0xe30] sm:$0xff] }
 0xa99   :  { %v17663_v62 = vadd.f32 %v10808_v25, %v8223_v14  ;;  %10109 = vmatpush.bf16.msra.mxu0 %v14097_v0  ;;  %v5653_v34 = vadd.f32 %v5571_v37, %v17588_v20  ;;  %v18635_v25 = vld [vmem:[#allocation21_spill] sm:$0xff]  ;;  %v4761_v0 = vadd.f32 %v17367_v26, %v18636_v50  ;;  %v13953_v26 = vld [vmem:[#allocation10 + $0x898] sm:$0xff]  ;;  %v14128_v50 = vld [vmem:[#allocation10 + $0xe10] sm:$0xff] }
 0xa9a   :  { %v14094_v20 = vld [vmem:[#allocation10 + $0xd00] sm:$0xff] }
 0xa9b   :  { %9678 = vmatpush.bf16.msrb.mxu1 %v14045_v53  ;;  %v14041_v53 = vld [vmem:[#allocation10 + $0xb58] sm:$0xff] }
 0xa9c   :  { %8767 = vmatpush.bf16.msrb.mxu2 %v13921_v51  ;;  %8826 = vmatpush.bf16.msrb.mxu3 %v13931_v60  ;;  %v5774_v51 = vmax.f32 %v5710_v46, 0.0  ;;  %v17665_v60 = vld [vmem:[#allocation8] ss:$0 sm:$0xff]  ;;  %v5063_v46 = vadd.f32 %v17377_v18, %v4761_v0  ;;  %v13963_v18 = vld [vmem:[#allocation10 + $0x8e8] sm:$0xff] }
 0xa9d   :  { %v5700_v9 = vadd.f32 %v17665_v60, %v17497_v42  ;;  %10110 = vmatpush.bf16.msra.mxu0 %v14096_v43  ;;  %v5721_v29 = vadd.f32 %v17665_v60, %v5653_v34  ;;  %v13926_v42 = vld [vmem:[#allocation10 + $0x7c0] sm:$0xff] }
 0xa9f   :  { %9679 = vmatpush.bf16.msrb.mxu1 %v14044_v63  ;;  %v14130_v63 = vld [vmem:[#allocation10 + $0xe20] sm:$0xff] }
 0xaa0   :  { %8768 = vmatpush.bf16.msrb.mxu2 %v13920_v13  ;;  %8827 = vmatpush.bf16.msrb.mxu3 %v13930_v56  ;;  %v5297_v13 = vpop.f32.mrf.mxu0  ;;  %v5838_v56 = vpack.c.bf16 %v5774_v51, %v5774_v51  ;;  %v8225_v1 = vpop.f32.mrf.mxu3  ;;  %v14131_v51 = vld [vmem:[#allocation10 + $0xe28] sm:$0xff] }
 0xaa1   :  { %v17671_v31 = vadd.f32 %v5297_v13, %v18635_v25  ;;  %10111 = vmatpush.bf16.msra.mxu0 %v14095_v39  ;;  %v17677_v5 = vpop.f32.mrf.mxu1  ;;  %v14040_v13 = vld [vmem:[#allocation10 + $0xb50] sm:$0xff]  ;;  %v5703_v25 = vadd.f32 %v17665_v60, %v17521_v10  ;;  %v14039_v1 = vld [vmem:[#allocation10 + $0xb48] sm:$0xff] }
 0xaa2   :  { %9442 = vmatmul.bf16.vlgmr.msra.gmra.mxu1 %v5838_v56  ;;  %v13951_v56 = vld [vmem:[#allocation10 + $0x888] sm:$0xff] }
 0xaa3   :  { %9680 = vmatpush.bf16.msrb.mxu1 %v14043_v7 }
 0xaa4   :  { %8769 = vmatpush.bf16.msrb.mxu2 %v13919_v52  ;;  %8828 = vmatpush.bf16.msrb.mxu3 %v13929_v4  ;;  %v5764_v52 = vmax.f32 %v5700_v9, 0.0  ;;  %v5785_v4 = vmax.f32 %v5721_v29, 0.0  ;;  %v13962_v9 = vld [vmem:[#allocation10 + $0x8e0] sm:$0xff]  ;;  %v13961_v29 = vld [vmem:[#allocation10 + $0x8d8] sm:$0xff] }
 0xaa5   :  { %10112 = vmatpush.bf16.msra.mxu0 %v14094_v20  ;;  %v13960_v20 = vld [vmem:[#allocation10 + $0x8d0] sm:$0xff] }
 0xaa6   :  { %v5849_v14 = vpack.c.bf16 %v5785_v4, %v5785_v4  ;;  %v13989_v4 = vld [vmem:[#allocation10 + $0x9b8] sm:$0xff] }
 0xaa8   :  { %8770 = vmatpush.bf16.msrb.mxu2 %v13918_v38  ;;  %8829 = vmatpush.bf16.msrb.mxu3 %v13928_v19  ;;  %v5828_v38 = vpack.c.bf16 %v5764_v52, %v5764_v52  ;;  %v5299_v19 = vpop.f32.mrf.mxu0 }
 0xaa9   :  { %10349 = vmatpush.bf16.msrb.mxu0 %v14133_v23  ;;  %v17679_v43 = vadd.f32 %v5299_v19, %v5063_v46  ;;  %v14038_v23 = vld [vmem:[#allocation10 + $0xb40] sm:$0xff]  ;;  %v14077_v46 = vld [vmem:[#allocation10 + $0xc78] sm:$0xff]  ;;  %v14127_v19 = vld [vmem:[#allocation10 + $0xe08] sm:$0xff] }
 0xaaa   :  { %10113 = vmatmul.bf16.vlgmr.msra.gmra.mxu0 %v5849_v14  ;;  %v13988_v14 = vld [vmem:[#allocation10 + $0x9b0] sm:$0xff] }
 0xaab   :  { %8771 = vmatmul.bf16.vlgmr.msrb.gmra.mxu2 %v5827_v27  ;;  %v13952_v27 = vld [vmem:[#allocation10 + $0x890] sm:$0xff] }
 0xaac   :  { %9007 = vmatpush.bf16.msra.mxu2 %v13957_v11  ;;  %8830 = vmatpush.bf16.msrb.mxu3 %v13927_v28  ;;  %v14042_v11 = vld [vmem:[#allocation10 + $0xb60] sm:$0xff]  ;;  %v5576_v28 = vpop.f32.mrf.mxu1 }
 0xaad   :  { %9681 = vmatpush.bf16.msrb.mxu1 %v14042_v11  ;;  %10350 = vmatpush.bf16.msrb.mxu0 %v14132_v41  ;;  %v17682_v37 = vadd.f32 %v5576_v28, %v17600_v35  ;;  %v14129_v35 = vld [vmem:[#allocation10 + $0xe18] sm:$0xff]  ;;  %v14076_v41 = vld [vmem:[#allocation10 + $0xc70] sm:$0xff] }
 0xab0   :  { %9008 = vmatpush.bf16.msra.mxu2 %v13956_v58  ;;  %8831 = vmatpush.bf16.msrb.mxu3 %v13926_v42  ;;  %v8284_v58 = vpop.f32.mrf.mxu2  ;;  %v17685_v34 = vpop.f32.mrf.mxu0  ;;  %v13950_v42 = vld [vmem:[#allocation10 + $0x880] sm:$0xff] }
 0xab1   :  { %v10810_v39 = vadd.f32 %v17663_v62, %v8284_v58  ;;  %9682 = vmatpush.bf16.msrb.mxu1 %v14041_v53  ;;  %10351 = vmatpush.bf16.msrb.mxu0 %v14131_v51  ;;  %v5714_v62 = vadd.f32 %v17665_v60, %v17608_v61  ;;  %v13997_v58 = vld [vmem:[#allocation10 + $0x9f8] sm:$0xff] }
 0xab3   :  { %8832 = vmatmul.bf16.vlgmr.msrb.gmra.mxu3 %v5828_v38  ;;  %v5778_v0 = vmax.f32 %v5714_v62, 0.0  ;;  %v13959_v38 = vld [vmem:[#allocation10 + $0x8c8] sm:$0xff] }
 0xab4   :  { %9009 = vmatpush.bf16.msra.mxu2 %v13955_v17  ;;  %9068 = vmatpush.bf16.msra.mxu3 %v13965_v22  ;;  %v5767_v17 = vmax.f32 %v5703_v25, 0.0  ;;  %v17691_v52 = vpop.f32.mrf.mxu1 }
 0xab5   :  { %9683 = vmatpush.bf16.msrb.mxu1 %v14040_v13  ;;  %10352 = vmatpush.bf16.msrb.mxu0 %v14130_v63  ;;  %v5842_v11 = vpack.c.bf16 %v5778_v0, %v5778_v0  ;;  %v18637_v13 = vld [vmem:[#allocation68_spill] sm:$0xff] }
 0xab6   :  { %v8345_v7 = vpop.f32.mrf.mxu3  ;;  %v5831_v61 = vpack.c.bf16 %v5767_v17, %v5767_v17  ;;  %v18638_v63 = vld [vmem:[#allocation72_spill] sm:$0xff]  ;;  %v13996_v17 = vld [vmem:[#allocation10 + $0x9f0] sm:$0xff] }
 0xab8   :  { %9010 = vmatpush.bf16.msra.mxu2 %v13954_v12  ;;  %9069 = vmatpush.bf16.msra.mxu3 %v13964_v36  ;;  %v8286_v22 = vpop.f32.mrf.mxu2  ;;  %v8896_v10 = vpop.f32.mrf.mxu0  ;;  %v17693_v12 = vadd.f32 %v10810_v39, %v8345_v7  ;;  %v5704_v36 = vadd.f32 %v17665_v60, %v17532_v45  ;;  %v13987_v45 = vld [vmem:[#allocation10 + $0x9a8] sm:$0xff]  ;;  %v14126_v39 = vld [vmem:[#allocation10 + $0xe00] sm:$0xff]  ;;  %v14164_v7 = vld [vmem:[#allocation10 + $0xf30] sm:$0xff] }
 0xab9   :  { %9684 = vmatpush.bf16.msrb.mxu1 %v14039_v1  ;;  %10353 = vmatpush.bf16.msrb.mxu0 %v14129_v35  ;;  %v18639_v1 = vld [vmem:[#allocation28_spill] sm:$0xff] }
 0xaba   :  { %v5768_v53 = vmax.f32 %v5704_v36, 0.0  ;;  %v14074_v22 = vld [vmem:[#allocation10 + $0xc60] sm:$0xff]  ;;  %v13995_v36 = vld [vmem:[#allocation10 + $0x9e8] sm:$0xff] }
 0xabc   :  { %9011 = vmatpush.bf16.msra.mxu2 %v13953_v26  ;;  %9070 = vmatpush.bf16.msra.mxu3 %v13963_v18  ;;  %v5581_v26 = vpop.f32.mrf.mxu1  ;;  %v13958_v18 = vld [vmem:[#allocation10 + $0x8c0] sm:$0xff] }
 0xabd   :  { %9685 = vmatpush.bf16.msrb.mxu1 %v14038_v23  ;;  %10354 = vmatpush.bf16.msrb.mxu0 %v14128_v50  ;;  %v5657_v51 = vadd.f32 %v5581_v26, %v17616_v16  ;;  %v5832_v16 = vpack.c.bf16 %v5768_v53, %v5768_v53  ;;  %v18640_v23 = vld [vmem:[#allocation123_spill] sm:$0xff]  ;;  %v18641_v50 = vld [vmem:[#allocation73_spill] sm:$0xff] }
 0xabe   :  { %v4747_v0 = vadd.f32 %v18641_v50, %v18640_v23  ;;  %v13994_v53 = vld [vmem:[#allocation10 + $0x9e0] sm:$0xff]  ;;  %v13991_v23 = vld [vmem:[#allocation10 + $0x9c8] sm:$0xff] }
 0xabf   :  { %v5725_v25 = vadd.f32 %v17665_v60, %v5657_v51 }
 0xac0   :  { %9012 = vmatpush.bf16.msra.mxu2 %v13952_v27  ;;  %9071 = vmatpush.bf16.msra.mxu3 %v13962_v9  ;;  %v8347_v27 = vpop.f32.mrf.mxu3  ;;  %v17698_v28 = vpop.f32.mrf.mxu0  ;;  %v14075_v9 = vld [vmem:[#allocation10 + $0xc68] sm:$0xff] }
 0xac1   :  { %9922 = vmatpush.bf16.msra.mxu1 %v14077_v46  ;;  %10355 = vmatpush.bf16.msrb.mxu0 %v14127_v19  ;;  %v5789_v62 = vmax.f32 %v5725_v25, 0.0  ;;  %v18642_v19 = vld [vmem:[#allocation129_spill] sm:$0xff]  ;;  %v14072_v27 = vld [vmem:[#allocation10 + $0xc50] sm:$0xff] }
 0xac2   :  { %9686 = vmatmul.bf16.vlgmr.msrb.gmra.mxu1 %v5842_v11  ;;  %v14163_v11 = vld [vmem:[#allocation10 + $0xf28] sm:$0xff] }
 0xac4   :  { %9013 = vmatpush.bf16.msra.mxu2 %v13951_v56  ;;  %9072 = vmatpush.bf16.msra.mxu3 %v13961_v29  ;;  %v4755_v56 = vadd.f32 %v18638_v63, %v18637_v13  ;;  %v14165_v29 = vld [vmem:[#allocation10 + $0xf38] sm:$0xff]  ;;  %v5583_v10 = vpop.f32.mrf.mxu1  ;;  %v13983_v13 = vld [vmem:[#allocation10 + $0x988] sm:$0xff] }
 0xac5   :  { %9923 = vmatpush.bf16.msra.mxu1 %v14076_v41  ;;  %10356 = vmatpush.bf16.msrb.mxu0 %v14126_v39  ;;  %v13993_v63 = vld [vmem:[#allocation10 + $0x9d8] sm:$0xff] }
 0xac6   :  { %v5057_v35 = vadd.f32 %v18639_v1, %v4755_v56  ;;  %v5707_v56 = vadd.f32 %v17665_v60, %v17554_v32  ;;  %v13992_v1 = vld [vmem:[#allocation10 + $0x9d0] sm:$0xff]  ;;  %v14109_v32 = vld [vmem:[#allocation10 + $0xd78] sm:$0xff] }
 0xac8   :  { %9014 = vmatpush.bf16.msra.mxu2 %v13950_v42  ;;  %9073 = vmatpush.bf16.msra.mxu3 %v13960_v20  ;;  %v13986_v42 = vld [vmem:[#allocation10 + $0x9a0] sm:$0xff]  ;;  %v5359_v20 = vadd.f32 %v17623_v59, %v5057_v35  ;;  %v5049_v59 = vadd.f32 %v18642_v19, %v4747_v0  ;;  %v5771_v35 = vmax.f32 %v5707_v56, 0.0  ;;  %v5708_v0 = vadd.f32 %v17665_v60, %v17562_v33 }
 0xac9   :  { %9924 = vmatpush.bf16.msra.mxu1 %v14075_v9  ;;  %10593 = vmatpush.bf16.msra.mxu0 %v14165_v29  ;;  %v14158_v33 = vld [vmem:[#allocation10 + $0xf00] sm:$0xff] }
 0xaca   :  { %v17707_v46 = vadd.f32 %v5583_v10, %v5359_v20  ;;  %v5351_v41 = vadd.f32 %v17564_v3, %v5049_v59  ;;  %v14160_v20 = vld [vmem:[#allocation10 + $0xf10] sm:$0xff]  ;;  %v5835_v50 = vpack.c.bf16 %v5771_v35, %v5771_v35  ;;  %v5772_v19 = vmax.f32 %v5708_v0, 0.0  ;;  %v18644_v56 = vld [vmem:[#allocation77_spill] sm:$0xff] }
 0xacb   :  { %9015 = vmatmul.bf16.vlgmr.msra.gmra.mxu2 %v5831_v61  ;;  %v9140_v61 = vpop.f32.mrf.mxu0  ;;  %v14103_v0 = vld [vmem:[#allocation10 + $0xd48] sm:$0xff] }
 0xacc   :  { %9251 = vmatpush.bf16.msrb.mxu2 %v13989_v4  ;;  %9074 = vmatpush.bf16.msra.mxu3 %v13959_v38  ;;  %v5853_v4 = vpack.c.bf16 %v5789_v62, %v5789_v62  ;;  %v13985_v38 = vld [vmem:[#allocation10 + $0x998] sm:$0xff]  ;;  %v5586_v9 = vpop.f32.mrf.mxu1  ;;  %v14020_v61 = vld [vmem:[#allocation10 + $0xab0] sm:$0xff] }
 0xacd   :  { %9925 = vmatpush.bf16.msra.mxu1 %v14074_v22  ;;  %10594 = vmatpush.bf16.msra.mxu0 %v14164_v7  ;;  %v17714_v39 = vadd.f32 %v5586_v9, %v17631_v47  ;;  %v13982_v47 = vld [vmem:[#allocation10 + $0x980] sm:$0xff]  ;;  %v14021_v62 = vld [vmem:[#allocation10 + $0xab8] sm:$0xff] }
 0xace   :  { %10357 = vmatmul.bf16.vlgmr.msrb.gmra.mxu0 %v5853_v4  ;;  %v8406_v26 = vpop.f32.mrf.mxu2  ;;  %v14106_v9 = vld [vmem:[#allocation10 + $0xd60] sm:$0xff] }
 0xacf   :  { %v10812_v51 = vadd.f32 %v17693_v12, %v8406_v26  ;;  %v14071_v12 = vld [vmem:[#allocation10 + $0xc48] sm:$0xff] }
 0xad0   :  { %9252 = vmatpush.bf16.msrb.mxu2 %v13988_v14  ;;  %9075 = vmatpush.bf16.msra.mxu3 %v13958_v18  ;;  %v14073_v14 = vld [vmem:[#allocation10 + $0xc58] sm:$0xff]  ;;  %v13984_v18 = vld [vmem:[#allocation10 + $0x990] sm:$0xff]  ;;  %v14107_v26 = vld [vmem:[#allocation10 + $0xd68] sm:$0xff] }
 0xad1   :  { %9926 = vmatpush.bf16.msra.mxu1 %v14073_v14  ;;  %10595 = vmatpush.bf16.msra.mxu0 %v14163_v11  ;;  %v14159_v14 = vld [vmem:[#allocation10 + $0xf08] sm:$0xff] }
 0xad2   :  { %v14019_v11 = vld [vmem:[#allocation10 + $0xaa8] sm:$0xff] }
 0xad3   :  { %9076 = vmatmul.bf16.vlgmr.msra.gmra.mxu3 %v5832_v16  ;;  %v17716_v3 = vpop.f32.mrf.mxu0 }
 0xad4   :  { %9253 = vmatpush.bf16.msrb.mxu2 %v13987_v45  ;;  %9312 = vmatpush.bf16.msrb.mxu3 %v13997_v58  ;;  %v5650_v45 = vadd.f32 %v17638_v2, %v5351_v41  ;;  %v14162_v58 = vld [vmem:[#allocation10 + $0xf20] sm:$0xff]  ;;  %v14161_v2 = vld [vmem:[#allocation10 + $0xf18] sm:$0xff]  ;;  %v5588_v4 = vpop.f32.mrf.mxu1 }
 0xad5   :  { %9927 = vmatpush.bf16.msra.mxu1 %v14072_v27  ;;  %10596 = vmatpush.bf16.msra.mxu0 %v14162_v58  ;;  %v17724_v7 = vadd.f32 %v5588_v4, %v17643_v57  ;;  %v13990_v57 = vld [vmem:[#allocation10 + $0x9c0] sm:$0xff]  ;;  %v14029_v41 = vld [vmem:[#allocation10 + $0xaf8] sm:$0xff]  ;;  %v14104_v4 = vld [vmem:[#allocation10 + $0xd50] sm:$0xff] }
 0xad6   :  { %v5718_v25 = vadd.f32 %v17665_v60, %v5650_v45  ;;  %v8408_v29 = vpop.f32.mrf.mxu2  ;;  %v8467_v16 = vpop.f32.mrf.mxu3  ;;  %v14018_v27 = vld [vmem:[#allocation10 + $0xaa0] sm:$0xff]  ;;  %v14028_v45 = vld [vmem:[#allocation10 + $0xaf0] sm:$0xff] }
 0xad7   :  { %v17721_v22 = vadd.f32 %v10812_v51, %v8467_v16  ;;  %v5836_v51 = vpack.c.bf16 %v5772_v19, %v5772_v19  ;;  %v14105_v29 = vld [vmem:[#allocation10 + $0xd58] sm:$0xff] }
 0xad8   :  { %9254 = vmatpush.bf16.msrb.mxu2 %v13986_v42  ;;  %9313 = vmatpush.bf16.msrb.mxu3 %v13996_v17  ;;  %v14070_v42 = vld [vmem:[#allocation10 + $0xc40] sm:$0xff]  ;;  %v5782_v17 = vmax.f32 %v5718_v25, 0.0  ;;  %v14017_v25 = vld [vmem:[#allocation10 + $0xa98] sm:$0xff] }
 0xad9   :  { %9928 = vmatpush.bf16.msra.mxu1 %v14071_v12  ;;  %10597 = vmatpush.bf16.msra.mxu0 %v14161_v2 }
 0xadb   :  { %v9384_v10 = vpop.f32.mrf.mxu0 }
 0xadc   :  { %9255 = vmatpush.bf16.msrb.mxu2 %v13985_v38  ;;  %9314 = vmatpush.bf16.msrb.mxu3 %v13995_v36  ;;  %v5846_v38 = vpack.c.bf16 %v5782_v17, %v5782_v17  ;;  %v14108_v36 = vld [vmem:[#allocation10 + $0xd70] sm:$0xff] }
 0xadd   :  { %9929 = vmatpush.bf16.msra.mxu1 %v14070_v42  ;;  %10598 = vmatpush.bf16.msra.mxu0 %v14160_v20  ;;  %v14016_v17 = vld [vmem:[#allocation10 + $0xa90] sm:$0xff] }
 0xade   :  { %v8469_v59 = vpop.f32.mrf.mxu3 }
 0xadf   :  { %v14053_v59 = vld [vmem:[#allocation10 + $0xbb8] sm:$0xff] }
 0xae0   :  { %9256 = vmatpush.bf16.msrb.mxu2 %v13984_v18  ;;  %9315 = vmatpush.bf16.msrb.mxu3 %v13994_v53  ;;  %v5591_v18 = vpop.f32.mrf.mxu1 }
 0xae1   :  { %10166 = vmatpush.bf16.msrb.mxu1 %v14109_v32  ;;  %10599 = vmatpush.bf16.msra.mxu0 %v14159_v14  ;;  %v5661_v53 = vadd.f32 %v5591_v18, %v17649_v24  ;;  %v14027_v24 = vld [vmem:[#allocation10 + $0xae8] sm:$0xff]  ;;  %v14026_v32 = vld [vmem:[#allocation10 + $0xae0] sm:$0xff]  ;;  %v14024_v14 = vld [vmem:[#allocation10 + $0xad0] sm:$0xff] }
 0xae2   :  { %9930 = vmatmul.bf16.vlgmr.msra.gmra.mxu1 %v5846_v38  ;;  %v14023_v18 = vld [vmem:[#allocation10 + $0xac8] sm:$0xff] }
 0xae3   :  { %v5729_v58 = vadd.f32 %v17665_v60, %v5661_v53 }
 0xae4   :  { %9257 = vmatpush.bf16.msrb.mxu2 %v13983_v13  ;;  %9316 = vmatpush.bf16.msrb.mxu3 %v13993_v63  ;;  %v18643_v63 = vld [vmem:[#allocation127_spill] sm:$0xff] }
 0xae5   :  { %10167 = vmatpush.bf16.msrb.mxu1 %v14108_v36  ;;  %10600 = vmatpush.bf16.msra.mxu0 %v14158_v33  ;;  %v5793_v13 = vmax.f32 %v5729_v58, 0.0  ;;  %v4751_v12 = vadd.f32 %v18644_v56, %v18643_v63  ;;  %v14014_v36 = vld [vmem:[#allocation10 + $0xa80] sm:$0xff]  ;;  %v14140_v58 = vld [vmem:[#allocation10 + $0xe70] sm:$0xff] }
 0xae7   :  { %v5857_v2 = vpack.c.bf16 %v5793_v13, %v5793_v13  ;;  %v14022_v13 = vld [vmem:[#allocation10 + $0xac0] sm:$0xff] }
 0xae8   :  { %9258 = vmatpush.bf16.msrb.mxu2 %v13982_v47  ;;  %9317 = vmatpush.bf16.msrb.mxu3 %v13992_v1  ;;  %v18645_v47 = vld [vmem:[#allocation64_spill] sm:$0xff]  ;;  %v5593_v35 = vpop.f32.mrf.mxu1 }
 0xae9   :  { %10168 = vmatpush.bf16.msrb.mxu1 %v14107_v26  ;;  %v5053_v1 = vadd.f32 %v18645_v47, %v4751_v12  ;;  %v17734_v16 = vadd.f32 %v5593_v35, %v17661_v15  ;;  %10601 = vmatmul.bf16.vlgmr.msra.gmra.mxu0 %v5857_v2  ;;  %v14015_v15 = vld [vmem:[#allocation10 + $0xa88] sm:$0xff]  ;;  %v14141_v26 = vld [vmem:[#allocation10 + $0xe78] sm:$0xff]  ;;  %v14050_v2 = vld [vmem:[#allocation10 + $0xba0] sm:$0xff] }
 0xaea   :  { %v14051_v12 = vld [vmem:[#allocation10 + $0xba8] sm:$0xff]  ;;  %v14138_v47 = vld [vmem:[#allocation10 + $0xe60] sm:$0xff] }
 0xaeb   :  { %9259 = vmatmul.bf16.vlgmr.msrb.gmra.mxu2 %v5835_v50  ;;  %v14025_v50 = vld [vmem:[#allocation10 + $0xad8] sm:$0xff]  ;;  %v14059_v35 = vld [vmem:[#allocation10 + $0xbe8] sm:$0xff] }
 0xaec   :  { %9495 = vmatpush.bf16.msra.mxu2 %v14021_v62  ;;  %9318 = vmatpush.bf16.msrb.mxu3 %v13991_v23  ;;  %v5355_v62 = vadd.f32 %v17595_v44, %v5053_v1  ;;  %v17739_v23 = vpop.f32.mrf.mxu0  ;;  %v5711_v44 = vadd.f32 %v17665_v60, %v17585_v49  ;;  %v14049_v1 = vld [vmem:[#allocation10 + $0xb98] sm:$0xff] }
 0xaed   :  { %10169 = vmatpush.bf16.msrb.mxu1 %v14106_v9 }
 0xaee   :  { %v8528_v42 = vpop.f32.mrf.mxu2  ;;  %v5654_v10 = vadd.f32 %v17677_v5, %v5355_v62  ;;  %v14137_v62 = vld [vmem:[#allocation10 + $0xe58] sm:$0xff] }
 0xaef   :  { %v10814_v20 = vadd.f32 %v17721_v22, %v8528_v42 }
 0xaf0   :  { %9496 = vmatpush.bf16.msra.mxu2 %v14020_v61  ;;  %9319 = vmatpush.bf16.msrb.mxu3 %v13990_v57  ;;  %v5722_v61 = vadd.f32 %v17665_v60, %v5654_v10  ;;  %v5596_v38 = vpop.f32.mrf.mxu1  ;;  %v5775_v57 = vmax.f32 %v5711_v44, 0.0  ;;  %v14136_v10 = vld [vmem:[#allocation10 + $0xe50] sm:$0xff] }
 0xaf1   :  { %10170 = vmatpush.bf16.msrb.mxu1 %v14105_v29  ;;  %v17745_v22 = vadd.f32 %v5596_v38, %v17671_v31  ;;  %v5712_v31 = vadd.f32 %v17665_v60, %v17592_v30  ;;  %v14139_v30 = vld [vmem:[#allocation10 + $0xe68] sm:$0xff]  ;;  %v14060_v29 = vld [vmem:[#allocation10 + $0xbf0] sm:$0xff]  ;;  %v14057_v38 = vld [vmem:[#allocation10 + $0xbd8] sm:$0xff] }
 0xaf2   :  { %v5839_v53 = vpack.c.bf16 %v5775_v57, %v5775_v57  ;;  %v14135_v57 = vld [vmem:[#allocation10 + $0xe48] sm:$0xff] }
 0xaf3   :  { %9320 = vmatmul.bf16.vlgmr.msrb.gmra.mxu3 %v5836_v51  ;;  %v14052_v51 = vld [vmem:[#allocation10 + $0xbb0] sm:$0xff]  ;;  %v5776_v63 = vmax.f32 %v5712_v31, 0.0  ;;  %v14134_v31 = vld [vmem:[#allocation10 + $0xe40] sm:$0xff] }
 0xaf4   :  { %9497 = vmatpush.bf16.msra.mxu2 %v14019_v11  ;;  %9556 = vmatpush.bf16.msra.mxu3 %v14029_v41  ;;  %v14102_v11 = vld [vmem:[#allocation10 + $0xd40] sm:$0xff]  ;;  %v5786_v41 = vmax.f32 %v5722_v61, 0.0  ;;  %v9628_v33 = vpop.f32.mrf.mxu0  ;;  %v14047_v61 = vld [vmem:[#allocation10 + $0xb88] sm:$0xff] }
 0xaf5   :  { %10171 = vmatpush.bf16.msrb.mxu1 %v14104_v4 }
 0xaf6   :  { %v8530_v5 = vpop.f32.mrf.mxu2  ;;  %v8589_v19 = vpop.f32.mrf.mxu3 }
 0xaf7   :  { %v10815_v49 = vadd.f32 %v10814_v20, %v8589_v19  ;;  %v18648_v5 = vld [vmem:[#allocation116_spill] sm:$0xff]  ;;  %v5726_v19 = vadd.f32 %v17665_v60, %v17707_v46  ;;  %v14055_v46 = vld [vmem:[#allocation10 + $0xbc8] sm:$0xff] }
 0xaf8   :  { %9498 = vmatpush.bf16.msra.mxu2 %v14018_v27  ;;  %9557 = vmatpush.bf16.msra.mxu3 %v14028_v45  ;;  %v5850_v27 = vpack.c.bf16 %v5786_v41, %v5786_v41  ;;  %v5598_v45 = vpop.f32.mrf.mxu1  ;;  %v14046_v41 = vld [vmem:[#allocation10 + $0xb80] sm:$0xff] }
 0xaf9   :  { %10172 = vmatpush.bf16.msrb.mxu1 %v14103_v0  ;;  %v17750_v9 = vadd.f32 %v5598_v45, %v17679_v43  ;;  %v14173_v45 = vld [vmem:[#allocation10 + $0xf78] sm:$0xff] }
 0xafc   :  { %9499 = vmatpush.bf16.msra.mxu2 %v14017_v25  ;;  %9558 = vmatpush.bf16.msra.mxu3 %v14027_v24  ;;  %v14061_v25 = vld [vmem:[#allocation10 + $0xbf8] sm:$0xff]  ;;  %v5840_v24 = vpack.c.bf16 %v5776_v63, %v5776_v63  ;;  %v14084_v63 = vld [vmem:[#allocation10 + $0xcb0] sm:$0xff] }
 0xafd   :  { %10173 = vmatpush.bf16.msrb.mxu1 %v14102_v11 }
 0xafe   :  { %v8591_v56 = vpop.f32.mrf.mxu3 }
 0xaff   :  { %v14172_v56 = vld [vmem:[#allocation10 + $0xf70] sm:$0xff] }
 0xb00   :  { %9500 = vmatpush.bf16.msra.mxu2 %v14016_v17  ;;  %9559 = vmatpush.bf16.msra.mxu3 %v14026_v32  ;;  %v17752_v43 = vpop.f32.mrf.mxu1  ;;  %v14048_v17 = vld [vmem:[#allocation10 + $0xb90] sm:$0xff]  ;;  %v14058_v32 = vld [vmem:[#allocation10 + $0xbe0] sm:$0xff] }
 0xb01   :  { %10410 = vmatpush.bf16.msra.mxu1 %v14141_v26 }
 0xb02   :  { %10174 = vmatmul.bf16.vlgmr.msrb.gmra.mxu1 %v5850_v27 }
 0xb04   :  { %9501 = vmatpush.bf16.msra.mxu2 %v14015_v15  ;;  %9560 = vmatpush.bf16.msra.mxu3 %v14025_v50  ;;  %v18646_v15 = vld [vmem:[#allocation114_spill] sm:$0xff]  ;;  %v18647_v50 = vld [vmem:[#allocation60_spill] sm:$0xff] }
 0xb05   :  { %10411 = vmatpush.bf16.msra.mxu1 %v14140_v58  ;;  %v4745_v44 = vadd.f32 %v18647_v50, %v18646_v15  ;;  %v14080_v15 = vld [vmem:[#allocation10 + $0xc90] sm:$0xff]  ;;  %v14090_v50 = vld [vmem:[#allocation10 + $0xce0] sm:$0xff] }
 0xb07   :  { %v17756_v0 = vpop.f32.mrf.mxu0 }
 0xb08   :  { %9502 = vmatpush.bf16.msra.mxu2 %v14014_v36  ;;  %9561 = vmatpush.bf16.msra.mxu3 %v14024_v14  ;;  %v8957_v4 = vpop.f32.mrf.mxu1  ;;  %v5047_v36 = vadd.f32 %v18648_v5, %v4745_v44  ;;  %v5715_v14 = vadd.f32 %v17665_v60, %v17613_v54  ;;  %v14085_v54 = vld [vmem:[#allocation10 + $0xcb8] sm:$0xff]  ;;  %v18650_v5 = vld [vmem:[#allocation121_spill] sm:$0xff] }
 0xb09   :  { %10412 = vmatpush.bf16.msra.mxu1 %v14139_v30  ;;  %v14169_v4 = vld [vmem:[#allocation10 + $0xf58] sm:$0xff] }
 0xb0a   :  { %v5779_v26 = vmax.f32 %v5715_v14, 0.0 }
 0xb0b   :  { %9503 = vmatmul.bf16.vlgmr.msra.gmra.mxu2 %v5839_v53 }
 0xb0c   :  { %9739 = vmatpush.bf16.msrb.mxu2 %v14053_v59  ;;  %9562 = vmatpush.bf16.msra.mxu3 %v14023_v18  ;;  %v5349_v59 = vadd.f32 %v17548_v48, %v5047_v36  ;;  %v5843_v58 = vpack.c.bf16 %v5779_v26, %v5779_v26  ;;  %v14167_v26 = vld [vmem:[#allocation10 + $0xf48] sm:$0xff] }
 0xb0d   :  { %10413 = vmatpush.bf16.msra.mxu1 %v14138_v47  ;;  %v14171_v47 = vld [vmem:[#allocation10 + $0xf68] sm:$0xff] }
 0xb0e   :  { %v8650_v42 = vpop.f32.mrf.mxu2  ;;  %v5648_v33 = vadd.f32 %v17619_v21, %v5349_v59  ;;  %v18651_v59 = vld [vmem:[#allocation58_spill] sm:$0xff] }
 0xb0f   :  { %v10816_v20 = vadd.f32 %v10815_v49, %v8650_v42  ;;  %v14056_v49 = vld [vmem:[#allocation10 + $0xbd0] sm:$0xff]  ;;  %v9872_v48 = vpop.f32.mrf.mxu0  ;;  %v14170_v42 = vld [vmem:[#allocation10 + $0xf60] sm:$0xff] }
 0xb10   :  { %9740 = vmatpush.bf16.msrb.mxu2 %v14052_v51  ;;  %9563 = vmatpush.bf16.msra.mxu3 %v14022_v13  ;;  %v17765_v53 = vpop.f32.mrf.mxu1  ;;  %v5790_v51 = vmax.f32 %v5726_v19, 0.0  ;;  %v5716_v13 = vadd.f32 %v17665_v60, %v5648_v33  ;;  %v14089_v19 = vld [vmem:[#allocation10 + $0xcd8] sm:$0xff]  ;;  %v5730_v33 = vadd.f32 %v17665_v60, %v17734_v16 }
 0xb11   :  { %10414 = vmatpush.bf16.msra.mxu1 %v14137_v62  ;;  %v14092_v62 = vld [vmem:[#allocation10 + $0xcf0] sm:$0xff] }
 0xb12   :  { %v5854_v21 = vpack.c.bf16 %v5790_v51, %v5790_v51  ;;  %v14088_v51 = vld [vmem:[#allocation10 + $0xcd0] sm:$0xff] }
 0xb13   :  { %9564 = vmatmul.bf16.vlgmr.msra.gmra.mxu3 %v5840_v24 }
 0xb14   :  { %9741 = vmatpush.bf16.msrb.mxu2 %v14051_v12  ;;  %9800 = vmatpush.bf16.msrb.mxu3 %v14061_v25  ;;  %v14054_v12 = vld [vmem:[#allocation10 + $0xbc0] sm:$0xff]  ;;  %v5780_v25 = vmax.f32 %v5716_v13, 0.0 }
 0xb15   :  { %10415 = vmatpush.bf16.msra.mxu1 %v14136_v10 }
 0xb16   :  { %v8652_v11 = vpop.f32.mrf.mxu2  ;;  %v8711_v18 = vpop.f32.mrf.mxu3 }
 0xb17   :  { %v10817_v27 = vadd.f32 %v10816_v20, %v8711_v18 }
 0xb18   :  { %9742 = vmatpush.bf16.msrb.mxu2 %v14050_v2  ;;  %9801 = vmatpush.bf16.msrb.mxu3 %v14060_v29  ;;  %v9201_v24 = vpop.f32.mrf.mxu1  ;;  %v14083_v2 = vld [vmem:[#allocation10 + $0xca8] sm:$0xff]  ;;  %v14093_v29 = vld [vmem:[#allocation10 + $0xcf8] sm:$0xff] }
 0xb19   :  { %10416 = vmatpush.bf16.msra.mxu1 %v14135_v57  ;;  %v14079_v57 = vld [vmem:[#allocation10 + $0xc88] sm:$0xff] }
 0xb1c   :  { %9743 = vmatpush.bf16.msrb.mxu2 %v14049_v1  ;;  %9802 = vmatpush.bf16.msrb.mxu3 %v14059_v35  ;;  %v5844_v1 = vpack.c.bf16 %v5780_v25, %v5780_v25  ;;  %v14082_v35 = vld [vmem:[#allocation10 + $0xca0] sm:$0xff] }
 0xb1d   :  { %10417 = vmatpush.bf16.msra.mxu1 %v14134_v31  ;;  %v14078_v31 = vld [vmem:[#allocation10 + $0xc80] sm:$0xff] }
 0xb1e   :  { %v8713_v30 = vpop.f32.mrf.mxu3 }
 0xb1f   :  { %v14086_v30 = vld [vmem:[#allocation10 + $0xcc0] sm:$0xff] }
 0xb20   :  { %9744 = vmatpush.bf16.msrb.mxu2 %v14048_v17  ;;  %9803 = vmatpush.bf16.msrb.mxu3 %v14058_v32  ;;  %v14081_v17 = vld [vmem:[#allocation10 + $0xc98] sm:$0xff]  ;;  %v14091_v32 = vld [vmem:[#allocation10 + $0xce8] sm:$0xff]  ;;  %v17768_v20 = vpop.f32.mrf.mxu1 }
 0xb21   :  { %10654 = vmatpush.bf16.msrb.mxu1 %v14173_v45 }
 0xb22   :  { %10418 = vmatmul.bf16.vlgmr.msra.gmra.mxu1 %v5854_v21 }
 0xb24   :  { %9745 = vmatpush.bf16.msrb.mxu2 %v14047_v61  ;;  %9804 = vmatpush.bf16.msrb.mxu3 %v14057_v38  ;;  %v14168_v61 = vld [vmem:[#allocation10 + $0xf50] sm:$0xff]  ;;  %v18649_v38 = vld [vmem:[#allocation125_spill] sm:$0xff] }
 0xb25   :  { %10655 = vmatpush.bf16.msrb.mxu1 %v14172_v56  ;;  %v4749_v36 = vadd.f32 %v18650_v5, %v18649_v38  ;;  %v14111_v38 = vld [vmem:[#allocation10 + $0xd88] sm:$0xff]  ;;  %v14121_v5 = vld [vmem:[#allocation10 + $0xdd8] sm:$0xff] }
 0xb27   :  { %v17772_v14 = vpop.f32.mrf.mxu0  ;;  %v5051_v11 = vadd.f32 %v18651_v59, %v4749_v36  ;;  %v18654_v36 = vld [vmem:[#allocation69_spill] sm:$0xff] }
 0xb28   :  { %9746 = vmatpush.bf16.msrb.mxu2 %v14046_v41  ;;  %9805 = vmatpush.bf16.msrb.mxu3 %v14056_v49  ;;  %v5719_v41 = vadd.f32 %v17665_v60, %v17646_v6  ;;  %v9445_v49 = vpop.f32.mrf.mxu1  ;;  %v14166_v6 = vld [vmem:[#allocation10 + $0xf40] sm:$0xff] }
 0xb29   :  { %10656 = vmatpush.bf16.msrb.mxu1 %v14171_v47  ;;  %v5353_v18 = vadd.f32 %v17579_v8, %v5051_v11  ;;  %v14087_v8 = vld [vmem:[#allocation10 + $0xcc8] sm:$0xff]  ;;  %v14110_v49 = vld [vmem:[#allocation10 + $0xd80] sm:$0xff] }
 0xb2b   :  { %9747 = vmatmul.bf16.vlgmr.msrb.gmra.mxu2 %v5843_v58  ;;  %v5652_v45 = vadd.f32 %v17656_v40, %v5353_v18  ;;  %v5794_v58 = vmax.f32 %v5730_v33, 0.0 }
 0xb2c   :  { %9983 = vmatpush.bf16.msra.mxu2 %v14085_v54  ;;  %9806 = vmatpush.bf16.msrb.mxu3 %v14055_v46  ;;  %v14117_v46 = vld [vmem:[#allocation10 + $0xdb8] sm:$0xff] }
 0xb2d   :  { %10657 = vmatpush.bf16.msrb.mxu1 %v14170_v42  ;;  %v5720_v56 = vadd.f32 %v17665_v60, %v5652_v45  ;;  %v5858_v25 = vpack.c.bf16 %v5794_v58, %v5794_v58  ;;  %v14123_v42 = vld [vmem:[#allocation10 + $0xde8] sm:$0xff]  ;;  %v14118_v58 = vld [vmem:[#allocation10 + $0xdc0] sm:$0xff] }
 0xb2e   :  { %v8772_v10 = vpop.f32.mrf.mxu2 }
 0xb2f   :  { %v10818_v44 = vadd.f32 %v10817_v27, %v8772_v10  ;;  %v5783_v27 = vmax.f32 %v5719_v41, 0.0  ;;  %v10116_v16 = vpop.f32.mrf.mxu0  ;;  %v5784_v24 = vmax.f32 %v5720_v56, 0.0  ;;  %v14155_v56 = vld [vmem:[#allocation10 + $0xee8] sm:$0xff] }
 0xb30   :  { %9984 = vmatpush.bf16.msra.mxu2 %v14084_v63  ;;  %9807 = vmatpush.bf16.msrb.mxu3 %v14054_v12  ;;  %v14116_v12 = vld [vmem:[#allocation10 + $0xdb0] sm:$0xff]  ;;  %v14157_v16 = vld [vmem:[#allocation10 + $0xef8] sm:$0xff] }
 0xb31   :  { %10658 = vmatpush.bf16.msrb.mxu1 %v14169_v4  ;;  %v5847_v21 = vpack.c.bf16 %v5783_v27, %v5783_v27  ;;  %v5848_v47 = vpack.c.bf16 %v5784_v24, %v5784_v24  ;;  %v14122_v4 = vld [vmem:[#allocation10 + $0xde0] sm:$0xff] }
 0xb33   :  { %9808 = vmatmul.bf16.vlgmr.msrb.gmra.mxu3 %v5844_v1  ;;  %v14114_v1 = vld [vmem:[#allocation10 + $0xda0] sm:$0xff] }
 0xb34   :  { %9985 = vmatpush.bf16.msra.mxu2 %v14083_v2  ;;  %10044 = vmatpush.bf16.msra.mxu3 %v14093_v29  ;;  %v14125_v29 = vld [vmem:[#allocation10 + $0xdf8] sm:$0xff] }
 0xb35   :  { %10659 = vmatpush.bf16.msrb.mxu1 %v14168_v61 }
 0xb36   :  { %v8774_v54 = vpop.f32.mrf.mxu2  ;;  %v8833_v48 = vpop.f32.mrf.mxu3 }
 0xb37   :  { %v10819_v13 = vadd.f32 %v10818_v44, %v8833_v48 }
 0xb38   :  { %9986 = vmatpush.bf16.msra.mxu2 %v14082_v35  ;;  %10045 = vmatpush.bf16.msra.mxu3 %v14092_v62  ;;  %v14124_v35 = vld [vmem:[#allocation10 + $0xdf0] sm:$0xff] }
 0xb39   :  { %10660 = vmatpush.bf16.msrb.mxu1 %v14167_v26  ;;  %v10820_v63 = vadd.f32 %v10819_v13, %v17685_v34  ;;  %v14115_v34 = vld [vmem:[#allocation10 + $0xda8] sm:$0xff]  ;;  %v14120_v26 = vld [vmem:[#allocation10 + $0xdd0] sm:$0xff] }
 0xb3b   :  { %v10821_v40 = vadd.f32 %v10820_v63, %v17752_v43  ;;  %v14113_v43 = vld [vmem:[#allocation10 + $0xd98] sm:$0xff]  ;;  %v14147_v63 = vld [vmem:[#allocation10 + $0xea8] sm:$0xff] }
 0xb3c   :  { %9987 = vmatpush.bf16.msra.mxu2 %v14081_v17  ;;  %10046 = vmatpush.bf16.msra.mxu3 %v14091_v32  ;;  %v14112_v32 = vld [vmem:[#allocation10 + $0xd90] sm:$0xff] }
 0xb3d   :  { %10661 = vmatpush.bf16.msrb.mxu1 %v14166_v6 }
 0xb3e   :  { %v8835_v2 = vpop.f32.mrf.mxu3 }
 0xb3f   :  { %v17784_v62 = vpop.f32.mrf.mxu1  ;;  %v14143_v2 = vld [vmem:[#allocation10 + $0xe88] sm:$0xff] }
 0xb40   :  { %9988 = vmatpush.bf16.msra.mxu2 %v14080_v15  ;;  %10047 = vmatpush.bf16.msra.mxu3 %v14090_v50  ;;  %v18652_v15 = vld [vmem:[#allocation130_spill] sm:$0xff] }
 0xb41   :  { %10662 = vmatmul.bf16.vlgmr.msrb.gmra.mxu1 %v5858_v25  ;;  %v18653_v50 = vld [vmem:[#allocation66_spill] sm:$0xff]  ;;  %v14154_v25 = vld [vmem:[#allocation10 + $0xee0] sm:$0xff] }
 0xb42   :  { %v4753_v44 = vadd.f32 %v18653_v50, %v18652_v15  ;;  %v14151_v15 = vld [vmem:[#allocation10 + $0xec8] sm:$0xff] }
 0xb44   :  { %9989 = vmatpush.bf16.msra.mxu2 %v14079_v57  ;;  %10048 = vmatpush.bf16.msra.mxu3 %v14089_v19  ;;  %v5055_v57 = vadd.f32 %v18654_v36, %v4753_v44  ;;  %v5723_v19 = vadd.f32 %v17665_v60, %v17682_v37  ;;  %v14119_v37 = vld [vmem:[#allocation10 + $0xdc8] sm:$0xff] }
 0xb46   :  { %v5357_v11 = vadd.f32 %v17610_v55, %v5055_v57  ;;  %v5787_v33 = vmax.f32 %v5723_v19, 0.0  ;;  %v14148_v55 = vld [vmem:[#allocation10 + $0xeb0] sm:$0xff]  ;;  %v14179_v57 = vld [vmem:[#allocation10 + $0xfa8] sm:$0xff]  ;;  %v14189_v19 = vld [vmem:[#allocation10 + $0xff8] sm:$0xff] }
 0xb47   :  { %v9689_v61 = vpop.f32.mrf.mxu1 }
 0xb48   :  { %9990 = vmatpush.bf16.msra.mxu2 %v14078_v31  ;;  %10049 = vmatpush.bf16.msra.mxu3 %v14088_v51  ;;  %v5656_v18 = vadd.f32 %v17691_v52, %v5357_v11  ;;  %v14149_v31 = vld [vmem:[#allocation10 + $0xeb8] sm:$0xff]  ;;  %v5851_v45 = vpack.c.bf16 %v5787_v33, %v5787_v33 }
 0xb49   :  { %v14177_v33 = vld [vmem:[#allocation10 + $0xf98] sm:$0xff] }
 0xb4a   :  { %v5724_v48 = vadd.f32 %v17665_v60, %v5656_v18  ;;  %v14187_v18 = vld [vmem:[#allocation10 + $0xfe8] sm:$0xff] }
 0xb4b   :  { %9991 = vmatmul.bf16.vlgmr.msra.gmra.mxu2 %v5847_v21  ;;  %v17791_v59 = vpop.f32.mrf.mxu0  ;;  %v14156_v21 = vld [vmem:[#allocation10 + $0xef0] sm:$0xff] }
 0xb4c   :  { %10227 = vmatpush.bf16.msrb.mxu2 %v14117_v46  ;;  %10050 = vmatpush.bf16.msra.mxu3 %v14087_v8  ;;  %v5788_v52 = vmax.f32 %v5724_v48, 0.0  ;;  %v14146_v8 = vld [vmem:[#allocation10 + $0xea0] sm:$0xff]  ;;  %v14175_v48 = vld [vmem:[#allocation10 + $0xf88] sm:$0xff] }
 0xb4e   :  { %v9016_v17 = vpop.f32.mrf.mxu2 }
 0xb4f   :  { %v10822_v10 = vadd.f32 %v10821_v40, %v9016_v17 }
 0xb50   :  { %10228 = vmatpush.bf16.msrb.mxu2 %v14116_v12  ;;  %10051 = vmatpush.bf16.msra.mxu3 %v14086_v30  ;;  %v14144_v12 = vld [vmem:[#allocation10 + $0xe90] sm:$0xff] }
 0xb53   :  { %10052 = vmatmul.bf16.vlgmr.msra.gmra.mxu3 %v5848_v47  ;;  %v10360_v46 = vpop.f32.mrf.mxu0 }
 0xb54   :  { %10229 = vmatpush.bf16.msrb.mxu2 %v14115_v34  ;;  %10288 = vmatpush.bf16.msrb.mxu3 %v14125_v29  ;;  %v14153_v34 = vld [vmem:[#allocation10 + $0xed8] sm:$0xff]  ;;  %v14174_v46 = vld [vmem:[#allocation10 + $0xf80] sm:$0xff] }
 0xb55   :  { %v17800_v29 = vld [vmem:[#allocation8] ss:$0 sm:$0xff] }
 0xb56   :  { %v9018_v41 = vpop.f32.mrf.mxu2  ;;  %v9077_v54 = vpop.f32.mrf.mxu3  ;;  %v5727_v47 = vadd.f32 %v17800_v29, %v17714_v39  ;;  %v5728_v44 = vadd.f32 %v17800_v29, %v17724_v7  ;;  %v14180_v39 = vld [vmem:[#allocation10 + $0xfb0] sm:$0xff] }
 0xb57   :  { %v10823_v51 = vadd.f32 %v10822_v10, %v9077_v54  ;;  %v14178_v41 = vld [vmem:[#allocation10 + $0xfa0] sm:$0xff] }
 0xb58   :  { %10230 = vmatpush.bf16.msrb.mxu2 %v14114_v1  ;;  %10289 = vmatpush.bf16.msrb.mxu3 %v14124_v35  ;;  %v14142_v35 = vld [vmem:[#allocation10 + $0xe80] sm:$0xff] }
 0xb59   :  { %v10824_v27 = vadd.f32 %v10823_v51, %v17698_v28  ;;  %v5852_v28 = vpack.c.bf16 %v5788_v52, %v5788_v52  ;;  %v14186_v51 = vld [vmem:[#allocation10 + $0xfe0] sm:$0xff] }
 0xb5b   :  { %v10825_v6 = vadd.f32 %v10824_v27, %v17765_v53  ;;  %v14145_v53 = vld [vmem:[#allocation10 + $0xe98] sm:$0xff] }
 0xb5c   :  { %10231 = vmatpush.bf16.msrb.mxu2 %v14113_v43  ;;  %10290 = vmatpush.bf16.msrb.mxu3 %v14123_v42  ;;  %v14152_v43 = vld [vmem:[#allocation10 + $0xed0] sm:$0xff]  ;;  %v5791_v42 = vmax.f32 %v5727_v47, 0.0 }
 0xb5e   :  { %v9079_v13 = vpop.f32.mrf.mxu3  ;;  %v5855_v50 = vpack.c.bf16 %v5791_v42, %v5791_v42 }
 0xb5f   :  { %v17798_v60 = vpop.f32.mrf.mxu1 }
 0xb60   :  { %10232 = vmatpush.bf16.msrb.mxu2 %v14112_v32  ;;  %10291 = vmatpush.bf16.msrb.mxu3 %v14122_v4  ;;  %v14181_v4 = vld [vmem:[#allocation10 + $0xfb8] sm:$0xff] }
 0xb64   :  { %10233 = vmatpush.bf16.msrb.mxu2 %v14111_v38  ;;  %10292 = vmatpush.bf16.msrb.mxu3 %v14121_v5  ;;  %v14150_v38 = vld [vmem:[#allocation10 + $0xec0] sm:$0xff]  ;;  %v5792_v5 = vmax.f32 %v5728_v44, 0.0 }
 0xb65   :  { %v14197_v44 = vld [vmem:[#allocation13 + $0x38] sm:$0xff] }
 0xb66   :  { %v17804_v1 = vpop.f32.mrf.mxu0  ;;  %v5856_v11 = vpack.c.bf16 %v5792_v5, %v5792_v5  ;;  %10927 = vmatpush.bf16.msrb.mxu0 %v14197_v44  ;;  %v14193_v5 = vld [vmem:[#allocation13 + $0x18] sm:$0xff] }
 0xb67   :  { %v9933_v24 = vpop.f32.mrf.mxu1 }
 0xb68   :  { %10234 = vmatpush.bf16.msrb.mxu2 %v14110_v49  ;;  %10293 = vmatpush.bf16.msrb.mxu3 %v14120_v26  ;;  %v14188_v49 = vld [vmem:[#allocation10 + $0xff0] sm:$0xff] }
 0xb6b   :  { %10235 = vmatmul.bf16.vlgmr.msrb.gmra.mxu2 %v5851_v45 }
 0xb6c   :  { %10471 = vmatpush.bf16.msra.mxu2 %v14149_v31  ;;  %10294 = vmatpush.bf16.msrb.mxu3 %v14119_v37  ;;  %v14176_v31 = vld [vmem:[#allocation10 + $0xf90] sm:$0xff] }
 0xb6e   :  { %v9260_v40 = vpop.f32.mrf.mxu2  ;;  %v10604_v61 = vpop.f32.mrf.mxu0 }
 0xb6f   :  { %v10826_v30 = vadd.f32 %v10825_v6, %v9260_v40  ;;  %v14184_v6 = vld [vmem:[#allocation10 + $0xfd0] sm:$0xff] }
 0xb70   :  { %10472 = vmatpush.bf16.msra.mxu2 %v14148_v55  ;;  %10295 = vmatpush.bf16.msrb.mxu3 %v14118_v58  ;;  %v14185_v55 = vld [vmem:[#allocation10 + $0xfd8] sm:$0xff]  ;;  %v14195_v61 = vld [vmem:[#allocation13 + $0x28] sm:$0xff] }
 0xb73   :  { %10296 = vmatmul.bf16.vlgmr.msrb.gmra.mxu3 %v5852_v28  ;;  %v5732_v28 = vadd.f32 %v17800_v29, %v17750_v9 }
 0xb74   :  { %10473 = vmatpush.bf16.msra.mxu2 %v14147_v63  ;;  %10532 = vmatpush.bf16.msra.mxu3 %v14157_v16  ;;  %v14183_v63 = vld [vmem:[#allocation10 + $0xfc8] sm:$0xff] }
 0xb76   :  { %v9262_v17 = vpop.f32.mrf.mxu2  ;;  %v9321_v32 = vpop.f32.mrf.mxu3 }
 0xb77   :  { %v10827_v10 = vadd.f32 %v10826_v30, %v9321_v32 }
 0xb78   :  { %10474 = vmatpush.bf16.msra.mxu2 %v14146_v8  ;;  %10533 = vmatpush.bf16.msra.mxu3 %v14156_v21  ;;  %v14182_v8 = vld [vmem:[#allocation10 + $0xfc0] sm:$0xff]  ;;  %v5796_v21 = vmax.f32 %v5732_v28, 0.0 }
 0xb79   :  { %v10828_v7 = vadd.f32 %v10827_v10, %v17716_v3  ;;  %v5731_v3 = vadd.f32 %v17800_v29, %v17745_v22 }
 0xb7b   :  { %v10829_v54 = vadd.f32 %v10828_v7, %v17768_v20  ;;  %v5795_v58 = vmax.f32 %v5731_v3, 0.0  ;;  %v14190_v7 = vld [vmem:[#allocation13] sm:$0xff] }
 0xb7c   :  { %10475 = vmatpush.bf16.msra.mxu2 %v14145_v53  ;;  %10534 = vmatpush.bf16.msra.mxu3 %v14155_v56  ;;  %v5860_v53 = vpack.c.bf16 %v5796_v21, %v5796_v21 }
 0xb7d   :  { %v5859_v16 = vpack.c.bf16 %v5795_v58, %v5795_v58 }
 0xb7e   :  { %v9323_v36 = vpop.f32.mrf.mxu3 }
 0xb7f   :  { %v17809_v26 = vpop.f32.mrf.mxu1 }
 0xb80   :  { %10476 = vmatpush.bf16.msra.mxu2 %v14144_v12  ;;  %10535 = vmatpush.bf16.msra.mxu3 %v14154_v25 }
 0xb84   :  { %10477 = vmatpush.bf16.msra.mxu2 %v14143_v2  ;;  %10536 = vmatpush.bf16.msra.mxu3 %v14153_v34 }
 0xb87   :  { %v10177_v45 = vpop.f32.mrf.mxu1 }
 0xb88   :  { %10478 = vmatpush.bf16.msra.mxu2 %v14142_v35  ;;  %10537 = vmatpush.bf16.msra.mxu3 %v14152_v43 }
 0xb8b   :  { %10479 = vmatmul.bf16.vlgmr.msra.gmra.mxu2 %v5855_v50 }
 0xb8c   :  { %10715 = vmatpush.bf16.msrb.mxu2 %v14181_v4  ;;  %10538 = vmatpush.bf16.msra.mxu3 %v14151_v15 }
 0xb8e   :  { %v9504_v27 = vpop.f32.mrf.mxu2 }
 0xb8f   :  { %v10830_v37 = vadd.f32 %v10829_v54, %v9504_v27 }
 0xb90   :  { %10716 = vmatpush.bf16.msrb.mxu2 %v14180_v39  ;;  %10539 = vmatpush.bf16.msra.mxu3 %v14150_v38  ;;  %v14196_v39 = vld [vmem:[#allocation13 + $0x30] sm:$0xff] }
 0xb91   :  { %10928 = vmatpush.bf16.msrb.mxu0 %v14196_v39 }
 0xb93   :  { %10540 = vmatmul.bf16.vlgmr.msra.gmra.mxu3 %v5856_v11 }
 0xb94   :  { %10717 = vmatpush.bf16.msrb.mxu2 %v14179_v57  ;;  %10776 = vmatpush.bf16.msrb.mxu3 %v14189_v19  ;;  %v14191_v19 = vld [vmem:[#allocation13 + $0x8] sm:$0xff] }
 0xb95   :  { %10929 = vmatpush.bf16.msrb.mxu0 %v14195_v61 }
 0xb96   :  { %v9506_v52 = vpop.f32.mrf.mxu2  ;;  %v9565_v13 = vpop.f32.mrf.mxu3 }
 0xb97   :  { %v10831_v20 = vadd.f32 %v10830_v37, %v9565_v13 }
 0xb98   :  { %10718 = vmatpush.bf16.msrb.mxu2 %v14178_v41  ;;  %10777 = vmatpush.bf16.msrb.mxu3 %v14188_v49 }
 0xb99   :  { %v10832_v56 = vadd.f32 %v10831_v20, %v17739_v23 }
 0xb9b   :  { %v10833_v25 = vadd.f32 %v10832_v56, %v17784_v62 }
 0xb9c   :  { %10719 = vmatpush.bf16.msrb.mxu2 %v14177_v33  ;;  %10778 = vmatpush.bf16.msrb.mxu3 %v14187_v18 }
 0xb9e   :  { %v9567_v22 = vpop.f32.mrf.mxu3 }
 0xb9f   :  { %v10419_v12 = vpop.f32.mrf.mxu1 }
 0xba0   :  { %10720 = vmatpush.bf16.msrb.mxu2 %v14176_v31  ;;  %10779 = vmatpush.bf16.msrb.mxu3 %v14186_v51 }
 0xba4   :  { %10721 = vmatpush.bf16.msrb.mxu2 %v14175_v48  ;;  %10780 = vmatpush.bf16.msrb.mxu3 %v14185_v55 }
 0xba7   :  { %v10421_v24 = vpop.f32.mrf.mxu1 }
 0xba8   :  { %10722 = vmatpush.bf16.msrb.mxu2 %v14174_v46  ;;  %10781 = vmatpush.bf16.msrb.mxu3 %v14184_v6  ;;  %v14213_v46 = vld [vmem:[#allocation11] ss:$0 sm:$0xff] }
 0xbab   :  { %10723 = vmatmul.bf16.vlgmr.msrb.gmra.mxu2 %v5859_v16  ;;  %v14214_v16 = vld [vmem:[#allocation14] ss:$0 sm:$0xff] }
 0xbac   :  { %10782 = vmatpush.bf16.msrb.mxu3 %v14183_v63 }
 0xbae   :  { %v9748_v40 = vpop.f32.mrf.mxu2 }
 0xbaf   :  { %v10834_v30 = vadd.f32 %v10833_v25, %v9748_v40 }
 0xbb0   :  { %10783 = vmatpush.bf16.msrb.mxu3 %v14182_v8 }
 0xbb3   :  { %10784 = vmatmul.bf16.vlgmr.msrb.gmra.mxu3 %v5860_v53 }
 0xbb6   :  { %v9750_v2 = vpop.f32.mrf.mxu2  ;;  %v9809_v34 = vpop.f32.mrf.mxu3 }
 0xbb7   :  { %v10835_v47 = vadd.f32 %v10834_v30, %v9809_v34 }
 0xbb9   :  { %v10836_v29 = vadd.f32 %v10835_v47, %v17756_v0  ;;  %v14194_v0 = vld [vmem:[#allocation13 + $0x20] sm:$0xff] }
 0xbba   :  { %10930 = vmatpush.bf16.msrb.mxu0 %v14194_v0 }
 0xbbb   :  { %v10837_v43 = vadd.f32 %v10836_v29, %v17798_v60  ;;  %v14192_v60 = vld [vmem:[#allocation13 + $0x10] sm:$0xff] }
 0xbbe   :  { %v9811_v9 = vpop.f32.mrf.mxu3  ;;  %v10663_v35 = vpop.f32.mrf.mxu1  ;;  %10931 = vmatpush.bf16.msrb.mxu0 %v14193_v5 }
 0xbc2   :  { %10932 = vmatpush.bf16.msrb.mxu0 %v14192_v60 }
 0xbc6   :  { %v10665_v32 = vpop.f32.mrf.mxu1  ;;  %10933 = vmatpush.bf16.msrb.mxu0 %v14191_v19 }
 0xbca   :  { %10934 = vmatpush.bf16.msrb.mxu0 %v14190_v7 }
 0xbce   :  { %v9992_v42 = vpop.f32.mrf.mxu2 }
 0xbcf   :  { %v10838_v17 = vadd.f32 %v10837_v43, %v9992_v42 }
 0xbd6   :  { %v9994_v4 = vpop.f32.mrf.mxu2  ;;  %v10053_v23 = vpop.f32.mrf.mxu3 }
 0xbd7   :  { %v10839_v57 = vadd.f32 %v10838_v17, %v10053_v23 }
 0xbd9   :  { %v10840_v11 = vadd.f32 %v10839_v57, %v17772_v14 }
 0xbdb   :  { %v10841_v33 = vadd.f32 %v10840_v11, %v17809_v26 }
 0xbde   :  { %v10055_v10 = vpop.f32.mrf.mxu3 }
 0xbee   :  { %v10236_v15 = vpop.f32.mrf.mxu2 }
 0xbef   :  { %v10842_v18 = vadd.f32 %v10841_v33, %v10236_v15 }
 0xbf6   :  { %v10238_v62 = vpop.f32.mrf.mxu2  ;;  %v10297_v50 = vpop.f32.mrf.mxu3 }
 0xbf7   :  { %v10843_v54 = vadd.f32 %v10842_v18, %v10297_v50 }
 0xbf9   :  { %v10844_v51 = vadd.f32 %v10843_v54, %v17791_v59 }
 0xbfb   :  { %v10845_v27 = vadd.f32 %v10844_v51, %v10419_v12 }
 0xbfe   :  { %v10299_v38 = vpop.f32.mrf.mxu3 }
 0xc0e   :  { %v10480_v36 = vpop.f32.mrf.mxu2 }
 0xc0f   :  { %v10846_v37 = vadd.f32 %v10845_v27, %v10480_v36 }
 0xc16   :  { %v10482_v41 = vpop.f32.mrf.mxu2  ;;  %v10541_v49 = vpop.f32.mrf.mxu3 }
 0xc17   :  { %v10847_v45 = vadd.f32 %v10846_v37, %v10541_v49 }
 0xc19   :  { %v10848_v55 = vadd.f32 %v10847_v45, %v17804_v1 }
 0xc1b   :  { %v10849_v3 = vadd.f32 %v10848_v55, %v10663_v35 }
 0xc1e   :  { %v10543_v31 = vpop.f32.mrf.mxu3 }
 0xc2e   :  { %v10724_v48 = vpop.f32.mrf.mxu2 }
 0xc2f   :  { %v10850_v14 = vadd.f32 %v10849_v3, %v10724_v48 }
 0xc36   :  { %v10726_v6 = vpop.f32.mrf.mxu2  ;;  %v10785_v58 = vpop.f32.mrf.mxu3 }
 0xc37   :  { %v10851_v52 = vadd.f32 %v10850_v14, %v10785_v58 }
 0xc39   :  { %v10856_v13 = vadd.f32 %v14213_v46, %v10851_v52 }
 0xc3b   :  { %v10857_v26 = vmax.f32 %v10856_v13, 0.0 }
 0xc3d   :  { %v10858_v20 = vpack.c.bf16 %v10857_v26, %v10857_v26 }
 0xc3e   :  { %v10787_v63 = vpop.f32.mrf.mxu3 }
 0xc3f   :  { %10935 = vmatmul.bf16.vlgmr.msrb.gmra.mxu0 %v10858_v20 }
 0xcbc   :  { %v10936_v28 = vpop.f32.mrf.mxu0 }
 0xcbd   :  { %v10937_v59 = vadd.f32 %v14214_v16, %v10936_v28 }
 0xcbf   :  { %10940 = vst [vmem:[%s17836_s9] sm:$0xff] %v10937_v59 }
 0xcc4   :  { %v10938_v8 = vpop.f32.mrf.mxu0 }
 0xcc5   :  { %10945 = vsyncpa [#allocation4], 1 }
 0xcc6   :  { %10946 = vsyncpa [#allocation6], 1 }
 0xcc7   :  { %10947 = vsyncpa [#allocation9], 1 }
 0xcc8   :  { %10948 = vsyncpa [#allocation12], 1 }
 0xcc9   :  { %10949 = vsyncpa [#allocation15], 1 }

</bundles_post_ra>
